<compile_context>
chip_gen: v5e
topology: v5e:2x2
jax: 0.10.0
libtpu: 0.0.40
codegen_flags: <defaults>
</compile_context>

<pallas_src>
import numpy as np
import jax
import jax.numpy as jnp
from jax import lax
from jax.experimental import pallas as pl
from jax.experimental.pallas import tpu as pltpu


def _round_up(x, m):
    return ((x + m - 1) // m) * m


def _lstm_fc_kernel(x_ref, w_ih_ref, w_hh_ref, b_ref, w_fc_ref, b_fc_ref,
                    last_ref, hN_ref, cN_ref,
                    gates_scr, seq_scr):
    """x_ref: (T, BT, Ep) f32; w_ih_ref: (L, Ep, 4Hp) bf16; w_hh_ref: (L, Hp, 4Hp) bf16;
    b_ref: (L, 1, 4Hp) f32 [gate order i,f,o,g]; w_fc_ref: (Hp, 128) bf16;
    b_fc_ref: (1, 128) f32.  Outputs: last_ref (BT, 128), hN_ref/cN_ref (L, BT, Hp)."""
    T, BT, Hp = seq_scr.shape
    L = hN_ref.shape[0]
    G = 4 * Hp

    h_last = None
    for layer in range(L):                      # static, unrolled layer loop
        w_ih = w_ih_ref[layer]                  # (Ep, 4Hp) bf16, loop-invariant
        w_hh = w_hh_ref[layer]                  # (Hp, 4Hp) bf16, loop-invariant
        b = b_ref[layer]                        # (1, 4Hp)  f32

        # Hoisted whole-sequence input projection: one big bf16 MXU matmul with
        # f32 accumulation, bias folded in.
        if layer == 0:
            x_seq = x_ref[...].reshape(T * BT, x_ref.shape[-1])
        else:
            x_seq = seq_scr[...].reshape(T * BT, Hp)
        gates_scr[...] = (
            jnp.dot(x_seq.astype(jnp.bfloat16), w_ih,
                    preferred_element_type=jnp.float32) + b
        ).reshape(T, BT, G)

        write_seq = layer < L - 1               # last layer's sequence is unused

        def step(t, carry):
            h, c = carry
            gates = gates_scr[t] + jnp.dot(h.astype(jnp.bfloat16), w_hh,
                                           preferred_element_type=jnp.float32)
            ifo = jax.nn.sigmoid(gates[:, :3 * Hp])   # [i | f | o] one EUP pass
            g_g = jnp.tanh(gates[:, 3 * Hp:])
            c_new = ifo[:, Hp:2 * Hp] * c + ifo[:, :Hp] * g_g
            h_new = ifo[:, 2 * Hp:] * jnp.tanh(c_new)
            if write_seq:
                seq_scr[t] = h_new              # next layer's input
            return h_new, c_new

        zeros = jnp.zeros((BT, Hp), jnp.float32)
        h_f, c_f = lax.fori_loop(0, T, step, (zeros, zeros), unroll=True)
        hN_ref[layer] = h_f
        cN_ref[layer] = c_f
        h_last = h_f

    # TODO(synk): nn.Dropout / inter-layer LSTM dropout are identity here
    # (inference semantics); training-mode dropout masks are not generated.

    # fc + sigmoid on the last timestep only; w_fc was pre-sliced to the single
    # consumed output unit and padded into a lane-dense 128-wide slab (col 0 real).
    logits = (jnp.dot(h_last.astype(jnp.bfloat16), w_fc_ref[...],
                      preferred_element_type=jnp.float32) + b_fc_ref[...])
    last_ref[...] = jax.nn.sigmoid(logits)      # (BT, 128)


def _pick_batch_tile(batch):
    """Generation-tuned batch tile: fill the MXU M dimension (128 on v5e,
    256 on v6e/v7x) and split big batches so v7x's two TensorCores both get
    grid steps.  Small batches collapse to one 8-aligned tile."""
    kind = ""
    try:
        kind = jax.devices()[0].device_kind.lower()
    except Exception:
        pass
    mxu_m = 128 if ("v5 lite" in kind or "v5e" in kind) else 256
    b8 = _round_up(max(batch, 1), 8)
    if b8 <= mxu_m:
        return b8                                # single tile; too small to split
    n_tiles = pl.cdiv(b8, mxu_m)
    return _round_up(pl.cdiv(b8, n_tiles), 8)


def sentiment_lstm_forward(input_words, params):
    """input_words: (B, T) int32 token ids.
    Returns (sigmoid_last (B,), (h_n, c_n)) matching the PyTorch forward (eval)."""
    emb = params["embedding"][input_words].astype(jnp.float32)   # (B, T, E) gather (glue)
    B, T, E = emb.shape
    L = params["w_hh"].shape[0]
    H = params["w_hh"].shape[2]
    n_out = params["w_fc"].shape[0]
    # Functional constraint of the stacked per-layer w_ih layout.
    assert E == H, "stacked per-layer w_ih requires n_embed == n_hidden"

    Hp = _round_up(H, 128)       # lane-align hidden size / gate boundaries
    Ep = _round_up(E, 128)
    NOUT = 128                   # lane-dense final output slab (col 0 is real)

    # Gate reorder [i,f,g,o] -> [i,f,o,g] + pre-transpose (paid once in JAX).
    perm = np.concatenate([np.arange(0, H), np.arange(H, 2 * H),
                           np.arange(3 * H, 4 * H), np.arange(2 * H, 3 * H)])
    w_ih = jnp.transpose(params["w_ih"][:, perm, :], (0, 2, 1))   # (L, E, 4H)
    w_hh = jnp.transpose(params["w_hh"][:, perm, :], (0, 2, 1))   # (L, H, 4H)
    b = params["b"][:, :, perm]                                   # (L, 1, 4H)

    def pad_gate_lanes(a):
        # (..., 4H) -> (..., 4Hp): zero-pad each gate block so gate boundaries
        # land on 128-lane vreg boundaries.  Padded lanes stay 0 in h and c:
        # pad gates = 0 -> i=f=o=0.5, g=0 -> c_pad=0, h_pad=0 forever.
        if Hp == H:
            return a
        pads = [(0, 0)] * (a.ndim - 1) + [(0, Hp - H)]
        return jnp.concatenate(
            [jnp.pad(a[..., g * H:(g + 1) * H], pads) for g in range(4)], axis=-1)

    w_ih = jnp.pad(pad_gate_lanes(w_ih),
                   ((0, 0), (0, Ep - E), (0, 0))).astype(jnp.bfloat16)   # (L, Ep, 4Hp)
    w_hh = jnp.pad(pad_gate_lanes(w_hh),
                   ((0, 0), (0, Hp - H), (0, 0))).astype(jnp.bfloat16)   # (L, Hp, 4Hp)
    b = pad_gate_lanes(b).astype(jnp.float32)                            # (L, 1, 4Hp)

    # Only sigmoid_out[:, -1] (last timestep, last output unit) is consumed ->
    # pre-slice fc to that unit and pad to a lane-dense 128-wide column block.
    w_fc = jnp.zeros((Hp, NOUT), jnp.float32).at[:H, 0].set(
        params["w_fc"][-1].astype(jnp.float32)).astype(jnp.bfloat16)
    b_fc = jnp.zeros((1, NOUT), jnp.float32).at[0, 0].set(
        params["b_fc"][0, -1].astype(jnp.float32))

    # Batch tiling: generation-tuned tile, padded batch, time-major layout.
    BT = _pick_batch_tile(B)
    B_pad = _round_up(B, BT)
    x_tm = jnp.transpose(emb, (1, 0, 2))                          # (T, B, E)
    x_tm = jnp.pad(x_tm, ((0, 0), (0, B_pad - B), (0, Ep - E)))   # (T, B_pad, Ep)
    grid = (B_pad // BT,)

    # VMEM budget (clamped to 75% of physical capacity) + advisory cost estimate.
    try:
        vmem_cap = int(pltpu.get_tpu_info().vmem_capacity_bytes)
    except Exception:
        vmem_cap = 64 << 20                       # conservative: v7x per-TC VMEM
    w_bytes = (w_ih.size + w_hh.size + w_fc.size) * 2 + (b.size + b_fc.size) * 4
    blk_bytes = (2 * T * BT * Ep * 4                              # x (double-buffered)
                 + 2 * (BT * NOUT + 2 * L * BT * Hp) * 4          # output blocks
                 + 2 * w_bytes)                                   # weights (worst case)
    scratch_bytes = (T * BT * 4 * Hp + T * BT * Hp) * 4
    need = blk_bytes + scratch_bytes
    vmem_limit = int(min(max(int(1.25 * need), 16 << 20), (vmem_cap * 3) // 4))

    flops = 2 * L * T * B_pad * (Ep + Hp) * 4 * Hp + 2 * B_pad * Hp * NOUT
    transc = L * T * B_pad * 5 * Hp + B_pad * NOUT
    bytes_acc = (x_tm.size * 4 + w_bytes
                 + (B_pad * NOUT + 2 * L * B_pad * Hp) * 4)
    cost = pl.CostEstimate(flops=flops, transcendentals=transc,
                           bytes_accessed=bytes_acc)

    out_shapes = (
        jax.ShapeDtypeStruct((B_pad, NOUT), jnp.float32),    # sigmoid slab (col 0)
        jax.ShapeDtypeStruct((L, B_pad, Hp), jnp.float32),   # h_n (lane padded)
        jax.ShapeDtypeStruct((L, B_pad, Hp), jnp.float32),   # c_n (lane padded)
    )

    def build_call(weight_mode):
        def wspec(shape):
            n = len(shape)
            kwargs = {} if weight_mode is None else {"pipeline_mode": weight_mode}
            return pl.BlockSpec(shape, lambda bb, _n=n: (0,) * _n, **kwargs)
        return pl.pallas_call(
            _lstm_fc_kernel,
            out_shape=out_shapes,
            grid_spec=pltpu.PrefetchScalarGridSpec(
                num_scalar_prefetch=0,
                grid=grid,
                in_specs=[
                    pl.BlockSpec((T, BT, Ep), lambda bb: (0, bb, 0)),
                    wspec((L, Ep, 4 * Hp)),
                    wspec((L, Hp, 4 * Hp)),
                    wspec((L, 1, 4 * Hp)),
                    wspec((Hp, NOUT)),
                    wspec((1, NOUT)),
                ],
                out_specs=(
                    pl.BlockSpec((BT, NOUT), lambda bb: (bb, 0)),
                    pl.BlockSpec((L, BT, Hp), lambda bb: (0, bb, 0)),
                    pl.BlockSpec((L, BT, Hp), lambda bb: (0, bb, 0)),
                ),
                scratch_shapes=[
                    pltpu.VMEM((T, BT, 4 * Hp), jnp.float32),  # hoisted projection
                    pltpu.VMEM((T, BT, Hp), jnp.float32),      # layer output sequence
                ],
            ),
            compiler_params=pltpu.CompilerParams(
                dimension_semantics=("parallel",),
                vmem_limit_bytes=vmem_limit,
            ),
            cost_estimate=cost,
        )

    args = (x_tm, w_ih, w_hh, b, w_fc, b_fc)
    try:
        # Loop-invariant weights: request single buffering (halves their VMEM).
        last, hN, cN = build_call(pl.Buffered(1))(*args)
    except Exception:
        # TODO(synk): pl.Buffered(1) single-buffering rejected on this jax
        # version; fall back to default double-buffered weight blocks.
        last, hN, cN = build_call(None)(*args)

    sigmoid_last = last[:B, 0]                                   # (B,)
    h_n = hN[:, :B, :H]
    c_n = cN[:, :B, :H]
    return sigmoid_last, (h_n, c_n)


def init_params(key, n_vocab, n_embed, n_hidden, n_output, n_layers):
    """Parameters in PyTorch layout (gate order i,f,g,o); b = b_ih + b_hh."""
    assert n_embed == n_hidden
    ks = jax.random.split(key, 7)
    bound = 1.0 / np.sqrt(n_hidden)
    emb = jax.random.normal(ks[0], (n_vocab, n_embed), jnp.float32)
    w_ih = jax.random.uniform(ks[1], (n_layers, 4 * n_hidden, n_embed),
                              jnp.float32, -bound, bound)
    w_hh = jax.random.uniform(ks[2], (n_layers, 4 * n_hidden, n_hidden),
                              jnp.float32, -bound, bound)
    b_ih = jax.random.uniform(ks[3], (n_layers, 1, 4 * n_hidden),
                              jnp.float32, -bound, bound)
    b_hh = jax.random.uniform(ks[4], (n_layers, 1, 4 * n_hidden),
                              jnp.float32, -bound, bound)
    w_fc = jax.random.uniform(ks[5], (n_output, n_hidden),
                              jnp.float32, -bound, bound)
    b_fc = jax.random.uniform(ks[6], (1, n_output),
                              jnp.float32, -bound, bound)
    return dict(embedding=emb, w_ih=w_ih, w_hh=w_hh, b=b_ih + b_hh,
                w_fc=w_fc, b_fc=b_fc)


def reference_forward(input_words, params):
    """Pure-JAX f32 reference mirroring the PyTorch forward (eval mode)."""
    emb = params["embedding"][input_words]
    B, T, _ = emb.shape
    L, _, H = params["w_hh"].shape
    seq = emb.astype(jnp.float32)
    hs, cs = [], []
    for l in range(L):
        w_ih, w_hh, b = params["w_ih"][l], params["w_hh"][l], params["b"][l]
        h = jnp.zeros((B, H), jnp.float32)
        c = jnp.zeros((B, H), jnp.float32)
        outs = []
        for t in range(T):
            gates = seq[:, t, :] @ w_ih.T + h @ w_hh.T + b
            i = jax.nn.sigmoid(gates[:, :H])
            f = jax.nn.sigmoid(gates[:, H:2 * H])
            g = jnp.tanh(gates[:, 2 * H:3 * H])
            o = jax.nn.sigmoid(gates[:, 3 * H:])
            c = f * c + i * g
            h = o * jnp.tanh(c)
            outs.append(h)
        seq = jnp.stack(outs, axis=1)
        hs.append(h)
        cs.append(c)
    fc = seq.reshape(-1, H) @ params["w_fc"].T + params["b_fc"]
    s = jax.nn.sigmoid(fc).reshape(B, -1)
    return s[:, -1], (jnp.stack(hs), jnp.stack(cs))


if __name__ == "__main__":
    n_vocab, B, T, E, H, n_out, L = 100, 2, 8, 32, 32, 1, 2
    key = jax.random.PRNGKey(0)
    pkey, ikey = jax.random.split(key)
    params = init_params(pkey, n_vocab, E, H, n_out, L)
    input_words = jax.random.randint(ikey, (B, T), 0, n_vocab, dtype=jnp.int32)

    sig_last, (h_n, c_n) = sentiment_lstm_forward(input_words, params)
    jax.block_until_ready((sig_last, h_n, c_n))

    ref_last, (ref_h, ref_c) = reference_forward(input_words, params)
    # bf16 MXU operands (f32 accumulate) -> looser tolerance than pure f32.
    np.testing.assert_allclose(np.asarray(sig_last), np.asarray(ref_last),
                               rtol=5e-2, atol=5e-2)
    np.testing.assert_allclose(np.asarray(h_n), np.asarray(ref_h),
                               rtol=5e-2, atol=5e-2)
    np.testing.assert_allclose(np.asarray(c_n), np.asarray(ref_c),
                               rtol=5e-2, atol=5e-2)
    print("KERNEL_OK")
</pallas_src>

<mosaic_0001>
module attributes {stable_mosaic.version = 11 : i64} {
  func.func @_lstm_fc_kernel(%arg0: i32, %arg1: memref<8x8x128xf32, #tpu.memory_space<vmem>>, %arg2: memref<2x128x512xbf16, #tpu.memory_space<vmem>>, %arg3: memref<2x128x512xbf16, #tpu.memory_space<vmem>>, %arg4: memref<2x1x512xf32, #tpu.memory_space<vmem>>, %arg5: memref<128x128xbf16, #tpu.memory_space<vmem>>, %arg6: memref<1x128xf32, #tpu.memory_space<vmem>>, %arg7: memref<8x128xf32, #tpu.memory_space<vmem>>, %arg8: memref<2x8x128xf32, #tpu.memory_space<vmem>>, %arg9: memref<2x8x128xf32, #tpu.memory_space<vmem>>, %arg10: memref<8x8x512xf32, #tpu.memory_space<vmem>>, %arg11: memref<8x8x128xf32, #tpu.memory_space<vmem>>) attributes {dimension_semantics = [#tpu.dimension_semantics<parallel>], iteration_bounds = array<i64: 1>, scalar_prefetch = 0 : i64, scratch_operands = 2 : i64, tpu.core_type = #tpu.core_type<tc>, window_params = [{transform_indices = @transform_0, window_bounds = array<i64: 8, 8, 128>}, {pipeline_mode = #tpu.pipeline_mode<synchronous>, transform_indices = @transform_1, window_bounds = array<i64: 2, 128, 512>}, {pipeline_mode = #tpu.pipeline_mode<synchronous>, transform_indices = @transform_2, window_bounds = array<i64: 2, 128, 512>}, {pipeline_mode = #tpu.pipeline_mode<synchronous>, transform_indices = @transform_3, window_bounds = array<i64: 2, 1, 512>}, {pipeline_mode = #tpu.pipeline_mode<synchronous>, transform_indices = @transform_4, window_bounds = array<i64: 128, 128>}, {pipeline_mode = #tpu.pipeline_mode<synchronous>, transform_indices = @transform_5, window_bounds = array<i64: 1, 128>}, {transform_indices = @transform_6, window_bounds = array<i64: 8, 128>}, {transform_indices = @transform_7, window_bounds = array<i64: 2, 8, 128>}, {transform_indices = @transform_8, window_bounds = array<i64: 2, 8, 128>}]} {
    %c0 = arith.constant 0 : index
    %c0_0 = arith.constant 0 : index
    %c0_1 = arith.constant 0 : index
    %0 = vector.load %arg2[%c0, %c0_0, %c0_1] : memref<2x128x512xbf16, #tpu.memory_space<vmem>>, vector<1x128x512xbf16>
    %1 = vector.shape_cast %0 : vector<1x128x512xbf16> to vector<128x512xbf16>
    %c0_2 = arith.constant 0 : index
    %c0_3 = arith.constant 0 : index
    %c0_4 = arith.constant 0 : index
    %2 = vector.load %arg3[%c0_2, %c0_3, %c0_4] : memref<2x128x512xbf16, #tpu.memory_space<vmem>>, vector<1x128x512xbf16>
    %3 = vector.shape_cast %2 : vector<1x128x512xbf16> to vector<128x512xbf16>
    %c0_5 = arith.constant 0 : index
    %c0_6 = arith.constant 0 : index
    %c0_7 = arith.constant 0 : index
    %4 = vector.load %arg4[%c0_5, %c0_6, %c0_7] : memref<2x1x512xf32, #tpu.memory_space<vmem>>, vector<1x1x512xf32>
    %5 = vector.shape_cast %4 : vector<1x1x512xf32> to vector<1x512xf32>
    %c0_8 = arith.constant 0 : index
    %c0_9 = arith.constant 0 : index
    %c0_10 = arith.constant 0 : index
    %6 = vector.load %arg1[%c0_8, %c0_9, %c0_10] : memref<8x8x128xf32, #tpu.memory_space<vmem>>, vector<8x8x128xf32>
    %7 = vector.shape_cast %6 : vector<8x8x128xf32> to vector<64x128xf32>
    %8 = arith.truncf %7 : vector<64x128xf32> to vector<64x128xbf16>
    %cst = arith.constant dense<0.000000e+00> : vector<64x512xf32>
    %9 = tpu.matmul %8, %1, %cst {dimension_numbers = #tpu.dot_dimension_numbers<[1], [0], [0], [1], [0, 0, 1, 1], [], []>} : vector<64x128xbf16>, vector<128x512xbf16>, vector<64x512xf32> -> vector<64x512xf32>
    %10 = vector.broadcast %5 : vector<1x512xf32> to vector<64x512xf32>
    %11 = arith.addf %9, %10 : vector<64x512xf32>
    %12 = vector.shape_cast %11 : vector<64x512xf32> to vector<8x8x512xf32>
    %c0_11 = arith.constant 0 : index
    %c0_12 = arith.constant 0 : index
    %c0_13 = arith.constant 0 : index
    %13 = vector.load %arg10[%c0_11, %c0_12, %c0_13] : memref<8x8x512xf32, #tpu.memory_space<vmem>>, vector<8x8x512xf32>
    tpu.vector_store %arg10[%c0_11, %c0_12, %c0_13], %12 {strides = array<i32>} : memref<8x8x512xf32, #tpu.memory_space<vmem>>, vector<8x8x512xf32>,
    %cst_14 = arith.constant 0.000000e+00 : f32
    %14 = vector.broadcast %cst_14 : f32 to vector<8x128xf32>
    %c0_i32 = arith.constant 0 : i32
    %15 = arith.index_cast %c0_i32 : i32 to index
    %c0_15 = arith.constant 0 : index
    %c0_16 = arith.constant 0 : index
    %16 = vector.load %arg10[%15, %c0_15, %c0_16] : memref<8x8x512xf32, #tpu.memory_space<vmem>>, vector<1x8x512xf32>
    %17 = vector.shape_cast %16 : vector<1x8x512xf32> to vector<8x512xf32>
    %18 = arith.truncf %14 : vector<8x128xf32> to vector<8x128xbf16>
    %cst_17 = arith.constant dense<0.000000e+00> : vector<8x512xf32>
    %19 = tpu.matmul %18, %3, %cst_17 {dimension_numbers = #tpu.dot_dimension_numbers<[1], [0], [0], [1], [0, 0, 1, 1], [], []>} : vector<8x128xbf16>, vector<128x512xbf16>, vector<8x512xf32> -> vector<8x512xf32>
    %20 = arith.addf %17, %19 : vector<8x512xf32>
    %21 = vector.extract_strided_slice %20 {offsets = [0, 0], sizes = [8, 384], strides = [1, 1]} : vector<8x512xf32> to vector<8x384xf32>
    %22 = arith.negf %21 : vector<8x384xf32>
    %23 = math.exp %22 : vector<8x384xf32>
    %cst_18 = arith.constant 1.000000e+00 : f32
    %24 = vector.broadcast %cst_18 : f32 to vector<8x384xf32>
    %25 = arith.addf %24, %23 : vector<8x384xf32>
    %26 = arith.divf %24, %25 : vector<8x384xf32>
    %27 = vector.extract_strided_slice %20 {offsets = [0, 384], sizes = [8, 128], strides = [1, 1]} : vector<8x512xf32> to vector<8x128xf32>
    %28 = math.tanh %27 : vector<8x128xf32>
    %29 = vector.extract_strided_slice %26 {offsets = [0, 128], sizes = [8, 128], strides = [1, 1]} : vector<8x384xf32> to vector<8x128xf32>
    %30 = arith.mulf %29, %14 : vector<8x128xf32>
    %31 = vector.extract_strided_slice %26 {offsets = [0, 0], sizes = [8, 128], strides = [1, 1]} : vector<8x384xf32> to vector<8x128xf32>
    %32 = arith.mulf %31, %28 : vector<8x128xf32>
    %33 = arith.addf %30, %32 : vector<8x128xf32>
    %34 = vector.extract_strided_slice %26 {offsets = [0, 256], sizes = [8, 128], strides = [1, 1]} : vector<8x384xf32> to vector<8x128xf32>
    %35 = math.tanh %33 : vector<8x128xf32>
    %36 = arith.mulf %34, %35 : vector<8x128xf32>
    %37 = arith.index_cast %c0_i32 : i32 to index
    %c0_19 = arith.constant 0 : index
    %c0_20 = arith.constant 0 : index
    %38 = vector.load %arg11[%37, %c0_19, %c0_20] : memref<8x8x128xf32, #tpu.memory_space<vmem>>, vector<1x8x128xf32>
    %39 = vector.shape_cast %38 : vector<1x8x128xf32> to vector<8x128xf32>
    %40 = vector.shape_cast %36 : vector<8x128xf32> to vector<1x8x128xf32>
    tpu.vector_store %arg11[%37, %c0_19, %c0_20], %40 {strides = array<i32>} : memref<8x8x128xf32, #tpu.memory_space<vmem>>, vector<1x8x128xf32>,
    %c1_i32 = arith.constant 1 : i32
    %41 = arith.index_cast %c1_i32 : i32 to index
    %c0_21 = arith.constant 0 : index
    %c0_22 = arith.constant 0 : index
    %42 = vector.load %arg10[%41, %c0_21, %c0_22] : memref<8x8x512xf32, #tpu.memory_space<vmem>>, vector<1x8x512xf32>
    %43 = vector.shape_cast %42 : vector<1x8x512xf32> to vector<8x512xf32>
    %44 = arith.truncf %36 : vector<8x128xf32> to vector<8x128xbf16>
    %cst_23 = arith.constant dense<0.000000e+00> : vector<8x512xf32>
    %45 = tpu.matmul %44, %3, %cst_23 {dimension_numbers = #tpu.dot_dimension_numbers<[1], [0], [0], [1], [0, 0, 1, 1], [], []>} : vector<8x128xbf16>, vector<128x512xbf16>, vector<8x512xf32> -> vector<8x512xf32>
    %46 = arith.addf %43, %45 : vector<8x512xf32>
    %47 = vector.extract_strided_slice %46 {offsets = [0, 0], sizes = [8, 384], strides = [1, 1]} : vector<8x512xf32> to vector<8x384xf32>
    %48 = arith.negf %47 : vector<8x384xf32>
    %49 = math.exp %48 : vector<8x384xf32>
    %cst_24 = arith.constant 1.000000e+00 : f32
    %50 = vector.broadcast %cst_24 : f32 to vector<8x384xf32>
    %51 = arith.addf %50, %49 : vector<8x384xf32>
    %52 = arith.divf %50, %51 : vector<8x384xf32>
    %53 = vector.extract_strided_slice %46 {offsets = [0, 384], sizes = [8, 128], strides = [1, 1]} : vector<8x512xf32> to vector<8x128xf32>
    %54 = math.tanh %53 : vector<8x128xf32>
    %55 = vector.extract_strided_slice %52 {offsets = [0, 128], sizes = [8, 128], strides = [1, 1]} : vector<8x384xf32> to vector<8x128xf32>
    %56 = arith.mulf %55, %33 : vector<8x128xf32>
    %57 = vector.extract_strided_slice %52 {offsets = [0, 0], sizes = [8, 128], strides = [1, 1]} : vector<8x384xf32> to vector<8x128xf32>
    %58 = arith.mulf %57, %54 : vector<8x128xf32>
    %59 = arith.addf %56, %58 : vector<8x128xf32>
    %60 = vector.extract_strided_slice %52 {offsets = [0, 256], sizes = [8, 128], strides = [1, 1]} : vector<8x384xf32> to vector<8x128xf32>
    %61 = math.tanh %59 : vector<8x128xf32>
    %62 = arith.mulf %60, %61 : vector<8x128xf32>
    %63 = arith.index_cast %c1_i32 : i32 to index
    %c0_25 = arith.constant 0 : index
    %c0_26 = arith.constant 0 : index
    %64 = vector.load %arg11[%63, %c0_25, %c0_26] : memref<8x8x128xf32, #tpu.memory_space<vmem>>, vector<1x8x128xf32>
    %65 = vector.shape_cast %64 : vector<1x8x128xf32> to vector<8x128xf32>
    %66 = vector.shape_cast %62 : vector<8x128xf32> to vector<1x8x128xf32>
    tpu.vector_store %arg11[%63, %c0_25, %c0_26], %66 {strides = array<i32>} : memref<8x8x128xf32, #tpu.memory_space<vmem>>, vector<1x8x128xf32>,
    %c2_i32 = arith.constant 2 : i32
    %67 = arith.index_cast %c2_i32 : i32 to index
    %c0_27 = arith.constant 0 : index
    %c0_28 = arith.constant 0 : index
    %68 = vector.load %arg10[%67, %c0_27, %c0_28] : memref<8x8x512xf32, #tpu.memory_space<vmem>>, vector<1x8x512xf32>
    %69 = vector.shape_cast %68 : vector<1x8x512xf32> to vector<8x512xf32>
    %70 = arith.truncf %62 : vector<8x128xf32> to vector<8x128xbf16>
    %cst_29 = arith.constant dense<0.000000e+00> : vector<8x512xf32>
    %71 = tpu.matmul %70, %3, %cst_29 {dimension_numbers = #tpu.dot_dimension_numbers<[1], [0], [0], [1], [0, 0, 1, 1], [], []>} : vector<8x128xbf16>, vector<128x512xbf16>, vector<8x512xf32> -> vector<8x512xf32>
    %72 = arith.addf %69, %71 : vector<8x512xf32>
    %73 = vector.extract_strided_slice %72 {offsets = [0, 0], sizes = [8, 384], strides = [1, 1]} : vector<8x512xf32> to vector<8x384xf32>
    %74 = arith.negf %73 : vector<8x384xf32>
    %75 = math.exp %74 : vector<8x384xf32>
    %cst_30 = arith.constant 1.000000e+00 : f32
    %76 = vector.broadcast %cst_30 : f32 to vector<8x384xf32>
    %77 = arith.addf %76, %75 : vector<8x384xf32>
    %78 = arith.divf %76, %77 : vector<8x384xf32>
    %79 = vector.extract_strided_slice %72 {offsets = [0, 384], sizes = [8, 128], strides = [1, 1]} : vector<8x512xf32> to vector<8x128xf32>
    %80 = math.tanh %79 : vector<8x128xf32>
    %81 = vector.extract_strided_slice %78 {offsets = [0, 128], sizes = [8, 128], strides = [1, 1]} : vector<8x384xf32> to vector<8x128xf32>
    %82 = arith.mulf %81, %59 : vector<8x128xf32>
    %83 = vector.extract_strided_slice %78 {offsets = [0, 0], sizes = [8, 128], strides = [1, 1]} : vector<8x384xf32> to vector<8x128xf32>
    %84 = arith.mulf %83, %80 : vector<8x128xf32>
    %85 = arith.addf %82, %84 : vector<8x128xf32>
    %86 = vector.extract_strided_slice %78 {offsets = [0, 256], sizes = [8, 128], strides = [1, 1]} : vector<8x384xf32> to vector<8x128xf32>
    %87 = math.tanh %85 : vector<8x128xf32>
    %88 = arith.mulf %86, %87 : vector<8x128xf32>
    %89 = arith.index_cast %c2_i32 : i32 to index
    %c0_31 = arith.constant 0 : index
    %c0_32 = arith.constant 0 : index
    %90 = vector.load %arg11[%89, %c0_31, %c0_32] : memref<8x8x128xf32, #tpu.memory_space<vmem>>, vector<1x8x128xf32>
    %91 = vector.shape_cast %90 : vector<1x8x128xf32> to vector<8x128xf32>
    %92 = vector.shape_cast %88 : vector<8x128xf32> to vector<1x8x128xf32>
    tpu.vector_store %arg11[%89, %c0_31, %c0_32], %92 {strides = array<i32>} : memref<8x8x128xf32, #tpu.memory_space<vmem>>, vector<1x8x128xf32>,
    %c3_i32 = arith.constant 3 : i32
    %93 = arith.index_cast %c3_i32 : i32 to index
    %c0_33 = arith.constant 0 : index
    %c0_34 = arith.constant 0 : index
    %94 = vector.load %arg10[%93, %c0_33, %c0_34] : memref<8x8x512xf32, #tpu.memory_space<vmem>>, vector<1x8x512xf32>
    %95 = vector.shape_cast %94 : vector<1x8x512xf32> to vector<8x512xf32>
    %96 = arith.truncf %88 : vector<8x128xf32> to vector<8x128xbf16>
    %cst_35 = arith.constant dense<0.000000e+00> : vector<8x512xf32>
    %97 = tpu.matmul %96, %3, %cst_35 {dimension_numbers = #tpu.dot_dimension_numbers<[1], [0], [0], [1], [0, 0, 1, 1], [], []>} : vector<8x128xbf16>, vector<128x512xbf16>, vector<8x512xf32> -> vector<8x512xf32>
    %98 = arith.addf %95, %97 : vector<8x512xf32>
    %99 = vector.extract_strided_slice %98 {offsets = [0, 0], sizes = [8, 384], strides = [1, 1]} : vector<8x512xf32> to vector<8x384xf32>
    %100 = arith.negf %99 : vector<8x384xf32>
    %101 = math.exp %100 : vector<8x384xf32>
    %cst_36 = arith.constant 1.000000e+00 : f32
    %102 = vector.broadcast %cst_36 : f32 to vector<8x384xf32>
    %103 = arith.addf %102, %101 : vector<8x384xf32>
    %104 = arith.divf %102, %103 : vector<8x384xf32>
    %105 = vector.extract_strided_slice %98 {offsets = [0, 384], sizes = [8, 128], strides = [1, 1]} : vector<8x512xf32> to vector<8x128xf32>
    %106 = math.tanh %105 : vector<8x128xf32>
    %107 = vector.extract_strided_slice %104 {offsets = [0, 128], sizes = [8, 128], strides = [1, 1]} : vector<8x384xf32> to vector<8x128xf32>
    %108 = arith.mulf %107, %85 : vector<8x128xf32>
    %109 = vector.extract_strided_slice %104 {offsets = [0, 0], sizes = [8, 128], strides = [1, 1]} : vector<8x384xf32> to vector<8x128xf32>
    %110 = arith.mulf %109, %106 : vector<8x128xf32>
    %111 = arith.addf %108, %110 : vector<8x128xf32>
    %112 = vector.extract_strided_slice %104 {offsets = [0, 256], sizes = [8, 128], strides = [1, 1]} : vector<8x384xf32> to vector<8x128xf32>
    %113 = math.tanh %111 : vector<8x128xf32>
    %114 = arith.mulf %112, %113 : vector<8x128xf32>
    %115 = arith.index_cast %c3_i32 : i32 to index
    %c0_37 = arith.constant 0 : index
    %c0_38 = arith.constant 0 : index
    %116 = vector.load %arg11[%115, %c0_37, %c0_38] : memref<8x8x128xf32, #tpu.memory_space<vmem>>, vector<1x8x128xf32>
    %117 = vector.shape_cast %116 : vector<1x8x128xf32> to vector<8x128xf32>
    %118 = vector.shape_cast %114 : vector<8x128xf32> to vector<1x8x128xf32>
    tpu.vector_store %arg11[%115, %c0_37, %c0_38], %118 {strides = array<i32>} : memref<8x8x128xf32, #tpu.memory_space<vmem>>, vector<1x8x128xf32>,
    %c4_i32 = arith.constant 4 : i32
    %119 = arith.index_cast %c4_i32 : i32 to index
    %c0_39 = arith.constant 0 : index
    %c0_40 = arith.constant 0 : index
    %120 = vector.load %arg10[%119, %c0_39, %c0_40] : memref<8x8x512xf32, #tpu.memory_space<vmem>>, vector<1x8x512xf32>
    %121 = vector.shape_cast %120 : vector<1x8x512xf32> to vector<8x512xf32>
    %122 = arith.truncf %114 : vector<8x128xf32> to vector<8x128xbf16>
    %cst_41 = arith.constant dense<0.000000e+00> : vector<8x512xf32>
    %123 = tpu.matmul %122, %3, %cst_41 {dimension_numbers = #tpu.dot_dimension_numbers<[1], [0], [0], [1], [0, 0, 1, 1], [], []>} : vector<8x128xbf16>, vector<128x512xbf16>, vector<8x512xf32> -> vector<8x512xf32>
    %124 = arith.addf %121, %123 : vector<8x512xf32>
    %125 = vector.extract_strided_slice %124 {offsets = [0, 0], sizes = [8, 384], strides = [1, 1]} : vector<8x512xf32> to vector<8x384xf32>
    %126 = arith.negf %125 : vector<8x384xf32>
    %127 = math.exp %126 : vector<8x384xf32>
    %cst_42 = arith.constant 1.000000e+00 : f32
    %128 = vector.broadcast %cst_42 : f32 to vector<8x384xf32>
    %129 = arith.addf %128, %127 : vector<8x384xf32>
    %130 = arith.divf %128, %129 : vector<8x384xf32>
    %131 = vector.extract_strided_slice %124 {offsets = [0, 384], sizes = [8, 128], strides = [1, 1]} : vector<8x512xf32> to vector<8x128xf32>
    %132 = math.tanh %131 : vector<8x128xf32>
    %133 = vector.extract_strided_slice %130 {offsets = [0, 128], sizes = [8, 128], strides = [1, 1]} : vector<8x384xf32> to vector<8x128xf32>
    %134 = arith.mulf %133, %111 : vector<8x128xf32>
    %135 = vector.extract_strided_slice %130 {offsets = [0, 0], sizes = [8, 128], strides = [1, 1]} : vector<8x384xf32> to vector<8x128xf32>
    %136 = arith.mulf %135, %132 : vector<8x128xf32>
    %137 = arith.addf %134, %136 : vector<8x128xf32>
    %138 = vector.extract_strided_slice %130 {offsets = [0, 256], sizes = [8, 128], strides = [1, 1]} : vector<8x384xf32> to vector<8x128xf32>
    %139 = math.tanh %137 : vector<8x128xf32>
    %140 = arith.mulf %138, %139 : vector<8x128xf32>
    %141 = arith.index_cast %c4_i32 : i32 to index
    %c0_43 = arith.constant 0 : index
    %c0_44 = arith.constant 0 : index
    %142 = vector.load %arg11[%141, %c0_43, %c0_44] : memref<8x8x128xf32, #tpu.memory_space<vmem>>, vector<1x8x128xf32>
    %143 = vector.shape_cast %142 : vector<1x8x128xf32> to vector<8x128xf32>
    %144 = vector.shape_cast %140 : vector<8x128xf32> to vector<1x8x128xf32>
    tpu.vector_store %arg11[%141, %c0_43, %c0_44], %144 {strides = array<i32>} : memref<8x8x128xf32, #tpu.memory_space<vmem>>, vector<1x8x128xf32>,
    %c5_i32 = arith.constant 5 : i32
    %145 = arith.index_cast %c5_i32 : i32 to index
    %c0_45 = arith.constant 0 : index
    %c0_46 = arith.constant 0 : index
    %146 = vector.load %arg10[%145, %c0_45, %c0_46] : memref<8x8x512xf32, #tpu.memory_space<vmem>>, vector<1x8x512xf32>
    %147 = vector.shape_cast %146 : vector<1x8x512xf32> to vector<8x512xf32>
    %148 = arith.truncf %140 : vector<8x128xf32> to vector<8x128xbf16>
    %cst_47 = arith.constant dense<0.000000e+00> : vector<8x512xf32>
    %149 = tpu.matmul %148, %3, %cst_47 {dimension_numbers = #tpu.dot_dimension_numbers<[1], [0], [0], [1], [0, 0, 1, 1], [], []>} : vector<8x128xbf16>, vector<128x512xbf16>, vector<8x512xf32> -> vector<8x512xf32>
    %150 = arith.addf %147, %149 : vector<8x512xf32>
    %151 = vector.extract_strided_slice %150 {offsets = [0, 0], sizes = [8, 384], strides = [1, 1]} : vector<8x512xf32> to vector<8x384xf32>
    %152 = arith.negf %151 : vector<8x384xf32>
    %153 = math.exp %152 : vector<8x384xf32>
    %cst_48 = arith.constant 1.000000e+00 : f32
    %154 = vector.broadcast %cst_48 : f32 to vector<8x384xf32>
    %155 = arith.addf %154, %153 : vector<8x384xf32>
    %156 = arith.divf %154, %155 : vector<8x384xf32>
    %157 = vector.extract_strided_slice %150 {offsets = [0, 384], sizes = [8, 128], strides = [1, 1]} : vector<8x512xf32> to vector<8x128xf32>
    %158 = math.tanh %157 : vector<8x128xf32>
    %159 = vector.extract_strided_slice %156 {offsets = [0, 128], sizes = [8, 128], strides = [1, 1]} : vector<8x384xf32> to vector<8x128xf32>
    %160 = arith.mulf %159, %137 : vector<8x128xf32>
    %161 = vector.extract_strided_slice %156 {offsets = [0, 0], sizes = [8, 128], strides = [1, 1]} : vector<8x384xf32> to vector<8x128xf32>
    %162 = arith.mulf %161, %158 : vector<8x128xf32>
    %163 = arith.addf %160, %162 : vector<8x128xf32>
    %164 = vector.extract_strided_slice %156 {offsets = [0, 256], sizes = [8, 128], strides = [1, 1]} : vector<8x384xf32> to vector<8x128xf32>
    %165 = math.tanh %163 : vector<8x128xf32>
    %166 = arith.mulf %164, %165 : vector<8x128xf32>
    %167 = arith.index_cast %c5_i32 : i32 to index
    %c0_49 = arith.constant 0 : index
    %c0_50 = arith.constant 0 : index
    %168 = vector.load %arg11[%167, %c0_49, %c0_50] : memref<8x8x128xf32, #tpu.memory_space<vmem>>, vector<1x8x128xf32>
    %169 = vector.shape_cast %168 : vector<1x8x128xf32> to vector<8x128xf32>
    %170 = vector.shape_cast %166 : vector<8x128xf32> to vector<1x8x128xf32>
    tpu.vector_store %arg11[%167, %c0_49, %c0_50], %170 {strides = array<i32>} : memref<8x8x128xf32, #tpu.memory_space<vmem>>, vector<1x8x128xf32>,
    %c6_i32 = arith.constant 6 : i32
    %171 = arith.index_cast %c6_i32 : i32 to index
    %c0_51 = arith.constant 0 : index
    %c0_52 = arith.constant 0 : index
    %172 = vector.load %arg10[%171, %c0_51, %c0_52] : memref<8x8x512xf32, #tpu.memory_space<vmem>>, vector<1x8x512xf32>
    %173 = vector.shape_cast %172 : vector<1x8x512xf32> to vector<8x512xf32>
    %174 = arith.truncf %166 : vector<8x128xf32> to vector<8x128xbf16>
    %cst_53 = arith.constant dense<0.000000e+00> : vector<8x512xf32>
    %175 = tpu.matmul %174, %3, %cst_53 {dimension_numbers = #tpu.dot_dimension_numbers<[1], [0], [0], [1], [0, 0, 1, 1], [], []>} : vector<8x128xbf16>, vector<128x512xbf16>, vector<8x512xf32> -> vector<8x512xf32>
    %176 = arith.addf %173, %175 : vector<8x512xf32>
    %177 = vector.extract_strided_slice %176 {offsets = [0, 0], sizes = [8, 384], strides = [1, 1]} : vector<8x512xf32> to vector<8x384xf32>
    %178 = arith.negf %177 : vector<8x384xf32>
    %179 = math.exp %178 : vector<8x384xf32>
    %cst_54 = arith.constant 1.000000e+00 : f32
    %180 = vector.broadcast %cst_54 : f32 to vector<8x384xf32>
    %181 = arith.addf %180, %179 : vector<8x384xf32>
    %182 = arith.divf %180, %181 : vector<8x384xf32>
    %183 = vector.extract_strided_slice %176 {offsets = [0, 384], sizes = [8, 128], strides = [1, 1]} : vector<8x512xf32> to vector<8x128xf32>
    %184 = math.tanh %183 : vector<8x128xf32>
    %185 = vector.extract_strided_slice %182 {offsets = [0, 128], sizes = [8, 128], strides = [1, 1]} : vector<8x384xf32> to vector<8x128xf32>
    %186 = arith.mulf %185, %163 : vector<8x128xf32>
    %187 = vector.extract_strided_slice %182 {offsets = [0, 0], sizes = [8, 128], strides = [1, 1]} : vector<8x384xf32> to vector<8x128xf32>
    %188 = arith.mulf %187, %184 : vector<8x128xf32>
    %189 = arith.addf %186, %188 : vector<8x128xf32>
    %190 = vector.extract_strided_slice %182 {offsets = [0, 256], sizes = [8, 128], strides = [1, 1]} : vector<8x384xf32> to vector<8x128xf32>
    %191 = math.tanh %189 : vector<8x128xf32>
    %192 = arith.mulf %190, %191 : vector<8x128xf32>
    %193 = arith.index_cast %c6_i32 : i32 to index
    %c0_55 = arith.constant 0 : index
    %c0_56 = arith.constant 0 : index
    %194 = vector.load %arg11[%193, %c0_55, %c0_56] : memref<8x8x128xf32, #tpu.memory_space<vmem>>, vector<1x8x128xf32>
    %195 = vector.shape_cast %194 : vector<1x8x128xf32> to vector<8x128xf32>
    %196 = vector.shape_cast %192 : vector<8x128xf32> to vector<1x8x128xf32>
    tpu.vector_store %arg11[%193, %c0_55, %c0_56], %196 {strides = array<i32>} : memref<8x8x128xf32, #tpu.memory_space<vmem>>, vector<1x8x128xf32>,
    %c7_i32 = arith.constant 7 : i32
    %197 = arith.index_cast %c7_i32 : i32 to index
    %c0_57 = arith.constant 0 : index
    %c0_58 = arith.constant 0 : index
    %198 = vector.load %arg10[%197, %c0_57, %c0_58] : memref<8x8x512xf32, #tpu.memory_space<vmem>>, vector<1x8x512xf32>
    %199 = vector.shape_cast %198 : vector<1x8x512xf32> to vector<8x512xf32>
    %200 = arith.truncf %192 : vector<8x128xf32> to vector<8x128xbf16>
    %cst_59 = arith.constant dense<0.000000e+00> : vector<8x512xf32>
    %201 = tpu.matmul %200, %3, %cst_59 {dimension_numbers = #tpu.dot_dimension_numbers<[1], [0], [0], [1], [0, 0, 1, 1], [], []>} : vector<8x128xbf16>, vector<128x512xbf16>, vector<8x512xf32> -> vector<8x512xf32>
    %202 = arith.addf %199, %201 : vector<8x512xf32>
    %203 = vector.extract_strided_slice %202 {offsets = [0, 0], sizes = [8, 384], strides = [1, 1]} : vector<8x512xf32> to vector<8x384xf32>
    %204 = arith.negf %203 : vector<8x384xf32>
    %205 = math.exp %204 : vector<8x384xf32>
    %cst_60 = arith.constant 1.000000e+00 : f32
    %206 = vector.broadcast %cst_60 : f32 to vector<8x384xf32>
    %207 = arith.addf %206, %205 : vector<8x384xf32>
    %208 = arith.divf %206, %207 : vector<8x384xf32>
    %209 = vector.extract_strided_slice %202 {offsets = [0, 384], sizes = [8, 128], strides = [1, 1]} : vector<8x512xf32> to vector<8x128xf32>
    %210 = math.tanh %209 : vector<8x128xf32>
    %211 = vector.extract_strided_slice %208 {offsets = [0, 128], sizes = [8, 128], strides = [1, 1]} : vector<8x384xf32> to vector<8x128xf32>
    %212 = arith.mulf %211, %189 : vector<8x128xf32>
    %213 = vector.extract_strided_slice %208 {offsets = [0, 0], sizes = [8, 128], strides = [1, 1]} : vector<8x384xf32> to vector<8x128xf32>
    %214 = arith.mulf %213, %210 : vector<8x128xf32>
    %215 = arith.addf %212, %214 : vector<8x128xf32>
    %216 = vector.extract_strided_slice %208 {offsets = [0, 256], sizes = [8, 128], strides = [1, 1]} : vector<8x384xf32> to vector<8x128xf32>
    %217 = math.tanh %215 : vector<8x128xf32>
    %218 = arith.mulf %216, %217 : vector<8x128xf32>
    %219 = arith.index_cast %c7_i32 : i32 to index
    %c0_61 = arith.constant 0 : index
    %c0_62 = arith.constant 0 : index
    %220 = vector.load %arg11[%219, %c0_61, %c0_62] : memref<8x8x128xf32, #tpu.memory_space<vmem>>, vector<1x8x128xf32>
    %221 = vector.shape_cast %220 : vector<1x8x128xf32> to vector<8x128xf32>
    %222 = vector.shape_cast %218 : vector<8x128xf32> to vector<1x8x128xf32>
    tpu.vector_store %arg11[%219, %c0_61, %c0_62], %222 {strides = array<i32>} : memref<8x8x128xf32, #tpu.memory_space<vmem>>, vector<1x8x128xf32>,
    %c8_i32 = arith.constant 8 : i32
    %c0_63 = arith.constant 0 : index
    %c0_64 = arith.constant 0 : index
    %c0_65 = arith.constant 0 : index
    %223 = vector.load %arg8[%c0_63, %c0_64, %c0_65] : memref<2x8x128xf32, #tpu.memory_space<vmem>>, vector<1x8x128xf32>
    %224 = vector.shape_cast %223 : vector<1x8x128xf32> to vector<8x128xf32>
    %225 = vector.shape_cast %218 : vector<8x128xf32> to vector<1x8x128xf32>
    tpu.vector_store %arg8[%c0_63, %c0_64, %c0_65], %225 {strides = array<i32>} : memref<2x8x128xf32, #tpu.memory_space<vmem>>, vector<1x8x128xf32>,
    %c0_66 = arith.constant 0 : index
    %c0_67 = arith.constant 0 : index
    %c0_68 = arith.constant 0 : index
    %226 = vector.load %arg9[%c0_66, %c0_67, %c0_68] : memref<2x8x128xf32, #tpu.memory_space<vmem>>, vector<1x8x128xf32>
    %227 = vector.shape_cast %226 : vector<1x8x128xf32> to vector<8x128xf32>
    %228 = vector.shape_cast %215 : vector<8x128xf32> to vector<1x8x128xf32>
    tpu.vector_store %arg9[%c0_66, %c0_67, %c0_68], %228 {strides = array<i32>} : memref<2x8x128xf32, #tpu.memory_space<vmem>>, vector<1x8x128xf32>,
    %c1 = arith.constant 1 : index
    %c0_69 = arith.constant 0 : index
    %c0_70 = arith.constant 0 : index
    %229 = vector.load %arg2[%c1, %c0_69, %c0_70] : memref<2x128x512xbf16, #tpu.memory_space<vmem>>, vector<1x128x512xbf16>
    %230 = vector.shape_cast %229 : vector<1x128x512xbf16> to vector<128x512xbf16>
    %c1_71 = arith.constant 1 : index
    %c0_72 = arith.constant 0 : index
    %c0_73 = arith.constant 0 : index
    %231 = vector.load %arg3[%c1_71, %c0_72, %c0_73] : memref<2x128x512xbf16, #tpu.memory_space<vmem>>, vector<1x128x512xbf16>
    %232 = vector.shape_cast %231 : vector<1x128x512xbf16> to vector<128x512xbf16>
    %c1_74 = arith.constant 1 : index
    %c0_75 = arith.constant 0 : index
    %c0_76 = arith.constant 0 : index
    %233 = vector.load %arg4[%c1_74, %c0_75, %c0_76] : memref<2x1x512xf32, #tpu.memory_space<vmem>>, vector<1x1x512xf32>
    %234 = vector.shape_cast %233 : vector<1x1x512xf32> to vector<1x512xf32>
    %c0_77 = arith.constant 0 : index
    %c0_78 = arith.constant 0 : index
    %c0_79 = arith.constant 0 : index
    %235 = vector.load %arg11[%c0_77, %c0_78, %c0_79] : memref<8x8x128xf32, #tpu.memory_space<vmem>>, vector<8x8x128xf32>
    %236 = vector.shape_cast %235 : vector<8x8x128xf32> to vector<64x128xf32>
    %237 = arith.truncf %236 : vector<64x128xf32> to vector<64x128xbf16>
    %cst_80 = arith.constant dense<0.000000e+00> : vector<64x512xf32>
    %238 = tpu.matmul %237, %230, %cst_80 {dimension_numbers = #tpu.dot_dimension_numbers<[1], [0], [0], [1], [0, 0, 1, 1], [], []>} : vector<64x128xbf16>, vector<128x512xbf16>, vector<64x512xf32> -> vector<64x512xf32>
    %239 = vector.broadcast %234 : vector<1x512xf32> to vector<64x512xf32>
    %240 = arith.addf %238, %239 : vector<64x512xf32>
    %241 = vector.shape_cast %240 : vector<64x512xf32> to vector<8x8x512xf32>
    %c0_81 = arith.constant 0 : index
    %c0_82 = arith.constant 0 : index
    %c0_83 = arith.constant 0 : index
    %242 = vector.load %arg10[%c0_81, %c0_82, %c0_83] : memref<8x8x512xf32, #tpu.memory_space<vmem>>, vector<8x8x512xf32>
    tpu.vector_store %arg10[%c0_81, %c0_82, %c0_83], %241 {strides = array<i32>} : memref<8x8x512xf32, #tpu.memory_space<vmem>>, vector<8x8x512xf32>,
    %cst_84 = arith.constant 0.000000e+00 : f32
    %243 = vector.broadcast %cst_84 : f32 to vector<8x128xf32>
    %c0_i32_85 = arith.constant 0 : i32
    %244 = arith.index_cast %c0_i32_85 : i32 to index
    %c0_86 = arith.constant 0 : index
    %c0_87 = arith.constant 0 : index
    %245 = vector.load %arg10[%244, %c0_86, %c0_87] : memref<8x8x512xf32, #tpu.memory_space<vmem>>, vector<1x8x512xf32>
    %246 = vector.shape_cast %245 : vector<1x8x512xf32> to vector<8x512xf32>
    %247 = arith.truncf %243 : vector<8x128xf32> to vector<8x128xbf16>
    %cst_88 = arith.constant dense<0.000000e+00> : vector<8x512xf32>
    %248 = tpu.matmul %247, %232, %cst_88 {dimension_numbers = #tpu.dot_dimension_numbers<[1], [0], [0], [1], [0, 0, 1, 1], [], []>} : vector<8x128xbf16>, vector<128x512xbf16>, vector<8x512xf32> -> vector<8x512xf32>
    %249 = arith.addf %246, %248 : vector<8x512xf32>
    %250 = vector.extract_strided_slice %249 {offsets = [0, 0], sizes = [8, 384], strides = [1, 1]} : vector<8x512xf32> to vector<8x384xf32>
    %251 = arith.negf %250 : vector<8x384xf32>
    %252 = math.exp %251 : vector<8x384xf32>
    %cst_89 = arith.constant 1.000000e+00 : f32
    %253 = vector.broadcast %cst_89 : f32 to vector<8x384xf32>
    %254 = arith.addf %253, %252 : vector<8x384xf32>
    %255 = arith.divf %253, %254 : vector<8x384xf32>
    %256 = vector.extract_strided_slice %249 {offsets = [0, 384], sizes = [8, 128], strides = [1, 1]} : vector<8x512xf32> to vector<8x128xf32>
    %257 = math.tanh %256 : vector<8x128xf32>
    %258 = vector.extract_strided_slice %255 {offsets = [0, 128], sizes = [8, 128], strides = [1, 1]} : vector<8x384xf32> to vector<8x128xf32>
    %259 = arith.mulf %258, %243 : vector<8x128xf32>
    %260 = vector.extract_strided_slice %255 {offsets = [0, 0], sizes = [8, 128], strides = [1, 1]} : vector<8x384xf32> to vector<8x128xf32>
    %261 = arith.mulf %260, %257 : vector<8x128xf32>
    %262 = arith.addf %259, %261 : vector<8x128xf32>
    %263 = vector.extract_strided_slice %255 {offsets = [0, 256], sizes = [8, 128], strides = [1, 1]} : vector<8x384xf32> to vector<8x128xf32>
    %264 = math.tanh %262 : vector<8x128xf32>
    %265 = arith.mulf %263, %264 : vector<8x128xf32>
    %c1_i32_90 = arith.constant 1 : i32
    %266 = arith.index_cast %c1_i32_90 : i32 to index
    %c0_91 = arith.constant 0 : index
    %c0_92 = arith.constant 0 : index
    %267 = vector.load %arg10[%266, %c0_91, %c0_92] : memref<8x8x512xf32, #tpu.memory_space<vmem>>, vector<1x8x512xf32>
    %268 = vector.shape_cast %267 : vector<1x8x512xf32> to vector<8x512xf32>
    %269 = arith.truncf %265 : vector<8x128xf32> to vector<8x128xbf16>
    %cst_93 = arith.constant dense<0.000000e+00> : vector<8x512xf32>
    %270 = tpu.matmul %269, %232, %cst_93 {dimension_numbers = #tpu.dot_dimension_numbers<[1], [0], [0], [1], [0, 0, 1, 1], [], []>} : vector<8x128xbf16>, vector<128x512xbf16>, vector<8x512xf32> -> vector<8x512xf32>
    %271 = arith.addf %268, %270 : vector<8x512xf32>
    %272 = vector.extract_strided_slice %271 {offsets = [0, 0], sizes = [8, 384], strides = [1, 1]} : vector<8x512xf32> to vector<8x384xf32>
    %273 = arith.negf %272 : vector<8x384xf32>
    %274 = math.exp %273 : vector<8x384xf32>
    %cst_94 = arith.constant 1.000000e+00 : f32
    %275 = vector.broadcast %cst_94 : f32 to vector<8x384xf32>
    %276 = arith.addf %275, %274 : vector<8x384xf32>
    %277 = arith.divf %275, %276 : vector<8x384xf32>
    %278 = vector.extract_strided_slice %271 {offsets = [0, 384], sizes = [8, 128], strides = [1, 1]} : vector<8x512xf32> to vector<8x128xf32>
    %279 = math.tanh %278 : vector<8x128xf32>
    %280 = vector.extract_strided_slice %277 {offsets = [0, 128], sizes = [8, 128], strides = [1, 1]} : vector<8x384xf32> to vector<8x128xf32>
    %281 = arith.mulf %280, %262 : vector<8x128xf32>
    %282 = vector.extract_strided_slice %277 {offsets = [0, 0], sizes = [8, 128], strides = [1, 1]} : vector<8x384xf32> to vector<8x128xf32>
    %283 = arith.mulf %282, %279 : vector<8x128xf32>
    %284 = arith.addf %281, %283 : vector<8x128xf32>
    %285 = vector.extract_strided_slice %277 {offsets = [0, 256], sizes = [8, 128], strides = [1, 1]} : vector<8x384xf32> to vector<8x128xf32>
    %286 = math.tanh %284 : vector<8x128xf32>
    %287 = arith.mulf %285, %286 : vector<8x128xf32>
    %c2_i32_95 = arith.constant 2 : i32
    %288 = arith.index_cast %c2_i32_95 : i32 to index
    %c0_96 = arith.constant 0 : index
    %c0_97 = arith.constant 0 : index
    %289 = vector.load %arg10[%288, %c0_96, %c0_97] : memref<8x8x512xf32, #tpu.memory_space<vmem>>, vector<1x8x512xf32>
    %290 = vector.shape_cast %289 : vector<1x8x512xf32> to vector<8x512xf32>
    %291 = arith.truncf %287 : vector<8x128xf32> to vector<8x128xbf16>
    %cst_98 = arith.constant dense<0.000000e+00> : vector<8x512xf32>
    %292 = tpu.matmul %291, %232, %cst_98 {dimension_numbers = #tpu.dot_dimension_numbers<[1], [0], [0], [1], [0, 0, 1, 1], [], []>} : vector<8x128xbf16>, vector<128x512xbf16>, vector<8x512xf32> -> vector<8x512xf32>
    %293 = arith.addf %290, %292 : vector<8x512xf32>
    %294 = vector.extract_strided_slice %293 {offsets = [0, 0], sizes = [8, 384], strides = [1, 1]} : vector<8x512xf32> to vector<8x384xf32>
    %295 = arith.negf %294 : vector<8x384xf32>
    %296 = math.exp %295 : vector<8x384xf32>
    %cst_99 = arith.constant 1.000000e+00 : f32
    %297 = vector.broadcast %cst_99 : f32 to vector<8x384xf32>
    %298 = arith.addf %297, %296 : vector<8x384xf32>
    %299 = arith.divf %297, %298 : vector<8x384xf32>
    %300 = vector.extract_strided_slice %293 {offsets = [0, 384], sizes = [8, 128], strides = [1, 1]} : vector<8x512xf32> to vector<8x128xf32>
    %301 = math.tanh %300 : vector<8x128xf32>
    %302 = vector.extract_strided_slice %299 {offsets = [0, 128], sizes = [8, 128], strides = [1, 1]} : vector<8x384xf32> to vector<8x128xf32>
    %303 = arith.mulf %302, %284 : vector<8x128xf32>
    %304 = vector.extract_strided_slice %299 {offsets = [0, 0], sizes = [8, 128], strides = [1, 1]} : vector<8x384xf32> to vector<8x128xf32>
    %305 = arith.mulf %304, %301 : vector<8x128xf32>
    %306 = arith.addf %303, %305 : vector<8x128xf32>
    %307 = vector.extract_strided_slice %299 {offsets = [0, 256], sizes = [8, 128], strides = [1, 1]} : vector<8x384xf32> to vector<8x128xf32>
    %308 = math.tanh %306 : vector<8x128xf32>
    %309 = arith.mulf %307, %308 : vector<8x128xf32>
    %c3_i32_100 = arith.constant 3 : i32
    %310 = arith.index_cast %c3_i32_100 : i32 to index
    %c0_101 = arith.constant 0 : index
    %c0_102 = arith.constant 0 : index
    %311 = vector.load %arg10[%310, %c0_101, %c0_102] : memref<8x8x512xf32, #tpu.memory_space<vmem>>, vector<1x8x512xf32>
    %312 = vector.shape_cast %311 : vector<1x8x512xf32> to vector<8x512xf32>
    %313 = arith.truncf %309 : vector<8x128xf32> to vector<8x128xbf16>
    %cst_103 = arith.constant dense<0.000000e+00> : vector<8x512xf32>
    %314 = tpu.matmul %313, %232, %cst_103 {dimension_numbers = #tpu.dot_dimension_numbers<[1], [0], [0], [1], [0, 0, 1, 1], [], []>} : vector<8x128xbf16>, vector<128x512xbf16>, vector<8x512xf32> -> vector<8x512xf32>
    %315 = arith.addf %312, %314 : vector<8x512xf32>
    %316 = vector.extract_strided_slice %315 {offsets = [0, 0], sizes = [8, 384], strides = [1, 1]} : vector<8x512xf32> to vector<8x384xf32>
    %317 = arith.negf %316 : vector<8x384xf32>
    %318 = math.exp %317 : vector<8x384xf32>
    %cst_104 = arith.constant 1.000000e+00 : f32
    %319 = vector.broadcast %cst_104 : f32 to vector<8x384xf32>
    %320 = arith.addf %319, %318 : vector<8x384xf32>
    %321 = arith.divf %319, %320 : vector<8x384xf32>
    %322 = vector.extract_strided_slice %315 {offsets = [0, 384], sizes = [8, 128], strides = [1, 1]} : vector<8x512xf32> to vector<8x128xf32>
    %323 = math.tanh %322 : vector<8x128xf32>
    %324 = vector.extract_strided_slice %321 {offsets = [0, 128], sizes = [8, 128], strides = [1, 1]} : vector<8x384xf32> to vector<8x128xf32>
    %325 = arith.mulf %324, %306 : vector<8x128xf32>
    %326 = vector.extract_strided_slice %321 {offsets = [0, 0], sizes = [8, 128], strides = [1, 1]} : vector<8x384xf32> to vector<8x128xf32>
    %327 = arith.mulf %326, %323 : vector<8x128xf32>
    %328 = arith.addf %325, %327 : vector<8x128xf32>
    %329 = vector.extract_strided_slice %321 {offsets = [0, 256], sizes = [8, 128], strides = [1, 1]} : vector<8x384xf32> to vector<8x128xf32>
    %330 = math.tanh %328 : vector<8x128xf32>
    %331 = arith.mulf %329, %330 : vector<8x128xf32>
    %c4_i32_105 = arith.constant 4 : i32
    %332 = arith.index_cast %c4_i32_105 : i32 to index
    %c0_106 = arith.constant 0 : index
    %c0_107 = arith.constant 0 : index
    %333 = vector.load %arg10[%332, %c0_106, %c0_107] : memref<8x8x512xf32, #tpu.memory_space<vmem>>, vector<1x8x512xf32>
    %334 = vector.shape_cast %333 : vector<1x8x512xf32> to vector<8x512xf32>
    %335 = arith.truncf %331 : vector<8x128xf32> to vector<8x128xbf16>
    %cst_108 = arith.constant dense<0.000000e+00> : vector<8x512xf32>
    %336 = tpu.matmul %335, %232, %cst_108 {dimension_numbers = #tpu.dot_dimension_numbers<[1], [0], [0], [1], [0, 0, 1, 1], [], []>} : vector<8x128xbf16>, vector<128x512xbf16>, vector<8x512xf32> -> vector<8x512xf32>
    %337 = arith.addf %334, %336 : vector<8x512xf32>
    %338 = vector.extract_strided_slice %337 {offsets = [0, 0], sizes = [8, 384], strides = [1, 1]} : vector<8x512xf32> to vector<8x384xf32>
    %339 = arith.negf %338 : vector<8x384xf32>
    %340 = math.exp %339 : vector<8x384xf32>
    %cst_109 = arith.constant 1.000000e+00 : f32
    %341 = vector.broadcast %cst_109 : f32 to vector<8x384xf32>
    %342 = arith.addf %341, %340 : vector<8x384xf32>
    %343 = arith.divf %341, %342 : vector<8x384xf32>
    %344 = vector.extract_strided_slice %337 {offsets = [0, 384], sizes = [8, 128], strides = [1, 1]} : vector<8x512xf32> to vector<8x128xf32>
    %345 = math.tanh %344 : vector<8x128xf32>
    %346 = vector.extract_strided_slice %343 {offsets = [0, 128], sizes = [8, 128], strides = [1, 1]} : vector<8x384xf32> to vector<8x128xf32>
    %347 = arith.mulf %346, %328 : vector<8x128xf32>
    %348 = vector.extract_strided_slice %343 {offsets = [0, 0], sizes = [8, 128], strides = [1, 1]} : vector<8x384xf32> to vector<8x128xf32>
    %349 = arith.mulf %348, %345 : vector<8x128xf32>
    %350 = arith.addf %347, %349 : vector<8x128xf32>
    %351 = vector.extract_strided_slice %343 {offsets = [0, 256], sizes = [8, 128], strides = [1, 1]} : vector<8x384xf32> to vector<8x128xf32>
    %352 = math.tanh %350 : vector<8x128xf32>
    %353 = arith.mulf %351, %352 : vector<8x128xf32>
    %c5_i32_110 = arith.constant 5 : i32
    %354 = arith.index_cast %c5_i32_110 : i32 to index
    %c0_111 = arith.constant 0 : index
    %c0_112 = arith.constant 0 : index
    %355 = vector.load %arg10[%354, %c0_111, %c0_112] : memref<8x8x512xf32, #tpu.memory_space<vmem>>, vector<1x8x512xf32>
    %356 = vector.shape_cast %355 : vector<1x8x512xf32> to vector<8x512xf32>
    %357 = arith.truncf %353 : vector<8x128xf32> to vector<8x128xbf16>
    %cst_113 = arith.constant dense<0.000000e+00> : vector<8x512xf32>
    %358 = tpu.matmul %357, %232, %cst_113 {dimension_numbers = #tpu.dot_dimension_numbers<[1], [0], [0], [1], [0, 0, 1, 1], [], []>} : vector<8x128xbf16>, vector<128x512xbf16>, vector<8x512xf32> -> vector<8x512xf32>
    %359 = arith.addf %356, %358 : vector<8x512xf32>
    %360 = vector.extract_strided_slice %359 {offsets = [0, 0], sizes = [8, 384], strides = [1, 1]} : vector<8x512xf32> to vector<8x384xf32>
    %361 = arith.negf %360 : vector<8x384xf32>
    %362 = math.exp %361 : vector<8x384xf32>
    %cst_114 = arith.constant 1.000000e+00 : f32
    %363 = vector.broadcast %cst_114 : f32 to vector<8x384xf32>
    %364 = arith.addf %363, %362 : vector<8x384xf32>
    %365 = arith.divf %363, %364 : vector<8x384xf32>
    %366 = vector.extract_strided_slice %359 {offsets = [0, 384], sizes = [8, 128], strides = [1, 1]} : vector<8x512xf32> to vector<8x128xf32>
    %367 = math.tanh %366 : vector<8x128xf32>
    %368 = vector.extract_strided_slice %365 {offsets = [0, 128], sizes = [8, 128], strides = [1, 1]} : vector<8x384xf32> to vector<8x128xf32>
    %369 = arith.mulf %368, %350 : vector<8x128xf32>
    %370 = vector.extract_strided_slice %365 {offsets = [0, 0], sizes = [8, 128], strides = [1, 1]} : vector<8x384xf32> to vector<8x128xf32>
    %371 = arith.mulf %370, %367 : vector<8x128xf32>
    %372 = arith.addf %369, %371 : vector<8x128xf32>
    %373 = vector.extract_strided_slice %365 {offsets = [0, 256], sizes = [8, 128], strides = [1, 1]} : vector<8x384xf32> to vector<8x128xf32>
    %374 = math.tanh %372 : vector<8x128xf32>
    %375 = arith.mulf %373, %374 : vector<8x128xf32>
    %c6_i32_115 = arith.constant 6 : i32
    %376 = arith.index_cast %c6_i32_115 : i32 to index
    %c0_116 = arith.constant 0 : index
    %c0_117 = arith.constant 0 : index
    %377 = vector.load %arg10[%376, %c0_116, %c0_117] : memref<8x8x512xf32, #tpu.memory_space<vmem>>, vector<1x8x512xf32>
    %378 = vector.shape_cast %377 : vector<1x8x512xf32> to vector<8x512xf32>
    %379 = arith.truncf %375 : vector<8x128xf32> to vector<8x128xbf16>
    %cst_118 = arith.constant dense<0.000000e+00> : vector<8x512xf32>
    %380 = tpu.matmul %379, %232, %cst_118 {dimension_numbers = #tpu.dot_dimension_numbers<[1], [0], [0], [1], [0, 0, 1, 1], [], []>} : vector<8x128xbf16>, vector<128x512xbf16>, vector<8x512xf32> -> vector<8x512xf32>
    %381 = arith.addf %378, %380 : vector<8x512xf32>
    %382 = vector.extract_strided_slice %381 {offsets = [0, 0], sizes = [8, 384], strides = [1, 1]} : vector<8x512xf32> to vector<8x384xf32>
    %383 = arith.negf %382 : vector<8x384xf32>
    %384 = math.exp %383 : vector<8x384xf32>
    %cst_119 = arith.constant 1.000000e+00 : f32
    %385 = vector.broadcast %cst_119 : f32 to vector<8x384xf32>
    %386 = arith.addf %385, %384 : vector<8x384xf32>
    %387 = arith.divf %385, %386 : vector<8x384xf32>
    %388 = vector.extract_strided_slice %381 {offsets = [0, 384], sizes = [8, 128], strides = [1, 1]} : vector<8x512xf32> to vector<8x128xf32>
    %389 = math.tanh %388 : vector<8x128xf32>
    %390 = vector.extract_strided_slice %387 {offsets = [0, 128], sizes = [8, 128], strides = [1, 1]} : vector<8x384xf32> to vector<8x128xf32>
    %391 = arith.mulf %390, %372 : vector<8x128xf32>
    %392 = vector.extract_strided_slice %387 {offsets = [0, 0], sizes = [8, 128], strides = [1, 1]} : vector<8x384xf32> to vector<8x128xf32>
    %393 = arith.mulf %392, %389 : vector<8x128xf32>
    %394 = arith.addf %391, %393 : vector<8x128xf32>
    %395 = vector.extract_strided_slice %387 {offsets = [0, 256], sizes = [8, 128], strides = [1, 1]} : vector<8x384xf32> to vector<8x128xf32>
    %396 = math.tanh %394 : vector<8x128xf32>
    %397 = arith.mulf %395, %396 : vector<8x128xf32>
    %c7_i32_120 = arith.constant 7 : i32
    %398 = arith.index_cast %c7_i32_120 : i32 to index
    %c0_121 = arith.constant 0 : index
    %c0_122 = arith.constant 0 : index
    %399 = vector.load %arg10[%398, %c0_121, %c0_122] : memref<8x8x512xf32, #tpu.memory_space<vmem>>, vector<1x8x512xf32>
    %400 = vector.shape_cast %399 : vector<1x8x512xf32> to vector<8x512xf32>
    %401 = arith.truncf %397 : vector<8x128xf32> to vector<8x128xbf16>
    %cst_123 = arith.constant dense<0.000000e+00> : vector<8x512xf32>
    %402 = tpu.matmul %401, %232, %cst_123 {dimension_numbers = #tpu.dot_dimension_numbers<[1], [0], [0], [1], [0, 0, 1, 1], [], []>} : vector<8x128xbf16>, vector<128x512xbf16>, vector<8x512xf32> -> vector<8x512xf32>
    %403 = arith.addf %400, %402 : vector<8x512xf32>
    %404 = vector.extract_strided_slice %403 {offsets = [0, 0], sizes = [8, 384], strides = [1, 1]} : vector<8x512xf32> to vector<8x384xf32>
    %405 = arith.negf %404 : vector<8x384xf32>
    %406 = math.exp %405 : vector<8x384xf32>
    %cst_124 = arith.constant 1.000000e+00 : f32
    %407 = vector.broadcast %cst_124 : f32 to vector<8x384xf32>
    %408 = arith.addf %407, %406 : vector<8x384xf32>
    %409 = arith.divf %407, %408 : vector<8x384xf32>
    %410 = vector.extract_strided_slice %403 {offsets = [0, 384], sizes = [8, 128], strides = [1, 1]} : vector<8x512xf32> to vector<8x128xf32>
    %411 = math.tanh %410 : vector<8x128xf32>
    %412 = vector.extract_strided_slice %409 {offsets = [0, 128], sizes = [8, 128], strides = [1, 1]} : vector<8x384xf32> to vector<8x128xf32>
    %413 = arith.mulf %412, %394 : vector<8x128xf32>
    %414 = vector.extract_strided_slice %409 {offsets = [0, 0], sizes = [8, 128], strides = [1, 1]} : vector<8x384xf32> to vector<8x128xf32>
    %415 = arith.mulf %414, %411 : vector<8x128xf32>
    %416 = arith.addf %413, %415 : vector<8x128xf32>
    %417 = vector.extract_strided_slice %409 {offsets = [0, 256], sizes = [8, 128], strides = [1, 1]} : vector<8x384xf32> to vector<8x128xf32>
    %418 = math.tanh %416 : vector<8x128xf32>
    %419 = arith.mulf %417, %418 : vector<8x128xf32>
    %c8_i32_125 = arith.constant 8 : i32
    %c1_126 = arith.constant 1 : index
    %c0_127 = arith.constant 0 : index
    %c0_128 = arith.constant 0 : index
    %420 = vector.load %arg8[%c1_126, %c0_127, %c0_128] : memref<2x8x128xf32, #tpu.memory_space<vmem>>, vector<1x8x128xf32>
    %421 = vector.shape_cast %420 : vector<1x8x128xf32> to vector<8x128xf32>
    %422 = vector.shape_cast %419 : vector<8x128xf32> to vector<1x8x128xf32>
    tpu.vector_store %arg8[%c1_126, %c0_127, %c0_128], %422 {strides = array<i32>} : memref<2x8x128xf32, #tpu.memory_space<vmem>>, vector<1x8x128xf32>,
    %c1_129 = arith.constant 1 : index
    %c0_130 = arith.constant 0 : index
    %c0_131 = arith.constant 0 : index
    %423 = vector.load %arg9[%c1_129, %c0_130, %c0_131] : memref<2x8x128xf32, #tpu.memory_space<vmem>>, vector<1x8x128xf32>
    %424 = vector.shape_cast %423 : vector<1x8x128xf32> to vector<8x128xf32>
    %425 = vector.shape_cast %416 : vector<8x128xf32> to vector<1x8x128xf32>
    tpu.vector_store %arg9[%c1_129, %c0_130, %c0_131], %425 {strides = array<i32>} : memref<2x8x128xf32, #tpu.memory_space<vmem>>, vector<1x8x128xf32>,
    %426 = arith.truncf %419 : vector<8x128xf32> to vector<8x128xbf16>
    %c0_132 = arith.constant 0 : index
    %c0_133 = arith.constant 0 : index
    %427 = vector.load %arg5[%c0_132, %c0_133] : memref<128x128xbf16, #tpu.memory_space<vmem>>, vector<128x128xbf16>
    %cst_134 = arith.constant dense<0.000000e+00> : vector<8x128xf32>
    %428 = tpu.matmul %426, %427, %cst_134 {dimension_numbers = #tpu.dot_dimension_numbers<[1], [0], [0], [1], [0, 0, 1, 1], [], []>} : vector<8x128xbf16>, vector<128x128xbf16>, vector<8x128xf32> -> vector<8x128xf32>
    %c0_135 = arith.constant 0 : index
    %c0_136 = arith.constant 0 : index
    %429 = vector.load %arg6[%c0_135, %c0_136] : memref<1x128xf32, #tpu.memory_space<vmem>>, vector<1x128xf32>
    %430 = vector.broadcast %429 : vector<1x128xf32> to vector<8x128xf32>
    %431 = arith.addf %428, %430 : vector<8x128xf32>
    %432 = arith.negf %431 : vector<8x128xf32>
    %433 = math.exp %432 : vector<8x128xf32>
    %cst_137 = arith.constant 1.000000e+00 : f32
    %434 = vector.broadcast %cst_137 : f32 to vector<8x128xf32>
    %435 = arith.addf %434, %433 : vector<8x128xf32>
    %436 = arith.divf %434, %435 : vector<8x128xf32>
    %c0_138 = arith.constant 0 : index
    %c0_139 = arith.constant 0 : index
    %437 = vector.load %arg7[%c0_138, %c0_139] : memref<8x128xf32, #tpu.memory_space<vmem>>, vector<8x128xf32>
    tpu.vector_store %arg7[%c0_138, %c0_139], %436 {strides = array<i32>} : memref<8x128xf32, #tpu.memory_space<vmem>>, vector<8x128xf32>,
    return
  }
  func.func @transform_0(%arg0: i32) -> (i32, i32, i32) {
    %c0_i32 = arith.constant 0 : i32
    %c0_i32_0 = arith.constant 0 : i32
    %c0_i32_1 = arith.constant 0 : i32
    return %c0_i32, %arg0, %c0_i32_0 : i32, i32, i32
  }
  func.func @transform_1(%arg0: i32) -> (i32, i32, i32) {
    %c0_i32 = arith.constant 0 : i32
    %c0_i32_0 = arith.constant 0 : i32
    %c0_i32_1 = arith.constant 0 : i32
    %c0_i32_2 = arith.constant 0 : i32
    return %c0_i32, %c0_i32_0, %c0_i32_1 : i32, i32, i32
  }
  func.func @transform_2(%arg0: i32) -> (i32, i32, i32) {
    %c0_i32 = arith.constant 0 : i32
    %c0_i32_0 = arith.constant 0 : i32
    %c0_i32_1 = arith.constant 0 : i32
    %c0_i32_2 = arith.constant 0 : i32
    return %c0_i32, %c0_i32_0, %c0_i32_1 : i32, i32, i32
  }
  func.func @transform_3(%arg0: i32) -> (i32, i32, i32) {
    %c0_i32 = arith.constant 0 : i32
    %c0_i32_0 = arith.constant 0 : i32
    %c0_i32_1 = arith.constant 0 : i32
    %c0_i32_2 = arith.constant 0 : i32
    return %c0_i32, %c0_i32_0, %c0_i32_1 : i32, i32, i32
  }
  func.func @transform_4(%arg0: i32) -> (i32, i32) {
    %c0_i32 = arith.constant 0 : i32
    %c0_i32_0 = arith.constant 0 : i32
    %c0_i32_1 = arith.constant 0 : i32
    return %c0_i32, %c0_i32_0 : i32, i32
  }
  func.func @transform_5(%arg0: i32) -> (i32, i32) {
    %c0_i32 = arith.constant 0 : i32
    %c0_i32_0 = arith.constant 0 : i32
    %c0_i32_1 = arith.constant 0 : i32
    return %c0_i32, %c0_i32_0 : i32, i32
  }
  func.func @transform_6(%arg0: i32) -> (i32, i32) {
    %c0_i32 = arith.constant 0 : i32
    %c0_i32_0 = arith.constant 0 : i32
    return %arg0, %c0_i32 : i32, i32
  }
  func.func @transform_7(%arg0: i32) -> (i32, i32, i32) {
    %c0_i32 = arith.constant 0 : i32
    %c0_i32_0 = arith.constant 0 : i32
    %c0_i32_1 = arith.constant 0 : i32
    return %c0_i32, %arg0, %c0_i32_0 : i32, i32, i32
  }
  func.func @transform_8(%arg0: i32) -> (i32, i32, i32) {
    %c0_i32 = arith.constant 0 : i32
    %c0_i32_0 = arith.constant 0 : i32
    %c0_i32_1 = arith.constant 0 : i32
    return %c0_i32, %arg0, %c0_i32_0 : i32, i32, i32
  }
}

module attributes {stable_mosaic.version = 11 : i64} {
  func.func @_lstm_fc_kernel(%arg0: i32, %arg1: memref<8x8x128xf32, #tpu.memory_space<vmem>>, %arg2: memref<2x128x512xbf16, #tpu.memory_space<vmem>>, %arg3: memref<2x128x512xbf16, #tpu.memory_space<vmem>>, %arg4: memref<2x1x512xf32, #tpu.memory_space<vmem>>, %arg5: memref<128x128xbf16, #tpu.memory_space<vmem>>, %arg6: memref<1x128xf32, #tpu.memory_space<vmem>>, %arg7: memref<8x128xf32, #tpu.memory_space<vmem>>, %arg8: memref<2x8x128xf32, #tpu.memory_space<vmem>>, %arg9: memref<2x8x128xf32, #tpu.memory_space<vmem>>, %arg10: memref<8x8x512xf32, #tpu.memory_space<vmem>>, %arg11: memref<8x8x128xf32, #tpu.memory_space<vmem>>) attributes {dimension_semantics = [#tpu.dimension_semantics<parallel>], iteration_bounds = array<i64: 1>, scalar_prefetch = 0 : i64, scratch_operands = 2 : i64, tpu.core_type = #tpu.core_type<tc>, window_params = [{transform_indices = @transform_0, window_bounds = array<i64: 8, 8, 128>}, {pipeline_mode = #tpu.pipeline_mode<synchronous>, transform_indices = @transform_1, window_bounds = array<i64: 2, 128, 512>}, {pipeline_mode = #tpu.pipeline_mode<synchronous>, transform_indices = @transform_2, window_bounds = array<i64: 2, 128, 512>}, {pipeline_mode = #tpu.pipeline_mode<synchronous>, transform_indices = @transform_3, window_bounds = array<i64: 2, 1, 512>}, {pipeline_mode = #tpu.pipeline_mode<synchronous>, transform_indices = @transform_4, window_bounds = array<i64: 128, 128>}, {pipeline_mode = #tpu.pipeline_mode<synchronous>, transform_indices = @transform_5, window_bounds = array<i64: 1, 128>}, {transform_indices = @transform_6, window_bounds = array<i64: 8, 128>}, {transform_indices = @transform_7, window_bounds = array<i64: 2, 8, 128>}, {transform_indices = @transform_8, window_bounds = array<i64: 2, 8, 128>}]} {
    %c0 = arith.constant 0 : index
    %c0_0 = arith.constant 0 : index
    %c0_1 = arith.constant 0 : index
    %0 = vector.load %arg2[%c0, %c0_0, %c0_1] : memref<2x128x512xbf16, #tpu.memory_space<vmem>>, vector<1x128x512xbf16>
    %1 = vector.shape_cast %0 : vector<1x128x512xbf16> to vector<128x512xbf16>
    %c0_2 = arith.constant 0 : index
    %c0_3 = arith.constant 0 : index
    %c0_4 = arith.constant 0 : index
    %2 = vector.load %arg3[%c0_2, %c0_3, %c0_4] : memref<2x128x512xbf16, #tpu.memory_space<vmem>>, vector<1x128x512xbf16>
    %3 = vector.shape_cast %2 : vector<1x128x512xbf16> to vector<128x512xbf16>
    %c0_5 = arith.constant 0 : index
    %c0_6 = arith.constant 0 : index
    %c0_7 = arith.constant 0 : index
    %4 = vector.load %arg4[%c0_5, %c0_6, %c0_7] : memref<2x1x512xf32, #tpu.memory_space<vmem>>, vector<1x1x512xf32>
    %5 = vector.shape_cast %4 : vector<1x1x512xf32> to vector<1x512xf32>
    %c0_8 = arith.constant 0 : index
    %c0_9 = arith.constant 0 : index
    %c0_10 = arith.constant 0 : index
    %6 = vector.load %arg1[%c0_8, %c0_9, %c0_10] : memref<8x8x128xf32, #tpu.memory_space<vmem>>, vector<8x8x128xf32>
    %7 = vector.shape_cast %6 : vector<8x8x128xf32> to vector<64x128xf32>
    %8 = arith.truncf %7 : vector<64x128xf32> to vector<64x128xbf16>
    %cst = arith.constant dense<0.000000e+00> : vector<64x512xf32>
    %9 = tpu.matmul %8, %1, %cst {dimension_numbers = #tpu.dot_dimension_numbers<[1], [0], [0], [1], [0, 0, 1, 1], [], []>} : vector<64x128xbf16>, vector<128x512xbf16>, vector<64x512xf32> -> vector<64x512xf32>
    %10 = vector.broadcast %5 : vector<1x512xf32> to vector<64x512xf32>
    %11 = arith.addf %9, %10 : vector<64x512xf32>
    %12 = vector.shape_cast %11 : vector<64x512xf32> to vector<8x8x512xf32>
    %c0_11 = arith.constant 0 : index
    %c0_12 = arith.constant 0 : index
    %c0_13 = arith.constant 0 : index
    %13 = vector.load %arg10[%c0_11, %c0_12, %c0_13] : memref<8x8x512xf32, #tpu.memory_space<vmem>>, vector<8x8x512xf32>
    tpu.vector_store %arg10[%c0_11, %c0_12, %c0_13], %12 {strides = array<i32>} : memref<8x8x512xf32, #tpu.memory_space<vmem>>, vector<8x8x512xf32>,
    %cst_14 = arith.constant 0.000000e+00 : f32
    %14 = vector.broadcast %cst_14 : f32 to vector<8x128xf32>
    %c0_i32 = arith.constant 0 : i32
    %15 = arith.index_cast %c0_i32 : i32 to index
    %c0_15 = arith.constant 0 : index
    %c0_16 = arith.constant 0 : index
    %16 = vector.load %arg10[%15, %c0_15, %c0_16] : memref<8x8x512xf32, #tpu.memory_space<vmem>>, vector<1x8x512xf32>
    %17 = vector.shape_cast %16 : vector<1x8x512xf32> to vector<8x512xf32>
    %18 = arith.truncf %14 : vector<8x128xf32> to vector<8x128xbf16>
    %cst_17 = arith.constant dense<0.000000e+00> : vector<8x512xf32>
    %19 = tpu.matmul %18, %3, %cst_17 {dimension_numbers = #tpu.dot_dimension_numbers<[1], [0], [0], [1], [0, 0, 1, 1], [], []>} : vector<8x128xbf16>, vector<128x512xbf16>, vector<8x512xf32> -> vector<8x512xf32>
    %20 = arith.addf %17, %19 : vector<8x512xf32>
    %21 = vector.extract_strided_slice %20 {offsets = [0, 0], sizes = [8, 384], strides = [1, 1]} : vector<8x512xf32> to vector<8x384xf32>
    %22 = arith.negf %21 : vector<8x384xf32>
    %23 = math.exp %22 : vector<8x384xf32>
    %cst_18 = arith.constant 1.000000e+00 : f32
    %24 = vector.broadcast %cst_18 : f32 to vector<8x384xf32>
    %25 = arith.addf %24, %23 : vector<8x384xf32>
    %26 = arith.divf %24, %25 : vector<8x384xf32>
    %27 = vector.extract_strided_slice %20 {offsets = [0, 384], sizes = [8, 128], strides = [1, 1]} : vector<8x512xf32> to vector<8x128xf32>
    %28 = math.tanh %27 : vector<8x128xf32>
    %29 = vector.extract_strided_slice %26 {offsets = [0, 128], sizes = [8, 128], strides = [1, 1]} : vector<8x384xf32> to vector<8x128xf32>
    %30 = arith.mulf %29, %14 : vector<8x128xf32>
    %31 = vector.extract_strided_slice %26 {offsets = [0, 0], sizes = [8, 128], strides = [1, 1]} : vector<8x384xf32> to vector<8x128xf32>
    %32 = arith.mulf %31, %28 : vector<8x128xf32>
    %33 = arith.addf %30, %32 : vector<8x128xf32>
    %34 = vector.extract_strided_slice %26 {offsets = [0, 256], sizes = [8, 128], strides = [1, 1]} : vector<8x384xf32> to vector<8x128xf32>
    %35 = math.tanh %33 : vector<8x128xf32>
    %36 = arith.mulf %34, %35 : vector<8x128xf32>
    %37 = arith.index_cast %c0_i32 : i32 to index
    %c0_19 = arith.constant 0 : index
    %c0_20 = arith.constant 0 : index
    %38 = vector.load %arg11[%37, %c0_19, %c0_20] : memref<8x8x128xf32, #tpu.memory_space<vmem>>, vector<1x8x128xf32>
    %39 = vector.shape_cast %38 : vector<1x8x128xf32> to vector<8x128xf32>
    %40 = vector.shape_cast %36 : vector<8x128xf32> to vector<1x8x128xf32>
    tpu.vector_store %arg11[%37, %c0_19, %c0_20], %40 {strides = array<i32>} : memref<8x8x128xf32, #tpu.memory_space<vmem>>, vector<1x8x128xf32>,
    %c1_i32 = arith.constant 1 : i32
    %41 = arith.index_cast %c1_i32 : i32 to index
    %c0_21 = arith.constant 0 : index
    %c0_22 = arith.constant 0 : index
    %42 = vector.load %arg10[%41, %c0_21, %c0_22] : memref<8x8x512xf32, #tpu.memory_space<vmem>>, vector<1x8x512xf32>
    %43 = vector.shape_cast %42 : vector<1x8x512xf32> to vector<8x512xf32>
    %44 = arith.truncf %36 : vector<8x128xf32> to vector<8x128xbf16>
    %cst_23 = arith.constant dense<0.000000e+00> : vector<8x512xf32>
    %45 = tpu.matmul %44, %3, %cst_23 {dimension_numbers = #tpu.dot_dimension_numbers<[1], [0], [0], [1], [0, 0, 1, 1], [], []>} : vector<8x128xbf16>, vector<128x512xbf16>, vector<8x512xf32> -> vector<8x512xf32>
    %46 = arith.addf %43, %45 : vector<8x512xf32>
    %47 = vector.extract_strided_slice %46 {offsets = [0, 0], sizes = [8, 384], strides = [1, 1]} : vector<8x512xf32> to vector<8x384xf32>
    %48 = arith.negf %47 : vector<8x384xf32>
    %49 = math.exp %48 : vector<8x384xf32>
    %cst_24 = arith.constant 1.000000e+00 : f32
    %50 = vector.broadcast %cst_24 : f32 to vector<8x384xf32>
    %51 = arith.addf %50, %49 : vector<8x384xf32>
    %52 = arith.divf %50, %51 : vector<8x384xf32>
    %53 = vector.extract_strided_slice %46 {offsets = [0, 384], sizes = [8, 128], strides = [1, 1]} : vector<8x512xf32> to vector<8x128xf32>
    %54 = math.tanh %53 : vector<8x128xf32>
    %55 = vector.extract_strided_slice %52 {offsets = [0, 128], sizes = [8, 128], strides = [1, 1]} : vector<8x384xf32> to vector<8x128xf32>
    %56 = arith.mulf %55, %33 : vector<8x128xf32>
    %57 = vector.extract_strided_slice %52 {offsets = [0, 0], sizes = [8, 128], strides = [1, 1]} : vector<8x384xf32> to vector<8x128xf32>
    %58 = arith.mulf %57, %54 : vector<8x128xf32>
    %59 = arith.addf %56, %58 : vector<8x128xf32>
    %60 = vector.extract_strided_slice %52 {offsets = [0, 256], sizes = [8, 128], strides = [1, 1]} : vector<8x384xf32> to vector<8x128xf32>
    %61 = math.tanh %59 : vector<8x128xf32>
    %62 = arith.mulf %60, %61 : vector<8x128xf32>
    %63 = arith.index_cast %c1_i32 : i32 to index
    %c0_25 = arith.constant 0 : index
    %c0_26 = arith.constant 0 : index
    %64 = vector.load %arg11[%63, %c0_25, %c0_26] : memref<8x8x128xf32, #tpu.memory_space<vmem>>, vector<1x8x128xf32>
    %65 = vector.shape_cast %64 : vector<1x8x128xf32> to vector<8x128xf32>
    %66 = vector.shape_cast %62 : vector<8x128xf32> to vector<1x8x128xf32>
    tpu.vector_store %arg11[%63, %c0_25, %c0_26], %66 {strides = array<i32>} : memref<8x8x128xf32, #tpu.memory_space<vmem>>, vector<1x8x128xf32>,
    %c2_i32 = arith.constant 2 : i32
    %67 = arith.index_cast %c2_i32 : i32 to index
    %c0_27 = arith.constant 0 : index
    %c0_28 = arith.constant 0 : index
    %68 = vector.load %arg10[%67, %c0_27, %c0_28] : memref<8x8x512xf32, #tpu.memory_space<vmem>>, vector<1x8x512xf32>
    %69 = vector.shape_cast %68 : vector<1x8x512xf32> to vector<8x512xf32>
    %70 = arith.truncf %62 : vector<8x128xf32> to vector<8x128xbf16>
    %cst_29 = arith.constant dense<0.000000e+00> : vector<8x512xf32>
    %71 = tpu.matmul %70, %3, %cst_29 {dimension_numbers = #tpu.dot_dimension_numbers<[1], [0], [0], [1], [0, 0, 1, 1], [], []>} : vector<8x128xbf16>, vector<128x512xbf16>, vector<8x512xf32> -> vector<8x512xf32>
    %72 = arith.addf %69, %71 : vector<8x512xf32>
    %73 = vector.extract_strided_slice %72 {offsets = [0, 0], sizes = [8, 384], strides = [1, 1]} : vector<8x512xf32> to vector<8x384xf32>
    %74 = arith.negf %73 : vector<8x384xf32>
    %75 = math.exp %74 : vector<8x384xf32>
    %cst_30 = arith.constant 1.000000e+00 : f32
    %76 = vector.broadcast %cst_30 : f32 to vector<8x384xf32>
    %77 = arith.addf %76, %75 : vector<8x384xf32>
    %78 = arith.divf %76, %77 : vector<8x384xf32>
    %79 = vector.extract_strided_slice %72 {offsets = [0, 384], sizes = [8, 128], strides = [1, 1]} : vector<8x512xf32> to vector<8x128xf32>
    %80 = math.tanh %79 : vector<8x128xf32>
    %81 = vector.extract_strided_slice %78 {offsets = [0, 128], sizes = [8, 128], strides = [1, 1]} : vector<8x384xf32> to vector<8x128xf32>
    %82 = arith.mulf %81, %59 : vector<8x128xf32>
    %83 = vector.extract_strided_slice %78 {offsets = [0, 0], sizes = [8, 128], strides = [1, 1]} : vector<8x384xf32> to vector<8x128xf32>
    %84 = arith.mulf %83, %80 : vector<8x128xf32>
    %85 = arith.addf %82, %84 : vector<8x128xf32>
    %86 = vector.extract_strided_slice %78 {offsets = [0, 256], sizes = [8, 128], strides = [1, 1]} : vector<8x384xf32> to vector<8x128xf32>
    %87 = math.tanh %85 : vector<8x128xf32>
    %88 = arith.mulf %86, %87 : vector<8x128xf32>
    %89 = arith.index_cast %c2_i32 : i32 to index
    %c0_31 = arith.constant 0 : index
    %c0_32 = arith.constant 0 : index
    %90 = vector.load %arg11[%89, %c0_31, %c0_32] : memref<8x8x128xf32, #tpu.memory_space<vmem>>, vector<1x8x128xf32>
    %91 = vector.shape_cast %90 : vector<1x8x128xf32> to vector<8x128xf32>
    %92 = vector.shape_cast %88 : vector<8x128xf32> to vector<1x8x128xf32>
    tpu.vector_store %arg11[%89, %c0_31, %c0_32], %92 {strides = array<i32>} : memref<8x8x128xf32, #tpu.memory_space<vmem>>, vector<1x8x128xf32>,
    %c3_i32 = arith.constant 3 : i32
    %93 = arith.index_cast %c3_i32 : i32 to index
    %c0_33 = arith.constant 0 : index
    %c0_34 = arith.constant 0 : index
    %94 = vector.load %arg10[%93, %c0_33, %c0_34] : memref<8x8x512xf32, #tpu.memory_space<vmem>>, vector<1x8x512xf32>
    %95 = vector.shape_cast %94 : vector<1x8x512xf32> to vector<8x512xf32>
    %96 = arith.truncf %88 : vector<8x128xf32> to vector<8x128xbf16>
    %cst_35 = arith.constant dense<0.000000e+00> : vector<8x512xf32>
    %97 = tpu.matmul %96, %3, %cst_35 {dimension_numbers = #tpu.dot_dimension_numbers<[1], [0], [0], [1], [0, 0, 1, 1], [], []>} : vector<8x128xbf16>, vector<128x512xbf16>, vector<8x512xf32> -> vector<8x512xf32>
    %98 = arith.addf %95, %97 : vector<8x512xf32>
    %99 = vector.extract_strided_slice %98 {offsets = [0, 0], sizes = [8, 384], strides = [1, 1]} : vector<8x512xf32> to vector<8x384xf32>
    %100 = arith.negf %99 : vector<8x384xf32>
    %101 = math.exp %100 : vector<8x384xf32>
    %cst_36 = arith.constant 1.000000e+00 : f32
    %102 = vector.broadcast %cst_36 : f32 to vector<8x384xf32>
    %103 = arith.addf %102, %101 : vector<8x384xf32>
    %104 = arith.divf %102, %103 : vector<8x384xf32>
    %105 = vector.extract_strided_slice %98 {offsets = [0, 384], sizes = [8, 128], strides = [1, 1]} : vector<8x512xf32> to vector<8x128xf32>
    %106 = math.tanh %105 : vector<8x128xf32>
    %107 = vector.extract_strided_slice %104 {offsets = [0, 128], sizes = [8, 128], strides = [1, 1]} : vector<8x384xf32> to vector<8x128xf32>
    %108 = arith.mulf %107, %85 : vector<8x128xf32>
    %109 = vector.extract_strided_slice %104 {offsets = [0, 0], sizes = [8, 128], strides = [1, 1]} : vector<8x384xf32> to vector<8x128xf32>
    %110 = arith.mulf %109, %106 : vector<8x128xf32>
    %111 = arith.addf %108, %110 : vector<8x128xf32>
    %112 = vector.extract_strided_slice %104 {offsets = [0, 256], sizes = [8, 128], strides = [1, 1]} : vector<8x384xf32> to vector<8x128xf32>
    %113 = math.tanh %111 : vector<8x128xf32>
    %114 = arith.mulf %112, %113 : vector<8x128xf32>
    %115 = arith.index_cast %c3_i32 : i32 to index
    %c0_37 = arith.constant 0 : index
    %c0_38 = arith.constant 0 : index
    %116 = vector.load %arg11[%115, %c0_37, %c0_38] : memref<8x8x128xf32, #tpu.memory_space<vmem>>, vector<1x8x128xf32>
    %117 = vector.shape_cast %116 : vector<1x8x128xf32> to vector<8x128xf32>
    %118 = vector.shape_cast %114 : vector<8x128xf32> to vector<1x8x128xf32>
    tpu.vector_store %arg11[%115, %c0_37, %c0_38], %118 {strides = array<i32>} : memref<8x8x128xf32, #tpu.memory_space<vmem>>, vector<1x8x128xf32>,
    %c4_i32 = arith.constant 4 : i32
    %119 = arith.index_cast %c4_i32 : i32 to index
    %c0_39 = arith.constant 0 : index
    %c0_40 = arith.constant 0 : index
    %120 = vector.load %arg10[%119, %c0_39, %c0_40] : memref<8x8x512xf32, #tpu.memory_space<vmem>>, vector<1x8x512xf32>
    %121 = vector.shape_cast %120 : vector<1x8x512xf32> to vector<8x512xf32>
    %122 = arith.truncf %114 : vector<8x128xf32> to vector<8x128xbf16>
    %cst_41 = arith.constant dense<0.000000e+00> : vector<8x512xf32>
    %123 = tpu.matmul %122, %3, %cst_41 {dimension_numbers = #tpu.dot_dimension_numbers<[1], [0], [0], [1], [0, 0, 1, 1], [], []>} : vector<8x128xbf16>, vector<128x512xbf16>, vector<8x512xf32> -> vector<8x512xf32>
    %124 = arith.addf %121, %123 : vector<8x512xf32>
    %125 = vector.extract_strided_slice %124 {offsets = [0, 0], sizes = [8, 384], strides = [1, 1]} : vector<8x512xf32> to vector<8x384xf32>
    %126 = arith.negf %125 : vector<8x384xf32>
    %127 = math.exp %126 : vector<8x384xf32>
    %cst_42 = arith.constant 1.000000e+00 : f32
    %128 = vector.broadcast %cst_42 : f32 to vector<8x384xf32>
    %129 = arith.addf %128, %127 : vector<8x384xf32>
    %130 = arith.divf %128, %129 : vector<8x384xf32>
    %131 = vector.extract_strided_slice %124 {offsets = [0, 384], sizes = [8, 128], strides = [1, 1]} : vector<8x512xf32> to vector<8x128xf32>
    %132 = math.tanh %131 : vector<8x128xf32>
    %133 = vector.extract_strided_slice %130 {offsets = [0, 128], sizes = [8, 128], strides = [1, 1]} : vector<8x384xf32> to vector<8x128xf32>
    %134 = arith.mulf %133, %111 : vector<8x128xf32>
    %135 = vector.extract_strided_slice %130 {offsets = [0, 0], sizes = [8, 128], strides = [1, 1]} : vector<8x384xf32> to vector<8x128xf32>
    %136 = arith.mulf %135, %132 : vector<8x128xf32>
    %137 = arith.addf %134, %136 : vector<8x128xf32>
    %138 = vector.extract_strided_slice %130 {offsets = [0, 256], sizes = [8, 128], strides = [1, 1]} : vector<8x384xf32> to vector<8x128xf32>
    %139 = math.tanh %137 : vector<8x128xf32>
    %140 = arith.mulf %138, %139 : vector<8x128xf32>
    %141 = arith.index_cast %c4_i32 : i32 to index
    %c0_43 = arith.constant 0 : index
    %c0_44 = arith.constant 0 : index
    %142 = vector.load %arg11[%141, %c0_43, %c0_44] : memref<8x8x128xf32, #tpu.memory_space<vmem>>, vector<1x8x128xf32>
    %143 = vector.shape_cast %142 : vector<1x8x128xf32> to vector<8x128xf32>
    %144 = vector.shape_cast %140 : vector<8x128xf32> to vector<1x8x128xf32>
    tpu.vector_store %arg11[%141, %c0_43, %c0_44], %144 {strides = array<i32>} : memref<8x8x128xf32, #tpu.memory_space<vmem>>, vector<1x8x128xf32>,
    %c5_i32 = arith.constant 5 : i32
    %145 = arith.index_cast %c5_i32 : i32 to index
    %c0_45 = arith.constant 0 : index
    %c0_46 = arith.constant 0 : index
    %146 = vector.load %arg10[%145, %c0_45, %c0_46] : memref<8x8x512xf32, #tpu.memory_space<vmem>>, vector<1x8x512xf32>
    %147 = vector.shape_cast %146 : vector<1x8x512xf32> to vector<8x512xf32>
    %148 = arith.truncf %140 : vector<8x128xf32> to vector<8x128xbf16>
    %cst_47 = arith.constant dense<0.000000e+00> : vector<8x512xf32>
    %149 = tpu.matmul %148, %3, %cst_47 {dimension_numbers = #tpu.dot_dimension_numbers<[1], [0], [0], [1], [0, 0, 1, 1], [], []>} : vector<8x128xbf16>, vector<128x512xbf16>, vector<8x512xf32> -> vector<8x512xf32>
    %150 = arith.addf %147, %149 : vector<8x512xf32>
    %151 = vector.extract_strided_slice %150 {offsets = [0, 0], sizes = [8, 384], strides = [1, 1]} : vector<8x512xf32> to vector<8x384xf32>
    %152 = arith.negf %151 : vector<8x384xf32>
    %153 = math.exp %152 : vector<8x384xf32>
    %cst_48 = arith.constant 1.000000e+00 : f32
    %154 = vector.broadcast %cst_48 : f32 to vector<8x384xf32>
    %155 = arith.addf %154, %153 : vector<8x384xf32>
    %156 = arith.divf %154, %155 : vector<8x384xf32>
    %157 = vector.extract_strided_slice %150 {offsets = [0, 384], sizes = [8, 128], strides = [1, 1]} : vector<8x512xf32> to vector<8x128xf32>
    %158 = math.tanh %157 : vector<8x128xf32>
    %159 = vector.extract_strided_slice %156 {offsets = [0, 128], sizes = [8, 128], strides = [1, 1]} : vector<8x384xf32> to vector<8x128xf32>
    %160 = arith.mulf %159, %137 : vector<8x128xf32>
    %161 = vector.extract_strided_slice %156 {offsets = [0, 0], sizes = [8, 128], strides = [1, 1]} : vector<8x384xf32> to vector<8x128xf32>
    %162 = arith.mulf %161, %158 : vector<8x128xf32>
    %163 = arith.addf %160, %162 : vector<8x128xf32>
    %164 = vector.extract_strided_slice %156 {offsets = [0, 256], sizes = [8, 128], strides = [1, 1]} : vector<8x384xf32> to vector<8x128xf32>
    %165 = math.tanh %163 : vector<8x128xf32>
    %166 = arith.mulf %164, %165 : vector<8x128xf32>
    %167 = arith.index_cast %c5_i32 : i32 to index
    %c0_49 = arith.constant 0 : index
    %c0_50 = arith.constant 0 : index
    %168 = vector.load %arg11[%167, %c0_49, %c0_50] : memref<8x8x128xf32, #tpu.memory_space<vmem>>, vector<1x8x128xf32>
    %169 = vector.shape_cast %168 : vector<1x8x128xf32> to vector<8x128xf32>
    %170 = vector.shape_cast %166 : vector<8x128xf32> to vector<1x8x128xf32>
    tpu.vector_store %arg11[%167, %c0_49, %c0_50], %170 {strides = array<i32>} : memref<8x8x128xf32, #tpu.memory_space<vmem>>, vector<1x8x128xf32>,
    %c6_i32 = arith.constant 6 : i32
    %171 = arith.index_cast %c6_i32 : i32 to index
    %c0_51 = arith.constant 0 : index
    %c0_52 = arith.constant 0 : index
    %172 = vector.load %arg10[%171, %c0_51, %c0_52] : memref<8x8x512xf32, #tpu.memory_space<vmem>>, vector<1x8x512xf32>
    %173 = vector.shape_cast %172 : vector<1x8x512xf32> to vector<8x512xf32>
    %174 = arith.truncf %166 : vector<8x128xf32> to vector<8x128xbf16>
    %cst_53 = arith.constant dense<0.000000e+00> : vector<8x512xf32>
    %175 = tpu.matmul %174, %3, %cst_53 {dimension_numbers = #tpu.dot_dimension_numbers<[1], [0], [0], [1], [0, 0, 1, 1], [], []>} : vector<8x128xbf16>, vector<128x512xbf16>, vector<8x512xf32> -> vector<8x512xf32>
    %176 = arith.addf %173, %175 : vector<8x512xf32>
    %177 = vector.extract_strided_slice %176 {offsets = [0, 0], sizes = [8, 384], strides = [1, 1]} : vector<8x512xf32> to vector<8x384xf32>
    %178 = arith.negf %177 : vector<8x384xf32>
    %179 = math.exp %178 : vector<8x384xf32>
    %cst_54 = arith.constant 1.000000e+00 : f32
    %180 = vector.broadcast %cst_54 : f32 to vector<8x384xf32>
    %181 = arith.addf %180, %179 : vector<8x384xf32>
    %182 = arith.divf %180, %181 : vector<8x384xf32>
    %183 = vector.extract_strided_slice %176 {offsets = [0, 384], sizes = [8, 128], strides = [1, 1]} : vector<8x512xf32> to vector<8x128xf32>
    %184 = math.tanh %183 : vector<8x128xf32>
    %185 = vector.extract_strided_slice %182 {offsets = [0, 128], sizes = [8, 128], strides = [1, 1]} : vector<8x384xf32> to vector<8x128xf32>
    %186 = arith.mulf %185, %163 : vector<8x128xf32>
    %187 = vector.extract_strided_slice %182 {offsets = [0, 0], sizes = [8, 128], strides = [1, 1]} : vector<8x384xf32> to vector<8x128xf32>
    %188 = arith.mulf %187, %184 : vector<8x128xf32>
    %189 = arith.addf %186, %188 : vector<8x128xf32>
    %190 = vector.extract_strided_slice %182 {offsets = [0, 256], sizes = [8, 128], strides = [1, 1]} : vector<8x384xf32> to vector<8x128xf32>
    %191 = math.tanh %189 : vector<8x128xf32>
    %192 = arith.mulf %190, %191 : vector<8x128xf32>
    %193 = arith.index_cast %c6_i32 : i32 to index
    %c0_55 = arith.constant 0 : index
    %c0_56 = arith.constant 0 : index
    %194 = vector.load %arg11[%193, %c0_55, %c0_56] : memref<8x8x128xf32, #tpu.memory_space<vmem>>, vector<1x8x128xf32>
    %195 = vector.shape_cast %194 : vector<1x8x128xf32> to vector<8x128xf32>
    %196 = vector.shape_cast %192 : vector<8x128xf32> to vector<1x8x128xf32>
    tpu.vector_store %arg11[%193, %c0_55, %c0_56], %196 {strides = array<i32>} : memref<8x8x128xf32, #tpu.memory_space<vmem>>, vector<1x8x128xf32>,
    %c7_i32 = arith.constant 7 : i32
    %197 = arith.index_cast %c7_i32 : i32 to index
    %c0_57 = arith.constant 0 : index
    %c0_58 = arith.constant 0 : index
    %198 = vector.load %arg10[%197, %c0_57, %c0_58] : memref<8x8x512xf32, #tpu.memory_space<vmem>>, vector<1x8x512xf32>
    %199 = vector.shape_cast %198 : vector<1x8x512xf32> to vector<8x512xf32>
    %200 = arith.truncf %192 : vector<8x128xf32> to vector<8x128xbf16>
    %cst_59 = arith.constant dense<0.000000e+00> : vector<8x512xf32>
    %201 = tpu.matmul %200, %3, %cst_59 {dimension_numbers = #tpu.dot_dimension_numbers<[1], [0], [0], [1], [0, 0, 1, 1], [], []>} : vector<8x128xbf16>, vector<128x512xbf16>, vector<8x512xf32> -> vector<8x512xf32>
    %202 = arith.addf %199, %201 : vector<8x512xf32>
    %203 = vector.extract_strided_slice %202 {offsets = [0, 0], sizes = [8, 384], strides = [1, 1]} : vector<8x512xf32> to vector<8x384xf32>
    %204 = arith.negf %203 : vector<8x384xf32>
    %205 = math.exp %204 : vector<8x384xf32>
    %cst_60 = arith.constant 1.000000e+00 : f32
    %206 = vector.broadcast %cst_60 : f32 to vector<8x384xf32>
    %207 = arith.addf %206, %205 : vector<8x384xf32>
    %208 = arith.divf %206, %207 : vector<8x384xf32>
    %209 = vector.extract_strided_slice %202 {offsets = [0, 384], sizes = [8, 128], strides = [1, 1]} : vector<8x512xf32> to vector<8x128xf32>
    %210 = math.tanh %209 : vector<8x128xf32>
    %211 = vector.extract_strided_slice %208 {offsets = [0, 128], sizes = [8, 128], strides = [1, 1]} : vector<8x384xf32> to vector<8x128xf32>
    %212 = arith.mulf %211, %189 : vector<8x128xf32>
    %213 = vector.extract_strided_slice %208 {offsets = [0, 0], sizes = [8, 128], strides = [1, 1]} : vector<8x384xf32> to vector<8x128xf32>
    %214 = arith.mulf %213, %210 : vector<8x128xf32>
    %215 = arith.addf %212, %214 : vector<8x128xf32>
    %216 = vector.extract_strided_slice %208 {offsets = [0, 256], sizes = [8, 128], strides = [1, 1]} : vector<8x384xf32> to vector<8x128xf32>
    %217 = math.tanh %215 : vector<8x128xf32>
    %218 = arith.mulf %216, %217 : vector<8x128xf32>
    %219 = arith.index_cast %c7_i32 : i32 to index
    %c0_61 = arith.constant 0 : index
    %c0_62 = arith.constant 0 : index
    %220 = vector.load %arg11[%219, %c0_61, %c0_62] : memref<8x8x128xf32, #tpu.memory_space<vmem>>, vector<1x8x128xf32>
    %221 = vector.shape_cast %220 : vector<1x8x128xf32> to vector<8x128xf32>
    %222 = vector.shape_cast %218 : vector<8x128xf32> to vector<1x8x128xf32>
    tpu.vector_store %arg11[%219, %c0_61, %c0_62], %222 {strides = array<i32>} : memref<8x8x128xf32, #tpu.memory_space<vmem>>, vector<1x8x128xf32>,
    %c8_i32 = arith.constant 8 : i32
    %c0_63 = arith.constant 0 : index
    %c0_64 = arith.constant 0 : index
    %c0_65 = arith.constant 0 : index
    %223 = vector.load %arg8[%c0_63, %c0_64, %c0_65] : memref<2x8x128xf32, #tpu.memory_space<vmem>>, vector<1x8x128xf32>
    %224 = vector.shape_cast %223 : vector<1x8x128xf32> to vector<8x128xf32>
    %225 = vector.shape_cast %218 : vector<8x128xf32> to vector<1x8x128xf32>
    tpu.vector_store %arg8[%c0_63, %c0_64, %c0_65], %225 {strides = array<i32>} : memref<2x8x128xf32, #tpu.memory_space<vmem>>, vector<1x8x128xf32>,
    %c0_66 = arith.constant 0 : index
    %c0_67 = arith.constant 0 : index
    %c0_68 = arith.constant 0 : index
    %226 = vector.load %arg9[%c0_66, %c0_67, %c0_68] : memref<2x8x128xf32, #tpu.memory_space<vmem>>, vector<1x8x128xf32>
    %227 = vector.shape_cast %226 : vector<1x8x128xf32> to vector<8x128xf32>
    %228 = vector.shape_cast %215 : vector<8x128xf32> to vector<1x8x128xf32>
    tpu.vector_store %arg9[%c0_66, %c0_67, %c0_68], %228 {strides = array<i32>} : memref<2x8x128xf32, #tpu.memory_space<vmem>>, vector<1x8x128xf32>,
    %c1 = arith.constant 1 : index
    %c0_69 = arith.constant 0 : index
    %c0_70 = arith.constant 0 : index
    %229 = vector.load %arg2[%c1, %c0_69, %c0_70] : memref<2x128x512xbf16, #tpu.memory_space<vmem>>, vector<1x128x512xbf16>
    %230 = vector.shape_cast %229 : vector<1x128x512xbf16> to vector<128x512xbf16>
    %c1_71 = arith.constant 1 : index
    %c0_72 = arith.constant 0 : index
    %c0_73 = arith.constant 0 : index
    %231 = vector.load %arg3[%c1_71, %c0_72, %c0_73] : memref<2x128x512xbf16, #tpu.memory_space<vmem>>, vector<1x128x512xbf16>
    %232 = vector.shape_cast %231 : vector<1x128x512xbf16> to vector<128x512xbf16>
    %c1_74 = arith.constant 1 : index
    %c0_75 = arith.constant 0 : index
    %c0_76 = arith.constant 0 : index
    %233 = vector.load %arg4[%c1_74, %c0_75, %c0_76] : memref<2x1x512xf32, #tpu.memory_space<vmem>>, vector<1x1x512xf32>
    %234 = vector.shape_cast %233 : vector<1x1x512xf32> to vector<1x512xf32>
    %c0_77 = arith.constant 0 : index
    %c0_78 = arith.constant 0 : index
    %c0_79 = arith.constant 0 : index
    %235 = vector.load %arg11[%c0_77, %c0_78, %c0_79] : memref<8x8x128xf32, #tpu.memory_space<vmem>>, vector<8x8x128xf32>
    %236 = vector.shape_cast %235 : vector<8x8x128xf32> to vector<64x128xf32>
    %237 = arith.truncf %236 : vector<64x128xf32> to vector<64x128xbf16>
    %cst_80 = arith.constant dense<0.000000e+00> : vector<64x512xf32>
    %238 = tpu.matmul %237, %230, %cst_80 {dimension_numbers = #tpu.dot_dimension_numbers<[1], [0], [0], [1], [0, 0, 1, 1], [], []>} : vector<64x128xbf16>, vector<128x512xbf16>, vector<64x512xf32> -> vector<64x512xf32>
    %239 = vector.broadcast %234 : vector<1x512xf32> to vector<64x512xf32>
    %240 = arith.addf %238, %239 : vector<64x512xf32>
    %241 = vector.shape_cast %240 : vector<64x512xf32> to vector<8x8x512xf32>
    %c0_81 = arith.constant 0 : index
    %c0_82 = arith.constant 0 : index
    %c0_83 = arith.constant 0 : index
    %242 = vector.load %arg10[%c0_81, %c0_82, %c0_83] : memref<8x8x512xf32, #tpu.memory_space<vmem>>, vector<8x8x512xf32>
    tpu.vector_store %arg10[%c0_81, %c0_82, %c0_83], %241 {strides = array<i32>} : memref<8x8x512xf32, #tpu.memory_space<vmem>>, vector<8x8x512xf32>,
    %cst_84 = arith.constant 0.000000e+00 : f32
    %243 = vector.broadcast %cst_84 : f32 to vector<8x128xf32>
    %c0_i32_85 = arith.constant 0 : i32
    %244 = arith.index_cast %c0_i32_85 : i32 to index
    %c0_86 = arith.constant 0 : index
    %c0_87 = arith.constant 0 : index
    %245 = vector.load %arg10[%244, %c0_86, %c0_87] : memref<8x8x512xf32, #tpu.memory_space<vmem>>, vector<1x8x512xf32>
    %246 = vector.shape_cast %245 : vector<1x8x512xf32> to vector<8x512xf32>
    %247 = arith.truncf %243 : vector<8x128xf32> to vector<8x128xbf16>
    %cst_88 = arith.constant dense<0.000000e+00> : vector<8x512xf32>
    %248 = tpu.matmul %247, %232, %cst_88 {dimension_numbers = #tpu.dot_dimension_numbers<[1], [0], [0], [1], [0, 0, 1, 1], [], []>} : vector<8x128xbf16>, vector<128x512xbf16>, vector<8x512xf32> -> vector<8x512xf32>
    %249 = arith.addf %246, %248 : vector<8x512xf32>
    %250 = vector.extract_strided_slice %249 {offsets = [0, 0], sizes = [8, 384], strides = [1, 1]} : vector<8x512xf32> to vector<8x384xf32>
    %251 = arith.negf %250 : vector<8x384xf32>
    %252 = math.exp %251 : vector<8x384xf32>
    %cst_89 = arith.constant 1.000000e+00 : f32
    %253 = vector.broadcast %cst_89 : f32 to vector<8x384xf32>
    %254 = arith.addf %253, %252 : vector<8x384xf32>
    %255 = arith.divf %253, %254 : vector<8x384xf32>
    %256 = vector.extract_strided_slice %249 {offsets = [0, 384], sizes = [8, 128], strides = [1, 1]} : vector<8x512xf32> to vector<8x128xf32>
    %257 = math.tanh %256 : vector<8x128xf32>
    %258 = vector.extract_strided_slice %255 {offsets = [0, 128], sizes = [8, 128], strides = [1, 1]} : vector<8x384xf32> to vector<8x128xf32>
    %259 = arith.mulf %258, %243 : vector<8x128xf32>
    %260 = vector.extract_strided_slice %255 {offsets = [0, 0], sizes = [8, 128], strides = [1, 1]} : vector<8x384xf32> to vector<8x128xf32>
    %261 = arith.mulf %260, %257 : vector<8x128xf32>
    %262 = arith.addf %259, %261 : vector<8x128xf32>
    %263 = vector.extract_strided_slice %255 {offsets = [0, 256], sizes = [8, 128], strides = [1, 1]} : vector<8x384xf32> to vector<8x128xf32>
    %264 = math.tanh %262 : vector<8x128xf32>
    %265 = arith.mulf %263, %264 : vector<8x128xf32>
    %c1_i32_90 = arith.constant 1 : i32
    %266 = arith.index_cast %c1_i32_90 : i32 to index
    %c0_91 = arith.constant 0 : index
    %c0_92 = arith.constant 0 : index
    %267 = vector.load %arg10[%266, %c0_91, %c0_92] : memref<8x8x512xf32, #tpu.memory_space<vmem>>, vector<1x8x512xf32>
    %268 = vector.shape_cast %267 : vector<1x8x512xf32> to vector<8x512xf32>
    %269 = arith.truncf %265 : vector<8x128xf32> to vector<8x128xbf16>
    %cst_93 = arith.constant dense<0.000000e+00> : vector<8x512xf32>
    %270 = tpu.matmul %269, %232, %cst_93 {dimension_numbers = #tpu.dot_dimension_numbers<[1], [0], [0], [1], [0, 0, 1, 1], [], []>} : vector<8x128xbf16>, vector<128x512xbf16>, vector<8x512xf32> -> vector<8x512xf32>
    %271 = arith.addf %268, %270 : vector<8x512xf32>
    %272 = vector.extract_strided_slice %271 {offsets = [0, 0], sizes = [8, 384], strides = [1, 1]} : vector<8x512xf32> to vector<8x384xf32>
    %273 = arith.negf %272 : vector<8x384xf32>
    %274 = math.exp %273 : vector<8x384xf32>
    %cst_94 = arith.constant 1.000000e+00 : f32
    %275 = vector.broadcast %cst_94 : f32 to vector<8x384xf32>
    %276 = arith.addf %275, %274 : vector<8x384xf32>
    %277 = arith.divf %275, %276 : vector<8x384xf32>
    %278 = vector.extract_strided_slice %271 {offsets = [0, 384], sizes = [8, 128], strides = [1, 1]} : vector<8x512xf32> to vector<8x128xf32>
    %279 = math.tanh %278 : vector<8x128xf32>
    %280 = vector.extract_strided_slice %277 {offsets = [0, 128], sizes = [8, 128], strides = [1, 1]} : vector<8x384xf32> to vector<8x128xf32>
    %281 = arith.mulf %280, %262 : vector<8x128xf32>
    %282 = vector.extract_strided_slice %277 {offsets = [0, 0], sizes = [8, 128], strides = [1, 1]} : vector<8x384xf32> to vector<8x128xf32>
    %283 = arith.mulf %282, %279 : vector<8x128xf32>
    %284 = arith.addf %281, %283 : vector<8x128xf32>
    %285 = vector.extract_strided_slice %277 {offsets = [0, 256], sizes = [8, 128], strides = [1, 1]} : vector<8x384xf32> to vector<8x128xf32>
    %286 = math.tanh %284 : vector<8x128xf32>
    %287 = arith.mulf %285, %286 : vector<8x128xf32>
    %c2_i32_95 = arith.constant 2 : i32
    %288 = arith.index_cast %c2_i32_95 : i32 to index
    %c0_96 = arith.constant 0 : index
    %c0_97 = arith.constant 0 : index
    %289 = vector.load %arg10[%288, %c0_96, %c0_97] : memref<8x8x512xf32, #tpu.memory_space<vmem>>, vector<1x8x512xf32>
    %290 = vector.shape_cast %289 : vector<1x8x512xf32> to vector<8x512xf32>
    %291 = arith.truncf %287 : vector<8x128xf32> to vector<8x128xbf16>
    %cst_98 = arith.constant dense<0.000000e+00> : vector<8x512xf32>
    %292 = tpu.matmul %291, %232, %cst_98 {dimension_numbers = #tpu.dot_dimension_numbers<[1], [0], [0], [1], [0, 0, 1, 1], [], []>} : vector<8x128xbf16>, vector<128x512xbf16>, vector<8x512xf32> -> vector<8x512xf32>
    %293 = arith.addf %290, %292 : vector<8x512xf32>
    %294 = vector.extract_strided_slice %293 {offsets = [0, 0], sizes = [8, 384], strides = [1, 1]} : vector<8x512xf32> to vector<8x384xf32>
    %295 = arith.negf %294 : vector<8x384xf32>
    %296 = math.exp %295 : vector<8x384xf32>
    %cst_99 = arith.constant 1.000000e+00 : f32
    %297 = vector.broadcast %cst_99 : f32 to vector<8x384xf32>
    %298 = arith.addf %297, %296 : vector<8x384xf32>
    %299 = arith.divf %297, %298 : vector<8x384xf32>
    %300 = vector.extract_strided_slice %293 {offsets = [0, 384], sizes = [8, 128], strides = [1, 1]} : vector<8x512xf32> to vector<8x128xf32>
    %301 = math.tanh %300 : vector<8x128xf32>
    %302 = vector.extract_strided_slice %299 {offsets = [0, 128], sizes = [8, 128], strides = [1, 1]} : vector<8x384xf32> to vector<8x128xf32>
    %303 = arith.mulf %302, %284 : vector<8x128xf32>
    %304 = vector.extract_strided_slice %299 {offsets = [0, 0], sizes = [8, 128], strides = [1, 1]} : vector<8x384xf32> to vector<8x128xf32>
    %305 = arith.mulf %304, %301 : vector<8x128xf32>
    %306 = arith.addf %303, %305 : vector<8x128xf32>
    %307 = vector.extract_strided_slice %299 {offsets = [0, 256], sizes = [8, 128], strides = [1, 1]} : vector<8x384xf32> to vector<8x128xf32>
    %308 = math.tanh %306 : vector<8x128xf32>
    %309 = arith.mulf %307, %308 : vector<8x128xf32>
    %c3_i32_100 = arith.constant 3 : i32
    %310 = arith.index_cast %c3_i32_100 : i32 to index
    %c0_101 = arith.constant 0 : index
    %c0_102 = arith.constant 0 : index
    %311 = vector.load %arg10[%310, %c0_101, %c0_102] : memref<8x8x512xf32, #tpu.memory_space<vmem>>, vector<1x8x512xf32>
    %312 = vector.shape_cast %311 : vector<1x8x512xf32> to vector<8x512xf32>
    %313 = arith.truncf %309 : vector<8x128xf32> to vector<8x128xbf16>
    %cst_103 = arith.constant dense<0.000000e+00> : vector<8x512xf32>
    %314 = tpu.matmul %313, %232, %cst_103 {dimension_numbers = #tpu.dot_dimension_numbers<[1], [0], [0], [1], [0, 0, 1, 1], [], []>} : vector<8x128xbf16>, vector<128x512xbf16>, vector<8x512xf32> -> vector<8x512xf32>
    %315 = arith.addf %312, %314 : vector<8x512xf32>
    %316 = vector.extract_strided_slice %315 {offsets = [0, 0], sizes = [8, 384], strides = [1, 1]} : vector<8x512xf32> to vector<8x384xf32>
    %317 = arith.negf %316 : vector<8x384xf32>
    %318 = math.exp %317 : vector<8x384xf32>
    %cst_104 = arith.constant 1.000000e+00 : f32
    %319 = vector.broadcast %cst_104 : f32 to vector<8x384xf32>
    %320 = arith.addf %319, %318 : vector<8x384xf32>
    %321 = arith.divf %319, %320 : vector<8x384xf32>
    %322 = vector.extract_strided_slice %315 {offsets = [0, 384], sizes = [8, 128], strides = [1, 1]} : vector<8x512xf32> to vector<8x128xf32>
    %323 = math.tanh %322 : vector<8x128xf32>
    %324 = vector.extract_strided_slice %321 {offsets = [0, 128], sizes = [8, 128], strides = [1, 1]} : vector<8x384xf32> to vector<8x128xf32>
    %325 = arith.mulf %324, %306 : vector<8x128xf32>
    %326 = vector.extract_strided_slice %321 {offsets = [0, 0], sizes = [8, 128], strides = [1, 1]} : vector<8x384xf32> to vector<8x128xf32>
    %327 = arith.mulf %326, %323 : vector<8x128xf32>
    %328 = arith.addf %325, %327 : vector<8x128xf32>
    %329 = vector.extract_strided_slice %321 {offsets = [0, 256], sizes = [8, 128], strides = [1, 1]} : vector<8x384xf32> to vector<8x128xf32>
    %330 = math.tanh %328 : vector<8x128xf32>
    %331 = arith.mulf %329, %330 : vector<8x128xf32>
    %c4_i32_105 = arith.constant 4 : i32
    %332 = arith.index_cast %c4_i32_105 : i32 to index
    %c0_106 = arith.constant 0 : index
    %c0_107 = arith.constant 0 : index
    %333 = vector.load %arg10[%332, %c0_106, %c0_107] : memref<8x8x512xf32, #tpu.memory_space<vmem>>, vector<1x8x512xf32>
    %334 = vector.shape_cast %333 : vector<1x8x512xf32> to vector<8x512xf32>
    %335 = arith.truncf %331 : vector<8x128xf32> to vector<8x128xbf16>
    %cst_108 = arith.constant dense<0.000000e+00> : vector<8x512xf32>
    %336 = tpu.matmul %335, %232, %cst_108 {dimension_numbers = #tpu.dot_dimension_numbers<[1], [0], [0], [1], [0, 0, 1, 1], [], []>} : vector<8x128xbf16>, vector<128x512xbf16>, vector<8x512xf32> -> vector<8x512xf32>
    %337 = arith.addf %334, %336 : vector<8x512xf32>
    %338 = vector.extract_strided_slice %337 {offsets = [0, 0], sizes = [8, 384], strides = [1, 1]} : vector<8x512xf32> to vector<8x384xf32>
    %339 = arith.negf %338 : vector<8x384xf32>
    %340 = math.exp %339 : vector<8x384xf32>
    %cst_109 = arith.constant 1.000000e+00 : f32
    %341 = vector.broadcast %cst_109 : f32 to vector<8x384xf32>
    %342 = arith.addf %341, %340 : vector<8x384xf32>
    %343 = arith.divf %341, %342 : vector<8x384xf32>
    %344 = vector.extract_strided_slice %337 {offsets = [0, 384], sizes = [8, 128], strides = [1, 1]} : vector<8x512xf32> to vector<8x128xf32>
    %345 = math.tanh %344 : vector<8x128xf32>
    %346 = vector.extract_strided_slice %343 {offsets = [0, 128], sizes = [8, 128], strides = [1, 1]} : vector<8x384xf32> to vector<8x128xf32>
    %347 = arith.mulf %346, %328 : vector<8x128xf32>
    %348 = vector.extract_strided_slice %343 {offsets = [0, 0], sizes = [8, 128], strides = [1, 1]} : vector<8x384xf32> to vector<8x128xf32>
    %349 = arith.mulf %348, %345 : vector<8x128xf32>
    %350 = arith.addf %347, %349 : vector<8x128xf32>
    %351 = vector.extract_strided_slice %343 {offsets = [0, 256], sizes = [8, 128], strides = [1, 1]} : vector<8x384xf32> to vector<8x128xf32>
    %352 = math.tanh %350 : vector<8x128xf32>
    %353 = arith.mulf %351, %352 : vector<8x128xf32>
    %c5_i32_110 = arith.constant 5 : i32
    %354 = arith.index_cast %c5_i32_110 : i32 to index
    %c0_111 = arith.constant 0 : index
    %c0_112 = arith.constant 0 : index
    %355 = vector.load %arg10[%354, %c0_111, %c0_112] : memref<8x8x512xf32, #tpu.memory_space<vmem>>, vector<1x8x512xf32>
    %356 = vector.shape_cast %355 : vector<1x8x512xf32> to vector<8x512xf32>
    %357 = arith.truncf %353 : vector<8x128xf32> to vector<8x128xbf16>
    %cst_113 = arith.constant dense<0.000000e+00> : vector<8x512xf32>
    %358 = tpu.matmul %357, %232, %cst_113 {dimension_numbers = #tpu.dot_dimension_numbers<[1], [0], [0], [1], [0, 0, 1, 1], [], []>} : vector<8x128xbf16>, vector<128x512xbf16>, vector<8x512xf32> -> vector<8x512xf32>
    %359 = arith.addf %356, %358 : vector<8x512xf32>
    %360 = vector.extract_strided_slice %359 {offsets = [0, 0], sizes = [8, 384], strides = [1, 1]} : vector<8x512xf32> to vector<8x384xf32>
    %361 = arith.negf %360 : vector<8x384xf32>
    %362 = math.exp %361 : vector<8x384xf32>
    %cst_114 = arith.constant 1.000000e+00 : f32
    %363 = vector.broadcast %cst_114 : f32 to vector<8x384xf32>
    %364 = arith.addf %363, %362 : vector<8x384xf32>
    %365 = arith.divf %363, %364 : vector<8x384xf32>
    %366 = vector.extract_strided_slice %359 {offsets = [0, 384], sizes = [8, 128], strides = [1, 1]} : vector<8x512xf32> to vector<8x128xf32>
    %367 = math.tanh %366 : vector<8x128xf32>
    %368 = vector.extract_strided_slice %365 {offsets = [0, 128], sizes = [8, 128], strides = [1, 1]} : vector<8x384xf32> to vector<8x128xf32>
    %369 = arith.mulf %368, %350 : vector<8x128xf32>
    %370 = vector.extract_strided_slice %365 {offsets = [0, 0], sizes = [8, 128], strides = [1, 1]} : vector<8x384xf32> to vector<8x128xf32>
    %371 = arith.mulf %370, %367 : vector<8x128xf32>
    %372 = arith.addf %369, %371 : vector<8x128xf32>
    %373 = vector.extract_strided_slice %365 {offsets = [0, 256], sizes = [8, 128], strides = [1, 1]} : vector<8x384xf32> to vector<8x128xf32>
    %374 = math.tanh %372 : vector<8x128xf32>
    %375 = arith.mulf %373, %374 : vector<8x128xf32>
    %c6_i32_115 = arith.constant 6 : i32
    %376 = arith.index_cast %c6_i32_115 : i32 to index
    %c0_116 = arith.constant 0 : index
    %c0_117 = arith.constant 0 : index
    %377 = vector.load %arg10[%376, %c0_116, %c0_117] : memref<8x8x512xf32, #tpu.memory_space<vmem>>, vector<1x8x512xf32>
    %378 = vector.shape_cast %377 : vector<1x8x512xf32> to vector<8x512xf32>
    %379 = arith.truncf %375 : vector<8x128xf32> to vector<8x128xbf16>
    %cst_118 = arith.constant dense<0.000000e+00> : vector<8x512xf32>
    %380 = tpu.matmul %379, %232, %cst_118 {dimension_numbers = #tpu.dot_dimension_numbers<[1], [0], [0], [1], [0, 0, 1, 1], [], []>} : vector<8x128xbf16>, vector<128x512xbf16>, vector<8x512xf32> -> vector<8x512xf32>
    %381 = arith.addf %378, %380 : vector<8x512xf32>
    %382 = vector.extract_strided_slice %381 {offsets = [0, 0], sizes = [8, 384], strides = [1, 1]} : vector<8x512xf32> to vector<8x384xf32>
    %383 = arith.negf %382 : vector<8x384xf32>
    %384 = math.exp %383 : vector<8x384xf32>
    %cst_119 = arith.constant 1.000000e+00 : f32
    %385 = vector.broadcast %cst_119 : f32 to vector<8x384xf32>
    %386 = arith.addf %385, %384 : vector<8x384xf32>
    %387 = arith.divf %385, %386 : vector<8x384xf32>
    %388 = vector.extract_strided_slice %381 {offsets = [0, 384], sizes = [8, 128], strides = [1, 1]} : vector<8x512xf32> to vector<8x128xf32>
    %389 = math.tanh %388 : vector<8x128xf32>
    %390 = vector.extract_strided_slice %387 {offsets = [0, 128], sizes = [8, 128], strides = [1, 1]} : vector<8x384xf32> to vector<8x128xf32>
    %391 = arith.mulf %390, %372 : vector<8x128xf32>
    %392 = vector.extract_strided_slice %387 {offsets = [0, 0], sizes = [8, 128], strides = [1, 1]} : vector<8x384xf32> to vector<8x128xf32>
    %393 = arith.mulf %392, %389 : vector<8x128xf32>
    %394 = arith.addf %391, %393 : vector<8x128xf32>
    %395 = vector.extract_strided_slice %387 {offsets = [0, 256], sizes = [8, 128], strides = [1, 1]} : vector<8x384xf32> to vector<8x128xf32>
    %396 = math.tanh %394 : vector<8x128xf32>
    %397 = arith.mulf %395, %396 : vector<8x128xf32>
    %c7_i32_120 = arith.constant 7 : i32
    %398 = arith.index_cast %c7_i32_120 : i32 to index
    %c0_121 = arith.constant 0 : index
    %c0_122 = arith.constant 0 : index
    %399 = vector.load %arg10[%398, %c0_121, %c0_122] : memref<8x8x512xf32, #tpu.memory_space<vmem>>, vector<1x8x512xf32>
    %400 = vector.shape_cast %399 : vector<1x8x512xf32> to vector<8x512xf32>
    %401 = arith.truncf %397 : vector<8x128xf32> to vector<8x128xbf16>
    %cst_123 = arith.constant dense<0.000000e+00> : vector<8x512xf32>
    %402 = tpu.matmul %401, %232, %cst_123 {dimension_numbers = #tpu.dot_dimension_numbers<[1], [0], [0], [1], [0, 0, 1, 1], [], []>} : vector<8x128xbf16>, vector<128x512xbf16>, vector<8x512xf32> -> vector<8x512xf32>
    %403 = arith.addf %400, %402 : vector<8x512xf32>
    %404 = vector.extract_strided_slice %403 {offsets = [0, 0], sizes = [8, 384], strides = [1, 1]} : vector<8x512xf32> to vector<8x384xf32>
    %405 = arith.negf %404 : vector<8x384xf32>
    %406 = math.exp %405 : vector<8x384xf32>
    %cst_124 = arith.constant 1.000000e+00 : f32
    %407 = vector.broadcast %cst_124 : f32 to vector<8x384xf32>
    %408 = arith.addf %407, %406 : vector<8x384xf32>
    %409 = arith.divf %407, %408 : vector<8x384xf32>
    %410 = vector.extract_strided_slice %403 {offsets = [0, 384], sizes = [8, 128], strides = [1, 1]} : vector<8x512xf32> to vector<8x128xf32>
    %411 = math.tanh %410 : vector<8x128xf32>
    %412 = vector.extract_strided_slice %409 {offsets = [0, 128], sizes = [8, 128], strides = [1, 1]} : vector<8x384xf32> to vector<8x128xf32>
    %413 = arith.mulf %412, %394 : vector<8x128xf32>
    %414 = vector.extract_strided_slice %409 {offsets = [0, 0], sizes = [8, 128], strides = [1, 1]} : vector<8x384xf32> to vector<8x128xf32>
    %415 = arith.mulf %414, %411 : vector<8x128xf32>
    %416 = arith.addf %413, %415 : vector<8x128xf32>
    %417 = vector.extract_strided_slice %409 {offsets = [0, 256], sizes = [8, 128], strides = [1, 1]} : vector<8x384xf32> to vector<8x128xf32>
    %418 = math.tanh %416 : vector<8x128xf32>
    %419 = arith.mulf %417, %418 : vector<8x128xf32>
    %c8_i32_125 = arith.constant 8 : i32
    %c1_126 = arith.constant 1 : index
    %c0_127 = arith.constant 0 : index
    %c0_128 = arith.constant 0 : index
    %420 = vector.load %arg8[%c1_126, %c0_127, %c0_128] : memref<2x8x128xf32, #tpu.memory_space<vmem>>, vector<1x8x128xf32>
    %421 = vector.shape_cast %420 : vector<1x8x128xf32> to vector<8x128xf32>
    %422 = vector.shape_cast %419 : vector<8x128xf32> to vector<1x8x128xf32>
    tpu.vector_store %arg8[%c1_126, %c0_127, %c0_128], %422 {strides = array<i32>} : memref<2x8x128xf32, #tpu.memory_space<vmem>>, vector<1x8x128xf32>,
    %c1_129 = arith.constant 1 : index
    %c0_130 = arith.constant 0 : index
    %c0_131 = arith.constant 0 : index
    %423 = vector.load %arg9[%c1_129, %c0_130, %c0_131] : memref<2x8x128xf32, #tpu.memory_space<vmem>>, vector<1x8x128xf32>
    %424 = vector.shape_cast %423 : vector<1x8x128xf32> to vector<8x128xf32>
    %425 = vector.shape_cast %416 : vector<8x128xf32> to vector<1x8x128xf32>
    tpu.vector_store %arg9[%c1_129, %c0_130, %c0_131], %425 {strides = array<i32>} : memref<2x8x128xf32, #tpu.memory_space<vmem>>, vector<1x8x128xf32>,
    %426 = arith.truncf %419 : vector<8x128xf32> to vector<8x128xbf16>
    %c0_132 = arith.constant 0 : index
    %c0_133 = arith.constant 0 : index
    %427 = vector.load %arg5[%c0_132, %c0_133] : memref<128x128xbf16, #tpu.memory_space<vmem>>, vector<128x128xbf16>
    %cst_134 = arith.constant dense<0.000000e+00> : vector<8x128xf32>
    %428 = tpu.matmul %426, %427, %cst_134 {dimension_numbers = #tpu.dot_dimension_numbers<[1], [0], [0], [1], [0, 0, 1, 1], [], []>} : vector<8x128xbf16>, vector<128x128xbf16>, vector<8x128xf32> -> vector<8x128xf32>
    %c0_135 = arith.constant 0 : index
    %c0_136 = arith.constant 0 : index
    %429 = vector.load %arg6[%c0_135, %c0_136] : memref<1x128xf32, #tpu.memory_space<vmem>>, vector<1x128xf32>
    %430 = vector.broadcast %429 : vector<1x128xf32> to vector<8x128xf32>
    %431 = arith.addf %428, %430 : vector<8x128xf32>
    %432 = arith.negf %431 : vector<8x128xf32>
    %433 = math.exp %432 : vector<8x128xf32>
    %cst_137 = arith.constant 1.000000e+00 : f32
    %434 = vector.broadcast %cst_137 : f32 to vector<8x128xf32>
    %435 = arith.addf %434, %433 : vector<8x128xf32>
    %436 = arith.divf %434, %435 : vector<8x128xf32>
    %c0_138 = arith.constant 0 : index
    %c0_139 = arith.constant 0 : index
    %437 = vector.load %arg7[%c0_138, %c0_139] : memref<8x128xf32, #tpu.memory_space<vmem>>, vector<8x128xf32>
    tpu.vector_store %arg7[%c0_138, %c0_139], %436 {strides = array<i32>} : memref<8x128xf32, #tpu.memory_space<vmem>>, vector<8x128xf32>,
    return
  }
  func.func @transform_0(%arg0: i32) -> (i32, i32, i32) {
    %c0_i32 = arith.constant 0 : i32
    %c0_i32_0 = arith.constant 0 : i32
    %c0_i32_1 = arith.constant 0 : i32
    return %c0_i32, %arg0, %c0_i32_0 : i32, i32, i32
  }
  func.func @transform_1(%arg0: i32) -> (i32, i32, i32) {
    %c0_i32 = arith.constant 0 : i32
    %c0_i32_0 = arith.constant 0 : i32
    %c0_i32_1 = arith.constant 0 : i32
    %c0_i32_2 = arith.constant 0 : i32
    return %c0_i32, %c0_i32_0, %c0_i32_1 : i32, i32, i32
  }
  func.func @transform_2(%arg0: i32) -> (i32, i32, i32) {
    %c0_i32 = arith.constant 0 : i32
    %c0_i32_0 = arith.constant 0 : i32
    %c0_i32_1 = arith.constant 0 : i32
    %c0_i32_2 = arith.constant 0 : i32
    return %c0_i32, %c0_i32_0, %c0_i32_1 : i32, i32, i32
  }
  func.func @transform_3(%arg0: i32) -> (i32, i32, i32) {
    %c0_i32 = arith.constant 0 : i32
    %c0_i32_0 = arith.constant 0 : i32
    %c0_i32_1 = arith.constant 0 : i32
    %c0_i32_2 = arith.constant 0 : i32
    return %c0_i32, %c0_i32_0, %c0_i32_1 : i32, i32, i32
  }
  func.func @transform_4(%arg0: i32) -> (i32, i32) {
    %c0_i32 = arith.constant 0 : i32
    %c0_i32_0 = arith.constant 0 : i32
    %c0_i32_1 = arith.constant 0 : i32
    return %c0_i32, %c0_i32_0 : i32, i32
  }
  func.func @transform_5(%arg0: i32) -> (i32, i32) {
    %c0_i32 = arith.constant 0 : i32
    %c0_i32_0 = arith.constant 0 : i32
    %c0_i32_1 = arith.constant 0 : i32
    return %c0_i32, %c0_i32_0 : i32, i32
  }
  func.func @transform_6(%arg0: i32) -> (i32, i32) {
    %c0_i32 = arith.constant 0 : i32
    %c0_i32_0 = arith.constant 0 : i32
    return %arg0, %c0_i32 : i32, i32
  }
  func.func @transform_7(%arg0: i32) -> (i32, i32, i32) {
    %c0_i32 = arith.constant 0 : i32
    %c0_i32_0 = arith.constant 0 : i32
    %c0_i32_1 = arith.constant 0 : i32
    return %c0_i32, %arg0, %c0_i32_0 : i32, i32, i32
  }
  func.func @transform_8(%arg0: i32) -> (i32, i32, i32) {
    %c0_i32 = arith.constant 0 : i32
    %c0_i32_0 = arith.constant 0 : i32
    %c0_i32_1 = arith.constant 0 : i32
    return %c0_i32, %arg0, %c0_i32_0 : i32, i32, i32
  }
}

</mosaic_0001>

<bundles_post_ra>
// kernel: tpu_custom_call.1
= control target key start
LH: loop header
LB: loop body
LE: loop exit
PB: predicated region body
PF: predicated region fallthrough
CT: control target
= control target key end

     0   :  { %14 = vsyncpa [#allocation5], 0  ;;  %s5766_s0 = inlined_call_operand.hbm [shape: f32[8,8,128], index: 0, kind: input, shape index: {}]   ;;  %s5767_s1 = inlined_call_operand.hbm [shape: bf16[2,128,512], index: 1, kind: input, shape index: {}]   ;;  %s5768_s2 = inlined_call_operand.hbm [shape: bf16[2,128,512], index: 2, kind: input, shape index: {}]   ;;  %s5769_s3 = inlined_call_operand.hbm [shape: f32[2,1,512], index: 3, kind: input, shape index: {}]   ;;  %s5770_s4 = inlined_call_operand.hbm [shape: bf16[128,128], index: 4, kind: input, shape index: {}]   ;;  %s5771_s5 = inlined_call_operand.vmem [shape: f32[1,128], index: 5, kind: input, shape index: {}]   ;;  %s5772_s6 = inlined_call_operand.hbm [shape: f32[8,128], index: 6, kind: output, shape index: {0}]   ;;  %s5773_s7 = inlined_call_operand.hbm [shape: f32[2,8,128], index: 7, kind: output, shape index: {1}]   ;;  %s5774_s8 = inlined_call_operand.hbm [shape: f32[2,8,128], index: 8, kind: output, shape index: {2}]  }
   0x1   :  { %15 = vsyncpa [#allocation8], 0 }
   0x2   :  { %16 = vsyncpa [#allocation11], 0 }
   0x3   :  { %17 = vsyncpa [#allocation6], 0  ;;  %s36_s29 = sshll.u32 %s5767_s1, 4  ;;  %s37_s29 = int_to_ptr.hbm [resolvable:$true] %s36_s29 }
   0x4   :  { %18 = vsyncpa [#allocation15], 0  ;;  %s4591_s30 = smov [#allocation7]   ;;  %s62_s12 = sshll.u32 %s5769_s3, 4  ;;  %s63_s12 = int_to_ptr.hbm [resolvable:$true] %s62_s12 }
   0x5   :  { %s38_s9 = sshll.u32 %s4591_s30, 4  ;;  %s4592_s13 = smov 256   ;;  %s39_s9 = int_to_ptr.vmem [resolvable:$true] %s38_s9 }
   0x6   :  { %s4593_s14 = smov 16   ;;  %s4594_s15 = smov [#allocation10]  }
   0x7   :  { %44 = dma.hbm_to_vmem [thread:$0]  %s37_s29, 8192, %s39_s9, [#allocation8], %s4592_s13, %s4592_s13, %s4593_s14  }
   0x8   :  { %s64_s16 = sshll.u32 %s4594_s15, 4  ;;  %s4595_s17 = smov 64   ;;  %s65_s16 = int_to_ptr.vmem [resolvable:$true] %s64_s16 }
   0x9   :  { %s4596_s18 = smov 4   ;;  %s23_s20 = sshll.u32 %s5766_s0, 4  ;;  %s24_s20 = int_to_ptr.hbm [resolvable:$true] %s23_s20 }
   0xa   :  { %70 = dma.hbm_to_vmem [thread:$0]  %s63_s12, 128, %s65_s16, [#allocation11], %s4595_s17, %s4595_s17, %s4596_s18  }
   0xb   :  { %s4597_s21 = smov [#allocation4]   ;;  %s49_s24 = sshll.u32 %s5768_s2, 4  ;;  %s50_s24 = int_to_ptr.hbm [resolvable:$true] %s49_s24 }
   0xc   :  { %s25_s22 = sshll.u32 %s4597_s21, 4  ;;  %s4598_s25 = smov 128   ;;  %s26_s22 = int_to_ptr.vmem [resolvable:$true] %s25_s22 }
   0xd   :  { %s4599_s26 = smov 8   ;;  %s4600_s27 = smov [#allocation9]  }
   0xe   :  { %31 = dma.hbm_to_vmem [thread:$0]  %s24_s20, 1024, %s26_s22, [#allocation5], %s4598_s25, %s4598_s25, %s4599_s26  }
   0xf   :  { %s51_s28 = sshll.u32 %s4600_s27, 4  ;;  %s75_s0 = sshll.u32 %s5770_s4, 4  ;;  %s52_s28 = int_to_ptr.vmem [resolvable:$true] %s51_s28  ;;  %s76_s0 = int_to_ptr.hbm [resolvable:$true] %s75_s0 }
  0x10   :  { %57 = dma.hbm_to_vmem [thread:$0]  %s50_s24, 8192, %s52_s28, [#allocation8], %s4592_s13, %s4592_s13, %s4593_s14  }
  0x11   :  { %s4601_s9 = smov [#allocation12]  }
  0x12   :  { %s77_s10 = sshll.u32 %s4601_s9, 4  ;;  %s78_s10 = int_to_ptr.vmem [resolvable:$true] %s77_s10 }
  0x13   :  { %83 = dma.hbm_to_vmem [thread:$0]  %s76_s0, 1024, %s78_s10, [#allocation11], %s4595_s17, %s4595_s17, %s4596_s18  }
  0x14   :  { %4581 = dma.done.wait [#allocation5], 1024  }
  0x15   :  { %4582 = vsyncadd [#allocation5], 4294966272 }
  0x16   :  { %4583 = dma.done.wait [#allocation8], 16384  }
  0x17   :  { %4584 = vsyncadd [#allocation8], 4294950912 }
  0x18   :  { %4585 = dma.done.wait [#allocation11], 1152  }
  0x19   :  { %4586 = vsyncadd [#allocation11], 4294966144  ;;  %v3498_v0 = vld [vmem:[#allocation7 + $0xe0] sm:$0xf]  ;;  %v4007_v1 = vld [vmem:[#allocation7 + $0xec] sm:$0xf0] }
  0x1a   :  { %v4005_v2 = vld [vmem:[#allocation7 + $0xe4] sm:$0xf]  ;;  %v3499_v3 = vor.u32 %v4007_v1, %v3498_v0  ;;  %v3500_v4 = vld [vmem:[#allocation7 + $0xf0] sm:$0xf0]  ;;  %v3506_v5 = vld [vmem:[#allocation7 + $0xe8] sm:$0xf] }
  0x1b   :  { %v4008_v6 = vld [vmem:[#allocation7 + $0xf4] sm:$0xf0]  ;;  %v3503_v7 = vor.u32 %v4005_v2, %v3500_v4  ;;  %v4006_v9 = vld [vmem:[#allocation7 + $0xec] sm:$0xf]  ;;  %v3508_v10 = vld [vmem:[#allocation7 + $0xf8] sm:$0xf0] }
  0x1c   :  { %v3507_v8 = vor.u32 %v4008_v6, %v3506_v5  ;;  %v3482_v11 = vld [vmem:[#allocation7 + $0xc0] sm:$0xf]  ;;  %353 = vmatpush.bf16.msra.mxu0 %v3499_v3  ;;  %v3511_v12 = vor.u32 %v4006_v9, %v3508_v10  ;;  %v4003_v13 = vld [vmem:[#allocation7 + $0xcc] sm:$0xf0]  ;;  %v4001_v14 = vld [vmem:[#allocation7 + $0xc4] sm:$0xf] }
  0x1d   :  { %v3484_v15 = vld [vmem:[#allocation7 + $0xd0] sm:$0xf0]  ;;  %382 = vmatpush.bf16.msra.mxu1 %v3503_v7  ;;  %v3483_v16 = vor.u32 %v4003_v13, %v3482_v11  ;;  %v3490_v18 = vld [vmem:[#allocation7 + $0xc8] sm:$0xf]  ;;  %v4004_v19 = vld [vmem:[#allocation7 + $0xd4] sm:$0xf0] }
  0x1e   :  { %411 = vmatpush.bf16.msra.mxu2 %v3507_v8  ;;  %v3487_v17 = vor.u32 %v4001_v14, %v3484_v15  ;;  %v4002_v20 = vld [vmem:[#allocation7 + $0xcc] sm:$0xf]  ;;  %440 = vmatpush.bf16.msra.mxu3 %v3511_v12  ;;  %v3491_v21 = vor.u32 %v4004_v19, %v3490_v18  ;;  %v3492_v22 = vld [vmem:[#allocation7 + $0xd8] sm:$0xf0]  ;;  %v3466_v23 = vld [vmem:[#allocation7 + $0xa0] sm:$0xf] }
  0x1f   :  { %v3999_v24 = vld [vmem:[#allocation7 + $0xac] sm:$0xf0]  ;;  %v3495_v25 = vor.u32 %v4002_v20, %v3492_v22  ;;  %v3997_v26 = vld [vmem:[#allocation7 + $0xa4] sm:$0xf]  ;;  %v3468_v27 = vld [vmem:[#allocation7 + $0xb0] sm:$0xf0] }
  0x20   :  { %v3474_v28 = vld [vmem:[#allocation7 + $0xa8] sm:$0xf]  ;;  %354 = vmatpush.bf16.msra.mxu0 %v3483_v16  ;;  %v3467_v29 = vor.u32 %v3999_v24, %v3466_v23  ;;  %v4000_v30 = vld [vmem:[#allocation7 + $0xb4] sm:$0xf0]  ;;  %v3998_v31 = vld [vmem:[#allocation7 + $0xac] sm:$0xf]  ;;  %v3471_v33 = vor.u32 %v3997_v26, %v3468_v27 }
  0x21   :  { %v3476_v32 = vld [vmem:[#allocation7 + $0xb8] sm:$0xf0]  ;;  %383 = vmatpush.bf16.msra.mxu1 %v3487_v17  ;;  %v3475_v34 = vor.u32 %v4000_v30, %v3474_v28  ;;  %v3450_v35 = vld [vmem:[#allocation7 + $0x80] sm:$0xf]  ;;  %v3995_v36 = vld [vmem:[#allocation7 + $0x8c] sm:$0xf0] }
  0x22   :  { %412 = vmatpush.bf16.msra.mxu2 %v3491_v21  ;;  %v3993_v37 = vld [vmem:[#allocation7 + $0x84] sm:$0xf]  ;;  %441 = vmatpush.bf16.msra.mxu3 %v3495_v25  ;;  %v3479_v38 = vor.u32 %v3998_v31, %v3476_v32  ;;  %v3452_v39 = vld [vmem:[#allocation7 + $0x90] sm:$0xf0]  ;;  %v3458_v40 = vld [vmem:[#allocation7 + $0x88] sm:$0xf]  ;;  %v3451_v44 = vor.u32 %v3995_v36, %v3450_v35 }
  0x23   :  { %v3996_v41 = vld [vmem:[#allocation7 + $0x94] sm:$0xf0]  ;;  %v3994_v42 = vld [vmem:[#allocation7 + $0x8c] sm:$0xf]  ;;  %v3460_v43 = vld [vmem:[#allocation7 + $0x98] sm:$0xf0]  ;;  %v3455_v45 = vor.u32 %v3993_v37, %v3452_v39 }
  0x24   :  { %355 = vmatpush.bf16.msra.mxu0 %v3467_v29  ;;  %v3459_v46 = vor.u32 %v3996_v41, %v3458_v40  ;;  %v3434_v47 = vld [vmem:[#allocation7 + $0x60] sm:$0xf]  ;;  %v3991_v48 = vld [vmem:[#allocation7 + $0x6c] sm:$0xf0]  ;;  %v3989_v49 = vld [vmem:[#allocation7 + $0x64] sm:$0xf]  ;;  %v3463_v50 = vor.u32 %v3994_v42, %v3460_v43 }
  0x25   :  { %384 = vmatpush.bf16.msra.mxu1 %v3471_v33  ;;  %v3436_v51 = vld [vmem:[#allocation7 + $0x70] sm:$0xf0]  ;;  %v3442_v52 = vld [vmem:[#allocation7 + $0x68] sm:$0xf]  ;;  %v3992_v53 = vld [vmem:[#allocation7 + $0x74] sm:$0xf0]  ;;  %v3435_v56 = vor.u32 %v3991_v48, %v3434_v47 }
  0x26   :  { %413 = vmatpush.bf16.msra.mxu2 %v3475_v34  ;;  %442 = vmatpush.bf16.msra.mxu3 %v3479_v38  ;;  %v3990_v54 = vld [vmem:[#allocation7 + $0x6c] sm:$0xf]  ;;  %v3444_v55 = vld [vmem:[#allocation7 + $0x78] sm:$0xf0]  ;;  %v3439_v57 = vor.u32 %v3989_v49, %v3436_v51  ;;  %v3443_v58 = vor.u32 %v3992_v53, %v3442_v52  ;;  %v3418_v59 = vld [vmem:[#allocation7 + $0x40] sm:$0xf] }
  0x27   :  { %v3987_v60 = vld [vmem:[#allocation7 + $0x4c] sm:$0xf0]  ;;  %v3985_v61 = vld [vmem:[#allocation7 + $0x44] sm:$0xf]  ;;  %v3447_v62 = vor.u32 %v3990_v54, %v3444_v55  ;;  %v3420_v63 = vld [vmem:[#allocation7 + $0x50] sm:$0xf0] }
  0x28   :  { %356 = vmatpush.bf16.msra.mxu0 %v3451_v44  ;;  %v3426_v0 = vld [vmem:[#allocation7 + $0x48] sm:$0xf]  ;;  %v3988_v1 = vld [vmem:[#allocation7 + $0x54] sm:$0xf0]  ;;  %v3986_v2 = vld [vmem:[#allocation7 + $0x4c] sm:$0xf]  ;;  %v3419_v4 = vor.u32 %v3987_v60, %v3418_v59  ;;  %v3423_v5 = vor.u32 %v3985_v61, %v3420_v63 }
  0x29   :  { %385 = vmatpush.bf16.msra.mxu1 %v3455_v45  ;;  %v3428_v3 = vld [vmem:[#allocation7 + $0x58] sm:$0xf0]  ;;  %v3427_v6 = vor.u32 %v3988_v1, %v3426_v0  ;;  %v3402_v7 = vld [vmem:[#allocation7 + $0x20] sm:$0xf]  ;;  %v3983_v8 = vld [vmem:[#allocation7 + $0x2c] sm:$0xf0] }
  0x2a   :  { %414 = vmatpush.bf16.msra.mxu2 %v3459_v46  ;;  %443 = vmatpush.bf16.msra.mxu3 %v3463_v50  ;;  %v3981_v9 = vld [vmem:[#allocation7 + $0x24] sm:$0xf]  ;;  %v3431_v10 = vor.u32 %v3986_v2, %v3428_v3  ;;  %v3404_v11 = vld [vmem:[#allocation7 + $0x30] sm:$0xf0]  ;;  %v3410_v12 = vld [vmem:[#allocation7 + $0x28] sm:$0xf]  ;;  %v3403_v16 = vor.u32 %v3983_v8, %v3402_v7 }
  0x2b   :  { %v3984_v13 = vld [vmem:[#allocation7 + $0x34] sm:$0xf0]  ;;  %v3982_v14 = vld [vmem:[#allocation7 + $0x2c] sm:$0xf]  ;;  %v3412_v15 = vld [vmem:[#allocation7 + $0x38] sm:$0xf0]  ;;  %v3407_v19 = vor.u32 %v3981_v9, %v3404_v11 }
  0x2c   :  { %357 = vmatpush.bf16.msra.mxu0 %v3435_v56  ;;  %v3386_v17 = vld [vmem:[#allocation7] sm:$0xf]  ;;  %v3979_v18 = vld [vmem:[#allocation7 + $0xc] sm:$0xf0]  ;;  %v3411_v20 = vor.u32 %v3984_v13, %v3410_v12  ;;  %v3977_v21 = vld [vmem:[#allocation7 + $0x4] sm:$0xf]  ;;  %v3415_v24 = vor.u32 %v3982_v14, %v3412_v15 }
  0x2d   :  { %386 = vmatpush.bf16.msra.mxu1 %v3439_v57  ;;  %v3388_v22 = vld [vmem:[#allocation7 + $0x10] sm:$0xf0]  ;;  %v3394_v23 = vld [vmem:[#allocation7 + $0x8] sm:$0xf]  ;;  %v3980_v25 = vld [vmem:[#allocation7 + $0x14] sm:$0xf0]  ;;  %v3387_v31 = vor.u32 %v3979_v18, %v3386_v17 }
  0x2e   :  { %415 = vmatpush.bf16.msra.mxu2 %v3443_v58  ;;  %444 = vmatpush.bf16.msra.mxu3 %v3447_v62  ;;  %v3978_v26 = vld [vmem:[#allocation7 + $0xc] sm:$0xf]  ;;  %v3396_v27 = vld [vmem:[#allocation7 + $0x18] sm:$0xf0]  ;;  %v172_v28 = vld [vmem:[#allocation4] sm:$0xff]  ;;  %v3391_v35 = vor.u32 %v3977_v21, %v3388_v22  ;;  %v3395_v36 = vor.u32 %v3980_v25, %v3394_v23  ;;  %s3347_s11 = sshll.u32 %s5773_s7, 4  ;;  %s3348_s11 = int_to_ptr.hbm [resolvable:$true] %s3347_s11 }
  0x2f   :  { %v3626_v29 = vld [vmem:[#allocation9 + $0xe0] sm:$0xf]  ;;  %v4039_v30 = vld [vmem:[#allocation9 + $0xec] sm:$0xf0]  ;;  %v173_v32 = vld [vmem:[#allocation4 + $0x8] sm:$0xff]  ;;  %v3399_v37 = vor.u32 %v3978_v26, %v3396_v27  ;;  %s4603_s12 = smov [#allocation14]  }
  0x30   :  { %358 = vmatpush.bf16.msra.mxu0 %v3419_v4  ;;  %v4037_v33 = vld [vmem:[#allocation9 + $0xe4] sm:$0xf]  ;;  %v3628_v34 = vld [vmem:[#allocation9 + $0xf0] sm:$0xf0]  ;;  %v4669_v38 = vor.u32 %v4039_v30, %v3626_v29  ;;  %v3634_v39 = vld [vmem:[#allocation9 + $0xe8] sm:$0xf]  ;;  %v180_v42 = vpack.c.bf16 %v173_v32, %v172_v28 }
  0x31   :  { %387 = vmatpush.bf16.msra.mxu1 %v3423_v5  ;;  %v4040_v40 = vld [vmem:[#allocation9 + $0xf4] sm:$0xf0]  ;;  %v3610_v41 = vld [vmem:[#allocation9 + $0xc0] sm:$0xf]  ;;  %v4671_v43 = vor.u32 %v4037_v33, %v3628_v34  ;;  %v4035_v44 = vld [vmem:[#allocation9 + $0xcc] sm:$0xf0] }
  0x32   :  { %416 = vmatpush.bf16.msra.mxu2 %v3427_v6  ;;  %445 = vmatpush.bf16.msra.mxu3 %v3431_v10  ;;  %v4038_v45 = vld [vmem:[#allocation9 + $0xec] sm:$0xf]  ;;  %v3636_v46 = vld [vmem:[#allocation9 + $0xf8] sm:$0xf0]  ;;  %v4033_v47 = vld [vmem:[#allocation9 + $0xc4] sm:$0xf]  ;;  %v4673_v49 = vor.u32 %v4040_v40, %v3634_v39  ;;  %v4676_v51 = vor.u32 %v4035_v44, %v3610_v41 }
  0x33   :  { %v3612_v48 = vld [vmem:[#allocation9 + $0xd0] sm:$0xf0]  ;;  %v3618_v50 = vld [vmem:[#allocation9 + $0xc8] sm:$0xf]  ;;  %v4036_v52 = vld [vmem:[#allocation9 + $0xd4] sm:$0xf0]  ;;  %v4678_v53 = vor.u32 %v4038_v45, %v3636_v46 }
  0x34   :  { %359 = vmatpush.bf16.msra.mxu0 %v3403_v16  ;;  %v3594_v54 = vld [vmem:[#allocation9 + $0xa0] sm:$0xf]  ;;  %v4681_v55 = vor.u32 %v4033_v47, %v3612_v48  ;;  %v4031_v56 = vld [vmem:[#allocation9 + $0xac] sm:$0xf0]  ;;  %v4034_v57 = vld [vmem:[#allocation9 + $0xcc] sm:$0xf]  ;;  %v4684_v61 = vor.u32 %v4036_v52, %v3618_v50 }
  0x35   :  { %388 = vmatpush.bf16.msra.mxu1 %v3407_v19  ;;  %v3620_v58 = vld [vmem:[#allocation9 + $0xd8] sm:$0xf0]  ;;  %v4029_v59 = vld [vmem:[#allocation9 + $0xa4] sm:$0xf]  ;;  %v3596_v60 = vld [vmem:[#allocation9 + $0xb0] sm:$0xf0]  ;;  %v4688_v62 = vor.u32 %v4031_v56, %v3594_v54 }
  0x36   :  { %417 = vmatpush.bf16.msra.mxu2 %v3411_v20  ;;  %446 = vmatpush.bf16.msra.mxu3 %v3415_v24  ;;  %v3602_v63 = vld [vmem:[#allocation9 + $0xa8] sm:$0xf]  ;;  %v4032_v0 = vld [vmem:[#allocation9 + $0xb4] sm:$0xf0]  ;;  %v4690_v1 = vor.u32 %v4034_v57, %v3620_v58  ;;  %v3578_v2 = vld [vmem:[#allocation9 + $0x80] sm:$0xf]  ;;  %v4693_v3 = vor.u32 %v4029_v59, %v3596_v60 }
  0x37   :  { %v4027_v4 = vld [vmem:[#allocation9 + $0x8c] sm:$0xf0]  ;;  %v4030_v5 = vld [vmem:[#allocation9 + $0xac] sm:$0xf]  ;;  %v3604_v6 = vld [vmem:[#allocation9 + $0xb8] sm:$0xf0]  ;;  %v4696_v9 = vor.u32 %v4032_v0, %v3602_v63 }
  0x38   :  { %360 = vmatpush.bf16.msra.mxu0 %v3387_v31  ;;  %v4025_v7 = vld [vmem:[#allocation9 + $0x84] sm:$0xf]  ;;  %v3580_v8 = vld [vmem:[#allocation9 + $0x90] sm:$0xf0]  ;;  %v4700_v11 = vor.u32 %v4027_v4, %v3578_v2  ;;  %v3586_v12 = vld [vmem:[#allocation9 + $0x88] sm:$0xf]  ;;  %v4702_v14 = vor.u32 %v4030_v5, %v3604_v6 }
  0x39   :  { %389 = vmatpush.bf16.msra.mxu1 %v3391_v35  ;;  %v174_v10 = vld [vmem:[#allocation4 + $0x10] sm:$0xff]  ;;  %v4028_v13 = vld [vmem:[#allocation9 + $0x94] sm:$0xf0]  ;;  %v3562_v15 = vld [vmem:[#allocation9 + $0x60] sm:$0xf]  ;;  %v4705_v16 = vor.u32 %v4025_v7, %v3580_v8  ;;  %s3345_s13 = sshll.u32 %s4603_s12, 4  ;;  %s3346_s13 = int_to_ptr.vmem [resolvable:$true] %s3345_s13 }
  0x3a   :  { %418 = vmatpush.bf16.msra.mxu2 %v3395_v36  ;;  %447 = vmatpush.bf16.msra.mxu3 %v3399_v37  ;;  %v4023_v17 = vld [vmem:[#allocation9 + $0x6c] sm:$0xf0]  ;;  %v4026_v18 = vld [vmem:[#allocation9 + $0x8c] sm:$0xf]  ;;  %v3588_v19 = vld [vmem:[#allocation9 + $0x98] sm:$0xf0]  ;;  %v4708_v23 = vor.u32 %v4028_v13, %v3586_v12 }
  0x3b   :  { %361 = vmatmul.bf16.vlgmr.msra.gmra.mxu0 %v180_v42  ;;  %v175_v20 = vld [vmem:[#allocation4 + $0x18] sm:$0xff]  ;;  %v4021_v21 = vld [vmem:[#allocation9 + $0x64] sm:$0xf]  ;;  %v3564_v22 = vld [vmem:[#allocation9 + $0x70] sm:$0xf0]  ;;  %v4712_v24 = vor.u32 %v4023_v17, %v3562_v15  ;;  %v4714_v27 = vor.u32 %v4026_v18, %v3588_v19  ;;  %s4604_s14 = smov [#allocation16]  }
  0x3c   :  { %665 = vmatpush.bf16.msrb.mxu0 %v4669_v38  ;;  %390 = vmatmul.bf16.vlgmr.msra.gmra.mxu1 %v180_v42  ;;  %v3570_v25 = vld [vmem:[#allocation9 + $0x68] sm:$0xf]  ;;  %v4024_v26 = vld [vmem:[#allocation9 + $0x74] sm:$0xf0]  ;;  %v3546_v28 = vld [vmem:[#allocation9 + $0x40] sm:$0xf]  ;;  %v181_v29 = vpack.c.bf16 %v175_v20, %v174_v10  ;;  %v4717_v30 = vor.u32 %v4021_v21, %v3564_v22 }
  0x3d   :  { %678 = vmatpush.bf16.msrb.mxu1 %v4671_v43  ;;  %419 = vmatmul.bf16.vlgmr.msra.gmra.mxu2 %v180_v42  ;;  %v4019_v31 = vld [vmem:[#allocation9 + $0x4c] sm:$0xf0]  ;;  %v4022_v32 = vld [vmem:[#allocation9 + $0x6c] sm:$0xf]  ;;  %v3572_v33 = vld [vmem:[#allocation9 + $0x78] sm:$0xf0]  ;;  %v4720_v36 = vor.u32 %v4024_v26, %v3570_v25 }
  0x3e   :  { %448 = vmatmul.bf16.vlgmr.msra.gmra.mxu3 %v180_v42  ;;  %691 = vmatpush.bf16.msrb.mxu2 %v4673_v49  ;;  %v4017_v34 = vld [vmem:[#allocation9 + $0x44] sm:$0xf]  ;;  %v3548_v35 = vld [vmem:[#allocation9 + $0x50] sm:$0xf0]  ;;  %v4724_v37 = vor.u32 %v4019_v31, %v3546_v28  ;;  %v3554_v39 = vld [vmem:[#allocation9 + $0x48] sm:$0xf]  ;;  %v4726_v41 = vor.u32 %v4022_v32, %v3572_v33 }
  0x3f   :  { %704 = vmatpush.bf16.msrb.mxu3 %v4678_v53  ;;  %v4020_v40 = vld [vmem:[#allocation9 + $0x54] sm:$0xf0]  ;;  %v4729_v42 = vor.u32 %v4017_v34, %v3548_v35  ;;  %v3530_v45 = vld [vmem:[#allocation9 + $0x20] sm:$0xf]  ;;  %v4015_v46 = vld [vmem:[#allocation9 + $0x2c] sm:$0xf0] }
  0x40   :  { %666 = vmatpush.bf16.msrb.mxu0 %v4676_v51  ;;  %v4732_v44 = vor.u32 %v4020_v40, %v3554_v39  ;;  %v4013_v47 = vld [vmem:[#allocation9 + $0x24] sm:$0xf]  ;;  %v4736_v48 = vor.u32 %v4015_v46, %v3530_v45  ;;  %v3532_v50 = vld [vmem:[#allocation9 + $0x30] sm:$0xf0]  ;;  %v3538_v52 = vld [vmem:[#allocation9 + $0x28] sm:$0xf] }
  0x41   :  { %679 = vmatpush.bf16.msrb.mxu1 %v4681_v55  ;;  %v4016_v54 = vld [vmem:[#allocation9 + $0x34] sm:$0xf0]  ;;  %v4739_v56 = vor.u32 %v4013_v47, %v3532_v50  ;;  %v4018_v57 = vld [vmem:[#allocation9 + $0x4c] sm:$0xf]  ;;  %v3556_v58 = vld [vmem:[#allocation9 + $0x58] sm:$0xf0] }
  0x42   :  { %692 = vmatpush.bf16.msrb.mxu2 %v4684_v61  ;;  %v3514_v59 = vld [vmem:[#allocation9] sm:$0xf]  ;;  %v4741_v60 = vor.u32 %v4018_v57, %v3556_v58  ;;  %v4011_v63 = vld [vmem:[#allocation9 + $0xc] sm:$0xf0]  ;;  %v4009_v0 = vld [vmem:[#allocation9 + $0x4] sm:$0xf]  ;;  %v4744_v4 = vor.u32 %v4016_v54, %v3538_v52 }
  0x43   :  { %705 = vmatpush.bf16.msrb.mxu3 %v4690_v1  ;;  %v3516_v2 = vld [vmem:[#allocation9 + $0x10] sm:$0xf0]  ;;  %v4014_v5 = vld [vmem:[#allocation9 + $0x2c] sm:$0xf]  ;;  %v3540_v6 = vld [vmem:[#allocation9 + $0x38] sm:$0xf0]  ;;  %v4748_v7 = vor.u32 %v4011_v63, %v3514_v59 }
  0x44   :  { %667 = vmatpush.bf16.msrb.mxu0 %v4688_v62  ;;  %v4750_v8 = vor.u32 %v4014_v5, %v3540_v6  ;;  %v3522_v10 = vld [vmem:[#allocation9 + $0x8] sm:$0xf]  ;;  %v4012_v12 = vld [vmem:[#allocation9 + $0x14] sm:$0xf0]  ;;  %v4753_v13 = vor.u32 %v4009_v0, %v3516_v2  ;;  %v4010_v15 = vld [vmem:[#allocation9 + $0xc] sm:$0xf] }
  0x45   :  { %680 = vmatpush.bf16.msrb.mxu1 %v4693_v3  ;;  %v3524_v17 = vld [vmem:[#allocation9 + $0x18] sm:$0xf0]  ;;  %v176_v18 = vld [vmem:[#allocation4 + $0x20] sm:$0xff]  ;;  %v177_v19 = vld [vmem:[#allocation4 + $0x28] sm:$0xff]  ;;  %v4756_v20 = vor.u32 %v4012_v12, %v3522_v10  ;;  %s3358_s15 = sshll.u32 %s4604_s14, 4  ;;  %s3360_s18 = sshll.u32 %s5774_s8, 4  ;;  %s3359_s15 = int_to_ptr.vmem [resolvable:$true] %s3358_s15  ;;  %s3361_s18 = int_to_ptr.hbm [resolvable:$true] %s3360_s18 }
  0x46   :  { %693 = vmatpush.bf16.msrb.mxu2 %v4696_v9  ;;  %v4760_v21 = vor.u32 %v4010_v15, %v3524_v17  ;;  %v182_v22 = vpack.c.bf16 %v177_v19, %v176_v18  ;;  %v178_v25 = vld [vmem:[#allocation4 + $0x30] sm:$0xff]  ;;  %v179_v26 = vld [vmem:[#allocation4 + $0x38] sm:$0xff]  ;;  %v171_v40 = vld [vmem:[#allocation10] sm:$0xf]  ;;  %s4605_s8 = smov [#allocation13]  }
  0x47   :  { %706 = vmatpush.bf16.msrb.mxu3 %v4702_v14  ;;  %v183_v28 = vpack.c.bf16 %v179_v26, %v178_v25  ;;  %v4839_v45 = vperm.slane %v171_v40, 0  ;;  %v4843_v47 = vperm.slane %v171_v40, 1  ;;  %v4853_v59 = vperm.slane %v171_v40, 2  ;;  %s3335_s19 = sshll.u32 %s4605_s8, 4  ;;  %s3336_s19 = int_to_ptr.vmem [resolvable:$true] %s3335_s19 }
  0x48   :  { %668 = vmatpush.bf16.msrb.mxu0 %v4700_v11  ;;  %v4855_v63 = vperm.slane %v171_v40, 3 }
  0x49   :  { %681 = vmatpush.bf16.msrb.mxu1 %v4705_v16 }
  0x4a   :  { %694 = vmatpush.bf16.msrb.mxu2 %v4708_v23  ;;  %5786 = vst [vmem:[#allocation25_spill] sm:$0xff] %v4855_v63 }
  0x4b   :  { %707 = vmatpush.bf16.msrb.mxu3 %v4714_v27  ;;  %366 = vmatmul.bf16.gmra.mxu0 %v181_v29 }
  0x4c   :  { %669 = vmatpush.bf16.msrb.mxu0 %v4712_v24  ;;  %395 = vmatmul.bf16.gmra.mxu1 %v181_v29 }
  0x4d   :  { %682 = vmatpush.bf16.msrb.mxu1 %v4717_v30  ;;  %424 = vmatmul.bf16.gmra.mxu2 %v181_v29 }
  0x4e   :  { %453 = vmatmul.bf16.gmra.mxu3 %v181_v29  ;;  %695 = vmatpush.bf16.msrb.mxu2 %v4720_v36  ;;  %v5775_v29 = vmov 0  }
  0x4f   :  { %708 = vmatpush.bf16.msrb.mxu3 %v4726_v41 }
  0x50   :  { %670 = vmatpush.bf16.msrb.mxu0 %v4724_v37 }
  0x51   :  { %683 = vmatpush.bf16.msrb.mxu1 %v4729_v42 }
  0x52   :  { %696 = vmatpush.bf16.msrb.mxu2 %v4732_v44 }
  0x53   :  { %709 = vmatpush.bf16.msrb.mxu3 %v4741_v60 }
  0x54   :  { %671 = vmatpush.bf16.msrb.mxu0 %v4736_v48 }
  0x55   :  { %684 = vmatpush.bf16.msrb.mxu1 %v4739_v56 }
  0x56   :  { %697 = vmatpush.bf16.msrb.mxu2 %v4744_v4 }
  0x57   :  { %710 = vmatpush.bf16.msrb.mxu3 %v4750_v8 }
  0x58   :  { %672 = vmatpush.bf16.msrb.mxu0 %v4748_v7 }
  0x59   :  { %685 = vmatpush.bf16.msrb.mxu1 %v4753_v13 }
  0x5a   :  { %698 = vmatpush.bf16.msrb.mxu2 %v4756_v20 }
  0x5b   :  { %711 = vmatpush.bf16.msrb.mxu3 %v4760_v21  ;;  %371 = vmatmul.bf16.gmra.mxu0 %v182_v22 }
  0x5c   :  { %791 = vmatpush.bf16.msra.mxu0 %v4669_v38  ;;  %400 = vmatmul.bf16.gmra.mxu1 %v182_v22 }
  0x5d   :  { %804 = vmatpush.bf16.msra.mxu1 %v4671_v43  ;;  %429 = vmatmul.bf16.gmra.mxu2 %v182_v22 }
  0x5e   :  { %817 = vmatpush.bf16.msra.mxu2 %v4673_v49  ;;  %458 = vmatmul.bf16.gmra.mxu3 %v182_v22 }
  0x5f   :  { %830 = vmatpush.bf16.msra.mxu3 %v4678_v53 }
  0x60   :  { %792 = vmatpush.bf16.msra.mxu0 %v4676_v51 }
  0x61   :  { %805 = vmatpush.bf16.msra.mxu1 %v4681_v55 }
  0x62   :  { %818 = vmatpush.bf16.msra.mxu2 %v4684_v61 }
  0x63   :  { %831 = vmatpush.bf16.msra.mxu3 %v4690_v1 }
  0x64   :  { %793 = vmatpush.bf16.msra.mxu0 %v4688_v62 }
  0x65   :  { %806 = vmatpush.bf16.msra.mxu1 %v4693_v3 }
  0x66   :  { %819 = vmatpush.bf16.msra.mxu2 %v4696_v9 }
  0x67   :  { %832 = vmatpush.bf16.msra.mxu3 %v4702_v14 }
  0x68   :  { %794 = vmatpush.bf16.msra.mxu0 %v4700_v11 }
  0x69   :  { %807 = vmatpush.bf16.msra.mxu1 %v4705_v16 }
  0x6a   :  { %820 = vmatpush.bf16.msra.mxu2 %v4708_v23 }
  0x6b   :  { %833 = vmatpush.bf16.msra.mxu3 %v4714_v27  ;;  %376 = vmatmul.bf16.gmra.mxu0 %v183_v28 }
  0x6c   :  { %795 = vmatpush.bf16.msra.mxu0 %v4712_v24  ;;  %405 = vmatmul.bf16.gmra.mxu1 %v183_v28 }
  0x6d   :  { %808 = vmatpush.bf16.msra.mxu1 %v4717_v30  ;;  %434 = vmatmul.bf16.gmra.mxu2 %v183_v28 }
  0x6e   :  { %821 = vmatpush.bf16.msra.mxu2 %v4720_v36  ;;  %463 = vmatmul.bf16.gmra.mxu3 %v183_v28 }
  0x6f   :  { %834 = vmatpush.bf16.msra.mxu3 %v4726_v41 }
  0x70   :  { %796 = vmatpush.bf16.msra.mxu0 %v4724_v37 }
  0x71   :  { %809 = vmatpush.bf16.msra.mxu1 %v4729_v42 }
  0x72   :  { %822 = vmatpush.bf16.msra.mxu2 %v4732_v44 }
  0x73   :  { %835 = vmatpush.bf16.msra.mxu3 %v4741_v60 }
  0x74   :  { %797 = vmatpush.bf16.msra.mxu0 %v4736_v48 }
  0x75   :  { %810 = vmatpush.bf16.msra.mxu1 %v4739_v56 }
  0x76   :  { %823 = vmatpush.bf16.msra.mxu2 %v4744_v4 }
  0x77   :  { %836 = vmatpush.bf16.msra.mxu3 %v4750_v8 }
  0x78   :  { %798 = vmatpush.bf16.msra.mxu0 %v4748_v7 }
  0x79   :  { %811 = vmatpush.bf16.msra.mxu1 %v4753_v13 }
  0x7a   :  { %824 = vmatpush.bf16.msra.mxu2 %v4756_v20 }
  0x7b   :  { %837 = vmatpush.bf16.msra.mxu3 %v4760_v21  ;;  %673 = vmatmul.bf16.vlgmr.msrb.gmra.mxu0 %v5775_v29 }
  0x7c   :  { %686 = vmatmul.bf16.vlgmr.msrb.gmra.mxu1 %v5775_v29  ;;  %918 = vmatpush.bf16.msrb.mxu0 %v4669_v38 }
  0x7d   :  { %699 = vmatmul.bf16.vlgmr.msrb.gmra.mxu2 %v5775_v29  ;;  %931 = vmatpush.bf16.msrb.mxu1 %v4671_v43 }
  0x7e   :  { %712 = vmatmul.bf16.vlgmr.msrb.gmra.mxu3 %v5775_v29  ;;  %944 = vmatpush.bf16.msrb.mxu2 %v4673_v49 }
  0x7f   :  { %957 = vmatpush.bf16.msrb.mxu3 %v4678_v53 }
  0x80   :  { %919 = vmatpush.bf16.msrb.mxu0 %v4676_v51 }
  0x81   :  { %932 = vmatpush.bf16.msrb.mxu1 %v4681_v55 }
  0x82   :  { %945 = vmatpush.bf16.msrb.mxu2 %v4684_v61 }
  0x83   :  { %958 = vmatpush.bf16.msrb.mxu3 %v4690_v1 }
  0x84   :  { %920 = vmatpush.bf16.msrb.mxu0 %v4688_v62 }
  0x85   :  { %933 = vmatpush.bf16.msrb.mxu1 %v4693_v3 }
  0x86   :  { %946 = vmatpush.bf16.msrb.mxu2 %v4696_v9 }
  0x87   :  { %959 = vmatpush.bf16.msrb.mxu3 %v4702_v14 }
  0x88   :  { %921 = vmatpush.bf16.msrb.mxu0 %v4700_v11 }
  0x89   :  { %934 = vmatpush.bf16.msrb.mxu1 %v4705_v16 }
  0x8a   :  { %947 = vmatpush.bf16.msrb.mxu2 %v4708_v23 }
  0x8b   :  { %960 = vmatpush.bf16.msrb.mxu3 %v4714_v27 }
  0x8c   :  { %922 = vmatpush.bf16.msrb.mxu0 %v4712_v24 }
  0x8d   :  { %935 = vmatpush.bf16.msrb.mxu1 %v4717_v30 }
  0x8e   :  { %948 = vmatpush.bf16.msrb.mxu2 %v4720_v36 }
  0x8f   :  { %961 = vmatpush.bf16.msrb.mxu3 %v4726_v41 }
  0x90   :  { %923 = vmatpush.bf16.msrb.mxu0 %v4724_v37 }
  0x91   :  { %936 = vmatpush.bf16.msrb.mxu1 %v4729_v42 }
  0x92   :  { %949 = vmatpush.bf16.msrb.mxu2 %v4732_v44 }
  0x93   :  { %962 = vmatpush.bf16.msrb.mxu3 %v4741_v60 }
  0x94   :  { %924 = vmatpush.bf16.msrb.mxu0 %v4736_v48 }
  0x95   :  { %937 = vmatpush.bf16.msrb.mxu1 %v4739_v56 }
  0x96   :  { %950 = vmatpush.bf16.msrb.mxu2 %v4744_v4 }
  0x97   :  { %963 = vmatpush.bf16.msrb.mxu3 %v4750_v8 }
  0x98   :  { %925 = vmatpush.bf16.msrb.mxu0 %v4748_v7 }
  0x99   :  { %938 = vmatpush.bf16.msrb.mxu1 %v4753_v13 }
  0x9a   :  { %951 = vmatpush.bf16.msrb.mxu2 %v4756_v20 }
  0x9b   :  { %964 = vmatpush.bf16.msrb.mxu3 %v4760_v21 }
  0xb8   :  { %v362_v31 = vpop.f32.mrf.mxu0 }
  0xb9   :  { %v391_v32 = vpop.f32.mrf.mxu1 }
  0xc0   :  { %v420_v33 = vpop.f32.mrf.mxu2  ;;  %v4835_v35 = vpop.f32.mrf.mxu0 }
  0xc1   :  { %v4833_v34 = vpop.f32.mrf.mxu3  ;;  %v4837_v39 = vpop.f32.mrf.mxu1 }
  0xc8   :  { %v4841_v46 = vpop.f32.mrf.mxu2  ;;  %v367_v52 = vpop.f32.mrf.mxu0 }
  0xc9   :  { %v4845_v50 = vpop.f32.mrf.mxu3  ;;  %v4848_v54 = vadd.f32 %v367_v52, %v4839_v45  ;;  %v396_v57 = vpop.f32.mrf.mxu1 }
  0xca   :  { %5783 = vst [vmem:[#allocation22_spill] sm:$0xff] %v4845_v50  ;;  %v4851_v58 = vadd.f32 %v396_v57, %v4843_v47 }
  0xcb   :  { %5784 = vst [vmem:[#allocation23_spill] sm:$0xff] %v4848_v54 }
  0xcc   :  { %5785 = vst [vmem:[#allocation24_spill] sm:$0xff] %v4851_v58 }
  0xd0   :  { %v425_v0 = vpop.f32.mrf.mxu2  ;;  %v4860_v6 = vpop.f32.mrf.mxu0 }
  0xd1   :  { %v4858_v2 = vadd.f32 %v425_v0, %v4853_v59  ;;  %v454_v5 = vpop.f32.mrf.mxu3  ;;  %5788 = vst [vmem:[#allocation27_spill] sm:$0xff] %v4860_v6  ;;  %v4865_v12 = vpop.f32.mrf.mxu1 }
  0xd2   :  { %v4863_v10 = vadd.f32 %v454_v5, %v4855_v63  ;;  %5790 = vst [vmem:[#allocation29_spill] sm:$0xff] %v4865_v12 }
  0xd3   :  { %5787 = vst [vmem:[#allocation26_spill] sm:$0xff] %v4858_v2 }
  0xd4   :  { %5789 = vst [vmem:[#allocation28_spill] sm:$0xff] %v4863_v10 }
  0xd8   :  { %v4867_v15 = vpop.f32.mrf.mxu2  ;;  %v372_v18 = vpop.f32.mrf.mxu0 }
  0xd9   :  { %5791 = vst [vmem:[#allocation30_spill] sm:$0xff] %v4867_v15  ;;  %v4869_v17 = vpop.f32.mrf.mxu3  ;;  %v4872_v19 = vadd.f32 %v372_v18, %v4839_v45  ;;  %v401_v22 = vpop.f32.mrf.mxu1 }
  0xda   :  { %5792 = vst [vmem:[#allocation31_spill] sm:$0xff] %v4869_v17  ;;  %v4875_v25 = vadd.f32 %v401_v22, %v4843_v47 }
  0xdb   :  { %5793 = vst [vmem:[#allocation32_spill] sm:$0xff] %v4872_v19 }
  0xdc   :  { %5794 = vst [vmem:[#allocation33_spill] sm:$0xff] %v4875_v25 }
  0xe0   :  { %v430_v26 = vpop.f32.mrf.mxu2  ;;  %v4880_v52 = vpop.f32.mrf.mxu0 }
  0xe1   :  { %v4878_v28 = vadd.f32 %v430_v26, %v4853_v59  ;;  %v459_v40 = vpop.f32.mrf.mxu3  ;;  %5796 = vst [vmem:[#allocation35_spill] sm:$0xff] %v4880_v52  ;;  %v4885_v0 = vpop.f32.mrf.mxu1 }
  0xe2   :  { %v4883_v57 = vadd.f32 %v459_v40, %v4855_v63  ;;  %5798 = vst [vmem:[#allocation37_spill] sm:$0xff] %v4885_v0 }
  0xe3   :  { %5795 = vst [vmem:[#allocation34_spill] sm:$0xff] %v4878_v28 }
  0xe4   :  { %5797 = vst [vmem:[#allocation36_spill] sm:$0xff] %v4883_v57 }
  0xe8   :  { %v4887_v5 = vpop.f32.mrf.mxu2  ;;  %v377_v29 = vpop.f32.mrf.mxu0 }
  0xe9   :  { %5799 = vst [vmem:[#allocation38_spill] sm:$0xff] %v4887_v5  ;;  %v4889_v18 = vpop.f32.mrf.mxu3  ;;  %v4892_v22 = vadd.f32 %v377_v29, %v4839_v45  ;;  %v406_v25 = vpop.f32.mrf.mxu1 }
  0xea   :  { %5800 = vst [vmem:[#allocation39_spill] sm:$0xff] %v4889_v18  ;;  %v4895_v26 = vadd.f32 %v406_v25, %v4843_v47  ;;  %v363_v18 = vadd.f32 %v362_v31, %v4839_v45 }
  0xeb   :  { %5801 = vst [vmem:[#allocation40_spill] sm:$0xff] %v4892_v22  ;;  %v392_v22 = vadd.f32 %v391_v32, %v4843_v47 }
  0xec   :  { %5802 = vst [vmem:[#allocation41_spill] sm:$0xff] %v4895_v26 }
  0xf0   :  { %v435_v28 = vpop.f32.mrf.mxu2  ;;  %v4900_v57 = vpop.f32.mrf.mxu0 }
  0xf1   :  { %v4898_v52 = vadd.f32 %v435_v28, %v4853_v59  ;;  %v464_v40 = vpop.f32.mrf.mxu3  ;;  %5804 = vst [vmem:[#allocation43_spill] sm:$0xff] %v4900_v57  ;;  %v4905_v5 = vpop.f32.mrf.mxu1 }
  0xf2   :  { %v4903_v0 = vadd.f32 %v464_v40, %v4855_v63  ;;  %5806 = vst [vmem:[#allocation45_spill] sm:$0xff] %v4905_v5  ;;  %v421_v40 = vadd.f32 %v420_v33, %v4853_v59  ;;  %v450_v33 = vadd.f32 %v4833_v34, %v4855_v63 }
  0xf3   :  { %5803 = vst [vmem:[#allocation42_spill] sm:$0xff] %v4898_v52 }
  0xf4   :  { %5805 = vst [vmem:[#allocation44_spill] sm:$0xff] %v4903_v0 }
  0xf8   :  { %v4908_v29 = vpop.f32.mrf.mxu2  ;;  %v674_v26 = vpop.f32.mrf.mxu0 }
  0xf9   :  { %5807 = vst [vmem:[#allocation46_spill] sm:$0xff] %v4908_v29  ;;  %v4911_v25 = vpop.f32.mrf.mxu3  ;;  %v717_v19 = vadd.f32 %v674_v26, %v363_v18  ;;  %v687_v28 = vpop.f32.mrf.mxu1 }
  0xfa   :  { %5808 = vst [vmem:[#allocation47_spill] sm:$0xff] %v4911_v25  ;;  %v718_v52 = vadd.f32 %v687_v28, %v392_v22 }
  0xfb   :  { %v3640_v17 = vmul.f32 -1.442695, %v717_v19 }
  0xfc   :  { %v3641_v15 = vmul.f32 -1.442695, %v718_v52 }
  0xfd   :  { %4129 = vpow2.f32 %v3640_v17 }
  0xfe   :  { %4131 = vpow2.f32 %v3641_v15 }
 0x100   :  { %v700_v57 = vpop.f32.mrf.mxu2  ;;  %v676_v31 = vpop.f32.mrf.mxu0 }
 0x101   :  { %v719_v5 = vadd.f32 %v700_v57, %v421_v40  ;;  %v713_v0 = vpop.f32.mrf.mxu3  ;;  %v689_v12 = vpop.f32.mrf.mxu1 }
 0x102   :  { %v720_v57 = vadd.f32 %v713_v0, %v450_v33 }
 0x103   :  { %v3642_v29 = vmul.f32 -1.442695, %v719_v5  ;;  %v4130_v6 = vpop.eup %4129 }
 0x104   :  { %v4132_v32 = vpop.eup %4131  ;;  %v730_v10 = vadd.f32 1.0, %v4130_v6 }
 0x105   :  { %4133 = vpow2.f32 %v3642_v29  ;;  %v731_v25 = vadd.f32 1.0, %v4132_v32 }
 0x106   :  { %4135 = vrcp.f32 %v730_v10  ;;  %v744_v6 = vand.u32 2147483648, %v730_v10  ;;  %v742_v31 = vand.u32 2147483647, %v730_v10  ;;  %vm738_vm2 = vweird.f32 %v730_v10 }
 0x107   :  { %4137 = vrcp.f32 %v731_v25  ;;  %v759_v29 = vand.u32 2147483648, %v731_v25  ;;  %vm753_vm3 = vweird.f32 %v731_v25 }
 0x108   :  { %v702_v18 = vpop.f32.mrf.mxu2  ;;  %vm743_vm5 = vcmp.eq.f32.partialorder %v742_v31, 8.507059e+37 }
 0x109   :  { %v715_v19 = vpop.f32.mrf.mxu3  ;;  %v757_v18 = vand.u32 2147483647, %v731_v25  ;;  %v760_v2 = vor.u32 1.1754944e-38, %v759_v29 }
 0x10b   :  { %v4134_v52 = vpop.eup %4133  ;;  %vm758_vm7 = vcmp.eq.f32.partialorder %v757_v18, 8.507059e+37 }
 0x10c   :  { %v732_v15 = vadd.f32 1.0, %v4134_v52  ;;  %v4136_v17 = vpop.eup %4135  ;;  %v745_v52 = vor.u32 1.1754944e-38, %v744_v6 }
 0x10d   :  { %v4138_v22 = vpop.eup %4137  ;;  %v734_v26 = vmul.f32 %v4136_v17, %v730_v10  ;;  %vm739_vm0 = vweird.f32 %v4136_v17 }
 0x10e   :  { %4139 = vrcp.f32 %v732_v15  ;;  %v749_v12 = vmul.f32 %v4138_v22, %v731_v25  ;;  %vm754_vm1 = vweird.f32 %v4138_v22  ;;  %vm740_vm4 = vmor %vm738_vm2, %vm739_vm0  ;;  %v774_v25 = vand.u32 2147483648, %v732_v15 }
 0x10f   :  { %v735_v5 = vsub.f32 1.0, %v734_v26  ;;  %4141 = vtanh.f32 %v720_v57  ;;  %vm755_vm6 = vmor %vm753_vm3, %vm754_vm1  ;;  %vm768_vm9 = vweird.f32 %v732_v15 }
 0x110   :  { %v750_v28 = vsub.f32 1.0, %v749_v12  ;;  %v775_v29 = vor.u32 1.1754944e-38, %v774_v25 }
 0x111   :  { %v736_v40 = vmul.f32 %v4136_v17, %v735_v5 }
 0x112   :  { %v751_v32 = vmul.f32 %v4138_v22, %v750_v28 }
 0x113   :  { %v737_v34 = vadd.f32 %v4136_v17, %v736_v40 }
 0x114   :  { %v4140_v19 = vpop.eup %4139  ;;  %v752_v33 = vadd.f32 %v4138_v22, %v751_v32 }
 0x115   :  { %v764_v0 = vmul.f32 %v4140_v19, %v732_v15  ;;  %v741_v26 = vsel %vm740_vm4, %v4136_v17, %v737_v34  ;;  %v4142_v57 = vpop.eup %4141  ;;  %vm769_vm8 = vweird.f32 %v4140_v19  ;;  %v772_v17 = vand.u32 2147483647, %v732_v15 }
 0x116   :  { %v746_v5 = vsel %vm743_vm5, %v745_v52, %v741_v26  ;;  %v756_v58 = vsel %vm755_vm6, %v4138_v22, %v752_v33  ;;  %vm770_vm10 = vmor %vm768_vm9, %vm769_vm8 }
 0x117   :  { %v765_v12 = vsub.f32 1.0, %v764_v0  ;;  %v761_v28 = vsel %vm758_vm7, %v760_v2, %v756_v58  ;;  %v780_v54 = vmul.f32 %v4142_v57, %v746_v5  ;;  %vm773_vm11 = vcmp.eq.f32.partialorder %v772_v17, 8.507059e+37 }
 0x118   :  { %v779_v63 = vmul.f32 0.0, %v761_v28  ;;  %v423_v0 = vadd.f32 %v4841_v46, %v4853_v59 }
 0x119   :  { %v766_v50 = vmul.f32 %v4140_v19, %v765_v12 }
 0x11a   :  { %v4916_v40 = vadd.f32 %v780_v54, %v779_v63  ;;  %v394_v54 = vadd.f32 %v4837_v39, %v4843_v47 }
 0x11b   :  { %v767_v10 = vadd.f32 %v4140_v19, %v766_v50  ;;  %v365_v50 = vadd.f32 %v4835_v35, %v4839_v45 }
 0x11c   :  { %4143 = vtanh.f32 %v4916_v40 }
 0x11d   :  { %v771_v6 = vsel %vm770_vm10, %v4140_v19, %v767_v10 }
 0x11e   :  { %v776_v22 = vsel %vm773_vm11, %v775_v29, %v771_v6  ;;  %v5809_v29 = vld [vmem:[#allocation25_spill] sm:$0xff] }
 0x122   :  { %v4144_v31 = vpop.eup %4143 }
 0x123   :  { %v4919_v32 = vmul.f32 %v4144_v31, %v776_v22  ;;  %v5810_v31 = vld [vmem:[#allocation22_spill] sm:$0xff] }
 0x124   :  { %v452_v46 = vadd.f32 %v5810_v31, %v5809_v29 }
 0x125   :  { %v790_v58 = vpack.c.bf16 %v4919_v32, %v4919_v32 }
 0x127   :  { %799 = vmatmul.bf16.vlgmr.msra.gmra.mxu0 %v790_v58  ;;  %812 = vmatmul.bf16.vlgmr.msra.gmra.mxu1 %v790_v58 }
 0x128   :  { %825 = vmatmul.bf16.vlgmr.msra.gmra.mxu2 %v790_v58  ;;  %838 = vmatmul.bf16.vlgmr.msra.gmra.mxu3 %v790_v58 }
 0x129   :  { %1045 = vmatpush.bf16.msra.mxu0 %v4669_v38  ;;  %1058 = vmatpush.bf16.msra.mxu1 %v4671_v43 }
 0x12a   :  { %1071 = vmatpush.bf16.msra.mxu2 %v4673_v49  ;;  %1084 = vmatpush.bf16.msra.mxu3 %v4678_v53 }
 0x12d   :  { %1046 = vmatpush.bf16.msra.mxu0 %v4676_v51  ;;  %1059 = vmatpush.bf16.msra.mxu1 %v4681_v55 }
 0x12e   :  { %1072 = vmatpush.bf16.msra.mxu2 %v4684_v61  ;;  %1085 = vmatpush.bf16.msra.mxu3 %v4690_v1 }
 0x131   :  { %1047 = vmatpush.bf16.msra.mxu0 %v4688_v62  ;;  %1060 = vmatpush.bf16.msra.mxu1 %v4693_v3 }
 0x132   :  { %1073 = vmatpush.bf16.msra.mxu2 %v4696_v9  ;;  %1086 = vmatpush.bf16.msra.mxu3 %v4702_v14 }
 0x135   :  { %1048 = vmatpush.bf16.msra.mxu0 %v4700_v11  ;;  %1061 = vmatpush.bf16.msra.mxu1 %v4705_v16 }
 0x136   :  { %1074 = vmatpush.bf16.msra.mxu2 %v4708_v23  ;;  %1087 = vmatpush.bf16.msra.mxu3 %v4714_v27 }
 0x139   :  { %1049 = vmatpush.bf16.msra.mxu0 %v4712_v24  ;;  %1062 = vmatpush.bf16.msra.mxu1 %v4717_v30 }
 0x13a   :  { %1075 = vmatpush.bf16.msra.mxu2 %v4720_v36  ;;  %1088 = vmatpush.bf16.msra.mxu3 %v4726_v41 }
 0x13d   :  { %1050 = vmatpush.bf16.msra.mxu0 %v4724_v37  ;;  %1063 = vmatpush.bf16.msra.mxu1 %v4729_v42 }
 0x13e   :  { %1076 = vmatpush.bf16.msra.mxu2 %v4732_v44  ;;  %1089 = vmatpush.bf16.msra.mxu3 %v4741_v60 }
 0x141   :  { %1051 = vmatpush.bf16.msra.mxu0 %v4736_v48  ;;  %1064 = vmatpush.bf16.msra.mxu1 %v4739_v56 }
 0x142   :  { %1077 = vmatpush.bf16.msra.mxu2 %v4744_v4  ;;  %1090 = vmatpush.bf16.msra.mxu3 %v4750_v8 }
 0x145   :  { %1052 = vmatpush.bf16.msra.mxu0 %v4748_v7  ;;  %1065 = vmatpush.bf16.msra.mxu1 %v4753_v13 }
 0x146   :  { %1078 = vmatpush.bf16.msra.mxu2 %v4756_v20  ;;  %1091 = vmatpush.bf16.msra.mxu3 %v4760_v21 }
 0x1a4   :  { %v800_v63 = vpop.f32.mrf.mxu0  ;;  %v813_v2 = vpop.f32.mrf.mxu1 }
 0x1a5   :  { %v843_v15 = vadd.f32 %v800_v63, %v365_v50  ;;  %v844_v18 = vadd.f32 %v813_v2, %v394_v54 }
 0x1a7   :  { %v3643_v19 = vmul.f32 -1.442695, %v843_v15  ;;  %v3644_v34 = vmul.f32 -1.442695, %v844_v18 }
 0x1a9   :  { %4145 = vpow2.f32 %v3643_v19 }
 0x1aa   :  { %4147 = vpow2.f32 %v3644_v34 }
 0x1ab   :  { %v826_v52 = vpop.f32.mrf.mxu2  ;;  %v839_v33 = vpop.f32.mrf.mxu3 }
 0x1ac   :  { %v845_v26 = vadd.f32 %v826_v52, %v423_v0  ;;  %v802_v57 = vpop.f32.mrf.mxu0  ;;  %v815_v12 = vpop.f32.mrf.mxu1  ;;  %v846_v50 = vadd.f32 %v839_v33, %v452_v46 }
 0x1ae   :  { %v3645_v35 = vmul.f32 -1.442695, %v845_v26 }
 0x1af   :  { %v4146_v5 = vpop.eup %4145 }
 0x1b0   :  { %v4148_v28 = vpop.eup %4147  ;;  %v856_v39 = vadd.f32 1.0, %v4146_v5  ;;  %4149 = vpow2.f32 %v3645_v35 }
 0x1b1   :  { %v857_v10 = vadd.f32 1.0, %v4148_v28 }
 0x1b2   :  { %4151 = vrcp.f32 %v856_v39  ;;  %v870_v19 = vand.u32 2147483648, %v856_v39  ;;  %v868_v52 = vand.u32 2147483647, %v856_v39  ;;  %vm864_vm14 = vweird.f32 %v856_v39 }
 0x1b3   :  { %4153 = vrcp.f32 %v857_v10  ;;  %v828_v25 = vpop.f32.mrf.mxu2  ;;  %v841_v17 = vpop.f32.mrf.mxu3  ;;  %v885_v34 = vand.u32 2147483648, %v857_v10  ;;  %v883_v57 = vand.u32 2147483647, %v857_v10  ;;  %vm879_vm15 = vweird.f32 %v857_v10 }
 0x1b4   :  { %v871_v5 = vor.u32 1.1754944e-38, %v870_v19  ;;  %vm869_vm2 = vcmp.eq.f32.partialorder %v868_v52, 8.507059e+37 }
 0x1b5   :  { %v886_v25 = vor.u32 1.1754944e-38, %v885_v34  ;;  %vm884_vm3 = vcmp.eq.f32.partialorder %v883_v57, 8.507059e+37 }
 0x1b6   :  { %v4150_v6 = vpop.eup %4149 }
 0x1b7   :  { %v858_v22 = vadd.f32 1.0, %v4150_v6 }
 0x1b8   :  { %v4152_v58 = vpop.eup %4151 }
 0x1b9   :  { %v4154_v54 = vpop.eup %4153  ;;  %v860_v63 = vmul.f32 %v4152_v58, %v856_v39  ;;  %4155 = vrcp.f32 %v858_v22  ;;  %vm865_vm12 = vweird.f32 %v4152_v58  ;;  %v900_v19 = vand.u32 2147483648, %v858_v22 }
 0x1ba   :  { %v875_v2 = vmul.f32 %v4154_v54, %v857_v10  ;;  %4157 = vtanh.f32 %v846_v50  ;;  %vm880_vm13 = vweird.f32 %v4154_v54  ;;  %vm866_vm0 = vmor %vm864_vm14, %vm865_vm12  ;;  %vm894_vm5 = vweird.f32 %v858_v22 }
 0x1bb   :  { %v861_v15 = vsub.f32 1.0, %v860_v63  ;;  %vm881_vm1 = vmor %vm879_vm15, %vm880_vm13 }
 0x1bc   :  { %v876_v18 = vsub.f32 1.0, %v875_v2 }
 0x1bd   :  { %v862_v0 = vmul.f32 %v4152_v58, %v861_v15 }
 0x1be   :  { %v877_v26 = vmul.f32 %v4154_v54, %v876_v18 }
 0x1bf   :  { %v4156_v12 = vpop.eup %4155  ;;  %v863_v35 = vadd.f32 %v4152_v58, %v862_v0  ;;  %v901_v0 = vor.u32 1.1754944e-38, %v900_v19 }
 0x1c0   :  { %v890_v33 = vmul.f32 %v4156_v12, %v858_v22  ;;  %v878_v28 = vadd.f32 %v4154_v54, %v877_v26  ;;  %v4158_v6 = vpop.eup %4157  ;;  %vm895_vm4 = vweird.f32 %v4156_v12 }
 0x1c1   :  { %v867_v17 = vsel %vm866_vm0, %v4152_v58, %v863_v35  ;;  %v898_v58 = vand.u32 2147483647, %v858_v22  ;;  %vm896_vm6 = vmor %vm894_vm5, %vm895_vm4 }
 0x1c2   :  { %v891_v31 = vsub.f32 1.0, %v890_v33  ;;  %v872_v46 = vsel %vm869_vm2, %v871_v5, %v867_v17  ;;  %v882_v50 = vsel %vm881_vm1, %v4154_v54, %v878_v28  ;;  %v5812_v33 = vld [vmem:[#allocation24_spill] sm:$0xff] }
 0x1c3   :  { %v887_v63 = vsel %vm884_vm3, %v886_v25, %v882_v50  ;;  %v906_v2 = vmul.f32 %v4158_v6, %v872_v46  ;;  %vm899_vm7 = vcmp.eq.f32.partialorder %v898_v58, 8.507059e+37 }
 0x1c4   :  { %v892_v15 = vmul.f32 %v4156_v12, %v891_v31  ;;  %v905_v18 = vmul.f32 %v887_v63, %v4916_v40  ;;  %v5813_v31 = vld [vmem:[#allocation26_spill] sm:$0xff] }
 0x1c6   :  { %v4964_v39 = vadd.f32 %v906_v2, %v905_v18  ;;  %v893_v10 = vadd.f32 %v4156_v12, %v892_v15 }
 0x1c8   :  { %4159 = vtanh.f32 %v4964_v39  ;;  %v897_v34 = vsel %vm896_vm6, %v4156_v12, %v893_v10  ;;  %v5811_v12 = vld [vmem:[#allocation23_spill] sm:$0xff] }
 0x1c9   :  { %v902_v52 = vsel %vm899_vm7, %v901_v0, %v897_v34 }
 0x1ce   :  { %v4160_v54 = vpop.eup %4159 }
 0x1cf   :  { %v4967_v26 = vmul.f32 %v4160_v54, %v902_v52 }
 0x1d1   :  { %v917_v40 = vpack.c.bf16 %v4967_v26, %v4967_v26 }
 0x1d3   :  { %926 = vmatmul.bf16.vlgmr.msrb.gmra.mxu0 %v917_v40  ;;  %939 = vmatmul.bf16.vlgmr.msrb.gmra.mxu1 %v917_v40 }
 0x1d4   :  { %952 = vmatmul.bf16.vlgmr.msrb.gmra.mxu2 %v917_v40  ;;  %965 = vmatmul.bf16.vlgmr.msrb.gmra.mxu3 %v917_v40  ;;  %v5814_v40 = vld [vmem:[#allocation28_spill] sm:$0xff] }
 0x1d5   :  { %1172 = vmatpush.bf16.msrb.mxu0 %v4669_v38  ;;  %1185 = vmatpush.bf16.msrb.mxu1 %v4671_v43 }
 0x1d6   :  { %1198 = vmatpush.bf16.msrb.mxu2 %v4673_v49  ;;  %1211 = vmatpush.bf16.msrb.mxu3 %v4678_v53 }
 0x1d9   :  { %1173 = vmatpush.bf16.msrb.mxu0 %v4676_v51  ;;  %1186 = vmatpush.bf16.msrb.mxu1 %v4681_v55 }
 0x1da   :  { %1199 = vmatpush.bf16.msrb.mxu2 %v4684_v61  ;;  %1212 = vmatpush.bf16.msrb.mxu3 %v4690_v1 }
 0x1dd   :  { %1174 = vmatpush.bf16.msrb.mxu0 %v4688_v62  ;;  %1187 = vmatpush.bf16.msrb.mxu1 %v4693_v3 }
 0x1de   :  { %1200 = vmatpush.bf16.msrb.mxu2 %v4696_v9  ;;  %1213 = vmatpush.bf16.msrb.mxu3 %v4702_v14 }
 0x1e1   :  { %1175 = vmatpush.bf16.msrb.mxu0 %v4700_v11  ;;  %1188 = vmatpush.bf16.msrb.mxu1 %v4705_v16 }
 0x1e2   :  { %1201 = vmatpush.bf16.msrb.mxu2 %v4708_v23  ;;  %1214 = vmatpush.bf16.msrb.mxu3 %v4714_v27 }
 0x1e5   :  { %1176 = vmatpush.bf16.msrb.mxu0 %v4712_v24  ;;  %1189 = vmatpush.bf16.msrb.mxu1 %v4717_v30 }
 0x1e6   :  { %1202 = vmatpush.bf16.msrb.mxu2 %v4720_v36  ;;  %1215 = vmatpush.bf16.msrb.mxu3 %v4726_v41 }
 0x1e9   :  { %1177 = vmatpush.bf16.msrb.mxu0 %v4724_v37  ;;  %1190 = vmatpush.bf16.msrb.mxu1 %v4729_v42 }
 0x1ea   :  { %1203 = vmatpush.bf16.msrb.mxu2 %v4732_v44  ;;  %1216 = vmatpush.bf16.msrb.mxu3 %v4741_v60 }
 0x1ed   :  { %1178 = vmatpush.bf16.msrb.mxu0 %v4736_v48  ;;  %1191 = vmatpush.bf16.msrb.mxu1 %v4739_v56 }
 0x1ee   :  { %1204 = vmatpush.bf16.msrb.mxu2 %v4744_v4  ;;  %1217 = vmatpush.bf16.msrb.mxu3 %v4750_v8 }
 0x1f1   :  { %1179 = vmatpush.bf16.msrb.mxu0 %v4748_v7  ;;  %1192 = vmatpush.bf16.msrb.mxu1 %v4753_v13 }
 0x1f2   :  { %1205 = vmatpush.bf16.msrb.mxu2 %v4756_v20  ;;  %1218 = vmatpush.bf16.msrb.mxu3 %v4760_v21 }
 0x250   :  { %v927_v22 = vpop.f32.mrf.mxu0  ;;  %v940_v57 = vpop.f32.mrf.mxu1 }
 0x251   :  { %v970_v35 = vadd.f32 %v927_v22, %v5811_v12  ;;  %v971_v5 = vadd.f32 %v940_v57, %v5812_v33 }
 0x253   :  { %v3646_v28 = vmul.f32 -1.442695, %v970_v35  ;;  %v3647_v25 = vmul.f32 -1.442695, %v971_v5 }
 0x255   :  { %4161 = vpow2.f32 %v3646_v28 }
 0x256   :  { %4163 = vpow2.f32 %v3647_v25 }
 0x257   :  { %v953_v17 = vpop.f32.mrf.mxu2  ;;  %v966_v6 = vpop.f32.mrf.mxu3 }
 0x258   :  { %v972_v46 = vadd.f32 %v953_v17, %v5813_v31  ;;  %v929_v50 = vpop.f32.mrf.mxu0  ;;  %v942_v63 = vpop.f32.mrf.mxu1  ;;  %v973_v22 = vadd.f32 %v966_v6, %v5814_v40 }
 0x25a   :  { %v3648_v2 = vmul.f32 -1.442695, %v972_v46 }
 0x25b   :  { %v4162_v15 = vpop.eup %4161 }
 0x25c   :  { %v4164_v18 = vpop.eup %4163  ;;  %v983_v10 = vadd.f32 1.0, %v4162_v15  ;;  %4165 = vpow2.f32 %v3648_v2 }
 0x25d   :  { %v984_v19 = vadd.f32 1.0, %v4164_v18 }
 0x25e   :  { %4167 = vrcp.f32 %v983_v10  ;;  %v997_v28 = vand.u32 2147483648, %v983_v10  ;;  %v995_v31 = vand.u32 2147483647, %v983_v10  ;;  %vm991_vm10 = vweird.f32 %v983_v10 }
 0x25f   :  { %4169 = vrcp.f32 %v984_v19  ;;  %v955_v58 = vpop.f32.mrf.mxu2  ;;  %v968_v34 = vpop.f32.mrf.mxu3  ;;  %v1012_v25 = vand.u32 2147483648, %v984_v19  ;;  %v1010_v50 = vand.u32 2147483647, %v984_v19  ;;  %vm1006_vm11 = vweird.f32 %v984_v19 }
 0x260   :  { %v998_v15 = vor.u32 1.1754944e-38, %v997_v28  ;;  %vm996_vm14 = vcmp.eq.f32.partialorder %v995_v31, 8.507059e+37 }
 0x261   :  { %v1013_v58 = vor.u32 1.1754944e-38, %v1012_v25  ;;  %vm1011_vm15 = vcmp.eq.f32.partialorder %v1010_v50, 8.507059e+37 }
 0x262   :  { %v4166_v0 = vpop.eup %4165 }
 0x263   :  { %v985_v54 = vadd.f32 1.0, %v4166_v0 }
 0x264   :  { %v4168_v52 = vpop.eup %4167 }
 0x265   :  { %v4170_v57 = vpop.eup %4169  ;;  %v987_v12 = vmul.f32 %v4168_v52, %v983_v10  ;;  %4171 = vrcp.f32 %v985_v54  ;;  %vm992_vm8 = vweird.f32 %v4168_v52  ;;  %v1027_v28 = vand.u32 2147483648, %v985_v54 }
 0x266   :  { %v1002_v35 = vmul.f32 %v4170_v57, %v984_v19  ;;  %4173 = vtanh.f32 %v973_v22  ;;  %vm1007_vm9 = vweird.f32 %v4170_v57  ;;  %vm993_vm12 = vmor %vm991_vm10, %vm992_vm8  ;;  %vm1021_vm1 = vweird.f32 %v985_v54 }
 0x267   :  { %v988_v33 = vsub.f32 1.0, %v987_v12  ;;  %vm1008_vm13 = vmor %vm1006_vm11, %vm1007_vm9  ;;  %v1028_v31 = vor.u32 1.1754944e-38, %v1027_v28 }
 0x268   :  { %v1003_v5 = vsub.f32 1.0, %v1002_v35 }
 0x269   :  { %v989_v17 = vmul.f32 %v4168_v52, %v988_v33 }
 0x26a   :  { %v1004_v46 = vmul.f32 %v4170_v57, %v1003_v5 }
 0x26b   :  { %v4172_v63 = vpop.eup %4171  ;;  %v990_v2 = vadd.f32 %v4168_v52, %v989_v17 }
 0x26c   :  { %v1017_v6 = vmul.f32 %v4172_v63, %v985_v54  ;;  %v1005_v18 = vadd.f32 %v4170_v57, %v1004_v46  ;;  %v4174_v0 = vpop.eup %4173  ;;  %vm1022_vm0 = vweird.f32 %v4172_v63 }
 0x26d   :  { %v994_v34 = vsel %vm993_vm12, %v4168_v52, %v990_v2  ;;  %v1025_v52 = vand.u32 2147483647, %v985_v54  ;;  %vm1023_vm2 = vmor %vm1021_vm1, %vm1022_vm0  ;;  %v5816_v54 = vld [vmem:[#allocation27_spill] sm:$0xff]  ;;  %v5817_v2 = vld [vmem:[#allocation29_spill] sm:$0xff] }
 0x26e   :  { %v1018_v40 = vsub.f32 1.0, %v1017_v6  ;;  %v999_v22 = vsel %vm996_vm14, %v998_v15, %v994_v34  ;;  %v1009_v12 = vsel %vm1008_vm13, %v4170_v57, %v1005_v18  ;;  %v399_v6 = vadd.f32 %v5817_v2, %v4843_v47 }
 0x26f   :  { %v1014_v35 = vsel %vm1011_vm15, %v1013_v58, %v1009_v12  ;;  %v1033_v33 = vmul.f32 %v4174_v0, %v999_v22  ;;  %vm1026_vm3 = vcmp.eq.f32.partialorder %v1025_v52, 8.507059e+37  ;;  %v5818_v22 = vld [vmem:[#allocation30_spill] sm:$0xff] }
 0x270   :  { %v1019_v5 = vmul.f32 %v4172_v63, %v1018_v40  ;;  %v1032_v17 = vmul.f32 %v1014_v35, %v4964_v39  ;;  %v428_v12 = vadd.f32 %v5818_v22, %v4853_v59 }
 0x272   :  { %v5008_v10 = vadd.f32 %v1033_v33, %v1032_v17  ;;  %v1020_v19 = vadd.f32 %v4172_v63, %v1019_v5 }
 0x274   :  { %4175 = vtanh.f32 %v5008_v10  ;;  %v1024_v25 = vsel %vm1023_vm2, %v4172_v63, %v1020_v19  ;;  %v370_v63 = vadd.f32 %v5816_v54, %v4839_v45 }
 0x275   :  { %v1029_v46 = vsel %vm1026_vm3, %v1028_v31, %v1024_v25 }
 0x27a   :  { %v4176_v57 = vpop.eup %4175 }
 0x27b   :  { %v5011_v50 = vmul.f32 %v4176_v57, %v1029_v46 }
 0x27d   :  { %5815 = vst [vmem:[#allocation25_spill] sm:$0xff] %v5011_v50  ;;  %v1044_v39 = vpack.c.bf16 %v5011_v50, %v5011_v50 }
 0x27f   :  { %1053 = vmatmul.bf16.vlgmr.msra.gmra.mxu0 %v1044_v39  ;;  %1066 = vmatmul.bf16.vlgmr.msra.gmra.mxu1 %v1044_v39 }
 0x280   :  { %1079 = vmatmul.bf16.vlgmr.msra.gmra.mxu2 %v1044_v39  ;;  %1092 = vmatmul.bf16.vlgmr.msra.gmra.mxu3 %v1044_v39 }
 0x281   :  { %1299 = vmatpush.bf16.msra.mxu0 %v4669_v38  ;;  %1312 = vmatpush.bf16.msra.mxu1 %v4671_v43 }
 0x282   :  { %1325 = vmatpush.bf16.msra.mxu2 %v4673_v49  ;;  %1338 = vmatpush.bf16.msra.mxu3 %v4678_v53 }
 0x285   :  { %1300 = vmatpush.bf16.msra.mxu0 %v4676_v51  ;;  %1313 = vmatpush.bf16.msra.mxu1 %v4681_v55 }
 0x286   :  { %1326 = vmatpush.bf16.msra.mxu2 %v4684_v61  ;;  %1339 = vmatpush.bf16.msra.mxu3 %v4690_v1 }
 0x289   :  { %1301 = vmatpush.bf16.msra.mxu0 %v4688_v62  ;;  %1314 = vmatpush.bf16.msra.mxu1 %v4693_v3 }
 0x28a   :  { %1327 = vmatpush.bf16.msra.mxu2 %v4696_v9  ;;  %1340 = vmatpush.bf16.msra.mxu3 %v4702_v14 }
 0x28d   :  { %1302 = vmatpush.bf16.msra.mxu0 %v4700_v11  ;;  %1315 = vmatpush.bf16.msra.mxu1 %v4705_v16 }
 0x28e   :  { %1328 = vmatpush.bf16.msra.mxu2 %v4708_v23  ;;  %1341 = vmatpush.bf16.msra.mxu3 %v4714_v27 }
 0x291   :  { %1303 = vmatpush.bf16.msra.mxu0 %v4712_v24  ;;  %1316 = vmatpush.bf16.msra.mxu1 %v4717_v30 }
 0x292   :  { %1329 = vmatpush.bf16.msra.mxu2 %v4720_v36  ;;  %1342 = vmatpush.bf16.msra.mxu3 %v4726_v41 }
 0x295   :  { %1304 = vmatpush.bf16.msra.mxu0 %v4724_v37  ;;  %1317 = vmatpush.bf16.msra.mxu1 %v4729_v42 }
 0x296   :  { %1330 = vmatpush.bf16.msra.mxu2 %v4732_v44  ;;  %1343 = vmatpush.bf16.msra.mxu3 %v4741_v60 }
 0x299   :  { %1305 = vmatpush.bf16.msra.mxu0 %v4736_v48  ;;  %1318 = vmatpush.bf16.msra.mxu1 %v4739_v56 }
 0x29a   :  { %1331 = vmatpush.bf16.msra.mxu2 %v4744_v4  ;;  %1344 = vmatpush.bf16.msra.mxu3 %v4750_v8 }
 0x29d   :  { %1306 = vmatpush.bf16.msra.mxu0 %v4748_v7  ;;  %1319 = vmatpush.bf16.msra.mxu1 %v4753_v13 }
 0x29e   :  { %1332 = vmatpush.bf16.msra.mxu2 %v4756_v20  ;;  %1345 = vmatpush.bf16.msra.mxu3 %v4760_v21 }
 0x2fc   :  { %v1054_v15 = vpop.f32.mrf.mxu0  ;;  %v1067_v18 = vpop.f32.mrf.mxu1 }
 0x2fd   :  { %v1097_v58 = vadd.f32 %v1054_v15, %v370_v63  ;;  %v1098_v34 = vadd.f32 %v1067_v18, %v399_v6  ;;  %v5819_v63 = vld [vmem:[#allocation31_spill] sm:$0xff] }
 0x2fe   :  { %v457_v2 = vadd.f32 %v5819_v63, %v5809_v29 }
 0x2ff   :  { %v3649_v0 = vmul.f32 -1.442695, %v1097_v58  ;;  %v3650_v40 = vmul.f32 -1.442695, %v1098_v34 }
 0x301   :  { %4177 = vpow2.f32 %v3649_v0 }
 0x302   :  { %4179 = vpow2.f32 %v3650_v40 }
 0x303   :  { %v1080_v35 = vpop.f32.mrf.mxu2  ;;  %v1093_v33 = vpop.f32.mrf.mxu3 }
 0x304   :  { %v1099_v5 = vadd.f32 %v1080_v35, %v428_v12  ;;  %v1056_v17 = vpop.f32.mrf.mxu0  ;;  %v1069_v19 = vpop.f32.mrf.mxu1  ;;  %v1100_v18 = vadd.f32 %v1093_v33, %v457_v2 }
 0x306   :  { %v3651_v28 = vmul.f32 -1.442695, %v1099_v5 }
 0x307   :  { %v4178_v52 = vpop.eup %4177 }
 0x308   :  { %v4180_v25 = vpop.eup %4179  ;;  %v1110_v31 = vadd.f32 1.0, %v4178_v52  ;;  %4181 = vpow2.f32 %v3651_v28 }
 0x309   :  { %v1111_v57 = vadd.f32 1.0, %v4180_v25 }
 0x30a   :  { %4183 = vrcp.f32 %v1110_v31  ;;  %v1124_v12 = vand.u32 2147483648, %v1110_v31  ;;  %v1122_v17 = vand.u32 2147483647, %v1110_v31  ;;  %vm1118_vm6 = vweird.f32 %v1110_v31 }
 0x30b   :  { %4185 = vrcp.f32 %v1111_v57  ;;  %v1082_v46 = vpop.f32.mrf.mxu2  ;;  %v1095_v39 = vpop.f32.mrf.mxu3  ;;  %v1139_v35 = vand.u32 2147483648, %v1111_v57  ;;  %v1137_v28 = vand.u32 2147483647, %v1111_v57  ;;  %vm1133_vm7 = vweird.f32 %v1111_v57 }
 0x30c   :  { %v1125_v46 = vor.u32 1.1754944e-38, %v1124_v12  ;;  %vm1123_vm10 = vcmp.eq.f32.partialorder %v1122_v17, 8.507059e+37 }
 0x30d   :  { %vm1138_vm11 = vcmp.eq.f32.partialorder %v1137_v28, 8.507059e+37 }
 0x30e   :  { %v4182_v54 = vpop.eup %4181 }
 0x30f   :  { %v1112_v6 = vadd.f32 1.0, %v4182_v54  ;;  %v1140_v54 = vor.u32 1.1754944e-38, %v1139_v35 }
 0x310   :  { %v4184_v15 = vpop.eup %4183 }
 0x311   :  { %v4186_v58 = vpop.eup %4185  ;;  %v1114_v34 = vmul.f32 %v4184_v15, %v1110_v31  ;;  %4187 = vrcp.f32 %v1112_v6  ;;  %vm1119_vm4 = vweird.f32 %v4184_v15  ;;  %v1154_v12 = vand.u32 2147483648, %v1112_v6 }
 0x312   :  { %v1129_v0 = vmul.f32 %v4186_v58, %v1111_v57  ;;  %4189 = vtanh.f32 %v1100_v18  ;;  %vm1134_vm5 = vweird.f32 %v4186_v58  ;;  %vm1120_vm8 = vmor %vm1118_vm6, %vm1119_vm4  ;;  %vm1148_vm13 = vweird.f32 %v1112_v6 }
 0x313   :  { %v1115_v40 = vsub.f32 1.0, %v1114_v34  ;;  %vm1135_vm9 = vmor %vm1133_vm7, %vm1134_vm5  ;;  %v1155_v17 = vor.u32 1.1754944e-38, %v1154_v12 }
 0x314   :  { %v1130_v22 = vsub.f32 1.0, %v1129_v0 }
 0x315   :  { %v1116_v5 = vmul.f32 %v4184_v15, %v1115_v40 }
 0x316   :  { %v1131_v19 = vmul.f32 %v4186_v58, %v1130_v22 }
 0x317   :  { %v4188_v52 = vpop.eup %4187  ;;  %v1117_v25 = vadd.f32 %v4184_v15, %v1116_v5 }
 0x318   :  { %v1144_v33 = vmul.f32 %v4188_v52, %v1112_v6  ;;  %v1132_v39 = vadd.f32 %v4186_v58, %v1131_v19  ;;  %v4190_v2 = vpop.eup %4189  ;;  %vm1149_vm12 = vweird.f32 %v4188_v52 }
 0x319   :  { %v1121_v63 = vsel %vm1120_vm8, %v4184_v15, %v1117_v25  ;;  %v1152_v15 = vand.u32 2147483647, %v1112_v6  ;;  %vm1150_vm14 = vmor %vm1148_vm13, %vm1149_vm12 }
 0x31a   :  { %v1145_v18 = vsub.f32 1.0, %v1144_v33  ;;  %v1126_v34 = vsel %vm1123_vm10, %v1125_v46, %v1121_v63  ;;  %v1136_v0 = vsel %vm1135_vm9, %v4186_v58, %v1132_v39  ;;  %v5822_v33 = vld [vmem:[#allocation33_spill] sm:$0xff] }
 0x31b   :  { %v1141_v40 = vsel %vm1138_vm11, %v1140_v54, %v1136_v0  ;;  %v1160_v22 = vmul.f32 %v4190_v2, %v1126_v34  ;;  %vm1153_vm15 = vcmp.eq.f32.partialorder %v1152_v15, 8.507059e+37 }
 0x31c   :  { %v1146_v50 = vmul.f32 %v4188_v52, %v1145_v18  ;;  %v1159_v5 = vmul.f32 %v1141_v40, %v5008_v10  ;;  %v5823_v18 = vld [vmem:[#allocation34_spill] sm:$0xff] }
 0x31e   :  { %v5056_v31 = vadd.f32 %v1160_v22, %v1159_v5  ;;  %v1147_v57 = vadd.f32 %v4188_v52, %v1146_v50 }
 0x320   :  { %4191 = vtanh.f32 %v5056_v31  ;;  %v1151_v35 = vsel %vm1150_vm14, %v4188_v52, %v1147_v57  ;;  %v5821_v52 = vld [vmem:[#allocation32_spill] sm:$0xff] }
 0x321   :  { %v1156_v19 = vsel %vm1153_vm15, %v1155_v17, %v1151_v35 }
 0x326   :  { %v4192_v58 = vpop.eup %4191 }
 0x327   :  { %v5059_v28 = vmul.f32 %v4192_v58, %v1156_v19 }
 0x329   :  { %5820 = vst [vmem:[#allocation22_spill] sm:$0xff] %v5059_v28  ;;  %v1171_v10 = vpack.c.bf16 %v5059_v28, %v5059_v28 }
 0x32b   :  { %1180 = vmatmul.bf16.vlgmr.msrb.gmra.mxu0 %v1171_v10  ;;  %1193 = vmatmul.bf16.vlgmr.msrb.gmra.mxu1 %v1171_v10 }
 0x32c   :  { %1206 = vmatmul.bf16.vlgmr.msrb.gmra.mxu2 %v1171_v10  ;;  %1219 = vmatmul.bf16.vlgmr.msrb.gmra.mxu3 %v1171_v10 }
 0x32d   :  { %1426 = vmatpush.bf16.msrb.mxu0 %v4669_v38  ;;  %1439 = vmatpush.bf16.msrb.mxu1 %v4671_v43 }
 0x32e   :  { %1452 = vmatpush.bf16.msrb.mxu2 %v4673_v49  ;;  %1465 = vmatpush.bf16.msrb.mxu3 %v4678_v53 }
 0x331   :  { %1427 = vmatpush.bf16.msrb.mxu0 %v4676_v51  ;;  %1440 = vmatpush.bf16.msrb.mxu1 %v4681_v55 }
 0x332   :  { %1453 = vmatpush.bf16.msrb.mxu2 %v4684_v61  ;;  %1466 = vmatpush.bf16.msrb.mxu3 %v4690_v1 }
 0x335   :  { %1428 = vmatpush.bf16.msrb.mxu0 %v4688_v62  ;;  %1441 = vmatpush.bf16.msrb.mxu1 %v4693_v3 }
 0x336   :  { %1454 = vmatpush.bf16.msrb.mxu2 %v4696_v9  ;;  %1467 = vmatpush.bf16.msrb.mxu3 %v4702_v14 }
 0x339   :  { %1429 = vmatpush.bf16.msrb.mxu0 %v4700_v11  ;;  %1442 = vmatpush.bf16.msrb.mxu1 %v4705_v16 }
 0x33a   :  { %1455 = vmatpush.bf16.msrb.mxu2 %v4708_v23  ;;  %1468 = vmatpush.bf16.msrb.mxu3 %v4714_v27 }
 0x33d   :  { %1430 = vmatpush.bf16.msrb.mxu0 %v4712_v24  ;;  %1443 = vmatpush.bf16.msrb.mxu1 %v4717_v30 }
 0x33e   :  { %1456 = vmatpush.bf16.msrb.mxu2 %v4720_v36  ;;  %1469 = vmatpush.bf16.msrb.mxu3 %v4726_v41 }
 0x341   :  { %1431 = vmatpush.bf16.msrb.mxu0 %v4724_v37  ;;  %1444 = vmatpush.bf16.msrb.mxu1 %v4729_v42 }
 0x342   :  { %1457 = vmatpush.bf16.msrb.mxu2 %v4732_v44  ;;  %1470 = vmatpush.bf16.msrb.mxu3 %v4741_v60 }
 0x345   :  { %1432 = vmatpush.bf16.msrb.mxu0 %v4736_v48  ;;  %1445 = vmatpush.bf16.msrb.mxu1 %v4739_v56 }
 0x346   :  { %1458 = vmatpush.bf16.msrb.mxu2 %v4744_v4  ;;  %1471 = vmatpush.bf16.msrb.mxu3 %v4750_v8 }
 0x349   :  { %1433 = vmatpush.bf16.msrb.mxu0 %v4748_v7  ;;  %1446 = vmatpush.bf16.msrb.mxu1 %v4753_v13 }
 0x34a   :  { %1459 = vmatpush.bf16.msrb.mxu2 %v4756_v20  ;;  %1472 = vmatpush.bf16.msrb.mxu3 %v4760_v21 }
 0x3a8   :  { %v1181_v50 = vpop.f32.mrf.mxu0  ;;  %v1194_v6 = vpop.f32.mrf.mxu1 }
 0x3a9   :  { %v1224_v25 = vadd.f32 %v1181_v50, %v5821_v52  ;;  %v1225_v46 = vadd.f32 %v1194_v6, %v5822_v33  ;;  %v5824_v50 = vld [vmem:[#allocation36_spill] sm:$0xff] }
 0x3ab   :  { %v3652_v39 = vmul.f32 -1.442695, %v1224_v25  ;;  %v3653_v54 = vmul.f32 -1.442695, %v1225_v46 }
 0x3ad   :  { %4193 = vpow2.f32 %v3652_v39 }
 0x3ae   :  { %4195 = vpow2.f32 %v3653_v54 }
 0x3af   :  { %v1207_v63 = vpop.f32.mrf.mxu2  ;;  %v1220_v2 = vpop.f32.mrf.mxu3 }
 0x3b0   :  { %v1226_v34 = vadd.f32 %v1207_v63, %v5823_v18  ;;  %v1183_v0 = vpop.f32.mrf.mxu0  ;;  %v1196_v40 = vpop.f32.mrf.mxu1  ;;  %v1227_v6 = vadd.f32 %v1220_v2, %v5824_v50 }
 0x3b2   :  { %v3654_v22 = vmul.f32 -1.442695, %v1226_v34 }
 0x3b3   :  { %v4194_v5 = vpop.eup %4193 }
 0x3b4   :  { %v4196_v57 = vpop.eup %4195  ;;  %v1237_v12 = vadd.f32 1.0, %v4194_v5  ;;  %4197 = vpow2.f32 %v3654_v22 }
 0x3b5   :  { %v1238_v15 = vadd.f32 1.0, %v4196_v57 }
 0x3b6   :  { %4199 = vrcp.f32 %v1237_v12  ;;  %v1251_v54 = vand.u32 2147483648, %v1237_v12  ;;  %v1249_v34 = vand.u32 2147483647, %v1237_v12  ;;  %vm1245_vm2 = vweird.f32 %v1237_v12 }
 0x3b7   :  { %4201 = vrcp.f32 %v1238_v15  ;;  %v1209_v35 = vpop.f32.mrf.mxu2  ;;  %v1222_v17 = vpop.f32.mrf.mxu3  ;;  %v1266_v63 = vand.u32 2147483648, %v1238_v15  ;;  %v1264_v40 = vand.u32 2147483647, %v1238_v15  ;;  %vm1260_vm3 = vweird.f32 %v1238_v15 }
 0x3b8   :  { %v1252_v57 = vor.u32 1.1754944e-38, %v1251_v54  ;;  %vm1250_vm6 = vcmp.eq.f32.partialorder %v1249_v34, 8.507059e+37 }
 0x3b9   :  { %v1267_v17 = vor.u32 1.1754944e-38, %v1266_v63  ;;  %vm1265_vm7 = vcmp.eq.f32.partialorder %v1264_v40, 8.507059e+37 }
 0x3ba   :  { %v4198_v58 = vpop.eup %4197 }
 0x3bb   :  { %v1239_v19 = vadd.f32 1.0, %v4198_v58 }
 0x3bc   :  { %v4200_v10 = vpop.eup %4199 }
 0x3bd   :  { %v4202_v52 = vpop.eup %4201  ;;  %v1241_v25 = vmul.f32 %v4200_v10, %v1237_v12  ;;  %4203 = vrcp.f32 %v1239_v19  ;;  %vm1246_vm0 = vweird.f32 %v4200_v10  ;;  %v1281_v54 = vand.u32 2147483648, %v1239_v19 }
 0x3be   :  { %v1256_v33 = vmul.f32 %v4202_v52, %v1238_v15  ;;  %4205 = vtanh.f32 %v1227_v6  ;;  %vm1261_vm1 = vweird.f32 %v4202_v52  ;;  %vm1247_vm4 = vmor %vm1245_vm2, %vm1246_vm0  ;;  %vm1275_vm9 = vweird.f32 %v1239_v19 }
 0x3bf   :  { %v1242_v46 = vsub.f32 1.0, %v1241_v25  ;;  %vm1262_vm5 = vmor %vm1260_vm3, %vm1261_vm1  ;;  %v1282_v34 = vor.u32 1.1754944e-38, %v1281_v54 }
 0x3c0   :  { %v1257_v39 = vsub.f32 1.0, %v1256_v33 }
 0x3c1   :  { %v1243_v18 = vmul.f32 %v4200_v10, %v1242_v46 }
 0x3c2   :  { %v1258_v0 = vmul.f32 %v4202_v52, %v1257_v39 }
 0x3c3   :  { %v4204_v22 = vpop.eup %4203  ;;  %v1244_v5 = vadd.f32 %v4200_v10, %v1243_v18 }
 0x3c4   :  { %v1271_v2 = vmul.f32 %v4204_v22, %v1239_v19  ;;  %v1259_v35 = vadd.f32 %v4202_v52, %v1258_v0  ;;  %v4206_v50 = vpop.eup %4205  ;;  %vm1276_vm8 = vweird.f32 %v4204_v22 }
 0x3c5   :  { %v1248_v58 = vsel %vm1247_vm4, %v4200_v10, %v1244_v5  ;;  %v1279_v10 = vand.u32 2147483647, %v1239_v19  ;;  %vm1277_vm10 = vmor %vm1275_vm9, %vm1276_vm8 }
 0x3c6   :  { %v1272_v6 = vsub.f32 1.0, %v1271_v2  ;;  %v1253_v25 = vsel %vm1250_vm6, %v1252_v57, %v1248_v58  ;;  %v1263_v33 = vsel %vm1262_vm5, %v4202_v52, %v1259_v35 }
 0x3c7   :  { %v1268_v46 = vsel %vm1265_vm7, %v1267_v17, %v1263_v33  ;;  %v1287_v39 = vmul.f32 %v4206_v50, %v1253_v25  ;;  %vm1280_vm11 = vcmp.eq.f32.partialorder %v1279_v10, 8.507059e+37 }
 0x3c8   :  { %v1273_v28 = vmul.f32 %v4204_v22, %v1272_v6  ;;  %v1286_v18 = vmul.f32 %v1268_v46, %v5056_v31 }
 0x3ca   :  { %v5100_v12 = vadd.f32 %v1287_v39, %v1286_v18  ;;  %v1274_v15 = vadd.f32 %v4204_v22, %v1273_v28 }
 0x3cc   :  { %4207 = vtanh.f32 %v5100_v12  ;;  %v1278_v63 = vsel %vm1277_vm10, %v4204_v22, %v1274_v15 }
 0x3cd   :  { %v1283_v0 = vsel %vm1280_vm11, %v1282_v34, %v1278_v63 }
 0x3d2   :  { %v4208_v52 = vpop.eup %4207 }
 0x3d3   :  { %v5103_v40 = vmul.f32 %v4208_v52, %v1283_v0 }
 0x3d5   :  { %v1298_v31 = vpack.c.bf16 %v5103_v40, %v5103_v40 }
 0x3d7   :  { %1307 = vmatmul.bf16.vlgmr.msra.gmra.mxu0 %v1298_v31  ;;  %1320 = vmatmul.bf16.vlgmr.msra.gmra.mxu1 %v1298_v31 }
 0x3d8   :  { %1333 = vmatmul.bf16.vlgmr.msra.gmra.mxu2 %v1298_v31  ;;  %1346 = vmatmul.bf16.vlgmr.msra.gmra.mxu3 %v1298_v31 }
 0x3d9   :  { %1553 = vmatpush.bf16.msra.mxu0 %v4669_v38  ;;  %1566 = vmatpush.bf16.msra.mxu1 %v4671_v43  ;;  %v5825_v38 = vld [vmem:[#allocation35_spill] sm:$0xff] }
 0x3da   :  { %1579 = vmatpush.bf16.msra.mxu2 %v4673_v49  ;;  %1592 = vmatpush.bf16.msra.mxu3 %v4678_v53  ;;  %v375_v43 = vadd.f32 %v5825_v38, %v4839_v45  ;;  %v5826_v49 = vld [vmem:[#allocation37_spill] sm:$0xff] }
 0x3dd   :  { %1554 = vmatpush.bf16.msra.mxu0 %v4676_v51  ;;  %1567 = vmatpush.bf16.msra.mxu1 %v4681_v55  ;;  %v404_v51 = vadd.f32 %v5826_v49, %v4843_v47 }
 0x3de   :  { %1580 = vmatpush.bf16.msra.mxu2 %v4684_v61  ;;  %1593 = vmatpush.bf16.msra.mxu3 %v4690_v1 }
 0x3e1   :  { %1555 = vmatpush.bf16.msra.mxu0 %v4688_v62  ;;  %1568 = vmatpush.bf16.msra.mxu1 %v4693_v3 }
 0x3e2   :  { %1581 = vmatpush.bf16.msra.mxu2 %v4696_v9  ;;  %1594 = vmatpush.bf16.msra.mxu3 %v4702_v14  ;;  %v5827_v9 = vld [vmem:[#allocation38_spill] sm:$0xff] }
 0x3e5   :  { %1556 = vmatpush.bf16.msra.mxu0 %v4700_v11  ;;  %1569 = vmatpush.bf16.msra.mxu1 %v4705_v16  ;;  %v433_v11 = vadd.f32 %v5827_v9, %v4853_v59  ;;  %v4071_v9 = vld [vmem:[#allocation7 + $0x1ec] sm:$0xf0] }
 0x3e6   :  { %1582 = vmatpush.bf16.msra.mxu2 %v4708_v23  ;;  %1595 = vmatpush.bf16.msra.mxu3 %v4714_v27 }
 0x3e9   :  { %1557 = vmatpush.bf16.msra.mxu0 %v4712_v24  ;;  %1570 = vmatpush.bf16.msra.mxu1 %v4717_v30 }
 0x3ea   :  { %1583 = vmatpush.bf16.msra.mxu2 %v4720_v36  ;;  %1596 = vmatpush.bf16.msra.mxu3 %v4726_v41 }
 0x3ed   :  { %1558 = vmatpush.bf16.msra.mxu0 %v4724_v37  ;;  %1571 = vmatpush.bf16.msra.mxu1 %v4729_v42 }
 0x3ee   :  { %1584 = vmatpush.bf16.msra.mxu2 %v4732_v44  ;;  %1597 = vmatpush.bf16.msra.mxu3 %v4741_v60  ;;  %v5828_v60 = vld [vmem:[#allocation39_spill] sm:$0xff] }
 0x3f1   :  { %1559 = vmatpush.bf16.msra.mxu0 %v4736_v48  ;;  %1572 = vmatpush.bf16.msra.mxu1 %v4739_v56 }
 0x3f2   :  { %1585 = vmatpush.bf16.msra.mxu2 %v4744_v4  ;;  %1598 = vmatpush.bf16.msra.mxu3 %v4750_v8  ;;  %v462_v4 = vadd.f32 %v5828_v60, %v5809_v29  ;;  %v5830_v60 = vld [vmem:[#allocation41_spill] sm:$0xff] }
 0x3f5   :  { %1560 = vmatpush.bf16.msra.mxu0 %v4748_v7  ;;  %1573 = vmatpush.bf16.msra.mxu1 %v4753_v13 }
 0x3f6   :  { %1586 = vmatpush.bf16.msra.mxu2 %v4756_v20  ;;  %1599 = vmatpush.bf16.msra.mxu3 %v4760_v21 }
 0x454   :  { %v1308_v53 = vpop.f32.mrf.mxu0  ;;  %v1321_v55 = vpop.f32.mrf.mxu1 }
 0x455   :  { %v1351_v61 = vadd.f32 %v1308_v53, %v375_v43  ;;  %v1352_v62 = vadd.f32 %v1321_v55, %v404_v51 }
 0x457   :  { %v3655_v1 = vmul.f32 -1.442695, %v1351_v61  ;;  %v3656_v3 = vmul.f32 -1.442695, %v1352_v62 }
 0x459   :  { %4209 = vpow2.f32 %v3655_v1 }
 0x45a   :  { %4211 = vpow2.f32 %v3656_v3  ;;  %v3778_v3 = vld [vmem:[#allocation7 + $0x1e0] sm:$0xf] }
 0x45b   :  { %v1334_v14 = vpop.f32.mrf.mxu2  ;;  %v1347_v16 = vpop.f32.mrf.mxu3 }
 0x45c   :  { %v1353_v23 = vadd.f32 %v1334_v14, %v433_v11  ;;  %v1310_v24 = vpop.f32.mrf.mxu0  ;;  %v1323_v27 = vpop.f32.mrf.mxu1  ;;  %v1354_v13 = vadd.f32 %v1347_v16, %v462_v4  ;;  %v4069_v11 = vld [vmem:[#allocation7 + $0x1e4] sm:$0xf]  ;;  %v3779_v14 = vor.u32 %v4071_v9, %v3778_v3  ;;  %v3780_v16 = vld [vmem:[#allocation7 + $0x1f0] sm:$0xf0]  ;;  %v3738_v3 = vld [vmem:[#allocation7 + $0x188] sm:$0xf] }
 0x45d   :  { %v4072_v24 = vld [vmem:[#allocation7 + $0x1f4] sm:$0xf0]  ;;  %v3783_v27 = vor.u32 %v4069_v11, %v3780_v16  ;;  %v4058_v16 = vld [vmem:[#allocation7 + $0x18c] sm:$0xf] }
 0x45e   :  { %v3657_v30 = vmul.f32 -1.442695, %v1353_v23  ;;  %v3786_v23 = vld [vmem:[#allocation7 + $0x1e8] sm:$0xf]  ;;  %v4060_v9 = vld [vmem:[#allocation7 + $0x194] sm:$0xf0] }
 0x45f   :  { %v4210_v36 = vpop.eup %4209 }
 0x460   :  { %v4212_v37 = vpop.eup %4211  ;;  %v1364_v41 = vadd.f32 1.0, %v4210_v36  ;;  %4213 = vpow2.f32 %v3657_v30  ;;  %v3787_v30 = vor.u32 %v4072_v24, %v3786_v23  ;;  %v4070_v36 = vld [vmem:[#allocation7 + $0x1ec] sm:$0xf]  ;;  %v3740_v23 = vld [vmem:[#allocation7 + $0x198] sm:$0xf0] }
 0x461   :  { %v1365_v42 = vadd.f32 1.0, %v4212_v37  ;;  %v3788_v37 = vld [vmem:[#allocation7 + $0x1f8] sm:$0xf0] }
 0x462   :  { %4215 = vrcp.f32 %v1364_v41  ;;  %v1378_v5 = vand.u32 2147483648, %v1364_v41  ;;  %v1376_v35 = vand.u32 2147483647, %v1364_v41  ;;  %vm1372_vm14 = vweird.f32 %v1364_v41 }
 0x463   :  { %4217 = vrcp.f32 %v1365_v42  ;;  %v1336_v44 = vpop.f32.mrf.mxu2  ;;  %v1349_v48 = vpop.f32.mrf.mxu3  ;;  %v1393_v2 = vand.u32 2147483648, %v1365_v42  ;;  %v1391_v58 = vand.u32 2147483647, %v1365_v42  ;;  %vm1387_vm15 = vweird.f32 %v1365_v42 }
 0x464   :  { %v1379_v33 = vor.u32 1.1754944e-38, %v1378_v5  ;;  %vm1377_vm2 = vcmp.eq.f32.partialorder %v1376_v35, 8.507059e+37  ;;  %v3791_v44 = vor.u32 %v4070_v36, %v3788_v37  ;;  %v5829_v48 = vld [vmem:[#allocation40_spill] sm:$0xff]  ;;  %v4066_v35 = vld [vmem:[#allocation7 + $0x1cc] sm:$0xf] }
 0x465   :  { %v1394_v39 = vor.u32 1.1754944e-38, %v1393_v2  ;;  %vm1392_vm3 = vcmp.eq.f32.partialorder %v1391_v58, 8.507059e+37  ;;  %v3746_v58 = vld [vmem:[#allocation7 + $0x1a0] sm:$0xf] }
 0x466   :  { %v4214_v56 = vpop.eup %4213 }
 0x467   :  { %v1366_v7 = vadd.f32 1.0, %v4214_v56 }
 0x468   :  { %v4216_v8 = vpop.eup %4215 }
 0x469   :  { %v4218_v20 = vpop.eup %4217  ;;  %v1368_v21 = vmul.f32 %v4216_v8, %v1364_v41  ;;  %4219 = vrcp.f32 %v1366_v7  ;;  %vm1373_vm12 = vweird.f32 %v4216_v8  ;;  %v1408_v49 = vand.u32 2147483648, %v1366_v7 }
 0x46a   :  { %v1383_v28 = vmul.f32 %v4218_v20, %v1365_v42  ;;  %4221 = vtanh.f32 %v1354_v13  ;;  %vm1388_vm13 = vweird.f32 %v4218_v20  ;;  %vm1374_vm0 = vmor %vm1372_vm14, %vm1373_vm12  ;;  %vm1402_vm5 = vweird.f32 %v1366_v7  ;;  %v4065_v13 = vld [vmem:[#allocation7 + $0x1c4] sm:$0xf] }
 0x46b   :  { %v1369_v19 = vsub.f32 1.0, %v1368_v21  ;;  %vm1389_vm1 = vmor %vm1387_vm15, %vm1388_vm13  ;;  %v1406_v51 = vand.u32 2147483647, %v1366_v7  ;;  %v1409_v55 = vor.u32 1.1754944e-38, %v1408_v49  ;;  %v3764_v21 = vld [vmem:[#allocation7 + $0x1d0] sm:$0xf0] }
 0x46c   :  { %v1384_v22 = vsub.f32 1.0, %v1383_v28  ;;  %v3770_v28 = vld [vmem:[#allocation7 + $0x1c8] sm:$0xf]  ;;  %v3767_v2 = vor.u32 %v4065_v13, %v3764_v21  ;;  %v4057_v49 = vld [vmem:[#allocation7 + $0x184] sm:$0xf] }
 0x46d   :  { %v1370_v57 = vmul.f32 %v4216_v8, %v1369_v19  ;;  %vm1407_vm7 = vcmp.eq.f32.partialorder %v1406_v51, 8.507059e+37  ;;  %v4068_v19 = vld [vmem:[#allocation7 + $0x1d4] sm:$0xf0]  ;;  %v5831_v51 = vld [vmem:[#allocation42_spill] sm:$0xff] }
 0x46e   :  { %v1385_v17 = vmul.f32 %v4218_v20, %v1384_v22  ;;  %v4056_v21 = vld [vmem:[#allocation7 + $0x174] sm:$0xf0] }
 0x46f   :  { %v4220_v50 = vpop.eup %4219  ;;  %v1371_v6 = vadd.f32 %v4216_v8, %v1370_v57  ;;  %v3771_v57 = vor.u32 %v4068_v19, %v3770_v28  ;;  %v5832_v19 = vld [vmem:[#allocation44_spill] sm:$0xff] }
 0x470   :  { %v1398_v25 = vmul.f32 %v4220_v50, %v1366_v7  ;;  %v1386_v46 = vadd.f32 %v4218_v20, %v1385_v17  ;;  %v4222_v15 = vpop.eup %4221  ;;  %vm1403_vm4 = vweird.f32 %v4220_v50  ;;  %v3762_v7 = vld [vmem:[#allocation7 + $0x1c0] sm:$0xf]  ;;  %v3772_v17 = vld [vmem:[#allocation7 + $0x1d8] sm:$0xf0] }
 0x471   :  { %v1375_v18 = vsel %vm1374_vm0, %v4216_v8, %v1371_v6  ;;  %vm1404_vm6 = vmor %vm1402_vm5, %vm1403_vm4  ;;  %v4067_v8 = vld [vmem:[#allocation7 + $0x1cc] sm:$0xf0]  ;;  %v3775_v6 = vor.u32 %v4066_v35, %v3772_v17  ;;  %v3698_v35 = vld [vmem:[#allocation7 + $0x140] sm:$0xf] }
 0x472   :  { %v1399_v54 = vsub.f32 1.0, %v1398_v25  ;;  %v1380_v10 = vsel %vm1377_vm2, %v1379_v33, %v1375_v18  ;;  %v1390_v63 = vsel %vm1389_vm1, %v4218_v20, %v1386_v46  ;;  %v3763_v20 = vor.u32 %v4067_v8, %v3762_v7  ;;  %v4061_v33 = vld [vmem:[#allocation7 + $0x1a4] sm:$0xf]  ;;  %v3748_v46 = vld [vmem:[#allocation7 + $0x1b0] sm:$0xf0] }
 0x473   :  { %v1395_v34 = vsel %vm1392_vm3, %v1394_v39, %v1390_v63  ;;  %v1414_v52 = vmul.f32 %v4222_v15, %v1380_v10  ;;  %v3754_v39 = vld [vmem:[#allocation7 + $0x1a8] sm:$0xf]  ;;  %v3751_v18 = vor.u32 %v4061_v33, %v3748_v46  ;;  %v4064_v15 = vld [vmem:[#allocation7 + $0x1b4] sm:$0xf0]  ;;  %v3756_v10 = vld [vmem:[#allocation7 + $0x1b8] sm:$0xf0] }
 0x474   :  { %v1400_v0 = vmul.f32 %v4220_v50, %v1399_v54  ;;  %v1413_v31 = vmul.f32 %v1395_v34, %v5100_v12  ;;  %v4062_v54 = vld [vmem:[#allocation7 + $0x1ac] sm:$0xf]  ;;  %v3716_v7 = vld [vmem:[#allocation7 + $0x170] sm:$0xf0] }
 0x475   :  { %v3700_v46 = vld [vmem:[#allocation7 + $0x150] sm:$0xf0] }
 0x476   :  { %v5148_v38 = vadd.f32 %v1414_v52, %v1413_v31  ;;  %v1401_v43 = vadd.f32 %v4220_v50, %v1400_v0  ;;  %v3755_v52 = vor.u32 %v4064_v15, %v3754_v39  ;;  %v3759_v0 = vor.u32 %v4062_v54, %v3756_v10  ;;  %v3730_v31 = vld [vmem:[#allocation7 + $0x180] sm:$0xf]  ;;  %v3706_v39 = vld [vmem:[#allocation7 + $0x148] sm:$0xf]  ;;  %v4050_v10 = vld [vmem:[#allocation7 + $0x14c] sm:$0xf] }
 0x478   :  { %4223 = vtanh.f32 %v5148_v38  ;;  %v1405_v53 = vsel %vm1404_vm6, %v4220_v50, %v1401_v43  ;;  %v4063_v50 = vld [vmem:[#allocation7 + $0x1ac] sm:$0xf0] }
 0x479   :  { %v1410_v62 = vsel %vm1407_vm7, %v1409_v55, %v1405_v53  ;;  %v3747_v25 = vor.u32 %v4063_v50, %v3746_v58  ;;  %v4059_v43 = vld [vmem:[#allocation7 + $0x18c] sm:$0xf0] }
 0x47a   :  { %v4051_v50 = vld [vmem:[#allocation7 + $0x14c] sm:$0xf0] }
 0x47b   :  { %v3699_v33 = vor.u32 %v4051_v50, %v3698_v35  ;;  %v3676_v35 = vld [vmem:[#allocation7 + $0x118] sm:$0xf0] }
 0x47e   :  { %v4224_v61 = vpop.eup %4223 }
 0x47f   :  { %v5151_v1 = vmul.f32 %v4224_v61, %v1410_v62  ;;  %v3731_v62 = vor.u32 %v4059_v43, %v3730_v31  ;;  %v4047_v43 = vld [vmem:[#allocation7 + $0x12c] sm:$0xf0] }
 0x481   :  { %v1425_v12 = vpack.c.bf16 %v5151_v1, %v5151_v1 }
 0x483   :  { %1434 = vmatmul.bf16.vlgmr.msrb.gmra.mxu0 %v1425_v12  ;;  %1447 = vmatmul.bf16.vlgmr.msrb.gmra.mxu1 %v1425_v12 }
 0x484   :  { %1460 = vmatmul.bf16.vlgmr.msrb.gmra.mxu2 %v1425_v12  ;;  %1473 = vmatmul.bf16.vlgmr.msrb.gmra.mxu3 %v1425_v12  ;;  %v3732_v12 = vld [vmem:[#allocation7 + $0x190] sm:$0xf0] }
 0x485   :  { %1925 = vmatpush.bf16.msrb.mxu0 %v3779_v14  ;;  %1954 = vmatpush.bf16.msrb.mxu1 %v3783_v27  ;;  %v3735_v11 = vor.u32 %v4057_v49, %v3732_v12  ;;  %v3739_v14 = vor.u32 %v4060_v9, %v3738_v3  ;;  %v5835_v3 = vld [vmem:[#allocation25_spill] sm:$0xff] }
 0x486   :  { %1983 = vmatpush.bf16.msrb.mxu2 %v3787_v30  ;;  %2012 = vmatpush.bf16.msrb.mxu3 %v3791_v44  ;;  %v3743_v30 = vor.u32 %v4058_v16, %v3740_v23 }
 0x489   :  { %1926 = vmatpush.bf16.msrb.mxu0 %v3763_v20  ;;  %1955 = vmatpush.bf16.msrb.mxu1 %v3767_v2  ;;  %v3722_v20 = vld [vmem:[#allocation7 + $0x168] sm:$0xf]  ;;  %v4054_v2 = vld [vmem:[#allocation7 + $0x16c] sm:$0xf] }
 0x48a   :  { %1984 = vmatpush.bf16.msrb.mxu2 %v3771_v57  ;;  %2013 = vmatpush.bf16.msrb.mxu3 %v3775_v6  ;;  %v3724_v57 = vld [vmem:[#allocation7 + $0x178] sm:$0xf0]  ;;  %v4049_v6 = vld [vmem:[#allocation7 + $0x144] sm:$0xf] }
 0x48b   :  { %v3727_v58 = vor.u32 %v4054_v2, %v3724_v57  ;;  %v4042_v57 = vld [vmem:[#allocation7 + $0x10c] sm:$0xf] }
 0x48d   :  { %1927 = vmatpush.bf16.msrb.mxu0 %v3747_v25  ;;  %1956 = vmatpush.bf16.msrb.mxu1 %v3751_v18  ;;  %v4052_v18 = vld [vmem:[#allocation7 + $0x154] sm:$0xf0] }
 0x48e   :  { %1985 = vmatpush.bf16.msrb.mxu2 %v3755_v52  ;;  %2014 = vmatpush.bf16.msrb.mxu3 %v3759_v0 }
 0x491   :  { %1928 = vmatpush.bf16.msrb.mxu0 %v3731_v62  ;;  %1957 = vmatpush.bf16.msrb.mxu1 %v3735_v11  ;;  %v3684_v62 = vld [vmem:[#allocation7 + $0x130] sm:$0xf0] }
 0x492   :  { %1986 = vmatpush.bf16.msrb.mxu2 %v3739_v14  ;;  %2015 = vmatpush.bf16.msrb.mxu3 %v3743_v30  ;;  %v3690_v14 = vld [vmem:[#allocation7 + $0x128] sm:$0xf]  ;;  %v3692_v30 = vld [vmem:[#allocation7 + $0x138] sm:$0xf0] }
 0x496   :  { %2016 = vmatpush.bf16.msrb.mxu3 %v3727_v58 }
 0x500   :  { %v1435_v41 = vpop.f32.mrf.mxu0  ;;  %v1448_v42 = vpop.f32.mrf.mxu1 }
 0x501   :  { %v1478_v56 = vadd.f32 %v1435_v41, %v5829_v48  ;;  %v1479_v4 = vadd.f32 %v1448_v42, %v5830_v60  ;;  %v3714_v42 = vld [vmem:[#allocation7 + $0x160] sm:$0xf] }
 0x503   :  { %v3658_v22 = vmul.f32 -1.442695, %v1478_v56  ;;  %v3659_v5 = vmul.f32 -1.442695, %v1479_v4  ;;  %v4055_v56 = vld [vmem:[#allocation7 + $0x16c] sm:$0xf0] }
 0x504   :  { %v3715_v60 = vor.u32 %v4055_v56, %v3714_v42  ;;  %v4053_v4 = vld [vmem:[#allocation7 + $0x164] sm:$0xf]  ;;  %v4043_v56 = vld [vmem:[#allocation7 + $0x10c] sm:$0xf0] }
 0x505   :  { %4225 = vpow2.f32 %v3658_v22  ;;  %v3719_v13 = vor.u32 %v4053_v4, %v3716_v7 }
 0x506   :  { %4227 = vpow2.f32 %v3659_v5  ;;  %1929 = vmatpush.bf16.msrb.mxu0 %v3715_v60  ;;  %v3723_v5 = vor.u32 %v4056_v21, %v3722_v20  ;;  %v4041_v60 = vld [vmem:[#allocation7 + $0x104] sm:$0xf]  ;;  %v3674_v20 = vld [vmem:[#allocation7 + $0x108] sm:$0xf]  ;;  %v4044_v21 = vld [vmem:[#allocation7 + $0x114] sm:$0xf0] }
 0x507   :  { %v1461_v63 = vpop.f32.mrf.mxu2  ;;  %v1474_v34 = vpop.f32.mrf.mxu3  ;;  %1958 = vmatpush.bf16.msrb.mxu1 %v3719_v13  ;;  %v3668_v13 = vld [vmem:[#allocation7 + $0x110] sm:$0xf0]  ;;  %v3675_v50 = vor.u32 %v4044_v21, %v3674_v20  ;;  %v3898_v20 = vld [vmem:[#allocation9 + $0x1c8] sm:$0xf]  ;;  %v4100_v21 = vld [vmem:[#allocation9 + $0x1d4] sm:$0xf0] }
 0x508   :  { %v1480_v53 = vadd.f32 %v1461_v63, %v5831_v51  ;;  %v1437_v55 = vpop.f32.mrf.mxu0  ;;  %v1450_v61 = vpop.f32.mrf.mxu1  ;;  %v1481_v22 = vadd.f32 %v1474_v34, %v5832_v19  ;;  %1987 = vmatpush.bf16.msrb.mxu2 %v3723_v5  ;;  %v3708_v63 = vld [vmem:[#allocation7 + $0x158] sm:$0xf0]  ;;  %v3682_v34 = vld [vmem:[#allocation7 + $0x120] sm:$0xf]  ;;  %v3703_v51 = vor.u32 %v4049_v6, %v3700_v46  ;;  %v3671_v58 = vor.u32 %v4041_v60, %v3668_v13  ;;  %v3892_v13 = vld [vmem:[#allocation9 + $0x1d0] sm:$0xf0] }
 0x509   :  { %v3711_v55 = vor.u32 %v4050_v10, %v3708_v63  ;;  %v4045_v61 = vld [vmem:[#allocation7 + $0x124] sm:$0xf]  ;;  %v3683_v11 = vor.u32 %v4047_v43, %v3682_v34  ;;  %v3890_v60 = vld [vmem:[#allocation9 + $0x1c0] sm:$0xf] }
 0x50a   :  { %v3660_v24 = vmul.f32 -1.442695, %v1480_v53  ;;  %1930 = vmatpush.bf16.msrb.mxu0 %v3699_v33  ;;  %v3707_v53 = vor.u32 %v4052_v18, %v3706_v39  ;;  %v3687_v23 = vor.u32 %v4045_v61, %v3684_v62  ;;  %v3679_v39 = vor.u32 %v4042_v57, %v3676_v35  ;;  %v3908_v62 = vld [vmem:[#allocation9 + $0x1f0] sm:$0xf0]  ;;  %v4093_v57 = vld [vmem:[#allocation9 + $0x1a4] sm:$0xf] }
 0x50b   :  { %v4226_v27 = vpop.eup %4225  ;;  %1959 = vmatpush.bf16.msrb.mxu1 %v3703_v51  ;;  %2017 = vmatpush.bf16.msrb.mxu3 %v3711_v55  ;;  %v1752_v51 = vpack.c.bf16 %v4967_v26, %v4919_v32  ;;  %v4101_v55 = vld [vmem:[#allocation9 + $0x1e4] sm:$0xf]  ;;  %v1754_v32 = vpack.c.bf16 %v5151_v1, %v5103_v40  ;;  %v3914_v26 = vld [vmem:[#allocation9 + $0x1e8] sm:$0xf] }
 0x50c   :  { %v4228_v36 = vpop.eup %4227  ;;  %v5158_v37 = vadd.f32 1.0, %v4226_v27  ;;  %4229 = vpow2.f32 %v3660_v24  ;;  %1988 = vmatpush.bf16.msrb.mxu2 %v3707_v53  ;;  %v4048_v24 = vld [vmem:[#allocation7 + $0x134] sm:$0xf0]  ;;  %v4046_v27 = vld [vmem:[#allocation7 + $0x12c] sm:$0xf] }
 0x50d   :  { %v5160_v41 = vadd.f32 1.0, %v4228_v36  ;;  %v3691_v42 = vor.u32 %v4048_v24, %v3690_v14  ;;  %v4103_v53 = vld [vmem:[#allocation9 + $0x1ec] sm:$0xf0]  ;;  %v4104_v14 = vld [vmem:[#allocation9 + $0x1f4] sm:$0xf0] }
 0x50e   :  { %4231 = vrcp.f32 %v5158_v37  ;;  %v1503_v8 = vand.u32 2147483647, %v5158_v37  ;;  %v1505_v31 = vand.u32 2147483648, %v5158_v37  ;;  %1931 = vmatpush.bf16.msrb.mxu0 %v3683_v11  ;;  %vm1499_vm12 = vweird.f32 %v5158_v37  ;;  %v3916_v24 = vld [vmem:[#allocation9 + $0x1f8] sm:$0xf0] }
 0x50f   :  { %4233 = vrcp.f32 %v5160_v41  ;;  %v1463_v44 = vpop.f32.mrf.mxu2  ;;  %v1476_v48 = vpop.f32.mrf.mxu3  ;;  %v1520_v0 = vand.u32 2147483648, %v5160_v41  ;;  %v1518_v9 = vand.u32 2147483647, %v5160_v41  ;;  %vm1514_vm11 = vweird.f32 %v5160_v41  ;;  %1960 = vmatpush.bf16.msrb.mxu1 %v3687_v23  ;;  %v4102_v23 = vld [vmem:[#allocation9 + $0x1ec] sm:$0xf] }
 0x510   :  { %vm5179_vm8 = vcmp.eq.f32.partialorder %v1503_v8, 8.507059e+37  ;;  %v3695_v44 = vor.u32 %v4046_v27, %v3692_v30  ;;  %v3666_v48 = vld [vmem:[#allocation7 + $0x100] sm:$0xf]  ;;  %v1506_v5 = vor.u32 1.1754944e-38, %v1505_v31  ;;  %1989 = vmatpush.bf16.msrb.mxu2 %v3691_v42  ;;  %v5229_v27 = vor.u32 %v4102_v23, %v3916_v24  ;;  %v5837_v30 = vld [vmem:[#allocation43_spill] sm:$0xff]  ;;  %v5838_v42 = vld [vmem:[#allocation45_spill] sm:$0xff] }
 0x511   :  { %v3667_v8 = vor.u32 %v4043_v56, %v3666_v48  ;;  %v1521_v19 = vor.u32 1.1754944e-38, %v1520_v0  ;;  %vm1519_vm15 = vcmp.eq.f32.partialorder %v1518_v9, 8.507059e+37  ;;  %v5836_v9 = vld [vmem:[#allocation22_spill] sm:$0xff]  ;;  %v409_v40 = vadd.f32 %v5838_v42, %v4843_v47  ;;  %v4098_v47 = vld [vmem:[#allocation9 + $0x1cc] sm:$0xf] }
 0x512   :  { %v4230_v28 = vpop.eup %4229  ;;  %2018 = vmatpush.bf16.msrb.mxu3 %v3695_v44  ;;  %v1753_v11 = vpack.c.bf16 %v5836_v9, %v5835_v3  ;;  %v3842_v3 = vld [vmem:[#allocation9 + $0x160] sm:$0xf]  ;;  %v4087_v9 = vld [vmem:[#allocation9 + $0x16c] sm:$0xf0]  ;;  %v3850_v23 = vld [vmem:[#allocation9 + $0x168] sm:$0xf] }
 0x513   :  { %v5166_v17 = vadd.f32 1.0, %v4230_v28  ;;  %1932 = vmatpush.bf16.msrb.mxu0 %v3667_v8  ;;  %1961 = vmatpush.bf16.msrb.mxu1 %v3671_v58  ;;  %v3882_v58 = vld [vmem:[#allocation9 + $0x1a8] sm:$0xf]  ;;  %v3868_v42 = vld [vmem:[#allocation9 + $0x198] sm:$0xf0] }
 0x514   :  { %v5168_v25 = vpop.eup %4231  ;;  %1990 = vmatpush.bf16.msrb.mxu2 %v3675_v50  ;;  %v4096_v50 = vld [vmem:[#allocation9 + $0x1b4] sm:$0xf0] }
 0x515   :  { %v5170_v15 = vpop.eup %4233  ;;  %v1495_v54 = vmul.f32 %v5168_v25, %v5158_v37  ;;  %4235 = vrcp.f32 %v5166_v17  ;;  %vm1500_vm9 = vweird.f32 %v5168_v25  ;;  %v1535_v34 = vand.u32 2147483648, %v5166_v17 }
 0x516   :  { %v1510_v52 = vmul.f32 %v5170_v15, %v5160_v41  ;;  %4237 = vtanh.f32 %v1481_v22  ;;  %vm1515_vm10 = vweird.f32 %v5170_v15  ;;  %vm1501_vm13 = vmor %vm1499_vm12, %vm1500_vm9  ;;  %2019 = vmatpush.bf16.msrb.mxu3 %v3679_v39  ;;  %vm1529_vm1 = vweird.f32 %v5166_v17 }
 0x517   :  { %v1496_v49 = vsub.f32 1.0, %v1495_v54  ;;  %vm1516_vm14 = vmor %vm1514_vm11, %vm1515_vm10  ;;  %v1536_v0 = vor.u32 1.1754944e-38, %v1535_v34  ;;  %v5251_v39 = vor.u32 %v4096_v50, %v3882_v58 }
 0x518   :  { %v1511_v12 = vsub.f32 1.0, %v1510_v52 }
 0x519   :  { %v1497_v16 = vmul.f32 %v5168_v25, %v1496_v49 }
 0x51a   :  { %v1512_v36 = vmul.f32 %v5170_v15, %v1511_v12  ;;  %v5218_v12 = vor.u32 %v4101_v55, %v3908_v62 }
 0x51b   :  { %v4236_v4 = vpop.eup %4235  ;;  %v1498_v7 = vadd.f32 %v5168_v25, %v1497_v16  ;;  %v5226_v16 = vor.u32 %v4104_v14, %v3914_v26  ;;  %v3844_v14 = vld [vmem:[#allocation9 + $0x170] sm:$0xf0] }
 0x51c   :  { %v4238_v28 = vpop.eup %4237  ;;  %v1525_v22 = vmul.f32 %v4236_v4, %v5166_v17  ;;  %v1513_v2 = vadd.f32 %v5170_v15, %v1512_v36  ;;  %vm1530_vm0 = vweird.f32 %v4236_v4  ;;  %v380_v36 = vadd.f32 %v5837_v30, %v4839_v45  ;;  %v4088_v30 = vld [vmem:[#allocation9 + $0x174] sm:$0xf0] }
 0x51d   :  { %v1502_v37 = vsel %vm1501_vm13, %v5168_v25, %v1498_v7  ;;  %vm1531_vm2 = vmor %vm1529_vm1, %vm1530_vm0  ;;  %v4097_v7 = vld [vmem:[#allocation9 + $0x1c4] sm:$0xf] }
 0x51e   :  { %v1526_v6 = vsub.f32 1.0, %v1525_v22  ;;  %v1507_v33 = vsel %vm5179_vm8, %v1506_v5, %v1502_v37  ;;  %v1517_v46 = vsel %vm1516_vm14, %v5170_v15, %v1513_v2  ;;  %v1533_v15 = vand.u32 2147483647, %v5166_v17  ;;  %v3906_v17 = vld [vmem:[#allocation9 + $0x1e0] sm:$0xf] }
 0x51f   :  { %v1522_v18 = vsel %vm1519_vm15, %v1521_v19, %v1517_v46  ;;  %v1541_v54 = vmul.f32 %v4238_v28, %v1507_v33  ;;  %v5216_v61 = vor.u32 %v4103_v53, %v3906_v17  ;;  %v5238_v45 = vor.u32 %v4097_v7, %v3892_v13  ;;  %v3874_v5 = vld [vmem:[#allocation9 + $0x1a0] sm:$0xf]  ;;  %v4095_v2 = vld [vmem:[#allocation9 + $0x1ac] sm:$0xf0]  ;;  %v3876_v37 = vld [vmem:[#allocation9 + $0x1b0] sm:$0xf0] }
 0x520   :  { %v1527_v41 = vmul.f32 %v4236_v4, %v1526_v6  ;;  %v1540_v10 = vmul.f32 %v1522_v18, %v5148_v38  ;;  %vm1534_vm3 = vcmp.eq.f32.partialorder %v1533_v15, 8.507059e+37  ;;  %v5240_v22 = vor.u32 %v4100_v21, %v3898_v20  ;;  %v5839_v6 = vld [vmem:[#allocation46_spill] sm:$0xff]  ;;  %v3900_v18 = vld [vmem:[#allocation9 + $0x1d8] sm:$0xf0]  ;;  %v4089_v15 = vld [vmem:[#allocation9 + $0x184] sm:$0xf] }
 0x521   :  { %v5245_v35 = vor.u32 %v4095_v2, %v3874_v5  ;;  %v438_v33 = vadd.f32 %v5839_v6, %v4853_v59  ;;  %v5249_v46 = vor.u32 %v4093_v57, %v3876_v37  ;;  %v5255_v34 = vor.u32 %v4098_v47, %v3900_v18  ;;  %v4094_v17 = vld [vmem:[#allocation9 + $0x1ac] sm:$0xf]  ;;  %v3884_v53 = vld [vmem:[#allocation9 + $0x1b8] sm:$0xf0]  ;;  %v4083_v7 = vld [vmem:[#allocation9 + $0x14c] sm:$0xf0] }
 0x522   :  { %v5204_v25 = vadd.f32 %v1541_v54, %v1540_v10  ;;  %v1528_v63 = vadd.f32 %v4236_v4, %v1527_v41  ;;  %v3858_v54 = vld [vmem:[#allocation9 + $0x180] sm:$0xf]  ;;  %v4091_v41 = vld [vmem:[#allocation9 + $0x18c] sm:$0xf0]  ;;  %v5267_v26 = vor.u32 %v4094_v17, %v3884_v53  ;;  %v4081_v20 = vld [vmem:[#allocation9 + $0x144] sm:$0xf] }
 0x523   :  { %v5258_v59 = vor.u32 %v4091_v41, %v3858_v54  ;;  %v3828_v21 = vld [vmem:[#allocation9 + $0x150] sm:$0xf0]  ;;  %v4084_v5 = vld [vmem:[#allocation9 + $0x154] sm:$0xf0]  ;;  %v4086_v57 = vld [vmem:[#allocation9 + $0x16c] sm:$0xf] }
 0x524   :  { %4239 = vtanh.f32 %v5204_v25  ;;  %v1532_v52 = vsel %vm1531_vm2, %v4236_v4, %v1528_v63  ;;  %v4099_v4 = vld [vmem:[#allocation9 + $0x1cc] sm:$0xf0]  ;;  %v3852_v37 = vld [vmem:[#allocation9 + $0x178] sm:$0xf0]  ;;  %v5292_v58 = vor.u32 %v4081_v20, %v3828_v21  ;;  %v3810_v6 = vld [vmem:[#allocation9 + $0x120] sm:$0xf] }
 0x525   :  { %v1537_v31 = vsel %vm1534_vm3, %v1536_v0, %v1532_v52  ;;  %v5236_v8 = vor.u32 %v4099_v4, %v3890_v60  ;;  %v3860_v52 = vld [vmem:[#allocation9 + $0x190] sm:$0xf0]  ;;  %v3866_v0 = vld [vmem:[#allocation9 + $0x188] sm:$0xf]  ;;  %v5280_v60 = vor.u32 %v4088_v30, %v3850_v23  ;;  %v3826_v4 = vld [vmem:[#allocation9 + $0x140] sm:$0xf] }
 0x526   :  { %v5262_v55 = vor.u32 %v4089_v15, %v3860_v52  ;;  %v5288_v2 = vor.u32 %v4083_v7, %v3826_v4  ;;  %v5840_v54 = vld [vmem:[#allocation47_spill] sm:$0xff]  ;;  %v4077_v15 = vld [vmem:[#allocation9 + $0x124] sm:$0xf]  ;;  %v3812_v52 = vld [vmem:[#allocation9 + $0x130] sm:$0xf0] }
 0x527   :  { %v467_v41 = vadd.f32 %v5840_v54, %v5809_v29  ;;  %v4082_v53 = vld [vmem:[#allocation9 + $0x14c] sm:$0xf]  ;;  %v3836_v29 = vld [vmem:[#allocation9 + $0x158] sm:$0xf0]  ;;  %v3794_v7 = vld [vmem:[#allocation9 + $0x100] sm:$0xf] }
 0x528   :  { %v5325_v30 = vor.u32 %v4082_v53, %v3836_v29  ;;  %v4075_v20 = vld [vmem:[#allocation9 + $0x10c] sm:$0xf0] }
 0x52a   :  { %v4240_v38 = vpop.eup %4239 }
 0x52b   :  { %v5210_v43 = vmul.f32 %v4240_v38, %v1537_v31 }
 0x52d   :  { %v1552_v49 = vpack.c.bf16 %v5210_v43, %v5210_v43 }
 0x52f   :  { %1561 = vmatmul.bf16.vlgmr.msra.gmra.mxu0 %v1552_v49  ;;  %1574 = vmatmul.bf16.vlgmr.msra.gmra.mxu1 %v1552_v49 }
 0x530   :  { %1587 = vmatmul.bf16.vlgmr.msra.gmra.mxu2 %v1552_v49  ;;  %1600 = vmatmul.bf16.vlgmr.msra.gmra.mxu3 %v1552_v49 }
 0x531   :  { %2237 = vmatpush.bf16.msra.mxu0 %v5216_v61  ;;  %2250 = vmatpush.bf16.msra.mxu1 %v5218_v12 }
 0x532   :  { %2263 = vmatpush.bf16.msra.mxu2 %v5226_v16  ;;  %2276 = vmatpush.bf16.msra.mxu3 %v5229_v27 }
 0x535   :  { %2238 = vmatpush.bf16.msra.mxu0 %v5236_v8  ;;  %2251 = vmatpush.bf16.msra.mxu1 %v5238_v45 }
 0x536   :  { %2264 = vmatpush.bf16.msra.mxu2 %v5240_v22  ;;  %2277 = vmatpush.bf16.msra.mxu3 %v5255_v34 }
 0x539   :  { %2239 = vmatpush.bf16.msra.mxu0 %v5245_v35  ;;  %2252 = vmatpush.bf16.msra.mxu1 %v5249_v46 }
 0x53a   :  { %2265 = vmatpush.bf16.msra.mxu2 %v5251_v39  ;;  %2278 = vmatpush.bf16.msra.mxu3 %v5267_v26 }
 0x53d   :  { %2240 = vmatpush.bf16.msra.mxu0 %v5258_v59  ;;  %2253 = vmatpush.bf16.msra.mxu1 %v5262_v55 }
 0x53f   :  { %1933 = vmatmul.bf16.vlgmr.msrb.gmra.mxu0 %v1752_v51  ;;  %1962 = vmatmul.bf16.vlgmr.msrb.gmra.mxu1 %v1752_v51 }
 0x540   :  { %1991 = vmatmul.bf16.vlgmr.msrb.gmra.mxu2 %v1752_v51  ;;  %2020 = vmatmul.bf16.vlgmr.msrb.gmra.mxu3 %v1752_v51  ;;  %v4092_v51 = vld [vmem:[#allocation9 + $0x194] sm:$0xf0] }
 0x541   :  { %v5264_v62 = vor.u32 %v4092_v51, %v3866_v0  ;;  %v3818_v0 = vld [vmem:[#allocation9 + $0x128] sm:$0xf] }
 0x543   :  { %2266 = vmatpush.bf16.msra.mxu2 %v5264_v62 }
 0x547   :  { %2267 = vmatpush.bf16.msra.mxu2 %v5280_v60 }
 0x54f   :  { %1938 = vmatmul.bf16.gmra.mxu0 %v1753_v11  ;;  %1967 = vmatmul.bf16.gmra.mxu1 %v1753_v11 }
 0x550   :  { %1996 = vmatmul.bf16.gmra.mxu2 %v1753_v11  ;;  %2025 = vmatmul.bf16.gmra.mxu3 %v1753_v11  ;;  %v4085_v11 = vld [vmem:[#allocation9 + $0x164] sm:$0xf] }
 0x55f   :  { %1943 = vmatmul.bf16.gmra.mxu0 %v1754_v32  ;;  %1972 = vmatmul.bf16.gmra.mxu1 %v1754_v32 }
 0x560   :  { %2001 = vmatmul.bf16.gmra.mxu2 %v1754_v32  ;;  %2030 = vmatmul.bf16.gmra.mxu3 %v1754_v32 }
 0x5ac   :  { %v1562_v1 = vpop.f32.mrf.mxu0  ;;  %v1575_v44 = vpop.f32.mrf.mxu1 }
 0x5ad   :  { %v1605_v48 = vadd.f32 %v1562_v1, %v380_v36  ;;  %v1606_v56 = vadd.f32 %v1575_v44, %v409_v40  ;;  %v4090_v36 = vld [vmem:[#allocation9 + $0x18c] sm:$0xf]  ;;  %v5272_v44 = vor.u32 %v4087_v9, %v3842_v3 }
 0x5ae   :  { %v5284_v13 = vor.u32 %v4090_v36, %v3868_v42  ;;  %v4078_v36 = vld [vmem:[#allocation9 + $0x12c] sm:$0xf]  ;;  %v3820_v42 = vld [vmem:[#allocation9 + $0x138] sm:$0xf0] }
 0x5af   :  { %v3661_v28 = vmul.f32 -1.442695, %v1605_v48  ;;  %v3662_v19 = vmul.f32 -1.442695, %v1606_v56  ;;  %v5278_v56 = vor.u32 %v4085_v11, %v3844_v14  ;;  %2241 = vmatpush.bf16.msra.mxu0 %v5272_v44  ;;  %v5316_v11 = vor.u32 %v4077_v15, %v3812_v52  ;;  %v4074_v52 = vld [vmem:[#allocation9 + $0x10c] sm:$0xf] }
 0x5b0   :  { %2279 = vmatpush.bf16.msra.mxu3 %v5284_v13 }
 0x5b1   :  { %4241 = vpow2.f32 %v3661_v28  ;;  %v3834_v28 = vld [vmem:[#allocation9 + $0x148] sm:$0xf]  ;;  %2254 = vmatpush.bf16.msra.mxu1 %v5278_v56 }
 0x5b2   :  { %4243 = vpow2.f32 %v3662_v19  ;;  %v5294_v50 = vor.u32 %v4084_v5, %v3834_v28 }
 0x5b3   :  { %v1588_v10 = vpop.f32.mrf.mxu2  ;;  %v5253_v63 = vpop.f32.mrf.mxu3  ;;  %2242 = vmatpush.bf16.msra.mxu0 %v5288_v2 }
 0x5b4   :  { %v1607_v38 = vadd.f32 %v1588_v10, %v438_v33  ;;  %v1564_v31 = vpop.f32.mrf.mxu0  ;;  %v1577_v49 = vpop.f32.mrf.mxu1  ;;  %v4079_v33 = vld [vmem:[#allocation9 + $0x12c] sm:$0xf0]  ;;  %v5299_v10 = vor.u32 %v4086_v57, %v3852_v37  ;;  %v1608_v51 = vadd.f32 %v5253_v63, %v467_v41  ;;  %2268 = vmatpush.bf16.msra.mxu2 %v5294_v50  ;;  %v5337_v57 = vor.u32 %v4075_v20, %v3794_v7 }
 0x5b5   :  { %v4080_v31 = vld [vmem:[#allocation9 + $0x134] sm:$0xf0]  ;;  %v5307_v17 = vor.u32 %v4079_v33, %v3810_v6  ;;  %2255 = vmatpush.bf16.msra.mxu1 %v5292_v58  ;;  %v5341_v6 = vor.u32 %v4078_v36, %v3820_v42  ;;  %v3802_v33 = vld [vmem:[#allocation9 + $0x108] sm:$0xf] }
 0x5b6   :  { %v3663_v32 = vmul.f32 -1.442695, %v1607_v38  ;;  %v5318_v63 = vor.u32 %v4080_v31, %v3818_v0  ;;  %2280 = vmatpush.bf16.msra.mxu3 %v5299_v10  ;;  %v3804_v0 = vld [vmem:[#allocation9 + $0x118] sm:$0xf0] }
 0x5b7   :  { %v4242_v24 = vpop.eup %4241  ;;  %2243 = vmatpush.bf16.msra.mxu0 %v5307_v17 }
 0x5b8   :  { %v4244_v40 = vpop.eup %4243  ;;  %v5269_v1 = vadd.f32 1.0, %v4242_v24  ;;  %4245 = vpow2.f32 %v3663_v32  ;;  %2269 = vmatpush.bf16.msra.mxu2 %v5318_v63 }
 0x5b9   :  { %v5274_v48 = vadd.f32 1.0, %v4244_v40  ;;  %2256 = vmatpush.bf16.msra.mxu1 %v5316_v11 }
 0x5ba   :  { %4247 = vrcp.f32 %v5269_v1  ;;  %v1630_v14 = vand.u32 2147483647, %v5269_v1  ;;  %v1632_v24 = vand.u32 2147483648, %v5269_v1  ;;  %2281 = vmatpush.bf16.msra.mxu3 %v5325_v30  ;;  %vm1626_vm6 = vweird.f32 %v5269_v1 }
 0x5bb   :  { %4249 = vrcp.f32 %v5274_v48  ;;  %v1590_v19 = vpop.f32.mrf.mxu2  ;;  %v1603_v47 = vpop.f32.mrf.mxu3  ;;  %v1647_v4 = vand.u32 2147483648, %v5274_v48  ;;  %v1645_v28 = vand.u32 2147483647, %v5274_v48  ;;  %vm1641_vm7 = vweird.f32 %v5274_v48  ;;  %2244 = vmatpush.bf16.msra.mxu0 %v5337_v57 }
 0x5bc   :  { %v4073_v19 = vld [vmem:[#allocation9 + $0x104] sm:$0xf]  ;;  %v3796_v47 = vld [vmem:[#allocation9 + $0x110] sm:$0xf0]  ;;  %vm1631_vm10 = vcmp.eq.f32.partialorder %v1630_v14, 8.507059e+37 }
 0x5bd   :  { %v5339_v37 = vor.u32 %v4073_v19, %v3796_v47  ;;  %vm1646_vm11 = vcmp.eq.f32.partialorder %v1645_v28, 8.507059e+37  ;;  %v1934_v47 = vpop.f32.mrf.mxu0 }
 0x5be   :  { %v4246_v18 = vpop.eup %4245  ;;  %2282 = vmatpush.bf16.msra.mxu3 %v5341_v6 }
 0x5bf   :  { %v5301_v38 = vadd.f32 1.0, %v4246_v18  ;;  %v4076_v18 = vld [vmem:[#allocation9 + $0x114] sm:$0xf0]  ;;  %2257 = vmatpush.bf16.msra.mxu1 %v5339_v37  ;;  %2361 = vmatpush.bf16.msrb.mxu0 %v5216_v61 }
 0x5c0   :  { %v5303_v49 = vpop.eup %4247  ;;  %v5345_v15 = vor.u32 %v4076_v18, %v3802_v33 }
 0x5c1   :  { %v5309_v3 = vpop.eup %4249  ;;  %v1622_v9 = vmul.f32 %v5303_v49, %v5269_v1  ;;  %4251 = vrcp.f32 %v5301_v38  ;;  %vm1627_vm5 = vweird.f32 %v5303_v49  ;;  %v1648_v1 = vor.u32 1.1754944e-38, %v1647_v4 }
 0x5c2   :  { %v1637_v32 = vmul.f32 %v5309_v3, %v5274_v48  ;;  %4253 = vtanh.f32 %v1608_v51  ;;  %vm1642_vm4 = vweird.f32 %v5309_v3  ;;  %vm1628_vm8 = vmor %vm1626_vm6, %vm1627_vm5  ;;  %v1633_v51 = vor.u32 1.1754944e-38, %v1632_v24  ;;  %2270 = vmatpush.bf16.msra.mxu2 %v5345_v15 }
 0x5c3   :  { %v1623_v23 = vsub.f32 1.0, %v1622_v9  ;;  %vm1643_vm9 = vmor %vm1641_vm7, %vm1642_vm4  ;;  %v5360_v24 = vor.u32 %v4074_v52, %v3804_v0  ;;  %2374 = vmatpush.bf16.msrb.mxu1 %v5218_v12  ;;  %2362 = vmatpush.bf16.msrb.mxu0 %v5236_v8  ;;  %v1662_v4 = vand.u32 2147483648, %v5301_v38  ;;  %vm1656_vm13 = vweird.f32 %v5301_v38  ;;  %v1992_v33 = vpop.f32.mrf.mxu2  ;;  %v2021_v18 = vpop.f32.mrf.mxu3 }
 0x5c4   :  { %v1638_v40 = vsub.f32 1.0, %v1637_v32 }
 0x5c5   :  { %v1624_v21 = vmul.f32 %v5303_v49, %v1623_v23  ;;  %2283 = vmatpush.bf16.msra.mxu3 %v5360_v24  ;;  %v1663_v20 = vor.u32 1.1754944e-38, %v1662_v4 }
 0x5c6   :  { %v1639_v5 = vmul.f32 %v5309_v3, %v1638_v40  ;;  %2387 = vmatpush.bf16.msrb.mxu2 %v5226_v16 }
 0x5c7   :  { %v4252_v54 = vpop.eup %4251  ;;  %v1625_v41 = vadd.f32 %v5303_v49, %v1624_v21  ;;  %2375 = vmatpush.bf16.msrb.mxu1 %v5238_v45  ;;  %2363 = vmatpush.bf16.msrb.mxu0 %v5245_v35 }
 0x5c8   :  { %v1652_v31 = vmul.f32 %v4252_v54, %v5301_v38  ;;  %v1640_v53 = vadd.f32 %v5309_v3, %v1639_v5  ;;  %v4254_v48 = vpop.eup %4253  ;;  %vm1657_vm12 = vweird.f32 %v4252_v54  ;;  %v1963_v5 = vpop.f32.mrf.mxu1 }
 0x5c9   :  { %v1629_v29 = vsel %vm1628_vm8, %v5303_v49, %v1625_v41  ;;  %2400 = vmatpush.bf16.msrb.mxu3 %v5229_v27  ;;  %vm1658_vm14 = vmor %vm1656_vm13, %vm1657_vm12 }
 0x5ca   :  { %v1653_v9 = vsub.f32 1.0, %v1652_v31  ;;  %v1634_v32 = vsel %vm1631_vm10, %v1633_v51, %v1629_v29  ;;  %v1644_v23 = vsel %vm1643_vm9, %v5309_v3, %v1640_v53  ;;  %2388 = vmatpush.bf16.msrb.mxu2 %v5240_v22 }
 0x5cb   :  { %v1649_v36 = vsel %vm1646_vm11, %v1648_v1, %v1644_v23  ;;  %v1668_v42 = vmul.f32 %v4254_v48, %v1634_v32  ;;  %2376 = vmatpush.bf16.msrb.mxu1 %v5249_v46  ;;  %2364 = vmatpush.bf16.msrb.mxu0 %v5258_v59  ;;  %v5440_v52 = vpop.f32.mrf.mxu2  ;;  %v5442_v0 = vpop.f32.mrf.mxu3 }
 0x5cc   :  { %v1654_v49 = vmul.f32 %v4252_v54, %v1653_v9  ;;  %v1667_v14 = vmul.f32 %v1649_v36, %v5204_v25  ;;  %v1660_v25 = vand.u32 2147483647, %v5301_v38  ;;  %5842 = vst [vmem:[#allocation23_spill] sm:$0xff] %v5442_v0 }
 0x5cd   :  { %2401 = vmatpush.bf16.msrb.mxu3 %v5255_v34 }
 0x5ce   :  { %v1669_v40 = vadd.f32 %v1668_v42, %v1667_v14  ;;  %v1655_v3 = vadd.f32 %v4252_v54, %v1654_v49  ;;  %2389 = vmatpush.bf16.msrb.mxu2 %v5251_v39  ;;  %vm1661_vm15 = vcmp.eq.f32.partialorder %v1660_v25, 8.507059e+37 }
 0x5cf   :  { %2377 = vmatpush.bf16.msrb.mxu1 %v5262_v55  ;;  %2365 = vmatpush.bf16.msrb.mxu0 %v5272_v44 }
 0x5d0   :  { %4255 = vtanh.f32 %v1669_v40  ;;  %1675 = vst [vmem:[#allocation16] sm:$0xff] %v1669_v40  ;;  %v1659_v7 = vsel %vm1658_vm14, %v4252_v54, %v1655_v3  ;;  %v5436_v54 = vpop.f32.mrf.mxu0  ;;  %v5438_v41 = vpop.f32.mrf.mxu1 }
 0x5d1   :  { %v1664_v28 = vsel %vm1661_vm15, %v1663_v20, %v1659_v7  ;;  %2402 = vmatpush.bf16.msrb.mxu3 %v5267_v26 }
 0x5d2   :  { %2390 = vmatpush.bf16.msrb.mxu2 %v5264_v62 }
 0x5d3   :  { %2378 = vmatpush.bf16.msrb.mxu1 %v5278_v56  ;;  %2366 = vmatpush.bf16.msrb.mxu0 %v5288_v2  ;;  %v5448_v53 = vpop.f32.mrf.mxu2  ;;  %v5450_v1 = vpop.f32.mrf.mxu3 }
 0x5d4   :  { %5845 = vst [vmem:[#allocation28_spill] sm:$0xff] %v5448_v53 }
 0x5d5   :  { %2403 = vmatpush.bf16.msrb.mxu3 %v5284_v13  ;;  %5846 = vst [vmem:[#allocation27_spill] sm:$0xff] %v5450_v1 }
 0x5d6   :  { %v4256_v21 = vpop.eup %4255  ;;  %2391 = vmatpush.bf16.msrb.mxu2 %v5280_v60 }
 0x5d7   :  { %v1671_v19 = vmul.f32 %v4256_v21, %v1664_v28  ;;  %2379 = vmatpush.bf16.msrb.mxu1 %v5292_v58  ;;  %2367 = vmatpush.bf16.msrb.mxu0 %v5307_v17  ;;  %v1743_v28 = vld [vmem:[#allocation10 + $0x4] sm:$0xf] }
 0x5d8   :  { %v5444_v31 = vpop.f32.mrf.mxu0  ;;  %v5446_v51 = vpop.f32.mrf.mxu1 }
 0x5d9   :  { %v1755_v38 = vpack.c.bf16 %v1671_v19, %v5210_v43  ;;  %1674 = vst [vmem:[#allocation14] sm:$0xff] %v1671_v19  ;;  %2404 = vmatpush.bf16.msrb.mxu3 %v5299_v10  ;;  %v5841_v43 = vmov 0  }
 0x5da   :  { %2392 = vmatpush.bf16.msrb.mxu2 %v5294_v50  ;;  %5843 = vst [vmem:[#allocation24_spill] sm:$0xff] %v5444_v31 }
 0x5db   :  { %1948 = vmatmul.bf16.gmra.mxu0 %v1755_v38  ;;  %1977 = vmatmul.bf16.gmra.mxu1 %v1755_v38  ;;  %5844 = vst [vmem:[#allocation26_spill] sm:$0xff] %v5446_v51  ;;  %v5456_v9 = vpop.f32.mrf.mxu2  ;;  %v5458_v32 = vpop.f32.mrf.mxu3 }
 0x5dc   :  { %2006 = vmatmul.bf16.gmra.mxu2 %v1755_v38  ;;  %2035 = vmatmul.bf16.gmra.mxu3 %v1755_v38  ;;  %5849 = vst [vmem:[#allocation31_spill] sm:$0xff] %v5456_v9 }
 0x5dd   :  { %2405 = vmatpush.bf16.msrb.mxu3 %v5325_v30  ;;  %2380 = vmatpush.bf16.msrb.mxu1 %v5316_v11  ;;  %5850 = vst [vmem:[#allocation32_spill] sm:$0xff] %v5458_v32 }
 0x5de   :  { %2393 = vmatpush.bf16.msrb.mxu2 %v5318_v63  ;;  %2368 = vmatpush.bf16.msrb.mxu0 %v5337_v57 }
 0x5e0   :  { %v5452_v29 = vpop.f32.mrf.mxu0  ;;  %v5454_v48 = vpop.f32.mrf.mxu1 }
 0x5e1   :  { %2406 = vmatpush.bf16.msrb.mxu3 %v5341_v6  ;;  %2381 = vmatpush.bf16.msrb.mxu1 %v5339_v37  ;;  %5847 = vst [vmem:[#allocation29_spill] sm:$0xff] %v5452_v29 }
 0x5e2   :  { %2394 = vmatpush.bf16.msrb.mxu2 %v5345_v15  ;;  %5848 = vst [vmem:[#allocation30_spill] sm:$0xff] %v5454_v48 }
 0x5e3   :  { %v5464_v42 = vpop.f32.mrf.mxu2  ;;  %v5466_v49 = vpop.f32.mrf.mxu3 }
 0x5e4   :  { %5853 = vst [vmem:[#allocation36_spill] sm:$0xff] %v5464_v42  ;;  %v5498_v42 = vperm.slane %v1743_v28, 2 }
 0x5e5   :  { %2407 = vmatpush.bf16.msrb.mxu3 %v5360_v24  ;;  %5854 = vst [vmem:[#allocation35_spill] sm:$0xff] %v5466_v49 }
 0x5e8   :  { %v5460_v23 = vpop.f32.mrf.mxu0  ;;  %v5462_v36 = vpop.f32.mrf.mxu1 }
 0x5e9   :  { %5851 = vst [vmem:[#allocation33_spill] sm:$0xff] %v5460_v23 }
 0x5ea   :  { %5852 = vst [vmem:[#allocation34_spill] sm:$0xff] %v5462_v36  ;;  %v1993_v36 = vadd.f32 %v1992_v33, %v5498_v42 }
 0x5eb   :  { %2245 = vmatmul.bf16.vlgmr.msra.gmra.mxu0 %v5841_v43  ;;  %2258 = vmatmul.bf16.vlgmr.msra.gmra.mxu1 %v5841_v43  ;;  %v5472_v3 = vpop.f32.mrf.mxu2  ;;  %v5474_v4 = vpop.f32.mrf.mxu3 }
 0x5ec   :  { %2271 = vmatmul.bf16.vlgmr.msra.gmra.mxu2 %v5841_v43  ;;  %2284 = vmatmul.bf16.vlgmr.msra.gmra.mxu3 %v5841_v43  ;;  %5857 = vst [vmem:[#allocation39_spill] sm:$0xff] %v5472_v3  ;;  %v5488_v43 = vperm.slane %v1743_v28, 0 }
 0x5ed   :  { %2485 = vmatpush.bf16.msra.mxu0 %v5216_v61  ;;  %2498 = vmatpush.bf16.msra.mxu1 %v5218_v12  ;;  %5858 = vst [vmem:[#allocation40_spill] sm:$0xff] %v5474_v4 }
 0x5ee   :  { %2511 = vmatpush.bf16.msra.mxu2 %v5226_v16  ;;  %2524 = vmatpush.bf16.msra.mxu3 %v5229_v27  ;;  %v1935_v3 = vadd.f32 %v1934_v47, %v5488_v43 }
 0x5f0   :  { %v5468_v14 = vpop.f32.mrf.mxu0  ;;  %v5470_v40 = vpop.f32.mrf.mxu1 }
 0x5f1   :  { %2486 = vmatpush.bf16.msra.mxu0 %v5236_v8  ;;  %2499 = vmatpush.bf16.msra.mxu1 %v5238_v45  ;;  %5855 = vst [vmem:[#allocation37_spill] sm:$0xff] %v5468_v14 }
 0x5f2   :  { %2512 = vmatpush.bf16.msra.mxu2 %v5240_v22  ;;  %2525 = vmatpush.bf16.msra.mxu3 %v5255_v34  ;;  %5856 = vst [vmem:[#allocation38_spill] sm:$0xff] %v5470_v40  ;;  %v5490_v40 = vperm.slane %v1743_v28, 1 }
 0x5f4   :  { %v1964_v4 = vadd.f32 %v1963_v5, %v5490_v40 }
 0x5f5   :  { %2487 = vmatpush.bf16.msra.mxu0 %v5245_v35  ;;  %2500 = vmatpush.bf16.msra.mxu1 %v5249_v46 }
 0x5f6   :  { %2513 = vmatpush.bf16.msra.mxu2 %v5251_v39  ;;  %2526 = vmatpush.bf16.msra.mxu3 %v5267_v26 }
 0x5f9   :  { %2488 = vmatpush.bf16.msra.mxu0 %v5258_v59  ;;  %2501 = vmatpush.bf16.msra.mxu1 %v5262_v55 }
 0x5fa   :  { %2514 = vmatpush.bf16.msra.mxu2 %v5264_v62  ;;  %2527 = vmatpush.bf16.msra.mxu3 %v5284_v13 }
 0x5fd   :  { %2489 = vmatpush.bf16.msra.mxu0 %v5272_v44  ;;  %2502 = vmatpush.bf16.msra.mxu1 %v5278_v56 }
 0x5fe   :  { %2515 = vmatpush.bf16.msra.mxu2 %v5280_v60  ;;  %2528 = vmatpush.bf16.msra.mxu3 %v5299_v10 }
 0x601   :  { %2490 = vmatpush.bf16.msra.mxu0 %v5288_v2  ;;  %2503 = vmatpush.bf16.msra.mxu1 %v5292_v58 }
 0x602   :  { %2516 = vmatpush.bf16.msra.mxu2 %v5294_v50  ;;  %2529 = vmatpush.bf16.msra.mxu3 %v5325_v30 }
 0x605   :  { %2491 = vmatpush.bf16.msra.mxu0 %v5307_v17  ;;  %2504 = vmatpush.bf16.msra.mxu1 %v5316_v11 }
 0x606   :  { %2517 = vmatpush.bf16.msra.mxu2 %v5318_v63  ;;  %2530 = vmatpush.bf16.msra.mxu3 %v5341_v6 }
 0x609   :  { %2492 = vmatpush.bf16.msra.mxu0 %v5337_v57  ;;  %2505 = vmatpush.bf16.msra.mxu1 %v5339_v37 }
 0x60a   :  { %2518 = vmatpush.bf16.msra.mxu2 %v5345_v15  ;;  %2531 = vmatpush.bf16.msra.mxu3 %v5360_v24 }
 0x658   :  { %v5476_v25 = vpop.f32.mrf.mxu0  ;;  %v5478_v7 = vpop.f32.mrf.mxu1 }
 0x659   :  { %5859 = vst [vmem:[#allocation41_spill] sm:$0xff] %v5476_v25 }
 0x65a   :  { %5860 = vst [vmem:[#allocation42_spill] sm:$0xff] %v5478_v7 }
 0x65f   :  { %v5480_v20 = vpop.f32.mrf.mxu2  ;;  %v5482_v21 = vpop.f32.mrf.mxu3 }
 0x660   :  { %5861 = vst [vmem:[#allocation44_spill] sm:$0xff] %v5480_v20  ;;  %v5484_v19 = vpop.f32.mrf.mxu0  ;;  %v5486_v38 = vpop.f32.mrf.mxu1 }
 0x661   :  { %5862 = vst [vmem:[#allocation25_spill] sm:$0xff] %v5482_v21 }
 0x662   :  { %5863 = vst [vmem:[#allocation22_spill] sm:$0xff] %v5484_v19 }
 0x663   :  { %5864 = vst [vmem:[#allocation43_spill] sm:$0xff] %v5486_v38 }
 0x667   :  { %v5494_v25 = vpop.f32.mrf.mxu2  ;;  %v5496_v7 = vpop.f32.mrf.mxu3 }
 0x668   :  { %5865 = vst [vmem:[#allocation45_spill] sm:$0xff] %v5494_v25  ;;  %v2246_v20 = vpop.f32.mrf.mxu0  ;;  %v2259_v14 = vpop.f32.mrf.mxu1 }
 0x669   :  { %5866 = vst [vmem:[#allocation46_spill] sm:$0xff] %v5496_v7  ;;  %v2289_v21 = vadd.f32 %v2246_v20, %v1935_v3  ;;  %v2290_v49 = vadd.f32 %v2259_v14, %v1964_v4  ;;  %v5501_v14 = vperm.slane %v1743_v28, 3 }
 0x66b   :  { %v3920_v19 = vmul.f32 -1.442695, %v2289_v21  ;;  %v3921_v38 = vmul.f32 -1.442695, %v2290_v49  ;;  %5867 = vst [vmem:[#allocation47_spill] sm:$0xff] %v5501_v14  ;;  %v2022_v33 = vadd.f32 %v2021_v18, %v5501_v14 }
 0x66d   :  { %4257 = vpow2.f32 %v3920_v19 }
 0x66e   :  { %4259 = vpow2.f32 %v3921_v38 }
 0x66f   :  { %v2272_v23 = vpop.f32.mrf.mxu2  ;;  %v2285_v47 = vpop.f32.mrf.mxu3 }
 0x670   :  { %v2291_v32 = vadd.f32 %v2272_v23, %v1993_v36  ;;  %v2248_v5 = vpop.f32.mrf.mxu0  ;;  %v2261_v9 = vpop.f32.mrf.mxu1  ;;  %v2292_v23 = vadd.f32 %v2285_v47, %v2022_v33 }
 0x672   :  { %v3922_v25 = vmul.f32 -1.442695, %v2291_v32 }
 0x673   :  { %v4258_v48 = vpop.eup %4257 }
 0x674   :  { %v4260_v7 = vpop.eup %4259  ;;  %v2302_v29 = vadd.f32 1.0, %v4258_v48  ;;  %4261 = vpow2.f32 %v3922_v25 }
 0x675   :  { %v2303_v3 = vadd.f32 1.0, %v4260_v7 }
 0x676   :  { %4263 = vrcp.f32 %v2302_v29  ;;  %v2316_v25 = vand.u32 2147483648, %v2302_v29  ;;  %v2314_v5 = vand.u32 2147483647, %v2302_v29  ;;  %vm2310_vm2 = vweird.f32 %v2302_v29 }
 0x677   :  { %4265 = vrcp.f32 %v2303_v3  ;;  %v2274_v49 = vpop.f32.mrf.mxu2  ;;  %v2287_v4 = vpop.f32.mrf.mxu3  ;;  %v2331_v7 = vand.u32 2147483648, %v2303_v3  ;;  %vm2325_vm3 = vweird.f32 %v2303_v3 }
 0x678   :  { %v2329_v4 = vand.u32 2147483647, %v2303_v3  ;;  %vm2315_vm5 = vcmp.eq.f32.partialorder %v2314_v5, 8.507059e+37 }
 0x679   :  { %v2332_v53 = vor.u32 1.1754944e-38, %v2331_v7 }
 0x67a   :  { %v4262_v20 = vpop.eup %4261  ;;  %vm2330_vm7 = vcmp.eq.f32.partialorder %v2329_v4, 8.507059e+37 }
 0x67b   :  { %v2304_v21 = vadd.f32 1.0, %v4262_v20  ;;  %v2317_v20 = vor.u32 1.1754944e-38, %v2316_v25 }
 0x67c   :  { %v4264_v19 = vpop.eup %4263 }
 0x67d   :  { %v4266_v36 = vpop.eup %4265  ;;  %v2306_v9 = vmul.f32 %v4264_v19, %v2302_v29  ;;  %4267 = vrcp.f32 %v2304_v21  ;;  %vm2311_vm0 = vweird.f32 %v4264_v19  ;;  %vm2340_vm9 = vweird.f32 %v2304_v21 }
 0x67e   :  { %v2321_v32 = vmul.f32 %v4266_v36, %v2303_v3  ;;  %4269 = vtanh.f32 %v2292_v23  ;;  %vm2326_vm1 = vweird.f32 %v4266_v36  ;;  %vm2312_vm4 = vmor %vm2310_vm2, %vm2311_vm0  ;;  %v2346_v3 = vand.u32 2147483648, %v2304_v21 }
 0x67f   :  { %v2307_v38 = vsub.f32 1.0, %v2306_v9  ;;  %vm2327_vm6 = vmor %vm2325_vm3, %vm2326_vm1 }
 0x680   :  { %v2322_v48 = vsub.f32 1.0, %v2321_v32  ;;  %v2347_v7 = vor.u32 1.1754944e-38, %v2346_v3 }
 0x681   :  { %v2308_v28 = vmul.f32 %v4264_v19, %v2307_v38 }
 0x682   :  { %v2323_v49 = vmul.f32 %v4266_v36, %v2322_v48 }
 0x683   :  { %v4268_v1 = vpop.eup %4267  ;;  %v2309_v18 = vadd.f32 %v4264_v19, %v2308_v28 }
 0x684   :  { %v2336_v47 = vmul.f32 %v4268_v1, %v2304_v21  ;;  %v2324_v33 = vadd.f32 %v4266_v36, %v2323_v49  ;;  %v4270_v23 = vpop.eup %4269  ;;  %vm2341_vm8 = vweird.f32 %v4268_v1 }
 0x685   :  { %v2313_v9 = vsel %vm2312_vm4, %v4264_v19, %v2309_v18  ;;  %v2344_v19 = vand.u32 2147483647, %v2304_v21  ;;  %vm2342_vm10 = vmor %vm2340_vm9, %vm2341_vm8 }
 0x686   :  { %v2337_v32 = vsub.f32 1.0, %v2336_v47  ;;  %v2318_v38 = vsel %vm2315_vm5, %v2317_v20, %v2313_v9  ;;  %v2328_v51 = vsel %vm2327_vm6, %v4266_v36, %v2324_v33  ;;  %v1995_v47 = vadd.f32 %v5440_v52, %v5498_v42 }
 0x687   :  { %v2333_v48 = vsel %vm2330_vm7, %v2332_v53, %v2328_v51  ;;  %v2352_v31 = vmul.f32 %v4270_v23, %v2318_v38  ;;  %vm2345_vm11 = vcmp.eq.f32.partialorder %v2344_v19, 8.507059e+37 }
 0x688   :  { %v2338_v0 = vmul.f32 %v4268_v1, %v2337_v32  ;;  %v2351_v14 = vmul.f32 0.0, %v2333_v48 }
 0x68a   :  { %v5504_v28 = vadd.f32 %v2352_v31, %v2351_v14  ;;  %v2339_v29 = vadd.f32 %v4268_v1, %v2338_v0  ;;  %v1937_v0 = vadd.f32 %v5436_v54, %v5488_v43  ;;  %v1966_v31 = vadd.f32 %v5438_v41, %v5490_v40 }
 0x68c   :  { %4271 = vtanh.f32 %v5504_v28  ;;  %v2343_v25 = vsel %vm2342_vm10, %v4268_v1, %v2339_v29 }
 0x68d   :  { %v2348_v36 = vsel %vm2345_vm11, %v2347_v7, %v2343_v25  ;;  %v5868_v7 = vld [vmem:[#allocation47_spill] sm:$0xff] }
 0x692   :  { %v4272_v5 = vpop.eup %4271 }
 0x693   :  { %v2355_v49 = vmul.f32 %v4272_v5, %v2348_v36  ;;  %v5869_v5 = vld [vmem:[#allocation23_spill] sm:$0xff] }
 0x694   :  { %v2024_v52 = vadd.f32 %v5869_v5, %v5868_v7 }
 0x695   :  { %v2360_v51 = vpack.c.bf16 %v2355_v49, %v2355_v49 }
 0x697   :  { %2369 = vmatmul.bf16.vlgmr.msrb.gmra.mxu0 %v2360_v51  ;;  %2382 = vmatmul.bf16.vlgmr.msrb.gmra.mxu1 %v2360_v51 }
 0x698   :  { %2395 = vmatmul.bf16.vlgmr.msrb.gmra.mxu2 %v2360_v51  ;;  %2408 = vmatmul.bf16.vlgmr.msrb.gmra.mxu3 %v2360_v51 }
 0x699   :  { %2609 = vmatpush.bf16.msrb.mxu0 %v5216_v61  ;;  %2622 = vmatpush.bf16.msrb.mxu1 %v5218_v12 }
 0x69a   :  { %2635 = vmatpush.bf16.msrb.mxu2 %v5226_v16  ;;  %2648 = vmatpush.bf16.msrb.mxu3 %v5229_v27 }
 0x69d   :  { %2610 = vmatpush.bf16.msrb.mxu0 %v5236_v8  ;;  %2623 = vmatpush.bf16.msrb.mxu1 %v5238_v45 }
 0x69e   :  { %2636 = vmatpush.bf16.msrb.mxu2 %v5240_v22  ;;  %2649 = vmatpush.bf16.msrb.mxu3 %v5255_v34 }
 0x6a1   :  { %2611 = vmatpush.bf16.msrb.mxu0 %v5245_v35  ;;  %2624 = vmatpush.bf16.msrb.mxu1 %v5249_v46 }
 0x6a2   :  { %2637 = vmatpush.bf16.msrb.mxu2 %v5251_v39  ;;  %2650 = vmatpush.bf16.msrb.mxu3 %v5267_v26 }
 0x6a5   :  { %2612 = vmatpush.bf16.msrb.mxu0 %v5258_v59  ;;  %2625 = vmatpush.bf16.msrb.mxu1 %v5262_v55 }
 0x6a6   :  { %2638 = vmatpush.bf16.msrb.mxu2 %v5264_v62  ;;  %2651 = vmatpush.bf16.msrb.mxu3 %v5284_v13 }
 0x6a9   :  { %2613 = vmatpush.bf16.msrb.mxu0 %v5272_v44  ;;  %2626 = vmatpush.bf16.msrb.mxu1 %v5278_v56 }
 0x6aa   :  { %2639 = vmatpush.bf16.msrb.mxu2 %v5280_v60  ;;  %2652 = vmatpush.bf16.msrb.mxu3 %v5299_v10 }
 0x6ad   :  { %2614 = vmatpush.bf16.msrb.mxu0 %v5288_v2  ;;  %2627 = vmatpush.bf16.msrb.mxu1 %v5292_v58 }
 0x6ae   :  { %2640 = vmatpush.bf16.msrb.mxu2 %v5294_v50  ;;  %2653 = vmatpush.bf16.msrb.mxu3 %v5325_v30 }
 0x6b1   :  { %2615 = vmatpush.bf16.msrb.mxu0 %v5307_v17  ;;  %2628 = vmatpush.bf16.msrb.mxu1 %v5316_v11 }
 0x6b2   :  { %2641 = vmatpush.bf16.msrb.mxu2 %v5318_v63  ;;  %2654 = vmatpush.bf16.msrb.mxu3 %v5341_v6 }
 0x6b5   :  { %2616 = vmatpush.bf16.msrb.mxu0 %v5337_v57  ;;  %2629 = vmatpush.bf16.msrb.mxu1 %v5339_v37 }
 0x6b6   :  { %2642 = vmatpush.bf16.msrb.mxu2 %v5345_v15  ;;  %2655 = vmatpush.bf16.msrb.mxu3 %v5360_v24 }
 0x714   :  { %v2370_v53 = vpop.f32.mrf.mxu0  ;;  %v2383_v1 = vpop.f32.mrf.mxu1 }
 0x715   :  { %v2413_v14 = vadd.f32 %v2370_v53, %v1937_v0  ;;  %v2414_v21 = vadd.f32 %v2383_v1, %v1966_v31 }
 0x717   :  { %v3923_v4 = vmul.f32 -1.442695, %v2413_v14  ;;  %v3924_v18 = vmul.f32 -1.442695, %v2414_v21 }
 0x719   :  { %4273 = vpow2.f32 %v3923_v4 }
 0x71a   :  { %4275 = vpow2.f32 %v3924_v18 }
 0x71b   :  { %v2396_v20 = vpop.f32.mrf.mxu2  ;;  %v2409_v33 = vpop.f32.mrf.mxu3 }
 0x71c   :  { %v2415_v9 = vadd.f32 %v2396_v20, %v1995_v47  ;;  %v2372_v23 = vpop.f32.mrf.mxu0  ;;  %v2385_v32 = vpop.f32.mrf.mxu1  ;;  %v2416_v51 = vadd.f32 %v2409_v33, %v2024_v52 }
 0x71e   :  { %v3925_v54 = vmul.f32 -1.442695, %v2415_v9 }
 0x71f   :  { %v4274_v38 = vpop.eup %4273 }
 0x720   :  { %v4276_v48 = vpop.eup %4275  ;;  %v2426_v41 = vadd.f32 1.0, %v4274_v38  ;;  %4277 = vpow2.f32 %v3925_v54 }
 0x721   :  { %v2427_v29 = vadd.f32 1.0, %v4276_v48 }
 0x722   :  { %4279 = vrcp.f32 %v2426_v41  ;;  %v2440_v21 = vand.u32 2147483648, %v2426_v41  ;;  %v2438_v47 = vand.u32 2147483647, %v2426_v41  ;;  %vm2434_vm14 = vweird.f32 %v2426_v41 }
 0x723   :  { %4281 = vrcp.f32 %v2427_v29  ;;  %v2398_v3 = vpop.f32.mrf.mxu2  ;;  %v2411_v19 = vpop.f32.mrf.mxu3  ;;  %v2455_v4 = vand.u32 2147483648, %v2427_v29  ;;  %v2453_v9 = vand.u32 2147483647, %v2427_v29  ;;  %vm2449_vm15 = vweird.f32 %v2427_v29 }
 0x724   :  { %v2441_v54 = vor.u32 1.1754944e-38, %v2440_v21  ;;  %vm2439_vm2 = vcmp.eq.f32.partialorder %v2438_v47, 8.507059e+37 }
 0x725   :  { %v2456_v48 = vor.u32 1.1754944e-38, %v2455_v4  ;;  %vm2454_vm3 = vcmp.eq.f32.partialorder %v2453_v9, 8.507059e+37  ;;  %v5871_v9 = vld [vmem:[#allocation26_spill] sm:$0xff] }
 0x726   :  { %v4278_v25 = vpop.eup %4277 }
 0x727   :  { %v2428_v36 = vadd.f32 1.0, %v4278_v25 }
 0x728   :  { %v4280_v49 = vpop.eup %4279 }
 0x729   :  { %v4282_v0 = vpop.eup %4281  ;;  %v2430_v31 = vmul.f32 %v4280_v49, %v2426_v41  ;;  %4283 = vrcp.f32 %v2428_v36  ;;  %vm2435_vm12 = vweird.f32 %v4280_v49  ;;  %vm2464_vm5 = vweird.f32 %v2428_v36 }
 0x72a   :  { %v2445_v53 = vmul.f32 %v4282_v0, %v2427_v29  ;;  %4285 = vtanh.f32 %v2416_v51  ;;  %vm2450_vm13 = vweird.f32 %v4282_v0  ;;  %vm2436_vm0 = vmor %vm2434_vm14, %vm2435_vm12 }
 0x72b   :  { %v2431_v1 = vsub.f32 1.0, %v2430_v31  ;;  %vm2451_vm1 = vmor %vm2449_vm15, %vm2450_vm13 }
 0x72c   :  { %v2446_v14 = vsub.f32 1.0, %v2445_v53 }
 0x72d   :  { %v2432_v18 = vmul.f32 %v4280_v49, %v2431_v1 }
 0x72e   :  { %v2447_v20 = vmul.f32 %v4282_v0, %v2446_v14  ;;  %v2470_v14 = vand.u32 2147483648, %v2428_v36 }
 0x72f   :  { %v4284_v23 = vpop.eup %4283  ;;  %v2433_v32 = vadd.f32 %v4280_v49, %v2432_v18 }
 0x730   :  { %v2460_v33 = vmul.f32 %v4284_v23, %v2428_v36  ;;  %v2448_v38 = vadd.f32 %v4282_v0, %v2447_v20  ;;  %v4286_v19 = vpop.eup %4285  ;;  %vm2465_vm4 = vweird.f32 %v4284_v23  ;;  %v2471_v4 = vor.u32 1.1754944e-38, %v2470_v14 }
 0x731   :  { %v2437_v3 = vsel %vm2436_vm0, %v4280_v49, %v2433_v32  ;;  %v2468_v49 = vand.u32 2147483647, %v2428_v36  ;;  %vm2466_vm6 = vmor %vm2464_vm5, %vm2465_vm4 }
 0x732   :  { %v2461_v25 = vsub.f32 1.0, %v2460_v33  ;;  %v2442_v5 = vsel %vm2439_vm2, %v2441_v54, %v2437_v3  ;;  %v2452_v52 = vsel %vm2451_vm1, %v4282_v0, %v2448_v38 }
 0x733   :  { %v2457_v51 = vsel %vm2454_vm3, %v2456_v48, %v2452_v52  ;;  %v2476_v31 = vmul.f32 %v4286_v19, %v2442_v5  ;;  %vm2469_vm7 = vcmp.eq.f32.partialorder %v2468_v49, 8.507059e+37  ;;  %v5872_v19 = vld [vmem:[#allocation28_spill] sm:$0xff] }
 0x734   :  { %v2462_v53 = vmul.f32 %v4284_v23, %v2461_v25  ;;  %v2475_v1 = vmul.f32 %v2457_v51, %v5504_v28  ;;  %v5870_v28 = vld [vmem:[#allocation24_spill] sm:$0xff]  ;;  %v1998_v25 = vadd.f32 %v5872_v19, %v5498_v42 }
 0x735   :  { %v1940_v36 = vadd.f32 %v5870_v28, %v5488_v43 }
 0x736   :  { %v5548_v41 = vadd.f32 %v2476_v31, %v2475_v1  ;;  %v2463_v29 = vadd.f32 %v4284_v23, %v2462_v53 }
 0x738   :  { %4287 = vtanh.f32 %v5548_v41  ;;  %v2467_v21 = vsel %vm2466_vm6, %v4284_v23, %v2463_v29  ;;  %v1969_v23 = vadd.f32 %v5871_v9, %v5490_v40 }
 0x739   :  { %v2472_v18 = vsel %vm2469_vm7, %v2471_v4, %v2467_v21 }
 0x73e   :  { %v4288_v0 = vpop.eup %4287 }
 0x73f   :  { %v2479_v47 = vmul.f32 %v4288_v0, %v2472_v18 }
 0x741   :  { %v2484_v20 = vpack.c.bf16 %v2479_v47, %v2479_v47  ;;  %v5873_v47 = vld [vmem:[#allocation27_spill] sm:$0xff] }
 0x743   :  { %2493 = vmatmul.bf16.vlgmr.msra.gmra.mxu0 %v2484_v20  ;;  %2506 = vmatmul.bf16.vlgmr.msra.gmra.mxu1 %v2484_v20 }
 0x744   :  { %2519 = vmatmul.bf16.vlgmr.msra.gmra.mxu2 %v2484_v20  ;;  %2532 = vmatmul.bf16.vlgmr.msra.gmra.mxu3 %v2484_v20  ;;  %v2027_v20 = vadd.f32 %v5873_v47, %v5868_v7 }
 0x745   :  { %2733 = vmatpush.bf16.msra.mxu0 %v5216_v61  ;;  %2746 = vmatpush.bf16.msra.mxu1 %v5218_v12 }
 0x746   :  { %2759 = vmatpush.bf16.msra.mxu2 %v5226_v16  ;;  %2772 = vmatpush.bf16.msra.mxu3 %v5229_v27 }
 0x749   :  { %2734 = vmatpush.bf16.msra.mxu0 %v5236_v8  ;;  %2747 = vmatpush.bf16.msra.mxu1 %v5238_v45 }
 0x74a   :  { %2760 = vmatpush.bf16.msra.mxu2 %v5240_v22  ;;  %2773 = vmatpush.bf16.msra.mxu3 %v5255_v34 }
 0x74d   :  { %2735 = vmatpush.bf16.msra.mxu0 %v5245_v35  ;;  %2748 = vmatpush.bf16.msra.mxu1 %v5249_v46 }
 0x74e   :  { %2761 = vmatpush.bf16.msra.mxu2 %v5251_v39  ;;  %2774 = vmatpush.bf16.msra.mxu3 %v5267_v26 }
 0x751   :  { %2736 = vmatpush.bf16.msra.mxu0 %v5258_v59  ;;  %2749 = vmatpush.bf16.msra.mxu1 %v5262_v55 }
 0x752   :  { %2762 = vmatpush.bf16.msra.mxu2 %v5264_v62  ;;  %2775 = vmatpush.bf16.msra.mxu3 %v5284_v13 }
 0x755   :  { %2737 = vmatpush.bf16.msra.mxu0 %v5272_v44  ;;  %2750 = vmatpush.bf16.msra.mxu1 %v5278_v56 }
 0x756   :  { %2763 = vmatpush.bf16.msra.mxu2 %v5280_v60  ;;  %2776 = vmatpush.bf16.msra.mxu3 %v5299_v10 }
 0x759   :  { %2738 = vmatpush.bf16.msra.mxu0 %v5288_v2  ;;  %2751 = vmatpush.bf16.msra.mxu1 %v5292_v58 }
 0x75a   :  { %2764 = vmatpush.bf16.msra.mxu2 %v5294_v50  ;;  %2777 = vmatpush.bf16.msra.mxu3 %v5325_v30 }
 0x75d   :  { %2739 = vmatpush.bf16.msra.mxu0 %v5307_v17  ;;  %2752 = vmatpush.bf16.msra.mxu1 %v5316_v11 }
 0x75e   :  { %2765 = vmatpush.bf16.msra.mxu2 %v5318_v63  ;;  %2778 = vmatpush.bf16.msra.mxu3 %v5341_v6 }
 0x761   :  { %2740 = vmatpush.bf16.msra.mxu0 %v5337_v57  ;;  %2753 = vmatpush.bf16.msra.mxu1 %v5339_v37 }
 0x762   :  { %2766 = vmatpush.bf16.msra.mxu2 %v5345_v15  ;;  %2779 = vmatpush.bf16.msra.mxu3 %v5360_v24 }
 0x7c0   :  { %v2494_v32 = vpop.f32.mrf.mxu0  ;;  %v2507_v33 = vpop.f32.mrf.mxu1 }
 0x7c1   :  { %v2537_v54 = vadd.f32 %v2494_v32, %v1940_v36  ;;  %v2538_v38 = vadd.f32 %v2507_v33, %v1969_v23 }
 0x7c3   :  { %v3926_v48 = vmul.f32 -1.442695, %v2537_v54  ;;  %v3927_v3 = vmul.f32 -1.442695, %v2538_v38 }
 0x7c5   :  { %4289 = vpow2.f32 %v3926_v48 }
 0x7c6   :  { %4291 = vpow2.f32 %v3927_v3 }
 0x7c7   :  { %v2520_v5 = vpop.f32.mrf.mxu2  ;;  %v2533_v52 = vpop.f32.mrf.mxu3 }
 0x7c8   :  { %v2539_v51 = vadd.f32 %v2520_v5, %v1998_v25  ;;  %v2496_v31 = vpop.f32.mrf.mxu0  ;;  %v2509_v53 = vpop.f32.mrf.mxu1  ;;  %v2540_v9 = vadd.f32 %v2533_v52, %v2027_v20 }
 0x7ca   :  { %v3928_v1 = vmul.f32 -1.442695, %v2539_v51 }
 0x7cb   :  { %v4290_v29 = vpop.eup %4289 }
 0x7cc   :  { %v4292_v14 = vpop.eup %4291  ;;  %v2550_v49 = vadd.f32 1.0, %v4290_v29  ;;  %4293 = vpow2.f32 %v3928_v1 }
 0x7cd   :  { %v2551_v21 = vadd.f32 1.0, %v4292_v14 }
 0x7ce   :  { %4295 = vrcp.f32 %v2550_v49  ;;  %v2564_v48 = vand.u32 2147483648, %v2550_v49  ;;  %v2562_v25 = vand.u32 2147483647, %v2550_v49  ;;  %vm2558_vm10 = vweird.f32 %v2550_v49 }
 0x7cf   :  { %4297 = vrcp.f32 %v2551_v21  ;;  %v2522_v4 = vpop.f32.mrf.mxu2  ;;  %v2535_v0 = vpop.f32.mrf.mxu3  ;;  %v2579_v3 = vand.u32 2147483648, %v2551_v21  ;;  %v2577_v51 = vand.u32 2147483647, %v2551_v21  ;;  %vm2573_vm11 = vweird.f32 %v2551_v21 }
 0x7d0   :  { %v2565_v1 = vor.u32 1.1754944e-38, %v2564_v48  ;;  %vm2563_vm14 = vcmp.eq.f32.partialorder %v2562_v25, 8.507059e+37 }
 0x7d1   :  { %v2580_v14 = vor.u32 1.1754944e-38, %v2579_v3  ;;  %vm2578_vm15 = vcmp.eq.f32.partialorder %v2577_v51, 8.507059e+37  ;;  %v5875_v51 = vld [vmem:[#allocation30_spill] sm:$0xff] }
 0x7d2   :  { %v4294_v18 = vpop.eup %4293 }
 0x7d3   :  { %v2552_v28 = vadd.f32 1.0, %v4294_v18 }
 0x7d4   :  { %v4296_v36 = vpop.eup %4295 }
 0x7d5   :  { %v4298_v23 = vpop.eup %4297  ;;  %v2554_v32 = vmul.f32 %v4296_v36, %v2550_v49  ;;  %4299 = vrcp.f32 %v2552_v28  ;;  %vm2559_vm8 = vweird.f32 %v4296_v36  ;;  %vm2588_vm1 = vweird.f32 %v2552_v28 }
 0x7d6   :  { %v2569_v33 = vmul.f32 %v4298_v23, %v2551_v21  ;;  %4301 = vtanh.f32 %v2540_v9  ;;  %vm2574_vm9 = vweird.f32 %v4298_v23  ;;  %vm2560_vm12 = vmor %vm2558_vm10, %vm2559_vm8 }
 0x7d7   :  { %v2555_v54 = vsub.f32 1.0, %v2554_v32  ;;  %vm2575_vm13 = vmor %vm2573_vm11, %vm2574_vm9 }
 0x7d8   :  { %v2570_v38 = vsub.f32 1.0, %v2569_v33 }
 0x7d9   :  { %v2556_v19 = vmul.f32 %v4296_v36, %v2555_v54 }
 0x7da   :  { %v2571_v5 = vmul.f32 %v4298_v23, %v2570_v38  ;;  %v2594_v38 = vand.u32 2147483648, %v2552_v28 }
 0x7db   :  { %v4300_v31 = vpop.eup %4299  ;;  %v2557_v53 = vadd.f32 %v4296_v36, %v2556_v19 }
 0x7dc   :  { %v2584_v52 = vmul.f32 %v4300_v31, %v2552_v28  ;;  %v2572_v29 = vadd.f32 %v4298_v23, %v2571_v5  ;;  %v4302_v0 = vpop.eup %4301  ;;  %vm2589_vm0 = vweird.f32 %v4300_v31  ;;  %v2595_v3 = vor.u32 1.1754944e-38, %v2594_v38 }
 0x7dd   :  { %v2561_v4 = vsel %vm2560_vm12, %v4296_v36, %v2557_v53  ;;  %v2592_v36 = vand.u32 2147483647, %v2552_v28  ;;  %vm2590_vm2 = vmor %vm2588_vm1, %vm2589_vm0 }
 0x7de   :  { %v2585_v18 = vsub.f32 1.0, %v2584_v52  ;;  %v2566_v47 = vsel %vm2563_vm14, %v2565_v1, %v2561_v4  ;;  %v2576_v20 = vsel %vm2575_vm13, %v4298_v23, %v2572_v29 }
 0x7df   :  { %v2581_v9 = vsel %vm2578_vm15, %v2580_v14, %v2576_v20  ;;  %v2600_v32 = vmul.f32 %v4302_v0, %v2566_v47  ;;  %vm2593_vm3 = vcmp.eq.f32.partialorder %v2592_v36, 8.507059e+37  ;;  %v5876_v0 = vld [vmem:[#allocation31_spill] sm:$0xff] }
 0x7e0   :  { %v2586_v33 = vmul.f32 %v4300_v31, %v2585_v18  ;;  %v2599_v54 = vmul.f32 %v2581_v9, %v5548_v41  ;;  %v5874_v41 = vld [vmem:[#allocation29_spill] sm:$0xff]  ;;  %v2000_v18 = vadd.f32 %v5876_v0, %v5498_v42 }
 0x7e1   :  { %v1942_v28 = vadd.f32 %v5874_v41, %v5488_v43 }
 0x7e2   :  { %v5592_v49 = vadd.f32 %v2600_v32, %v2599_v54  ;;  %v2587_v21 = vadd.f32 %v4300_v31, %v2586_v33 }
 0x7e4   :  { %4303 = vtanh.f32 %v5592_v49  ;;  %v2591_v48 = vsel %vm2590_vm2, %v4300_v31, %v2587_v21  ;;  %v1971_v31 = vadd.f32 %v5875_v51, %v5490_v40 }
 0x7e5   :  { %v2596_v19 = vsel %vm2593_vm3, %v2595_v3, %v2591_v48 }
 0x7ea   :  { %v4304_v23 = vpop.eup %4303 }
 0x7eb   :  { %v2603_v25 = vmul.f32 %v4304_v23, %v2596_v19 }
 0x7ed   :  { %v2608_v5 = vpack.c.bf16 %v2603_v25, %v2603_v25  ;;  %v5877_v25 = vld [vmem:[#allocation32_spill] sm:$0xff] }
 0x7ef   :  { %2617 = vmatmul.bf16.vlgmr.msrb.gmra.mxu0 %v2608_v5  ;;  %2630 = vmatmul.bf16.vlgmr.msrb.gmra.mxu1 %v2608_v5 }
 0x7f0   :  { %2643 = vmatmul.bf16.vlgmr.msrb.gmra.mxu2 %v2608_v5  ;;  %2656 = vmatmul.bf16.vlgmr.msrb.gmra.mxu3 %v2608_v5  ;;  %v2029_v5 = vadd.f32 %v5877_v25, %v5868_v7 }
 0x7f1   :  { %2857 = vmatpush.bf16.msrb.mxu0 %v5216_v61  ;;  %2870 = vmatpush.bf16.msrb.mxu1 %v5218_v12 }
 0x7f2   :  { %2883 = vmatpush.bf16.msrb.mxu2 %v5226_v16  ;;  %2896 = vmatpush.bf16.msrb.mxu3 %v5229_v27 }
 0x7f5   :  { %2858 = vmatpush.bf16.msrb.mxu0 %v5236_v8  ;;  %2871 = vmatpush.bf16.msrb.mxu1 %v5238_v45 }
 0x7f6   :  { %2884 = vmatpush.bf16.msrb.mxu2 %v5240_v22  ;;  %2897 = vmatpush.bf16.msrb.mxu3 %v5255_v34 }
 0x7f9   :  { %2859 = vmatpush.bf16.msrb.mxu0 %v5245_v35  ;;  %2872 = vmatpush.bf16.msrb.mxu1 %v5249_v46 }
 0x7fa   :  { %2885 = vmatpush.bf16.msrb.mxu2 %v5251_v39  ;;  %2898 = vmatpush.bf16.msrb.mxu3 %v5267_v26 }
 0x7fd   :  { %2860 = vmatpush.bf16.msrb.mxu0 %v5258_v59  ;;  %2873 = vmatpush.bf16.msrb.mxu1 %v5262_v55 }
 0x7fe   :  { %2886 = vmatpush.bf16.msrb.mxu2 %v5264_v62  ;;  %2899 = vmatpush.bf16.msrb.mxu3 %v5284_v13 }
 0x801   :  { %2861 = vmatpush.bf16.msrb.mxu0 %v5272_v44  ;;  %2874 = vmatpush.bf16.msrb.mxu1 %v5278_v56 }
 0x802   :  { %2887 = vmatpush.bf16.msrb.mxu2 %v5280_v60  ;;  %2900 = vmatpush.bf16.msrb.mxu3 %v5299_v10 }
 0x805   :  { %2862 = vmatpush.bf16.msrb.mxu0 %v5288_v2  ;;  %2875 = vmatpush.bf16.msrb.mxu1 %v5292_v58 }
 0x806   :  { %2888 = vmatpush.bf16.msrb.mxu2 %v5294_v50  ;;  %2901 = vmatpush.bf16.msrb.mxu3 %v5325_v30 }
 0x809   :  { %2863 = vmatpush.bf16.msrb.mxu0 %v5307_v17  ;;  %2876 = vmatpush.bf16.msrb.mxu1 %v5316_v11 }
 0x80a   :  { %2889 = vmatpush.bf16.msrb.mxu2 %v5318_v63  ;;  %2902 = vmatpush.bf16.msrb.mxu3 %v5341_v6 }
 0x80d   :  { %2864 = vmatpush.bf16.msrb.mxu0 %v5337_v57  ;;  %2877 = vmatpush.bf16.msrb.mxu1 %v5339_v37 }
 0x80e   :  { %2890 = vmatpush.bf16.msrb.mxu2 %v5345_v15  ;;  %2903 = vmatpush.bf16.msrb.mxu3 %v5360_v24 }
 0x86c   :  { %v2618_v53 = vpop.f32.mrf.mxu0  ;;  %v2631_v52 = vpop.f32.mrf.mxu1 }
 0x86d   :  { %v2661_v1 = vadd.f32 %v2618_v53, %v1942_v28  ;;  %v2662_v29 = vadd.f32 %v2631_v52, %v1971_v31 }
 0x86f   :  { %v3929_v14 = vmul.f32 -1.442695, %v2661_v1  ;;  %v3930_v4 = vmul.f32 -1.442695, %v2662_v29 }
 0x871   :  { %4305 = vpow2.f32 %v3929_v14 }
 0x872   :  { %4307 = vpow2.f32 %v3930_v4 }
 0x873   :  { %v2644_v47 = vpop.f32.mrf.mxu2  ;;  %v2657_v20 = vpop.f32.mrf.mxu3 }
 0x874   :  { %v2663_v9 = vadd.f32 %v2644_v47, %v2000_v18  ;;  %v2620_v32 = vpop.f32.mrf.mxu0  ;;  %v2633_v33 = vpop.f32.mrf.mxu1  ;;  %v2664_v51 = vadd.f32 %v2657_v20, %v2029_v5 }
 0x876   :  { %v3931_v54 = vmul.f32 -1.442695, %v2663_v9 }
 0x877   :  { %v4306_v21 = vpop.eup %4305 }
 0x878   :  { %v4308_v38 = vpop.eup %4307  ;;  %v2674_v36 = vadd.f32 1.0, %v4306_v21  ;;  %4309 = vpow2.f32 %v3931_v54 }
 0x879   :  { %v2675_v48 = vadd.f32 1.0, %v4308_v38 }
 0x87a   :  { %4311 = vrcp.f32 %v2674_v36  ;;  %v2688_v14 = vand.u32 2147483648, %v2674_v36  ;;  %v2686_v18 = vand.u32 2147483647, %v2674_v36  ;;  %vm2682_vm6 = vweird.f32 %v2674_v36 }
 0x87b   :  { %4313 = vrcp.f32 %v2675_v48  ;;  %v2646_v3 = vpop.f32.mrf.mxu2  ;;  %v2659_v23 = vpop.f32.mrf.mxu3  ;;  %v2703_v4 = vand.u32 2147483648, %v2675_v48  ;;  %v2701_v9 = vand.u32 2147483647, %v2675_v48  ;;  %vm2697_vm7 = vweird.f32 %v2675_v48 }
 0x87c   :  { %v2689_v54 = vor.u32 1.1754944e-38, %v2688_v14  ;;  %vm2687_vm10 = vcmp.eq.f32.partialorder %v2686_v18, 8.507059e+37 }
 0x87d   :  { %v2704_v38 = vor.u32 1.1754944e-38, %v2703_v4  ;;  %vm2702_vm11 = vcmp.eq.f32.partialorder %v2701_v9, 8.507059e+37  ;;  %v5879_v9 = vld [vmem:[#allocation34_spill] sm:$0xff] }
 0x87e   :  { %v4310_v19 = vpop.eup %4309 }
 0x87f   :  { %v2676_v41 = vadd.f32 1.0, %v4310_v19 }
 0x880   :  { %v4312_v28 = vpop.eup %4311 }
 0x881   :  { %v4314_v31 = vpop.eup %4313  ;;  %v2678_v53 = vmul.f32 %v4312_v28, %v2674_v36  ;;  %4315 = vrcp.f32 %v2676_v41  ;;  %vm2683_vm4 = vweird.f32 %v4312_v28  ;;  %vm2712_vm13 = vweird.f32 %v2676_v41 }
 0x882   :  { %v2693_v52 = vmul.f32 %v4314_v31, %v2675_v48  ;;  %4317 = vtanh.f32 %v2664_v51  ;;  %vm2698_vm5 = vweird.f32 %v4314_v31  ;;  %vm2684_vm8 = vmor %vm2682_vm6, %vm2683_vm4 }
 0x883   :  { %v2679_v1 = vsub.f32 1.0, %v2678_v53  ;;  %vm2699_vm9 = vmor %vm2697_vm7, %vm2698_vm5 }
 0x884   :  { %v2694_v29 = vsub.f32 1.0, %v2693_v52 }
 0x885   :  { %v2680_v0 = vmul.f32 %v4312_v28, %v2679_v1 }
 0x886   :  { %v2695_v47 = vmul.f32 %v4314_v31, %v2694_v29  ;;  %v2718_v29 = vand.u32 2147483648, %v2676_v41 }
 0x887   :  { %v4316_v32 = vpop.eup %4315  ;;  %v2681_v33 = vadd.f32 %v4312_v28, %v2680_v0 }
 0x888   :  { %v2708_v20 = vmul.f32 %v4316_v32, %v2676_v41  ;;  %v2696_v21 = vadd.f32 %v4314_v31, %v2695_v47  ;;  %v4318_v23 = vpop.eup %4317  ;;  %vm2713_vm12 = vweird.f32 %v4316_v32  ;;  %v2719_v4 = vor.u32 1.1754944e-38, %v2718_v29 }
 0x889   :  { %v2685_v3 = vsel %vm2684_vm8, %v4312_v28, %v2681_v33  ;;  %v2716_v28 = vand.u32 2147483647, %v2676_v41  ;;  %vm2714_vm14 = vmor %vm2712_vm13, %vm2713_vm12 }
 0x88a   :  { %v2709_v19 = vsub.f32 1.0, %v2708_v20  ;;  %v2690_v25 = vsel %vm2687_vm10, %v2689_v54, %v2685_v3  ;;  %v2700_v5 = vsel %vm2699_vm9, %v4314_v31, %v2696_v21 }
 0x88b   :  { %v2705_v51 = vsel %vm2702_vm11, %v2704_v38, %v2700_v5  ;;  %v2724_v53 = vmul.f32 %v4318_v23, %v2690_v25  ;;  %vm2717_vm15 = vcmp.eq.f32.partialorder %v2716_v28, 8.507059e+37  ;;  %v5880_v23 = vld [vmem:[#allocation36_spill] sm:$0xff] }
 0x88c   :  { %v2710_v52 = vmul.f32 %v4316_v32, %v2709_v19  ;;  %v2723_v1 = vmul.f32 %v2705_v51, %v5592_v49  ;;  %v5878_v49 = vld [vmem:[#allocation33_spill] sm:$0xff]  ;;  %v2003_v19 = vadd.f32 %v5880_v23, %v5498_v42 }
 0x88d   :  { %v1945_v41 = vadd.f32 %v5878_v49, %v5488_v43 }
 0x88e   :  { %v5636_v36 = vadd.f32 %v2724_v53, %v2723_v1  ;;  %v2711_v48 = vadd.f32 %v4316_v32, %v2710_v52 }
 0x890   :  { %4319 = vtanh.f32 %v5636_v36  ;;  %v2715_v14 = vsel %vm2714_vm14, %v4316_v32, %v2711_v48  ;;  %v1974_v32 = vadd.f32 %v5879_v9, %v5490_v40 }
 0x891   :  { %v2720_v0 = vsel %vm2717_vm15, %v2719_v4, %v2715_v14 }
 0x896   :  { %v4320_v31 = vpop.eup %4319 }
 0x897   :  { %v2727_v18 = vmul.f32 %v4320_v31, %v2720_v0 }
 0x899   :  { %v2732_v47 = vpack.c.bf16 %v2727_v18, %v2727_v18  ;;  %v5881_v18 = vld [vmem:[#allocation35_spill] sm:$0xff] }
 0x89b   :  { %2741 = vmatmul.bf16.vlgmr.msra.gmra.mxu0 %v2732_v47  ;;  %2754 = vmatmul.bf16.vlgmr.msra.gmra.mxu1 %v2732_v47 }
 0x89c   :  { %2767 = vmatmul.bf16.vlgmr.msra.gmra.mxu2 %v2732_v47  ;;  %2780 = vmatmul.bf16.vlgmr.msra.gmra.mxu3 %v2732_v47  ;;  %v2032_v47 = vadd.f32 %v5881_v18, %v5868_v7 }
 0x89d   :  { %2981 = vmatpush.bf16.msra.mxu0 %v5216_v61  ;;  %2994 = vmatpush.bf16.msra.mxu1 %v5218_v12 }
 0x89e   :  { %3007 = vmatpush.bf16.msra.mxu2 %v5226_v16  ;;  %3020 = vmatpush.bf16.msra.mxu3 %v5229_v27 }
 0x8a1   :  { %2982 = vmatpush.bf16.msra.mxu0 %v5236_v8  ;;  %2995 = vmatpush.bf16.msra.mxu1 %v5238_v45 }
 0x8a2   :  { %3008 = vmatpush.bf16.msra.mxu2 %v5240_v22  ;;  %3021 = vmatpush.bf16.msra.mxu3 %v5255_v34 }
 0x8a5   :  { %2983 = vmatpush.bf16.msra.mxu0 %v5245_v35  ;;  %2996 = vmatpush.bf16.msra.mxu1 %v5249_v46 }
 0x8a6   :  { %3009 = vmatpush.bf16.msra.mxu2 %v5251_v39  ;;  %3022 = vmatpush.bf16.msra.mxu3 %v5267_v26 }
 0x8a9   :  { %2984 = vmatpush.bf16.msra.mxu0 %v5258_v59  ;;  %2997 = vmatpush.bf16.msra.mxu1 %v5262_v55 }
 0x8aa   :  { %3010 = vmatpush.bf16.msra.mxu2 %v5264_v62  ;;  %3023 = vmatpush.bf16.msra.mxu3 %v5284_v13 }
 0x8ad   :  { %2985 = vmatpush.bf16.msra.mxu0 %v5272_v44  ;;  %2998 = vmatpush.bf16.msra.mxu1 %v5278_v56 }
 0x8ae   :  { %3011 = vmatpush.bf16.msra.mxu2 %v5280_v60  ;;  %3024 = vmatpush.bf16.msra.mxu3 %v5299_v10 }
 0x8b1   :  { %2986 = vmatpush.bf16.msra.mxu0 %v5288_v2  ;;  %2999 = vmatpush.bf16.msra.mxu1 %v5292_v58 }
 0x8b2   :  { %3012 = vmatpush.bf16.msra.mxu2 %v5294_v50  ;;  %3025 = vmatpush.bf16.msra.mxu3 %v5325_v30 }
 0x8b5   :  { %2987 = vmatpush.bf16.msra.mxu0 %v5307_v17  ;;  %3000 = vmatpush.bf16.msra.mxu1 %v5316_v11 }
 0x8b6   :  { %3013 = vmatpush.bf16.msra.mxu2 %v5318_v63  ;;  %3026 = vmatpush.bf16.msra.mxu3 %v5341_v6 }
 0x8b9   :  { %2988 = vmatpush.bf16.msra.mxu0 %v5337_v57  ;;  %3001 = vmatpush.bf16.msra.mxu1 %v5339_v37 }
 0x8ba   :  { %3014 = vmatpush.bf16.msra.mxu2 %v5345_v15  ;;  %3027 = vmatpush.bf16.msra.mxu3 %v5360_v24 }
 0x918   :  { %v2742_v33 = vpop.f32.mrf.mxu0  ;;  %v2755_v20 = vpop.f32.mrf.mxu1 }
 0x919   :  { %v2785_v54 = vadd.f32 %v2742_v33, %v1945_v41  ;;  %v2786_v21 = vadd.f32 %v2755_v20, %v1974_v32 }
 0x91b   :  { %v3932_v38 = vmul.f32 -1.442695, %v2785_v54  ;;  %v3933_v3 = vmul.f32 -1.442695, %v2786_v21 }
 0x91d   :  { %4321 = vpow2.f32 %v3932_v38 }
 0x91e   :  { %4323 = vpow2.f32 %v3933_v3 }
 0x91f   :  { %v2768_v25 = vpop.f32.mrf.mxu2  ;;  %v2781_v5 = vpop.f32.mrf.mxu3 }
 0x920   :  { %v2787_v51 = vadd.f32 %v2768_v25, %v2003_v19  ;;  %v2744_v53 = vpop.f32.mrf.mxu0  ;;  %v2757_v52 = vpop.f32.mrf.mxu1  ;;  %v2788_v9 = vadd.f32 %v2781_v5, %v2032_v47 }
 0x922   :  { %v3934_v1 = vmul.f32 -1.442695, %v2787_v51 }
 0x923   :  { %v4322_v48 = vpop.eup %4321 }
 0x924   :  { %v4324_v29 = vpop.eup %4323  ;;  %v2798_v28 = vadd.f32 1.0, %v4322_v48  ;;  %4325 = vpow2.f32 %v3934_v1 }
 0x925   :  { %v2799_v14 = vadd.f32 1.0, %v4324_v29 }
 0x926   :  { %4327 = vrcp.f32 %v2798_v28  ;;  %v2812_v38 = vand.u32 2147483648, %v2798_v28  ;;  %v2810_v19 = vand.u32 2147483647, %v2798_v28  ;;  %vm2806_vm2 = vweird.f32 %v2798_v28 }
 0x927   :  { %4329 = vrcp.f32 %v2799_v14  ;;  %v2770_v4 = vpop.f32.mrf.mxu2  ;;  %v2783_v31 = vpop.f32.mrf.mxu3  ;;  %v2827_v3 = vand.u32 2147483648, %v2799_v14  ;;  %v2825_v51 = vand.u32 2147483647, %v2799_v14  ;;  %vm2821_vm3 = vweird.f32 %v2799_v14 }
 0x928   :  { %v2813_v1 = vor.u32 1.1754944e-38, %v2812_v38  ;;  %vm2811_vm6 = vcmp.eq.f32.partialorder %v2810_v19, 8.507059e+37 }
 0x929   :  { %v2828_v29 = vor.u32 1.1754944e-38, %v2827_v3  ;;  %vm2826_vm7 = vcmp.eq.f32.partialorder %v2825_v51, 8.507059e+37 }
 0x92a   :  { %v4326_v0 = vpop.eup %4325 }
 0x92b   :  { %v2800_v49 = vadd.f32 1.0, %v4326_v0 }
 0x92c   :  { %v4328_v41 = vpop.eup %4327 }
 0x92d   :  { %v4330_v32 = vpop.eup %4329  ;;  %v2802_v33 = vmul.f32 %v4328_v41, %v2798_v28  ;;  %4331 = vrcp.f32 %v2800_v49  ;;  %vm2807_vm0 = vweird.f32 %v4328_v41  ;;  %vm2836_vm9 = vweird.f32 %v2800_v49 }
 0x92e   :  { %v2817_v20 = vmul.f32 %v4330_v32, %v2799_v14  ;;  %4333 = vtanh.f32 %v2788_v9  ;;  %vm2822_vm1 = vweird.f32 %v4330_v32  ;;  %vm2808_vm4 = vmor %vm2806_vm2, %vm2807_vm0 }
 0x92f   :  { %v2803_v54 = vsub.f32 1.0, %v2802_v33  ;;  %vm2823_vm5 = vmor %vm2821_vm3, %vm2822_vm1 }
 0x930   :  { %v2818_v21 = vsub.f32 1.0, %v2817_v20 }
 0x931   :  { %v2804_v23 = vmul.f32 %v4328_v41, %v2803_v54 }
 0x932   :  { %v2819_v25 = vmul.f32 %v4330_v32, %v2818_v21  ;;  %v2842_v21 = vand.u32 2147483648, %v2800_v49 }
 0x933   :  { %v4332_v53 = vpop.eup %4331  ;;  %v2805_v52 = vadd.f32 %v4328_v41, %v2804_v23 }
 0x934   :  { %v2832_v5 = vmul.f32 %v4332_v53, %v2800_v49  ;;  %v2820_v48 = vadd.f32 %v4330_v32, %v2819_v25  ;;  %v4334_v31 = vpop.eup %4333  ;;  %vm2837_vm8 = vweird.f32 %v4332_v53  ;;  %v2843_v3 = vor.u32 1.1754944e-38, %v2842_v21 }
 0x935   :  { %v2809_v4 = vsel %vm2808_vm4, %v4328_v41, %v2805_v52  ;;  %v2840_v41 = vand.u32 2147483647, %v2800_v49  ;;  %vm2838_vm10 = vmor %vm2836_vm9, %vm2837_vm8 }
 0x936   :  { %v2833_v0 = vsub.f32 1.0, %v2832_v5  ;;  %v2814_v18 = vsel %vm2811_vm6, %v2813_v1, %v2809_v4  ;;  %v2824_v47 = vsel %vm2823_vm5, %v4330_v32, %v2820_v48 }
 0x937   :  { %v2829_v9 = vsel %vm2826_vm7, %v2828_v29, %v2824_v47  ;;  %v2848_v33 = vmul.f32 %v4334_v31, %v2814_v18  ;;  %vm2841_vm11 = vcmp.eq.f32.partialorder %v2840_v41, 8.507059e+37 }
 0x938   :  { %v2834_v20 = vmul.f32 %v4332_v53, %v2833_v0  ;;  %v2847_v54 = vmul.f32 %v2829_v9, %v5636_v36 }
 0x93a   :  { %v5680_v28 = vadd.f32 %v2848_v33, %v2847_v54  ;;  %v2835_v14 = vadd.f32 %v4332_v53, %v2834_v20 }
 0x93c   :  { %4335 = vtanh.f32 %v5680_v28  ;;  %v2839_v38 = vsel %vm2838_vm10, %v4332_v53, %v2835_v14 }
 0x93d   :  { %v2844_v23 = vsel %vm2841_vm11, %v2843_v3, %v2839_v38 }
 0x942   :  { %v4336_v32 = vpop.eup %4335 }
 0x943   :  { %v2851_v19 = vmul.f32 %v4336_v32, %v2844_v23 }
 0x945   :  { %v2856_v25 = vpack.c.bf16 %v2851_v19, %v2851_v19 }
 0x947   :  { %2865 = vmatmul.bf16.vlgmr.msrb.gmra.mxu0 %v2856_v25  ;;  %2878 = vmatmul.bf16.vlgmr.msrb.gmra.mxu1 %v2856_v25 }
 0x948   :  { %2891 = vmatmul.bf16.vlgmr.msrb.gmra.mxu2 %v2856_v25  ;;  %2904 = vmatmul.bf16.vlgmr.msrb.gmra.mxu3 %v2856_v25 }
 0x949   :  { %3105 = vmatpush.bf16.msrb.mxu0 %v5216_v61  ;;  %3118 = vmatpush.bf16.msrb.mxu1 %v5218_v12  ;;  %v5882_v61 = vld [vmem:[#allocation37_spill] sm:$0xff] }
 0x94a   :  { %3131 = vmatpush.bf16.msrb.mxu2 %v5226_v16  ;;  %3144 = vmatpush.bf16.msrb.mxu3 %v5229_v27  ;;  %v1947_v12 = vadd.f32 %v5882_v61, %v5488_v43  ;;  %v5883_v16 = vld [vmem:[#allocation38_spill] sm:$0xff] }
 0x94b   :  { %v1976_v27 = vadd.f32 %v5883_v16, %v5490_v40 }
 0x94d   :  { %3106 = vmatpush.bf16.msrb.mxu0 %v5236_v8  ;;  %3119 = vmatpush.bf16.msrb.mxu1 %v5238_v45 }
 0x94e   :  { %3132 = vmatpush.bf16.msrb.mxu2 %v5240_v22  ;;  %3145 = vmatpush.bf16.msrb.mxu3 %v5255_v34  ;;  %v5884_v34 = vld [vmem:[#allocation39_spill] sm:$0xff] }
 0x951   :  { %3107 = vmatpush.bf16.msrb.mxu0 %v5245_v35  ;;  %3120 = vmatpush.bf16.msrb.mxu1 %v5249_v46 }
 0x952   :  { %3133 = vmatpush.bf16.msrb.mxu2 %v5251_v39  ;;  %3146 = vmatpush.bf16.msrb.mxu3 %v5267_v26 }
 0x955   :  { %3108 = vmatpush.bf16.msrb.mxu0 %v5258_v59  ;;  %3121 = vmatpush.bf16.msrb.mxu1 %v5262_v55  ;;  %v2005_v59 = vadd.f32 %v5884_v34, %v5498_v42 }
 0x956   :  { %3134 = vmatpush.bf16.msrb.mxu2 %v5264_v62  ;;  %3147 = vmatpush.bf16.msrb.mxu3 %v5284_v13 }
 0x959   :  { %3109 = vmatpush.bf16.msrb.mxu0 %v5272_v44  ;;  %3122 = vmatpush.bf16.msrb.mxu1 %v5278_v56 }
 0x95a   :  { %3135 = vmatpush.bf16.msrb.mxu2 %v5280_v60  ;;  %3148 = vmatpush.bf16.msrb.mxu3 %v5299_v10 }
 0x95d   :  { %3110 = vmatpush.bf16.msrb.mxu0 %v5288_v2  ;;  %3123 = vmatpush.bf16.msrb.mxu1 %v5292_v58 }
 0x95e   :  { %3136 = vmatpush.bf16.msrb.mxu2 %v5294_v50  ;;  %3149 = vmatpush.bf16.msrb.mxu3 %v5325_v30 }
 0x961   :  { %3111 = vmatpush.bf16.msrb.mxu0 %v5307_v17  ;;  %3124 = vmatpush.bf16.msrb.mxu1 %v5316_v11 }
 0x962   :  { %3137 = vmatpush.bf16.msrb.mxu2 %v5318_v63  ;;  %3150 = vmatpush.bf16.msrb.mxu3 %v5341_v6  ;;  %v5885_v63 = vld [vmem:[#allocation40_spill] sm:$0xff] }
 0x963   :  { %v2034_v30 = vadd.f32 %v5885_v63, %v5868_v7 }
 0x965   :  { %3112 = vmatpush.bf16.msrb.mxu0 %v5337_v57  ;;  %3125 = vmatpush.bf16.msrb.mxu1 %v5339_v37 }
 0x966   :  { %3138 = vmatpush.bf16.msrb.mxu2 %v5345_v15  ;;  %3151 = vmatpush.bf16.msrb.mxu3 %v5360_v24 }
 0x9c4   :  { %v2866_v8 = vpop.f32.mrf.mxu0  ;;  %v2879_v45 = vpop.f32.mrf.mxu1 }
 0x9c5   :  { %v2909_v22 = vadd.f32 %v2866_v8, %v1947_v12  ;;  %v2910_v35 = vadd.f32 %v2879_v45, %v1976_v27 }
 0x9c7   :  { %v3935_v46 = vmul.f32 -1.442695, %v2909_v22  ;;  %v3936_v39 = vmul.f32 -1.442695, %v2910_v35 }
 0x9c9   :  { %4337 = vpow2.f32 %v3935_v46  ;;  %v5887_v46 = vld [vmem:[#allocation42_spill] sm:$0xff] }
 0x9ca   :  { %4339 = vpow2.f32 %v3936_v39  ;;  %v1979_v39 = vadd.f32 %v5887_v46, %v5490_v40 }
 0x9cb   :  { %v2892_v55 = vpop.f32.mrf.mxu2  ;;  %v2905_v62 = vpop.f32.mrf.mxu3 }
 0x9cc   :  { %v2911_v26 = vadd.f32 %v2892_v55, %v2005_v59  ;;  %v2868_v44 = vpop.f32.mrf.mxu0  ;;  %v2881_v56 = vpop.f32.mrf.mxu1  ;;  %v2912_v6 = vadd.f32 %v2905_v62, %v2034_v30 }
 0x9cd   :  { %v5888_v56 = vld [vmem:[#allocation44_spill] sm:$0xff] }
 0x9ce   :  { %v3937_v60 = vmul.f32 -1.442695, %v2911_v26 }
 0x9cf   :  { %v4338_v13 = vpop.eup %4337 }
 0x9d0   :  { %v4340_v2 = vpop.eup %4339  ;;  %v2922_v58 = vadd.f32 1.0, %v4338_v13  ;;  %4341 = vpow2.f32 %v3937_v60  ;;  %v2008_v60 = vadd.f32 %v5888_v56, %v5498_v42  ;;  %v5890_v56 = vld [vmem:[#allocation22_spill] sm:$0xff] }
 0x9d1   :  { %v2923_v50 = vadd.f32 1.0, %v4340_v2 }
 0x9d2   :  { %4343 = vrcp.f32 %v2922_v58  ;;  %v2936_v53 = vand.u32 2147483648, %v2922_v58  ;;  %v2934_v1 = vand.u32 2147483647, %v2922_v58  ;;  %vm2930_vm14 = vweird.f32 %v2922_v58 }
 0x9d3   :  { %4345 = vrcp.f32 %v2923_v50  ;;  %v2894_v10 = vpop.f32.mrf.mxu2  ;;  %v2907_v17 = vpop.f32.mrf.mxu3  ;;  %v2951_v52 = vand.u32 2147483648, %v2923_v50  ;;  %v2949_v29 = vand.u32 2147483647, %v2923_v50  ;;  %vm2945_vm15 = vweird.f32 %v2923_v50 }
 0x9d4   :  { %v2937_v18 = vor.u32 1.1754944e-38, %v2936_v53  ;;  %vm2935_vm2 = vcmp.eq.f32.partialorder %v2934_v1, 8.507059e+37 }
 0x9d5   :  { %v2952_v9 = vor.u32 1.1754944e-38, %v2951_v52  ;;  %vm2950_vm3 = vcmp.eq.f32.partialorder %v2949_v29, 8.507059e+37 }
 0x9d6   :  { %v4342_v11 = vpop.eup %4341 }
 0x9d7   :  { %v2924_v57 = vadd.f32 1.0, %v4342_v11 }
 0x9d8   :  { %v4344_v37 = vpop.eup %4343 }
 0x9d9   :  { %v4346_v15 = vpop.eup %4345  ;;  %v2926_v24 = vmul.f32 %v4344_v37, %v2922_v58  ;;  %4347 = vrcp.f32 %v2924_v57  ;;  %vm2931_vm12 = vweird.f32 %v4344_v37  ;;  %v2966_v25 = vand.u32 2147483648, %v2924_v57 }
 0x9da   :  { %v2941_v36 = vmul.f32 %v4346_v15, %v2923_v50  ;;  %4349 = vtanh.f32 %v2912_v6  ;;  %vm2946_vm13 = vweird.f32 %v4346_v15  ;;  %vm2932_vm0 = vmor %vm2930_vm14, %vm2931_vm12  ;;  %vm2960_vm5 = vweird.f32 %v2924_v57 }
 0x9db   :  { %v2927_v49 = vsub.f32 1.0, %v2926_v24  ;;  %vm2947_vm1 = vmor %vm2945_vm15, %vm2946_vm13  ;;  %v2964_v61 = vand.u32 2147483647, %v2924_v57  ;;  %v2967_v16 = vor.u32 1.1754944e-38, %v2966_v25  ;;  %v5889_v24 = vld [vmem:[#allocation25_spill] sm:$0xff] }
 0x9dc   :  { %v2942_v51 = vsub.f32 1.0, %v2941_v36  ;;  %v2037_v36 = vadd.f32 %v5889_v24, %v5868_v7 }
 0x9dd   :  { %v2928_v5 = vmul.f32 %v4344_v37, %v2927_v49  ;;  %vm2965_vm7 = vcmp.eq.f32.partialorder %v2964_v61, 8.507059e+37 }
 0x9de   :  { %v2943_v48 = vmul.f32 %v4346_v15, %v2942_v51 }
 0x9df   :  { %v4348_v4 = vpop.eup %4347  ;;  %v2929_v31 = vadd.f32 %v4344_v37, %v2928_v5 }
 0x9e0   :  { %v2956_v0 = vmul.f32 %v4348_v4, %v2924_v57  ;;  %v2944_v47 = vadd.f32 %v4346_v15, %v2943_v48  ;;  %v4350_v20 = vpop.eup %4349  ;;  %vm2961_vm4 = vweird.f32 %v4348_v4 }
 0x9e1   :  { %v2933_v33 = vsel %vm2932_vm0, %v4344_v37, %v2929_v31  ;;  %vm2962_vm6 = vmor %vm2960_vm5, %vm2961_vm4 }
 0x9e2   :  { %v2957_v54 = vsub.f32 1.0, %v2956_v0  ;;  %v2938_v14 = vsel %vm2935_vm2, %v2937_v18, %v2933_v33  ;;  %v2948_v21 = vsel %vm2947_vm1, %v4346_v15, %v2944_v47 }
 0x9e3   :  { %v2953_v41 = vsel %vm2950_vm3, %v2952_v9, %v2948_v21  ;;  %v2972_v38 = vmul.f32 %v4350_v20, %v2938_v14 }
 0x9e4   :  { %v2958_v3 = vmul.f32 %v4348_v4, %v2957_v54  ;;  %v2971_v32 = vmul.f32 %v2953_v41, %v5680_v28  ;;  %v5886_v28 = vld [vmem:[#allocation41_spill] sm:$0xff] }
 0x9e5   :  { %v1950_v35 = vadd.f32 %v5886_v28, %v5488_v43 }
 0x9e6   :  { %v5724_v23 = vadd.f32 %v2972_v38, %v2971_v32  ;;  %v2959_v19 = vadd.f32 %v4348_v4, %v2958_v3 }
 0x9e8   :  { %4351 = vtanh.f32 %v5724_v23  ;;  %v2963_v12 = vsel %vm2962_vm6, %v4348_v4, %v2959_v19 }
 0x9e9   :  { %v2968_v8 = vsel %vm2965_vm7, %v2967_v16, %v2963_v12 }
 0x9ee   :  { %v4352_v27 = vpop.eup %4351 }
 0x9ef   :  { %v2975_v45 = vmul.f32 %v4352_v27, %v2968_v8 }
 0x9f1   :  { %v2980_v22 = vpack.c.bf16 %v2975_v45, %v2975_v45 }
 0x9f3   :  { %2989 = vmatmul.bf16.vlgmr.msra.gmra.mxu0 %v2980_v22  ;;  %3002 = vmatmul.bf16.vlgmr.msra.gmra.mxu1 %v2980_v22 }
 0x9f4   :  { %3015 = vmatmul.bf16.vlgmr.msra.gmra.mxu2 %v2980_v22  ;;  %3028 = vmatmul.bf16.vlgmr.msra.gmra.mxu3 %v2980_v22 }
 0xa70   :  { %v2990_v34 = vpop.f32.mrf.mxu0  ;;  %v3003_v59 = vpop.f32.mrf.mxu1 }
 0xa71   :  { %v3033_v55 = vadd.f32 %v2990_v34, %v1950_v35  ;;  %v3034_v62 = vadd.f32 %v3003_v59, %v1979_v39 }
 0xa73   :  { %v3938_v26 = vmul.f32 -1.442695, %v3033_v55  ;;  %v3939_v44 = vmul.f32 -1.442695, %v3034_v62  ;;  %v4111_v62 = vld [vmem:[#allocation12 + $0x30] sm:$0xff] }
 0xa75   :  { %4353 = vpow2.f32 %v3938_v26  ;;  %v4110_v26 = vld [vmem:[#allocation12 + $0x28] sm:$0xff] }
 0xa76   :  { %4355 = vpow2.f32 %v3939_v44  ;;  %v4109_v44 = vld [vmem:[#allocation12 + $0x20] sm:$0xff] }
 0xa77   :  { %v3016_v13 = vpop.f32.mrf.mxu2  ;;  %v3029_v2 = vpop.f32.mrf.mxu3 }
 0xa78   :  { %v3035_v58 = vadd.f32 %v3016_v13, %v2008_v60  ;;  %v2992_v50 = vpop.f32.mrf.mxu0  ;;  %v3005_v10 = vpop.f32.mrf.mxu1  ;;  %v3036_v53 = vadd.f32 %v3029_v2, %v2037_v36  ;;  %v1952_v60 = vadd.f32 %v5890_v56, %v5488_v43  ;;  %v5891_v13 = vld [vmem:[#allocation43_spill] sm:$0xff] }
 0xa79   :  { %v1981_v2 = vadd.f32 %v5891_v13, %v5490_v40 }
 0xa7a   :  { %v3940_v17 = vmul.f32 -1.442695, %v3035_v58  ;;  %v4108_v58 = vld [vmem:[#allocation12 + $0x18] sm:$0xff] }
 0xa7b   :  { %v4354_v11 = vpop.eup %4353 }
 0xa7c   :  { %v4356_v63 = vpop.eup %4355  ;;  %v3046_v30 = vadd.f32 1.0, %v4354_v11  ;;  %4357 = vpow2.f32 %v3940_v17 }
 0xa7d   :  { %v3047_v57 = vadd.f32 1.0, %v4356_v63 }
 0xa7e   :  { %4359 = vrcp.f32 %v3046_v30  ;;  %v3060_v4 = vand.u32 2147483648, %v3046_v30  ;;  %v3058_v18 = vand.u32 2147483647, %v3046_v30  ;;  %vm3054_vm10 = vweird.f32 %v3046_v30 }
 0xa7f   :  { %4361 = vrcp.f32 %v3047_v57  ;;  %v3018_v37 = vpop.f32.mrf.mxu2  ;;  %v3031_v6 = vpop.f32.mrf.mxu3  ;;  %v3075_v31 = vand.u32 2147483648, %v3047_v57  ;;  %v3073_v9 = vand.u32 2147483647, %v3047_v57  ;;  %vm3069_vm11 = vweird.f32 %v3047_v57 }
 0xa80   :  { %v3061_v14 = vor.u32 1.1754944e-38, %v3060_v4  ;;  %vm3059_vm14 = vcmp.eq.f32.partialorder %v3058_v18, 8.507059e+37  ;;  %v4106_v37 = vld [vmem:[#allocation12 + $0x8] sm:$0xff]  ;;  %v5892_v6 = vld [vmem:[#allocation45_spill] sm:$0xff] }
 0xa81   :  { %v3076_v41 = vor.u32 1.1754944e-38, %v3075_v31  ;;  %vm3074_vm15 = vcmp.eq.f32.partialorder %v3073_v9, 8.507059e+37  ;;  %v5893_v31 = vld [vmem:[#allocation46_spill] sm:$0xff] }
 0xa82   :  { %v4358_v15 = vpop.eup %4357 }
 0xa83   :  { %v3048_v49 = vadd.f32 1.0, %v4358_v15  ;;  %v2010_v15 = vadd.f32 %v5892_v6, %v5498_v42 }
 0xa84   :  { %v4360_v51 = vpop.eup %4359 }
 0xa85   :  { %v4362_v52 = vpop.eup %4361  ;;  %v3050_v5 = vmul.f32 %v4360_v51, %v3046_v30  ;;  %4363 = vrcp.f32 %v3048_v49  ;;  %vm3055_vm8 = vweird.f32 %v4360_v51  ;;  %v3090_v22 = vand.u32 2147483648, %v3048_v49 }
 0xa86   :  { %v3065_v1 = vmul.f32 %v4362_v52, %v3047_v57  ;;  %4365 = vtanh.f32 %v3036_v53  ;;  %vm3070_vm9 = vweird.f32 %v4362_v52  ;;  %vm3056_vm12 = vmor %vm3054_vm10, %vm3055_vm8  ;;  %vm3084_vm1 = vweird.f32 %v3048_v49  ;;  %v4107_v57 = vld [vmem:[#allocation12 + $0x10] sm:$0xff] }
 0xa87   :  { %v3051_v48 = vsub.f32 1.0, %v3050_v5  ;;  %vm3071_vm13 = vmor %vm3069_vm11, %vm3070_vm9  ;;  %v3088_v28 = vand.u32 2147483647, %v3048_v49  ;;  %v3091_v46 = vor.u32 1.1754944e-38, %v3090_v22 }
 0xa88   :  { %v3066_v29 = vsub.f32 1.0, %v3065_v1 }
 0xa89   :  { %v3052_v0 = vmul.f32 %v4360_v51, %v3051_v48  ;;  %vm3089_vm3 = vcmp.eq.f32.partialorder %v3088_v28, 8.507059e+37 }
 0xa8a   :  { %v3067_v47 = vmul.f32 %v4362_v52, %v3066_v29 }
 0xa8b   :  { %v4364_v33 = vpop.eup %4363  ;;  %v3053_v20 = vadd.f32 %v4360_v51, %v3052_v0  ;;  %v2039_v0 = vadd.f32 %v5893_v31, %v5868_v7 }
 0xa8c   :  { %v3080_v54 = vmul.f32 %v4364_v33, %v3048_v49  ;;  %v3068_v21 = vadd.f32 %v4362_v52, %v3067_v47  ;;  %v4366_v3 = vpop.eup %4365  ;;  %vm3085_vm0 = vweird.f32 %v4364_v33 }
 0xa8d   :  { %v3057_v38 = vsel %vm3056_vm12, %v4360_v51, %v3053_v20  ;;  %vm3086_vm2 = vmor %vm3084_vm1, %vm3085_vm0  ;;  %v4105_v51 = vld [vmem:[#allocation12] sm:$0xff] }
 0xa8e   :  { %v3081_v32 = vsub.f32 1.0, %v3080_v54  ;;  %v3062_v19 = vsel %vm3059_vm14, %v3061_v14, %v3057_v38  ;;  %v3072_v25 = vsel %vm3071_vm13, %v4362_v52, %v3068_v21 }
 0xa8f   :  { %v3077_v61 = vsel %vm3074_vm15, %v3076_v41, %v3072_v25  ;;  %v3096_v12 = vmul.f32 %v4366_v3, %v3062_v19 }
 0xa90   :  { %v3082_v16 = vmul.f32 %v4364_v33, %v3081_v32  ;;  %v3095_v27 = vmul.f32 %v3077_v61, %v5724_v23  ;;  %v4112_v23 = vld [vmem:[#allocation12 + $0x38] sm:$0xff] }
 0xa91   :  { %3297 = vmatpush.bf16.msra.mxu0 %v4112_v23 }
 0xa92   :  { %v5736_v8 = vadd.f32 %v3096_v12, %v3095_v27  ;;  %v3083_v45 = vadd.f32 %v4364_v33, %v3082_v16 }
 0xa94   :  { %4367 = vtanh.f32 %v5736_v8  ;;  %v3087_v35 = vsel %vm3086_vm2, %v4364_v33, %v3083_v45 }
 0xa95   :  { %v3092_v34 = vsel %vm3089_vm3, %v3091_v46, %v3087_v35  ;;  %3298 = vmatpush.bf16.msra.mxu0 %v4111_v62 }
 0xa99   :  { %3299 = vmatpush.bf16.msra.mxu0 %v4110_v26 }
 0xa9a   :  { %v4368_v39 = vpop.eup %4367 }
 0xa9b   :  { %v3099_v59 = vmul.f32 %v4368_v39, %v3092_v34 }
 0xa9d   :  { %v3104_v55 = vpack.c.bf16 %v3099_v59, %v3099_v59  ;;  %3300 = vmatpush.bf16.msra.mxu0 %v4109_v44 }
 0xa9f   :  { %3113 = vmatmul.bf16.vlgmr.msrb.gmra.mxu0 %v3104_v55  ;;  %3126 = vmatmul.bf16.vlgmr.msrb.gmra.mxu1 %v3104_v55 }
 0xaa0   :  { %3139 = vmatmul.bf16.vlgmr.msrb.gmra.mxu2 %v3104_v55  ;;  %3152 = vmatmul.bf16.vlgmr.msrb.gmra.mxu3 %v3104_v55 }
 0xaa1   :  { %3301 = vmatpush.bf16.msra.mxu0 %v4108_v58 }
 0xaa5   :  { %3302 = vmatpush.bf16.msra.mxu0 %v4107_v57 }
 0xaa9   :  { %3303 = vmatpush.bf16.msra.mxu0 %v4106_v37 }
 0xaad   :  { %3304 = vmatpush.bf16.msra.mxu0 %v4105_v51 }
 0xb1c   :  { %v3114_v50 = vpop.f32.mrf.mxu0  ;;  %v3127_v10 = vpop.f32.mrf.mxu1 }
 0xb1d   :  { %v3157_v17 = vadd.f32 %v3114_v50, %v1952_v60  ;;  %v3158_v11 = vadd.f32 %v3127_v10, %v1981_v2 }
 0xb1f   :  { %v3941_v63 = vmul.f32 -1.442695, %v3157_v17  ;;  %v3942_v30 = vmul.f32 -1.442695, %v3158_v11 }
 0xb21   :  { %4369 = vpow2.f32 %v3941_v63 }
 0xb22   :  { %4371 = vpow2.f32 %v3942_v30 }
 0xb23   :  { %v3140_v43 = vpop.f32.mrf.mxu2  ;;  %v3153_v24 = vpop.f32.mrf.mxu3 }
 0xb24   :  { %v3159_v36 = vadd.f32 %v3140_v43, %v2010_v15  ;;  %v3116_v40 = vpop.f32.mrf.mxu0  ;;  %v3129_v49 = vpop.f32.mrf.mxu1  ;;  %v3160_v9 = vadd.f32 %v3153_v24, %v2039_v0 }
 0xb26   :  { %v3943_v53 = vmul.f32 -1.442695, %v3159_v36 }
 0xb27   :  { %v4370_v52 = vpop.eup %4369 }
 0xb28   :  { %v4372_v5 = vpop.eup %4371  ;;  %v3170_v1 = vadd.f32 1.0, %v4370_v52  ;;  %4373 = vpow2.f32 %v3943_v53 }
 0xb29   :  { %v3171_v48 = vadd.f32 1.0, %v4372_v5 }
 0xb2a   :  { %4375 = vrcp.f32 %v3170_v1  ;;  %v3184_v41 = vand.u32 2147483648, %v3170_v1  ;;  %v3182_v32 = vand.u32 2147483647, %v3170_v1  ;;  %vm3178_vm6 = vweird.f32 %v3170_v1 }
 0xb2b   :  { %4377 = vrcp.f32 %v3171_v48  ;;  %v3142_v29 = vpop.f32.mrf.mxu2  ;;  %v3155_v4 = vpop.f32.mrf.mxu3  ;;  %v3199_v38 = vand.u32 2147483648, %v3171_v48  ;;  %v3197_v25 = vand.u32 2147483647, %v3171_v48  ;;  %vm3193_vm7 = vweird.f32 %v3171_v48 }
 0xb2c   :  { %v3185_v16 = vor.u32 1.1754944e-38, %v3184_v41  ;;  %vm3183_vm10 = vcmp.eq.f32.partialorder %v3182_v32, 8.507059e+37 }
 0xb2d   :  { %v3200_v45 = vor.u32 1.1754944e-38, %v3199_v38  ;;  %vm3198_vm11 = vcmp.eq.f32.partialorder %v3197_v25, 8.507059e+37 }
 0xb2e   :  { %v4374_v42 = vpop.eup %4373 }
 0xb2f   :  { %v3172_v18 = vadd.f32 1.0, %v4374_v42 }
 0xb30   :  { %v4376_v47 = vpop.eup %4375 }
 0xb31   :  { %v4378_v33 = vpop.eup %4377  ;;  %v3174_v20 = vmul.f32 %v4376_v47, %v3170_v1  ;;  %4379 = vrcp.f32 %v3172_v18  ;;  %vm3179_vm4 = vweird.f32 %v4376_v47  ;;  %v3214_v44 = vand.u32 2147483648, %v3172_v18 }
 0xb32   :  { %v3189_v54 = vmul.f32 %v4378_v33, %v3171_v48  ;;  %4381 = vtanh.f32 %v3160_v9  ;;  %vm3194_vm5 = vweird.f32 %v4378_v33  ;;  %vm3180_vm8 = vmor %vm3178_vm6, %vm3179_vm4  ;;  %vm3208_vm13 = vweird.f32 %v3172_v18 }
 0xb33   :  { %v3175_v14 = vsub.f32 1.0, %v3174_v20  ;;  %vm3195_vm9 = vmor %vm3193_vm7, %vm3194_vm5  ;;  %v3212_v56 = vand.u32 2147483647, %v3172_v18  ;;  %v3215_v13 = vor.u32 1.1754944e-38, %v3214_v44 }
 0xb34   :  { %v3190_v21 = vsub.f32 1.0, %v3189_v54 }
 0xb35   :  { %v3176_v3 = vmul.f32 %v4376_v47, %v3175_v14  ;;  %vm3213_vm15 = vcmp.eq.f32.partialorder %v3212_v56, 8.507059e+37 }
 0xb36   :  { %v3191_v19 = vmul.f32 %v4378_v33, %v3190_v21 }
 0xb37   :  { %v4380_v61 = vpop.eup %4379  ;;  %v3177_v7 = vadd.f32 %v4376_v47, %v3176_v3 }
 0xb38   :  { %v3204_v12 = vmul.f32 %v4380_v61, %v3172_v18  ;;  %v3192_v27 = vadd.f32 %v4378_v33, %v3191_v19  ;;  %v4382_v28 = vpop.eup %4381  ;;  %vm3209_vm12 = vweird.f32 %v4380_v61 }
 0xb39   :  { %v3181_v22 = vsel %vm3180_vm8, %v4376_v47, %v3177_v7  ;;  %vm3210_vm14 = vmor %vm3208_vm13, %vm3209_vm12 }
 0xb3a   :  { %v3205_v35 = vsub.f32 1.0, %v3204_v12  ;;  %v3186_v46 = vsel %vm3183_vm10, %v3185_v16, %v3181_v22  ;;  %v3196_v39 = vsel %vm3195_vm9, %v4378_v33, %v3192_v27 }
 0xb3b   :  { %v3201_v34 = vsel %vm3198_vm11, %v3200_v45, %v3196_v39  ;;  %v3220_v59 = vmul.f32 %v4382_v28, %v3186_v46 }
 0xb3c   :  { %v3206_v55 = vmul.f32 %v4380_v61, %v3205_v35  ;;  %v3219_v23 = vmul.f32 %v3201_v34, %v5736_v8  ;;  %v4128_v8 = vld [vmem:[%s5771_s5] ss:$0 sm:$0xff]  ;;  %s3337_s5 = sshll.u32 %s5772_s6, 4  ;;  %s3338_s5 = int_to_ptr.hbm [resolvable:$true] %s3337_s5 }
 0xb3e   :  { %v3221_v62 = vadd.f32 %v3220_v59, %v3219_v23  ;;  %v3207_v26 = vadd.f32 %v4380_v61, %v3206_v55 }
 0xb40   :  { %4383 = vtanh.f32 %v3221_v62  ;;  %3227 = vst [vmem:[#allocation16 + $0x8] sm:$0xff] %v3221_v62  ;;  %v3211_v60 = vsel %vm3210_vm14, %v4380_v61, %v3207_v26 }
 0xb41   :  { %v3216_v58 = vsel %vm3213_vm15, %v3215_v13, %v3211_v60 }
 0xb46   :  { %v4384_v2 = vpop.eup %4383 }
 0xb47   :  { %v3223_v50 = vmul.f32 %v4384_v2, %v3216_v58 }
 0xb49   :  { %v3228_v10 = vpack.c.bf16 %v3223_v50, %v3223_v50  ;;  %3225 = vst [vmem:[#allocation14 + $0x8] sm:$0xff] %v3223_v50 }
 0xb4a   :  { %3353 = dma.vmem_to_hbm [thread:$0]  %s3346_s13, 256, %s3348_s11, [#allocation15], %s4598_s25, %s4598_s25, %s4599_s26  }
 0xb4b   :  { %3305 = vmatmul.bf16.vlgmr.msra.gmra.mxu0 %v3228_v10  ;;  %3366 = dma.vmem_to_hbm [thread:$0]  %s3359_s15, 256, %s3361_s18, [#allocation15], %s4598_s25, %s4598_s25, %s4599_s26  }
 0xbc8   :  { %v3306_v17 = vpop.f32.mrf.mxu0 }
 0xbc9   :  { %v3307_v11 = vadd.f32 %v4128_v8, %v3306_v17 }
 0xbcb   :  { %v3976_v63 = vmul.f32 -1.442695, %v3307_v11 }
 0xbcd   :  { %4385 = vpow2.f32 %v3976_v63 }
 0xbd0   :  { %v3308_v30 = vpop.f32.mrf.mxu0 }
 0xbd3   :  { %v4386_v57 = vpop.eup %4385 }
 0xbd4   :  { %v3313_v37 = vadd.f32 1.0, %v4386_v57 }
 0xbd6   :  { %4387 = vrcp.f32 %v3313_v37  ;;  %v3325_v24 = vand.u32 2147483648, %v3313_v37  ;;  %v3323_v40 = vand.u32 2147483647, %v3313_v37  ;;  %vm3319_vm1 = vweird.f32 %v3313_v37 }
 0xbd8   :  { %v3326_v51 = vor.u32 1.1754944e-38, %v3325_v24  ;;  %vm3324_vm3 = vcmp.eq.f32.partialorder %v3323_v40, 8.507059e+37 }
 0xbdc   :  { %v4388_v6 = vpop.eup %4387 }
 0xbdd   :  { %v3315_v15 = vmul.f32 %v4388_v6, %v3313_v37  ;;  %vm3320_vm0 = vweird.f32 %v4388_v6 }
 0xbde   :  { %vm3321_vm2 = vmor %vm3319_vm1, %vm3320_vm0 }
 0xbdf   :  { %v3316_v43 = vsub.f32 1.0, %v3315_v15 }
 0xbe1   :  { %v3317_v36 = vmul.f32 %v4388_v6, %v3316_v43 }
 0xbe3   :  { %v3318_v49 = vadd.f32 %v4388_v6, %v3317_v36 }
 0xbe5   :  { %v3322_v53 = vsel %vm3321_vm2, %v4388_v6, %v3318_v49 }
 0xbe6   :  { %v3327_v52 = vsel %vm3324_vm3, %v3326_v51, %v3322_v53 }
 0xbe7   :  { %3329 = vst [vmem:[#allocation13] sm:$0xff] %v3327_v52 }
 0xbe8   :  { %3340 = dma.vmem_to_hbm [thread:$0]  %s3336_s19, 128, %s3338_s5, [#allocation6]  }
 0xbe9   :  { %4587 = dma.done.wait [#allocation6], 128  }
 0xbea   :  { %4588 = vsyncadd [#allocation6], 4294967168 }
 0xbeb   :  { %4589 = dma.done.wait [#allocation15], 512  }
 0xbec   :  { %4590 = vsyncadd [#allocation15], 4294966784 }
 0xbed   :  { %3379 = vsyncpa [#allocation5], 1 }
 0xbee   :  { %3380 = vsyncpa [#allocation8], 1 }
 0xbef   :  { %3381 = vsyncpa [#allocation11], 1 }
 0xbf0   :  { %3382 = vsyncpa [#allocation6], 1 }
 0xbf1   :  { %3383 = vsyncpa [#allocation15], 1 }

// kernel: tpu_custom_call.1
= control target key start
LH: loop header
LB: loop body
LE: loop exit
PB: predicated region body
PF: predicated region fallthrough
CT: control target
= control target key end

     0   :  { %14 = vsyncpa [#allocation5], 0  ;;  %s5766_s0 = inlined_call_operand.hbm [shape: f32[8,8,128], index: 0, kind: input, shape index: {}]   ;;  %s5767_s1 = inlined_call_operand.hbm [shape: bf16[2,128,512], index: 1, kind: input, shape index: {}]   ;;  %s5768_s2 = inlined_call_operand.hbm [shape: bf16[2,128,512], index: 2, kind: input, shape index: {}]   ;;  %s5769_s3 = inlined_call_operand.hbm [shape: f32[2,1,512], index: 3, kind: input, shape index: {}]   ;;  %s5770_s4 = inlined_call_operand.hbm [shape: bf16[128,128], index: 4, kind: input, shape index: {}]   ;;  %s5771_s5 = inlined_call_operand.vmem [shape: f32[1,128], index: 5, kind: input, shape index: {}]   ;;  %s5772_s6 = inlined_call_operand.hbm [shape: f32[8,128], index: 6, kind: output, shape index: {0}]   ;;  %s5773_s7 = inlined_call_operand.hbm [shape: f32[2,8,128], index: 7, kind: output, shape index: {1}]   ;;  %s5774_s8 = inlined_call_operand.hbm [shape: f32[2,8,128], index: 8, kind: output, shape index: {2}]  }
   0x1   :  { %15 = vsyncpa [#allocation8], 0 }
   0x2   :  { %16 = vsyncpa [#allocation11], 0 }
   0x3   :  { %17 = vsyncpa [#allocation6], 0  ;;  %s36_s29 = sshll.u32 %s5767_s1, 4  ;;  %s37_s29 = int_to_ptr.hbm [resolvable:$true] %s36_s29 }
   0x4   :  { %18 = vsyncpa [#allocation15], 0  ;;  %s4591_s30 = smov [#allocation7]   ;;  %s62_s12 = sshll.u32 %s5769_s3, 4  ;;  %s63_s12 = int_to_ptr.hbm [resolvable:$true] %s62_s12 }
   0x5   :  { %s38_s9 = sshll.u32 %s4591_s30, 4  ;;  %s4592_s13 = smov 256   ;;  %s39_s9 = int_to_ptr.vmem [resolvable:$true] %s38_s9 }
   0x6   :  { %s4593_s14 = smov 16   ;;  %s4594_s15 = smov [#allocation10]  }
   0x7   :  { %44 = dma.hbm_to_vmem [thread:$0]  %s37_s29, 8192, %s39_s9, [#allocation8], %s4592_s13, %s4592_s13, %s4593_s14  }
   0x8   :  { %s64_s16 = sshll.u32 %s4594_s15, 4  ;;  %s4595_s17 = smov 64   ;;  %s65_s16 = int_to_ptr.vmem [resolvable:$true] %s64_s16 }
   0x9   :  { %s4596_s18 = smov 4   ;;  %s23_s20 = sshll.u32 %s5766_s0, 4  ;;  %s24_s20 = int_to_ptr.hbm [resolvable:$true] %s23_s20 }
   0xa   :  { %70 = dma.hbm_to_vmem [thread:$0]  %s63_s12, 128, %s65_s16, [#allocation11], %s4595_s17, %s4595_s17, %s4596_s18  }
   0xb   :  { %s4597_s21 = smov [#allocation4]   ;;  %s49_s24 = sshll.u32 %s5768_s2, 4  ;;  %s50_s24 = int_to_ptr.hbm [resolvable:$true] %s49_s24 }
   0xc   :  { %s25_s22 = sshll.u32 %s4597_s21, 4  ;;  %s4598_s25 = smov 128   ;;  %s26_s22 = int_to_ptr.vmem [resolvable:$true] %s25_s22 }
   0xd   :  { %s4599_s26 = smov 8   ;;  %s4600_s27 = smov [#allocation9]  }
   0xe   :  { %31 = dma.hbm_to_vmem [thread:$0]  %s24_s20, 1024, %s26_s22, [#allocation5], %s4598_s25, %s4598_s25, %s4599_s26  }
   0xf   :  { %s51_s28 = sshll.u32 %s4600_s27, 4  ;;  %s75_s0 = sshll.u32 %s5770_s4, 4  ;;  %s52_s28 = int_to_ptr.vmem [resolvable:$true] %s51_s28  ;;  %s76_s0 = int_to_ptr.hbm [resolvable:$true] %s75_s0 }
  0x10   :  { %57 = dma.hbm_to_vmem [thread:$0]  %s50_s24, 8192, %s52_s28, [#allocation8], %s4592_s13, %s4592_s13, %s4593_s14  }
  0x11   :  { %s4601_s9 = smov [#allocation12]  }
  0x12   :  { %s77_s10 = sshll.u32 %s4601_s9, 4  ;;  %s78_s10 = int_to_ptr.vmem [resolvable:$true] %s77_s10 }
  0x13   :  { %83 = dma.hbm_to_vmem [thread:$0]  %s76_s0, 1024, %s78_s10, [#allocation11], %s4595_s17, %s4595_s17, %s4596_s18  }
  0x14   :  { %4581 = dma.done.wait [#allocation5], 1024  }
  0x15   :  { %4582 = vsyncadd [#allocation5], 4294966272 }
  0x16   :  { %4583 = dma.done.wait [#allocation8], 16384  }
  0x17   :  { %4584 = vsyncadd [#allocation8], 4294950912 }
  0x18   :  { %4585 = dma.done.wait [#allocation11], 1152  }
  0x19   :  { %4586 = vsyncadd [#allocation11], 4294966144  ;;  %v3498_v0 = vld [vmem:[#allocation7 + $0xe0] sm:$0xf]  ;;  %v4007_v1 = vld [vmem:[#allocation7 + $0xec] sm:$0xf0] }
  0x1a   :  { %v4005_v2 = vld [vmem:[#allocation7 + $0xe4] sm:$0xf]  ;;  %v3499_v3 = vor.u32 %v4007_v1, %v3498_v0  ;;  %v3500_v4 = vld [vmem:[#allocation7 + $0xf0] sm:$0xf0]  ;;  %v3506_v5 = vld [vmem:[#allocation7 + $0xe8] sm:$0xf] }
  0x1b   :  { %v4008_v6 = vld [vmem:[#allocation7 + $0xf4] sm:$0xf0]  ;;  %v3503_v7 = vor.u32 %v4005_v2, %v3500_v4  ;;  %v4006_v9 = vld [vmem:[#allocation7 + $0xec] sm:$0xf]  ;;  %v3508_v10 = vld [vmem:[#allocation7 + $0xf8] sm:$0xf0] }
  0x1c   :  { %v3507_v8 = vor.u32 %v4008_v6, %v3506_v5  ;;  %v3482_v11 = vld [vmem:[#allocation7 + $0xc0] sm:$0xf]  ;;  %353 = vmatpush.bf16.msra.mxu0 %v3499_v3  ;;  %v3511_v12 = vor.u32 %v4006_v9, %v3508_v10  ;;  %v4003_v13 = vld [vmem:[#allocation7 + $0xcc] sm:$0xf0]  ;;  %v4001_v14 = vld [vmem:[#allocation7 + $0xc4] sm:$0xf] }
  0x1d   :  { %v3484_v15 = vld [vmem:[#allocation7 + $0xd0] sm:$0xf0]  ;;  %382 = vmatpush.bf16.msra.mxu1 %v3503_v7  ;;  %v3483_v16 = vor.u32 %v4003_v13, %v3482_v11  ;;  %v3490_v18 = vld [vmem:[#allocation7 + $0xc8] sm:$0xf]  ;;  %v4004_v19 = vld [vmem:[#allocation7 + $0xd4] sm:$0xf0] }
  0x1e   :  { %411 = vmatpush.bf16.msra.mxu2 %v3507_v8  ;;  %v3487_v17 = vor.u32 %v4001_v14, %v3484_v15  ;;  %v4002_v20 = vld [vmem:[#allocation7 + $0xcc] sm:$0xf]  ;;  %440 = vmatpush.bf16.msra.mxu3 %v3511_v12  ;;  %v3491_v21 = vor.u32 %v4004_v19, %v3490_v18  ;;  %v3492_v22 = vld [vmem:[#allocation7 + $0xd8] sm:$0xf0]  ;;  %v3466_v23 = vld [vmem:[#allocation7 + $0xa0] sm:$0xf] }
  0x1f   :  { %v3999_v24 = vld [vmem:[#allocation7 + $0xac] sm:$0xf0]  ;;  %v3495_v25 = vor.u32 %v4002_v20, %v3492_v22  ;;  %v3997_v26 = vld [vmem:[#allocation7 + $0xa4] sm:$0xf]  ;;  %v3468_v27 = vld [vmem:[#allocation7 + $0xb0] sm:$0xf0] }
  0x20   :  { %v3474_v28 = vld [vmem:[#allocation7 + $0xa8] sm:$0xf]  ;;  %354 = vmatpush.bf16.msra.mxu0 %v3483_v16  ;;  %v3467_v29 = vor.u32 %v3999_v24, %v3466_v23  ;;  %v4000_v30 = vld [vmem:[#allocation7 + $0xb4] sm:$0xf0]  ;;  %v3998_v31 = vld [vmem:[#allocation7 + $0xac] sm:$0xf]  ;;  %v3471_v33 = vor.u32 %v3997_v26, %v3468_v27 }
  0x21   :  { %v3476_v32 = vld [vmem:[#allocation7 + $0xb8] sm:$0xf0]  ;;  %383 = vmatpush.bf16.msra.mxu1 %v3487_v17  ;;  %v3475_v34 = vor.u32 %v4000_v30, %v3474_v28  ;;  %v3450_v35 = vld [vmem:[#allocation7 + $0x80] sm:$0xf]  ;;  %v3995_v36 = vld [vmem:[#allocation7 + $0x8c] sm:$0xf0] }
  0x22   :  { %412 = vmatpush.bf16.msra.mxu2 %v3491_v21  ;;  %v3993_v37 = vld [vmem:[#allocation7 + $0x84] sm:$0xf]  ;;  %441 = vmatpush.bf16.msra.mxu3 %v3495_v25  ;;  %v3479_v38 = vor.u32 %v3998_v31, %v3476_v32  ;;  %v3452_v39 = vld [vmem:[#allocation7 + $0x90] sm:$0xf0]  ;;  %v3458_v40 = vld [vmem:[#allocation7 + $0x88] sm:$0xf]  ;;  %v3451_v44 = vor.u32 %v3995_v36, %v3450_v35 }
  0x23   :  { %v3996_v41 = vld [vmem:[#allocation7 + $0x94] sm:$0xf0]  ;;  %v3994_v42 = vld [vmem:[#allocation7 + $0x8c] sm:$0xf]  ;;  %v3460_v43 = vld [vmem:[#allocation7 + $0x98] sm:$0xf0]  ;;  %v3455_v45 = vor.u32 %v3993_v37, %v3452_v39 }
  0x24   :  { %355 = vmatpush.bf16.msra.mxu0 %v3467_v29  ;;  %v3459_v46 = vor.u32 %v3996_v41, %v3458_v40  ;;  %v3434_v47 = vld [vmem:[#allocation7 + $0x60] sm:$0xf]  ;;  %v3991_v48 = vld [vmem:[#allocation7 + $0x6c] sm:$0xf0]  ;;  %v3989_v49 = vld [vmem:[#allocation7 + $0x64] sm:$0xf]  ;;  %v3463_v50 = vor.u32 %v3994_v42, %v3460_v43 }
  0x25   :  { %384 = vmatpush.bf16.msra.mxu1 %v3471_v33  ;;  %v3436_v51 = vld [vmem:[#allocation7 + $0x70] sm:$0xf0]  ;;  %v3442_v52 = vld [vmem:[#allocation7 + $0x68] sm:$0xf]  ;;  %v3992_v53 = vld [vmem:[#allocation7 + $0x74] sm:$0xf0]  ;;  %v3435_v56 = vor.u32 %v3991_v48, %v3434_v47 }
  0x26   :  { %413 = vmatpush.bf16.msra.mxu2 %v3475_v34  ;;  %442 = vmatpush.bf16.msra.mxu3 %v3479_v38  ;;  %v3990_v54 = vld [vmem:[#allocation7 + $0x6c] sm:$0xf]  ;;  %v3444_v55 = vld [vmem:[#allocation7 + $0x78] sm:$0xf0]  ;;  %v3439_v57 = vor.u32 %v3989_v49, %v3436_v51  ;;  %v3443_v58 = vor.u32 %v3992_v53, %v3442_v52  ;;  %v3418_v59 = vld [vmem:[#allocation7 + $0x40] sm:$0xf] }
  0x27   :  { %v3987_v60 = vld [vmem:[#allocation7 + $0x4c] sm:$0xf0]  ;;  %v3985_v61 = vld [vmem:[#allocation7 + $0x44] sm:$0xf]  ;;  %v3447_v62 = vor.u32 %v3990_v54, %v3444_v55  ;;  %v3420_v63 = vld [vmem:[#allocation7 + $0x50] sm:$0xf0] }
  0x28   :  { %356 = vmatpush.bf16.msra.mxu0 %v3451_v44  ;;  %v3426_v0 = vld [vmem:[#allocation7 + $0x48] sm:$0xf]  ;;  %v3988_v1 = vld [vmem:[#allocation7 + $0x54] sm:$0xf0]  ;;  %v3986_v2 = vld [vmem:[#allocation7 + $0x4c] sm:$0xf]  ;;  %v3419_v4 = vor.u32 %v3987_v60, %v3418_v59  ;;  %v3423_v5 = vor.u32 %v3985_v61, %v3420_v63 }
  0x29   :  { %385 = vmatpush.bf16.msra.mxu1 %v3455_v45  ;;  %v3428_v3 = vld [vmem:[#allocation7 + $0x58] sm:$0xf0]  ;;  %v3427_v6 = vor.u32 %v3988_v1, %v3426_v0  ;;  %v3402_v7 = vld [vmem:[#allocation7 + $0x20] sm:$0xf]  ;;  %v3983_v8 = vld [vmem:[#allocation7 + $0x2c] sm:$0xf0] }
  0x2a   :  { %414 = vmatpush.bf16.msra.mxu2 %v3459_v46  ;;  %443 = vmatpush.bf16.msra.mxu3 %v3463_v50  ;;  %v3981_v9 = vld [vmem:[#allocation7 + $0x24] sm:$0xf]  ;;  %v3431_v10 = vor.u32 %v3986_v2, %v3428_v3  ;;  %v3404_v11 = vld [vmem:[#allocation7 + $0x30] sm:$0xf0]  ;;  %v3410_v12 = vld [vmem:[#allocation7 + $0x28] sm:$0xf]  ;;  %v3403_v16 = vor.u32 %v3983_v8, %v3402_v7 }
  0x2b   :  { %v3984_v13 = vld [vmem:[#allocation7 + $0x34] sm:$0xf0]  ;;  %v3982_v14 = vld [vmem:[#allocation7 + $0x2c] sm:$0xf]  ;;  %v3412_v15 = vld [vmem:[#allocation7 + $0x38] sm:$0xf0]  ;;  %v3407_v19 = vor.u32 %v3981_v9, %v3404_v11 }
  0x2c   :  { %357 = vmatpush.bf16.msra.mxu0 %v3435_v56  ;;  %v3386_v17 = vld [vmem:[#allocation7] sm:$0xf]  ;;  %v3979_v18 = vld [vmem:[#allocation7 + $0xc] sm:$0xf0]  ;;  %v3411_v20 = vor.u32 %v3984_v13, %v3410_v12  ;;  %v3977_v21 = vld [vmem:[#allocation7 + $0x4] sm:$0xf]  ;;  %v3415_v24 = vor.u32 %v3982_v14, %v3412_v15 }
  0x2d   :  { %386 = vmatpush.bf16.msra.mxu1 %v3439_v57  ;;  %v3388_v22 = vld [vmem:[#allocation7 + $0x10] sm:$0xf0]  ;;  %v3394_v23 = vld [vmem:[#allocation7 + $0x8] sm:$0xf]  ;;  %v3980_v25 = vld [vmem:[#allocation7 + $0x14] sm:$0xf0]  ;;  %v3387_v31 = vor.u32 %v3979_v18, %v3386_v17 }
  0x2e   :  { %415 = vmatpush.bf16.msra.mxu2 %v3443_v58  ;;  %444 = vmatpush.bf16.msra.mxu3 %v3447_v62  ;;  %v3978_v26 = vld [vmem:[#allocation7 + $0xc] sm:$0xf]  ;;  %v3396_v27 = vld [vmem:[#allocation7 + $0x18] sm:$0xf0]  ;;  %v172_v28 = vld [vmem:[#allocation4] sm:$0xff]  ;;  %v3391_v35 = vor.u32 %v3977_v21, %v3388_v22  ;;  %v3395_v36 = vor.u32 %v3980_v25, %v3394_v23  ;;  %s3347_s11 = sshll.u32 %s5773_s7, 4  ;;  %s3348_s11 = int_to_ptr.hbm [resolvable:$true] %s3347_s11 }
  0x2f   :  { %v3626_v29 = vld [vmem:[#allocation9 + $0xe0] sm:$0xf]  ;;  %v4039_v30 = vld [vmem:[#allocation9 + $0xec] sm:$0xf0]  ;;  %v173_v32 = vld [vmem:[#allocation4 + $0x8] sm:$0xff]  ;;  %v3399_v37 = vor.u32 %v3978_v26, %v3396_v27  ;;  %s4603_s12 = smov [#allocation14]  }
  0x30   :  { %358 = vmatpush.bf16.msra.mxu0 %v3419_v4  ;;  %v4037_v33 = vld [vmem:[#allocation9 + $0xe4] sm:$0xf]  ;;  %v3628_v34 = vld [vmem:[#allocation9 + $0xf0] sm:$0xf0]  ;;  %v4669_v38 = vor.u32 %v4039_v30, %v3626_v29  ;;  %v3634_v39 = vld [vmem:[#allocation9 + $0xe8] sm:$0xf]  ;;  %v180_v42 = vpack.c.bf16 %v173_v32, %v172_v28 }
  0x31   :  { %387 = vmatpush.bf16.msra.mxu1 %v3423_v5  ;;  %v4040_v40 = vld [vmem:[#allocation9 + $0xf4] sm:$0xf0]  ;;  %v3610_v41 = vld [vmem:[#allocation9 + $0xc0] sm:$0xf]  ;;  %v4671_v43 = vor.u32 %v4037_v33, %v3628_v34  ;;  %v4035_v44 = vld [vmem:[#allocation9 + $0xcc] sm:$0xf0] }
  0x32   :  { %416 = vmatpush.bf16.msra.mxu2 %v3427_v6  ;;  %445 = vmatpush.bf16.msra.mxu3 %v3431_v10  ;;  %v4038_v45 = vld [vmem:[#allocation9 + $0xec] sm:$0xf]  ;;  %v3636_v46 = vld [vmem:[#allocation9 + $0xf8] sm:$0xf0]  ;;  %v4033_v47 = vld [vmem:[#allocation9 + $0xc4] sm:$0xf]  ;;  %v4673_v49 = vor.u32 %v4040_v40, %v3634_v39  ;;  %v4676_v51 = vor.u32 %v4035_v44, %v3610_v41 }
  0x33   :  { %v3612_v48 = vld [vmem:[#allocation9 + $0xd0] sm:$0xf0]  ;;  %v3618_v50 = vld [vmem:[#allocation9 + $0xc8] sm:$0xf]  ;;  %v4036_v52 = vld [vmem:[#allocation9 + $0xd4] sm:$0xf0]  ;;  %v4678_v53 = vor.u32 %v4038_v45, %v3636_v46 }
  0x34   :  { %359 = vmatpush.bf16.msra.mxu0 %v3403_v16  ;;  %v3594_v54 = vld [vmem:[#allocation9 + $0xa0] sm:$0xf]  ;;  %v4681_v55 = vor.u32 %v4033_v47, %v3612_v48  ;;  %v4031_v56 = vld [vmem:[#allocation9 + $0xac] sm:$0xf0]  ;;  %v4034_v57 = vld [vmem:[#allocation9 + $0xcc] sm:$0xf]  ;;  %v4684_v61 = vor.u32 %v4036_v52, %v3618_v50 }
  0x35   :  { %388 = vmatpush.bf16.msra.mxu1 %v3407_v19  ;;  %v3620_v58 = vld [vmem:[#allocation9 + $0xd8] sm:$0xf0]  ;;  %v4029_v59 = vld [vmem:[#allocation9 + $0xa4] sm:$0xf]  ;;  %v3596_v60 = vld [vmem:[#allocation9 + $0xb0] sm:$0xf0]  ;;  %v4688_v62 = vor.u32 %v4031_v56, %v3594_v54 }
  0x36   :  { %417 = vmatpush.bf16.msra.mxu2 %v3411_v20  ;;  %446 = vmatpush.bf16.msra.mxu3 %v3415_v24  ;;  %v3602_v63 = vld [vmem:[#allocation9 + $0xa8] sm:$0xf]  ;;  %v4032_v0 = vld [vmem:[#allocation9 + $0xb4] sm:$0xf0]  ;;  %v4690_v1 = vor.u32 %v4034_v57, %v3620_v58  ;;  %v3578_v2 = vld [vmem:[#allocation9 + $0x80] sm:$0xf]  ;;  %v4693_v3 = vor.u32 %v4029_v59, %v3596_v60 }
  0x37   :  { %v4027_v4 = vld [vmem:[#allocation9 + $0x8c] sm:$0xf0]  ;;  %v4030_v5 = vld [vmem:[#allocation9 + $0xac] sm:$0xf]  ;;  %v3604_v6 = vld [vmem:[#allocation9 + $0xb8] sm:$0xf0]  ;;  %v4696_v9 = vor.u32 %v4032_v0, %v3602_v63 }
  0x38   :  { %360 = vmatpush.bf16.msra.mxu0 %v3387_v31  ;;  %v4025_v7 = vld [vmem:[#allocation9 + $0x84] sm:$0xf]  ;;  %v3580_v8 = vld [vmem:[#allocation9 + $0x90] sm:$0xf0]  ;;  %v4700_v11 = vor.u32 %v4027_v4, %v3578_v2  ;;  %v3586_v12 = vld [vmem:[#allocation9 + $0x88] sm:$0xf]  ;;  %v4702_v14 = vor.u32 %v4030_v5, %v3604_v6 }
  0x39   :  { %389 = vmatpush.bf16.msra.mxu1 %v3391_v35  ;;  %v174_v10 = vld [vmem:[#allocation4 + $0x10] sm:$0xff]  ;;  %v4028_v13 = vld [vmem:[#allocation9 + $0x94] sm:$0xf0]  ;;  %v3562_v15 = vld [vmem:[#allocation9 + $0x60] sm:$0xf]  ;;  %v4705_v16 = vor.u32 %v4025_v7, %v3580_v8  ;;  %s3345_s13 = sshll.u32 %s4603_s12, 4  ;;  %s3346_s13 = int_to_ptr.vmem [resolvable:$true] %s3345_s13 }
  0x3a   :  { %418 = vmatpush.bf16.msra.mxu2 %v3395_v36  ;;  %447 = vmatpush.bf16.msra.mxu3 %v3399_v37  ;;  %v4023_v17 = vld [vmem:[#allocation9 + $0x6c] sm:$0xf0]  ;;  %v4026_v18 = vld [vmem:[#allocation9 + $0x8c] sm:$0xf]  ;;  %v3588_v19 = vld [vmem:[#allocation9 + $0x98] sm:$0xf0]  ;;  %v4708_v23 = vor.u32 %v4028_v13, %v3586_v12 }
  0x3b   :  { %361 = vmatmul.bf16.vlgmr.msra.gmra.mxu0 %v180_v42  ;;  %v175_v20 = vld [vmem:[#allocation4 + $0x18] sm:$0xff]  ;;  %v4021_v21 = vld [vmem:[#allocation9 + $0x64] sm:$0xf]  ;;  %v3564_v22 = vld [vmem:[#allocation9 + $0x70] sm:$0xf0]  ;;  %v4712_v24 = vor.u32 %v4023_v17, %v3562_v15  ;;  %v4714_v27 = vor.u32 %v4026_v18, %v3588_v19  ;;  %s4604_s14 = smov [#allocation16]  }
  0x3c   :  { %665 = vmatpush.bf16.msrb.mxu0 %v4669_v38  ;;  %390 = vmatmul.bf16.vlgmr.msra.gmra.mxu1 %v180_v42  ;;  %v3570_v25 = vld [vmem:[#allocation9 + $0x68] sm:$0xf]  ;;  %v4024_v26 = vld [vmem:[#allocation9 + $0x74] sm:$0xf0]  ;;  %v3546_v28 = vld [vmem:[#allocation9 + $0x40] sm:$0xf]  ;;  %v181_v29 = vpack.c.bf16 %v175_v20, %v174_v10  ;;  %v4717_v30 = vor.u32 %v4021_v21, %v3564_v22 }
  0x3d   :  { %678 = vmatpush.bf16.msrb.mxu1 %v4671_v43  ;;  %419 = vmatmul.bf16.vlgmr.msra.gmra.mxu2 %v180_v42  ;;  %v4019_v31 = vld [vmem:[#allocation9 + $0x4c] sm:$0xf0]  ;;  %v4022_v32 = vld [vmem:[#allocation9 + $0x6c] sm:$0xf]  ;;  %v3572_v33 = vld [vmem:[#allocation9 + $0x78] sm:$0xf0]  ;;  %v4720_v36 = vor.u32 %v4024_v26, %v3570_v25 }
  0x3e   :  { %448 = vmatmul.bf16.vlgmr.msra.gmra.mxu3 %v180_v42  ;;  %691 = vmatpush.bf16.msrb.mxu2 %v4673_v49  ;;  %v4017_v34 = vld [vmem:[#allocation9 + $0x44] sm:$0xf]  ;;  %v3548_v35 = vld [vmem:[#allocation9 + $0x50] sm:$0xf0]  ;;  %v4724_v37 = vor.u32 %v4019_v31, %v3546_v28  ;;  %v3554_v39 = vld [vmem:[#allocation9 + $0x48] sm:$0xf]  ;;  %v4726_v41 = vor.u32 %v4022_v32, %v3572_v33 }
  0x3f   :  { %704 = vmatpush.bf16.msrb.mxu3 %v4678_v53  ;;  %v4020_v40 = vld [vmem:[#allocation9 + $0x54] sm:$0xf0]  ;;  %v4729_v42 = vor.u32 %v4017_v34, %v3548_v35  ;;  %v3530_v45 = vld [vmem:[#allocation9 + $0x20] sm:$0xf]  ;;  %v4015_v46 = vld [vmem:[#allocation9 + $0x2c] sm:$0xf0] }
  0x40   :  { %666 = vmatpush.bf16.msrb.mxu0 %v4676_v51  ;;  %v4732_v44 = vor.u32 %v4020_v40, %v3554_v39  ;;  %v4013_v47 = vld [vmem:[#allocation9 + $0x24] sm:$0xf]  ;;  %v4736_v48 = vor.u32 %v4015_v46, %v3530_v45  ;;  %v3532_v50 = vld [vmem:[#allocation9 + $0x30] sm:$0xf0]  ;;  %v3538_v52 = vld [vmem:[#allocation9 + $0x28] sm:$0xf] }
  0x41   :  { %679 = vmatpush.bf16.msrb.mxu1 %v4681_v55  ;;  %v4016_v54 = vld [vmem:[#allocation9 + $0x34] sm:$0xf0]  ;;  %v4739_v56 = vor.u32 %v4013_v47, %v3532_v50  ;;  %v4018_v57 = vld [vmem:[#allocation9 + $0x4c] sm:$0xf]  ;;  %v3556_v58 = vld [vmem:[#allocation9 + $0x58] sm:$0xf0] }
  0x42   :  { %692 = vmatpush.bf16.msrb.mxu2 %v4684_v61  ;;  %v3514_v59 = vld [vmem:[#allocation9] sm:$0xf]  ;;  %v4741_v60 = vor.u32 %v4018_v57, %v3556_v58  ;;  %v4011_v63 = vld [vmem:[#allocation9 + $0xc] sm:$0xf0]  ;;  %v4009_v0 = vld [vmem:[#allocation9 + $0x4] sm:$0xf]  ;;  %v4744_v4 = vor.u32 %v4016_v54, %v3538_v52 }
  0x43   :  { %705 = vmatpush.bf16.msrb.mxu3 %v4690_v1  ;;  %v3516_v2 = vld [vmem:[#allocation9 + $0x10] sm:$0xf0]  ;;  %v4014_v5 = vld [vmem:[#allocation9 + $0x2c] sm:$0xf]  ;;  %v3540_v6 = vld [vmem:[#allocation9 + $0x38] sm:$0xf0]  ;;  %v4748_v7 = vor.u32 %v4011_v63, %v3514_v59 }
  0x44   :  { %667 = vmatpush.bf16.msrb.mxu0 %v4688_v62  ;;  %v4750_v8 = vor.u32 %v4014_v5, %v3540_v6  ;;  %v3522_v10 = vld [vmem:[#allocation9 + $0x8] sm:$0xf]  ;;  %v4012_v12 = vld [vmem:[#allocation9 + $0x14] sm:$0xf0]  ;;  %v4753_v13 = vor.u32 %v4009_v0, %v3516_v2  ;;  %v4010_v15 = vld [vmem:[#allocation9 + $0xc] sm:$0xf] }
  0x45   :  { %680 = vmatpush.bf16.msrb.mxu1 %v4693_v3  ;;  %v3524_v17 = vld [vmem:[#allocation9 + $0x18] sm:$0xf0]  ;;  %v176_v18 = vld [vmem:[#allocation4 + $0x20] sm:$0xff]  ;;  %v177_v19 = vld [vmem:[#allocation4 + $0x28] sm:$0xff]  ;;  %v4756_v20 = vor.u32 %v4012_v12, %v3522_v10  ;;  %s3358_s15 = sshll.u32 %s4604_s14, 4  ;;  %s3360_s18 = sshll.u32 %s5774_s8, 4  ;;  %s3359_s15 = int_to_ptr.vmem [resolvable:$true] %s3358_s15  ;;  %s3361_s18 = int_to_ptr.hbm [resolvable:$true] %s3360_s18 }
  0x46   :  { %693 = vmatpush.bf16.msrb.mxu2 %v4696_v9  ;;  %v4760_v21 = vor.u32 %v4010_v15, %v3524_v17  ;;  %v182_v22 = vpack.c.bf16 %v177_v19, %v176_v18  ;;  %v178_v25 = vld [vmem:[#allocation4 + $0x30] sm:$0xff]  ;;  %v179_v26 = vld [vmem:[#allocation4 + $0x38] sm:$0xff]  ;;  %v171_v40 = vld [vmem:[#allocation10] sm:$0xf]  ;;  %s4605_s8 = smov [#allocation13]  }
  0x47   :  { %706 = vmatpush.bf16.msrb.mxu3 %v4702_v14  ;;  %v183_v28 = vpack.c.bf16 %v179_v26, %v178_v25  ;;  %v4839_v45 = vperm.slane %v171_v40, 0  ;;  %v4843_v47 = vperm.slane %v171_v40, 1  ;;  %v4853_v59 = vperm.slane %v171_v40, 2  ;;  %s3335_s19 = sshll.u32 %s4605_s8, 4  ;;  %s3336_s19 = int_to_ptr.vmem [resolvable:$true] %s3335_s19 }
  0x48   :  { %668 = vmatpush.bf16.msrb.mxu0 %v4700_v11  ;;  %v4855_v63 = vperm.slane %v171_v40, 3 }
  0x49   :  { %681 = vmatpush.bf16.msrb.mxu1 %v4705_v16 }
  0x4a   :  { %694 = vmatpush.bf16.msrb.mxu2 %v4708_v23  ;;  %5786 = vst [vmem:[#allocation25_spill] sm:$0xff] %v4855_v63 }
  0x4b   :  { %707 = vmatpush.bf16.msrb.mxu3 %v4714_v27  ;;  %366 = vmatmul.bf16.gmra.mxu0 %v181_v29 }
  0x4c   :  { %669 = vmatpush.bf16.msrb.mxu0 %v4712_v24  ;;  %395 = vmatmul.bf16.gmra.mxu1 %v181_v29 }
  0x4d   :  { %682 = vmatpush.bf16.msrb.mxu1 %v4717_v30  ;;  %424 = vmatmul.bf16.gmra.mxu2 %v181_v29 }
  0x4e   :  { %453 = vmatmul.bf16.gmra.mxu3 %v181_v29  ;;  %695 = vmatpush.bf16.msrb.mxu2 %v4720_v36  ;;  %v5775_v29 = vmov 0  }
  0x4f   :  { %708 = vmatpush.bf16.msrb.mxu3 %v4726_v41 }
  0x50   :  { %670 = vmatpush.bf16.msrb.mxu0 %v4724_v37 }
  0x51   :  { %683 = vmatpush.bf16.msrb.mxu1 %v4729_v42 }
  0x52   :  { %696 = vmatpush.bf16.msrb.mxu2 %v4732_v44 }
  0x53   :  { %709 = vmatpush.bf16.msrb.mxu3 %v4741_v60 }
  0x54   :  { %671 = vmatpush.bf16.msrb.mxu0 %v4736_v48 }
  0x55   :  { %684 = vmatpush.bf16.msrb.mxu1 %v4739_v56 }
  0x56   :  { %697 = vmatpush.bf16.msrb.mxu2 %v4744_v4 }
  0x57   :  { %710 = vmatpush.bf16.msrb.mxu3 %v4750_v8 }
  0x58   :  { %672 = vmatpush.bf16.msrb.mxu0 %v4748_v7 }
  0x59   :  { %685 = vmatpush.bf16.msrb.mxu1 %v4753_v13 }
  0x5a   :  { %698 = vmatpush.bf16.msrb.mxu2 %v4756_v20 }
  0x5b   :  { %711 = vmatpush.bf16.msrb.mxu3 %v4760_v21  ;;  %371 = vmatmul.bf16.gmra.mxu0 %v182_v22 }
  0x5c   :  { %791 = vmatpush.bf16.msra.mxu0 %v4669_v38  ;;  %400 = vmatmul.bf16.gmra.mxu1 %v182_v22 }
  0x5d   :  { %804 = vmatpush.bf16.msra.mxu1 %v4671_v43  ;;  %429 = vmatmul.bf16.gmra.mxu2 %v182_v22 }
  0x5e   :  { %817 = vmatpush.bf16.msra.mxu2 %v4673_v49  ;;  %458 = vmatmul.bf16.gmra.mxu3 %v182_v22 }
  0x5f   :  { %830 = vmatpush.bf16.msra.mxu3 %v4678_v53 }
  0x60   :  { %792 = vmatpush.bf16.msra.mxu0 %v4676_v51 }
  0x61   :  { %805 = vmatpush.bf16.msra.mxu1 %v4681_v55 }
  0x62   :  { %818 = vmatpush.bf16.msra.mxu2 %v4684_v61 }
  0x63   :  { %831 = vmatpush.bf16.msra.mxu3 %v4690_v1 }
  0x64   :  { %793 = vmatpush.bf16.msra.mxu0 %v4688_v62 }
  0x65   :  { %806 = vmatpush.bf16.msra.mxu1 %v4693_v3 }
  0x66   :  { %819 = vmatpush.bf16.msra.mxu2 %v4696_v9 }
  0x67   :  { %832 = vmatpush.bf16.msra.mxu3 %v4702_v14 }
  0x68   :  { %794 = vmatpush.bf16.msra.mxu0 %v4700_v11 }
  0x69   :  { %807 = vmatpush.bf16.msra.mxu1 %v4705_v16 }
  0x6a   :  { %820 = vmatpush.bf16.msra.mxu2 %v4708_v23 }
  0x6b   :  { %833 = vmatpush.bf16.msra.mxu3 %v4714_v27  ;;  %376 = vmatmul.bf16.gmra.mxu0 %v183_v28 }
  0x6c   :  { %795 = vmatpush.bf16.msra.mxu0 %v4712_v24  ;;  %405 = vmatmul.bf16.gmra.mxu1 %v183_v28 }
  0x6d   :  { %808 = vmatpush.bf16.msra.mxu1 %v4717_v30  ;;  %434 = vmatmul.bf16.gmra.mxu2 %v183_v28 }
  0x6e   :  { %821 = vmatpush.bf16.msra.mxu2 %v4720_v36  ;;  %463 = vmatmul.bf16.gmra.mxu3 %v183_v28 }
  0x6f   :  { %834 = vmatpush.bf16.msra.mxu3 %v4726_v41 }
  0x70   :  { %796 = vmatpush.bf16.msra.mxu0 %v4724_v37 }
  0x71   :  { %809 = vmatpush.bf16.msra.mxu1 %v4729_v42 }
  0x72   :  { %822 = vmatpush.bf16.msra.mxu2 %v4732_v44 }
  0x73   :  { %835 = vmatpush.bf16.msra.mxu3 %v4741_v60 }
  0x74   :  { %797 = vmatpush.bf16.msra.mxu0 %v4736_v48 }
  0x75   :  { %810 = vmatpush.bf16.msra.mxu1 %v4739_v56 }
  0x76   :  { %823 = vmatpush.bf16.msra.mxu2 %v4744_v4 }
  0x77   :  { %836 = vmatpush.bf16.msra.mxu3 %v4750_v8 }
  0x78   :  { %798 = vmatpush.bf16.msra.mxu0 %v4748_v7 }
  0x79   :  { %811 = vmatpush.bf16.msra.mxu1 %v4753_v13 }
  0x7a   :  { %824 = vmatpush.bf16.msra.mxu2 %v4756_v20 }
  0x7b   :  { %837 = vmatpush.bf16.msra.mxu3 %v4760_v21  ;;  %673 = vmatmul.bf16.vlgmr.msrb.gmra.mxu0 %v5775_v29 }
  0x7c   :  { %686 = vmatmul.bf16.vlgmr.msrb.gmra.mxu1 %v5775_v29  ;;  %918 = vmatpush.bf16.msrb.mxu0 %v4669_v38 }
  0x7d   :  { %699 = vmatmul.bf16.vlgmr.msrb.gmra.mxu2 %v5775_v29  ;;  %931 = vmatpush.bf16.msrb.mxu1 %v4671_v43 }
  0x7e   :  { %712 = vmatmul.bf16.vlgmr.msrb.gmra.mxu3 %v5775_v29  ;;  %944 = vmatpush.bf16.msrb.mxu2 %v4673_v49 }
  0x7f   :  { %957 = vmatpush.bf16.msrb.mxu3 %v4678_v53 }
  0x80   :  { %919 = vmatpush.bf16.msrb.mxu0 %v4676_v51 }
  0x81   :  { %932 = vmatpush.bf16.msrb.mxu1 %v4681_v55 }
  0x82   :  { %945 = vmatpush.bf16.msrb.mxu2 %v4684_v61 }
  0x83   :  { %958 = vmatpush.bf16.msrb.mxu3 %v4690_v1 }
  0x84   :  { %920 = vmatpush.bf16.msrb.mxu0 %v4688_v62 }
  0x85   :  { %933 = vmatpush.bf16.msrb.mxu1 %v4693_v3 }
  0x86   :  { %946 = vmatpush.bf16.msrb.mxu2 %v4696_v9 }
  0x87   :  { %959 = vmatpush.bf16.msrb.mxu3 %v4702_v14 }
  0x88   :  { %921 = vmatpush.bf16.msrb.mxu0 %v4700_v11 }
  0x89   :  { %934 = vmatpush.bf16.msrb.mxu1 %v4705_v16 }
  0x8a   :  { %947 = vmatpush.bf16.msrb.mxu2 %v4708_v23 }
  0x8b   :  { %960 = vmatpush.bf16.msrb.mxu3 %v4714_v27 }
  0x8c   :  { %922 = vmatpush.bf16.msrb.mxu0 %v4712_v24 }
  0x8d   :  { %935 = vmatpush.bf16.msrb.mxu1 %v4717_v30 }
  0x8e   :  { %948 = vmatpush.bf16.msrb.mxu2 %v4720_v36 }
  0x8f   :  { %961 = vmatpush.bf16.msrb.mxu3 %v4726_v41 }
  0x90   :  { %923 = vmatpush.bf16.msrb.mxu0 %v4724_v37 }
  0x91   :  { %936 = vmatpush.bf16.msrb.mxu1 %v4729_v42 }
  0x92   :  { %949 = vmatpush.bf16.msrb.mxu2 %v4732_v44 }
  0x93   :  { %962 = vmatpush.bf16.msrb.mxu3 %v4741_v60 }
  0x94   :  { %924 = vmatpush.bf16.msrb.mxu0 %v4736_v48 }
  0x95   :  { %937 = vmatpush.bf16.msrb.mxu1 %v4739_v56 }
  0x96   :  { %950 = vmatpush.bf16.msrb.mxu2 %v4744_v4 }
  0x97   :  { %963 = vmatpush.bf16.msrb.mxu3 %v4750_v8 }
  0x98   :  { %925 = vmatpush.bf16.msrb.mxu0 %v4748_v7 }
  0x99   :  { %938 = vmatpush.bf16.msrb.mxu1 %v4753_v13 }
  0x9a   :  { %951 = vmatpush.bf16.msrb.mxu2 %v4756_v20 }
  0x9b   :  { %964 = vmatpush.bf16.msrb.mxu3 %v4760_v21 }
  0xb8   :  { %v362_v31 = vpop.f32.mrf.mxu0 }
  0xb9   :  { %v391_v32 = vpop.f32.mrf.mxu1 }
  0xc0   :  { %v420_v33 = vpop.f32.mrf.mxu2  ;;  %v4835_v35 = vpop.f32.mrf.mxu0 }
  0xc1   :  { %v4833_v34 = vpop.f32.mrf.mxu3  ;;  %v4837_v39 = vpop.f32.mrf.mxu1 }
  0xc8   :  { %v4841_v46 = vpop.f32.mrf.mxu2  ;;  %v367_v52 = vpop.f32.mrf.mxu0 }
  0xc9   :  { %v4845_v50 = vpop.f32.mrf.mxu3  ;;  %v4848_v54 = vadd.f32 %v367_v52, %v4839_v45  ;;  %v396_v57 = vpop.f32.mrf.mxu1 }
  0xca   :  { %5783 = vst [vmem:[#allocation22_spill] sm:$0xff] %v4845_v50  ;;  %v4851_v58 = vadd.f32 %v396_v57, %v4843_v47 }
  0xcb   :  { %5784 = vst [vmem:[#allocation23_spill] sm:$0xff] %v4848_v54 }
  0xcc   :  { %5785 = vst [vmem:[#allocation24_spill] sm:$0xff] %v4851_v58 }
  0xd0   :  { %v425_v0 = vpop.f32.mrf.mxu2  ;;  %v4860_v6 = vpop.f32.mrf.mxu0 }
  0xd1   :  { %v4858_v2 = vadd.f32 %v425_v0, %v4853_v59  ;;  %v454_v5 = vpop.f32.mrf.mxu3  ;;  %5788 = vst [vmem:[#allocation27_spill] sm:$0xff] %v4860_v6  ;;  %v4865_v12 = vpop.f32.mrf.mxu1 }
  0xd2   :  { %v4863_v10 = vadd.f32 %v454_v5, %v4855_v63  ;;  %5790 = vst [vmem:[#allocation29_spill] sm:$0xff] %v4865_v12 }
  0xd3   :  { %5787 = vst [vmem:[#allocation26_spill] sm:$0xff] %v4858_v2 }
  0xd4   :  { %5789 = vst [vmem:[#allocation28_spill] sm:$0xff] %v4863_v10 }
  0xd8   :  { %v4867_v15 = vpop.f32.mrf.mxu2  ;;  %v372_v18 = vpop.f32.mrf.mxu0 }
  0xd9   :  { %5791 = vst [vmem:[#allocation30_spill] sm:$0xff] %v4867_v15  ;;  %v4869_v17 = vpop.f32.mrf.mxu3  ;;  %v4872_v19 = vadd.f32 %v372_v18, %v4839_v45  ;;  %v401_v22 = vpop.f32.mrf.mxu1 }
  0xda   :  { %5792 = vst [vmem:[#allocation31_spill] sm:$0xff] %v4869_v17  ;;  %v4875_v25 = vadd.f32 %v401_v22, %v4843_v47 }
  0xdb   :  { %5793 = vst [vmem:[#allocation32_spill] sm:$0xff] %v4872_v19 }
  0xdc   :  { %5794 = vst [vmem:[#allocation33_spill] sm:$0xff] %v4875_v25 }
  0xe0   :  { %v430_v26 = vpop.f32.mrf.mxu2  ;;  %v4880_v52 = vpop.f32.mrf.mxu0 }
  0xe1   :  { %v4878_v28 = vadd.f32 %v430_v26, %v4853_v59  ;;  %v459_v40 = vpop.f32.mrf.mxu3  ;;  %5796 = vst [vmem:[#allocation35_spill] sm:$0xff] %v4880_v52  ;;  %v4885_v0 = vpop.f32.mrf.mxu1 }
  0xe2   :  { %v4883_v57 = vadd.f32 %v459_v40, %v4855_v63  ;;  %5798 = vst [vmem:[#allocation37_spill] sm:$0xff] %v4885_v0 }
  0xe3   :  { %5795 = vst [vmem:[#allocation34_spill] sm:$0xff] %v4878_v28 }
  0xe4   :  { %5797 = vst [vmem:[#allocation36_spill] sm:$0xff] %v4883_v57 }
  0xe8   :  { %v4887_v5 = vpop.f32.mrf.mxu2  ;;  %v377_v29 = vpop.f32.mrf.mxu0 }
  0xe9   :  { %5799 = vst [vmem:[#allocation38_spill] sm:$0xff] %v4887_v5  ;;  %v4889_v18 = vpop.f32.mrf.mxu3  ;;  %v4892_v22 = vadd.f32 %v377_v29, %v4839_v45  ;;  %v406_v25 = vpop.f32.mrf.mxu1 }
  0xea   :  { %5800 = vst [vmem:[#allocation39_spill] sm:$0xff] %v4889_v18  ;;  %v4895_v26 = vadd.f32 %v406_v25, %v4843_v47  ;;  %v363_v18 = vadd.f32 %v362_v31, %v4839_v45 }
  0xeb   :  { %5801 = vst [vmem:[#allocation40_spill] sm:$0xff] %v4892_v22  ;;  %v392_v22 = vadd.f32 %v391_v32, %v4843_v47 }
  0xec   :  { %5802 = vst [vmem:[#allocation41_spill] sm:$0xff] %v4895_v26 }
  0xf0   :  { %v435_v28 = vpop.f32.mrf.mxu2  ;;  %v4900_v57 = vpop.f32.mrf.mxu0 }
  0xf1   :  { %v4898_v52 = vadd.f32 %v435_v28, %v4853_v59  ;;  %v464_v40 = vpop.f32.mrf.mxu3  ;;  %5804 = vst [vmem:[#allocation43_spill] sm:$0xff] %v4900_v57  ;;  %v4905_v5 = vpop.f32.mrf.mxu1 }
  0xf2   :  { %v4903_v0 = vadd.f32 %v464_v40, %v4855_v63  ;;  %5806 = vst [vmem:[#allocation45_spill] sm:$0xff] %v4905_v5  ;;  %v421_v40 = vadd.f32 %v420_v33, %v4853_v59  ;;  %v450_v33 = vadd.f32 %v4833_v34, %v4855_v63 }
  0xf3   :  { %5803 = vst [vmem:[#allocation42_spill] sm:$0xff] %v4898_v52 }
  0xf4   :  { %5805 = vst [vmem:[#allocation44_spill] sm:$0xff] %v4903_v0 }
  0xf8   :  { %v4908_v29 = vpop.f32.mrf.mxu2  ;;  %v674_v26 = vpop.f32.mrf.mxu0 }
  0xf9   :  { %5807 = vst [vmem:[#allocation46_spill] sm:$0xff] %v4908_v29  ;;  %v4911_v25 = vpop.f32.mrf.mxu3  ;;  %v717_v19 = vadd.f32 %v674_v26, %v363_v18  ;;  %v687_v28 = vpop.f32.mrf.mxu1 }
  0xfa   :  { %5808 = vst [vmem:[#allocation47_spill] sm:$0xff] %v4911_v25  ;;  %v718_v52 = vadd.f32 %v687_v28, %v392_v22 }
  0xfb   :  { %v3640_v17 = vmul.f32 -1.442695, %v717_v19 }
  0xfc   :  { %v3641_v15 = vmul.f32 -1.442695, %v718_v52 }
  0xfd   :  { %4129 = vpow2.f32 %v3640_v17 }
  0xfe   :  { %4131 = vpow2.f32 %v3641_v15 }
 0x100   :  { %v700_v57 = vpop.f32.mrf.mxu2  ;;  %v676_v31 = vpop.f32.mrf.mxu0 }
 0x101   :  { %v719_v5 = vadd.f32 %v700_v57, %v421_v40  ;;  %v713_v0 = vpop.f32.mrf.mxu3  ;;  %v689_v12 = vpop.f32.mrf.mxu1 }
 0x102   :  { %v720_v57 = vadd.f32 %v713_v0, %v450_v33 }
 0x103   :  { %v3642_v29 = vmul.f32 -1.442695, %v719_v5  ;;  %v4130_v6 = vpop.eup %4129 }
 0x104   :  { %v4132_v32 = vpop.eup %4131  ;;  %v730_v10 = vadd.f32 1.0, %v4130_v6 }
 0x105   :  { %4133 = vpow2.f32 %v3642_v29  ;;  %v731_v25 = vadd.f32 1.0, %v4132_v32 }
 0x106   :  { %4135 = vrcp.f32 %v730_v10  ;;  %v744_v6 = vand.u32 2147483648, %v730_v10  ;;  %v742_v31 = vand.u32 2147483647, %v730_v10  ;;  %vm738_vm2 = vweird.f32 %v730_v10 }
 0x107   :  { %4137 = vrcp.f32 %v731_v25  ;;  %v759_v29 = vand.u32 2147483648, %v731_v25  ;;  %vm753_vm3 = vweird.f32 %v731_v25 }
 0x108   :  { %v702_v18 = vpop.f32.mrf.mxu2  ;;  %vm743_vm5 = vcmp.eq.f32.partialorder %v742_v31, 8.507059e+37 }
 0x109   :  { %v715_v19 = vpop.f32.mrf.mxu3  ;;  %v757_v18 = vand.u32 2147483647, %v731_v25  ;;  %v760_v2 = vor.u32 1.1754944e-38, %v759_v29 }
 0x10b   :  { %v4134_v52 = vpop.eup %4133  ;;  %vm758_vm7 = vcmp.eq.f32.partialorder %v757_v18, 8.507059e+37 }
 0x10c   :  { %v732_v15 = vadd.f32 1.0, %v4134_v52  ;;  %v4136_v17 = vpop.eup %4135  ;;  %v745_v52 = vor.u32 1.1754944e-38, %v744_v6 }
 0x10d   :  { %v4138_v22 = vpop.eup %4137  ;;  %v734_v26 = vmul.f32 %v4136_v17, %v730_v10  ;;  %vm739_vm0 = vweird.f32 %v4136_v17 }
 0x10e   :  { %4139 = vrcp.f32 %v732_v15  ;;  %v749_v12 = vmul.f32 %v4138_v22, %v731_v25  ;;  %vm754_vm1 = vweird.f32 %v4138_v22  ;;  %vm740_vm4 = vmor %vm738_vm2, %vm739_vm0  ;;  %v774_v25 = vand.u32 2147483648, %v732_v15 }
 0x10f   :  { %v735_v5 = vsub.f32 1.0, %v734_v26  ;;  %4141 = vtanh.f32 %v720_v57  ;;  %vm755_vm6 = vmor %vm753_vm3, %vm754_vm1  ;;  %vm768_vm9 = vweird.f32 %v732_v15 }
 0x110   :  { %v750_v28 = vsub.f32 1.0, %v749_v12  ;;  %v775_v29 = vor.u32 1.1754944e-38, %v774_v25 }
 0x111   :  { %v736_v40 = vmul.f32 %v4136_v17, %v735_v5 }
 0x112   :  { %v751_v32 = vmul.f32 %v4138_v22, %v750_v28 }
 0x113   :  { %v737_v34 = vadd.f32 %v4136_v17, %v736_v40 }
 0x114   :  { %v4140_v19 = vpop.eup %4139  ;;  %v752_v33 = vadd.f32 %v4138_v22, %v751_v32 }
 0x115   :  { %v764_v0 = vmul.f32 %v4140_v19, %v732_v15  ;;  %v741_v26 = vsel %vm740_vm4, %v4136_v17, %v737_v34  ;;  %v4142_v57 = vpop.eup %4141  ;;  %vm769_vm8 = vweird.f32 %v4140_v19  ;;  %v772_v17 = vand.u32 2147483647, %v732_v15 }
 0x116   :  { %v746_v5 = vsel %vm743_vm5, %v745_v52, %v741_v26  ;;  %v756_v58 = vsel %vm755_vm6, %v4138_v22, %v752_v33  ;;  %vm770_vm10 = vmor %vm768_vm9, %vm769_vm8 }
 0x117   :  { %v765_v12 = vsub.f32 1.0, %v764_v0  ;;  %v761_v28 = vsel %vm758_vm7, %v760_v2, %v756_v58  ;;  %v780_v54 = vmul.f32 %v4142_v57, %v746_v5  ;;  %vm773_vm11 = vcmp.eq.f32.partialorder %v772_v17, 8.507059e+37 }
 0x118   :  { %v779_v63 = vmul.f32 0.0, %v761_v28  ;;  %v423_v0 = vadd.f32 %v4841_v46, %v4853_v59 }
 0x119   :  { %v766_v50 = vmul.f32 %v4140_v19, %v765_v12 }
 0x11a   :  { %v4916_v40 = vadd.f32 %v780_v54, %v779_v63  ;;  %v394_v54 = vadd.f32 %v4837_v39, %v4843_v47 }
 0x11b   :  { %v767_v10 = vadd.f32 %v4140_v19, %v766_v50  ;;  %v365_v50 = vadd.f32 %v4835_v35, %v4839_v45 }
 0x11c   :  { %4143 = vtanh.f32 %v4916_v40 }
 0x11d   :  { %v771_v6 = vsel %vm770_vm10, %v4140_v19, %v767_v10 }
 0x11e   :  { %v776_v22 = vsel %vm773_vm11, %v775_v29, %v771_v6  ;;  %v5809_v29 = vld [vmem:[#allocation25_spill] sm:$0xff] }
 0x122   :  { %v4144_v31 = vpop.eup %4143 }
 0x123   :  { %v4919_v32 = vmul.f32 %v4144_v31, %v776_v22  ;;  %v5810_v31 = vld [vmem:[#allocation22_spill] sm:$0xff] }
 0x124   :  { %v452_v46 = vadd.f32 %v5810_v31, %v5809_v29 }
 0x125   :  { %v790_v58 = vpack.c.bf16 %v4919_v32, %v4919_v32 }
 0x127   :  { %799 = vmatmul.bf16.vlgmr.msra.gmra.mxu0 %v790_v58  ;;  %812 = vmatmul.bf16.vlgmr.msra.gmra.mxu1 %v790_v58 }
 0x128   :  { %825 = vmatmul.bf16.vlgmr.msra.gmra.mxu2 %v790_v58  ;;  %838 = vmatmul.bf16.vlgmr.msra.gmra.mxu3 %v790_v58 }
 0x129   :  { %1045 = vmatpush.bf16.msra.mxu0 %v4669_v38  ;;  %1058 = vmatpush.bf16.msra.mxu1 %v4671_v43 }
 0x12a   :  { %1071 = vmatpush.bf16.msra.mxu2 %v4673_v49  ;;  %1084 = vmatpush.bf16.msra.mxu3 %v4678_v53 }
 0x12d   :  { %1046 = vmatpush.bf16.msra.mxu0 %v4676_v51  ;;  %1059 = vmatpush.bf16.msra.mxu1 %v4681_v55 }
 0x12e   :  { %1072 = vmatpush.bf16.msra.mxu2 %v4684_v61  ;;  %1085 = vmatpush.bf16.msra.mxu3 %v4690_v1 }
 0x131   :  { %1047 = vmatpush.bf16.msra.mxu0 %v4688_v62  ;;  %1060 = vmatpush.bf16.msra.mxu1 %v4693_v3 }
 0x132   :  { %1073 = vmatpush.bf16.msra.mxu2 %v4696_v9  ;;  %1086 = vmatpush.bf16.msra.mxu3 %v4702_v14 }
 0x135   :  { %1048 = vmatpush.bf16.msra.mxu0 %v4700_v11  ;;  %1061 = vmatpush.bf16.msra.mxu1 %v4705_v16 }
 0x136   :  { %1074 = vmatpush.bf16.msra.mxu2 %v4708_v23  ;;  %1087 = vmatpush.bf16.msra.mxu3 %v4714_v27 }
 0x139   :  { %1049 = vmatpush.bf16.msra.mxu0 %v4712_v24  ;;  %1062 = vmatpush.bf16.msra.mxu1 %v4717_v30 }
 0x13a   :  { %1075 = vmatpush.bf16.msra.mxu2 %v4720_v36  ;;  %1088 = vmatpush.bf16.msra.mxu3 %v4726_v41 }
 0x13d   :  { %1050 = vmatpush.bf16.msra.mxu0 %v4724_v37  ;;  %1063 = vmatpush.bf16.msra.mxu1 %v4729_v42 }
 0x13e   :  { %1076 = vmatpush.bf16.msra.mxu2 %v4732_v44  ;;  %1089 = vmatpush.bf16.msra.mxu3 %v4741_v60 }
 0x141   :  { %1051 = vmatpush.bf16.msra.mxu0 %v4736_v48  ;;  %1064 = vmatpush.bf16.msra.mxu1 %v4739_v56 }
 0x142   :  { %1077 = vmatpush.bf16.msra.mxu2 %v4744_v4  ;;  %1090 = vmatpush.bf16.msra.mxu3 %v4750_v8 }
 0x145   :  { %1052 = vmatpush.bf16.msra.mxu0 %v4748_v7  ;;  %1065 = vmatpush.bf16.msra.mxu1 %v4753_v13 }
 0x146   :  { %1078 = vmatpush.bf16.msra.mxu2 %v4756_v20  ;;  %1091 = vmatpush.bf16.msra.mxu3 %v4760_v21 }
 0x1a4   :  { %v800_v63 = vpop.f32.mrf.mxu0  ;;  %v813_v2 = vpop.f32.mrf.mxu1 }
 0x1a5   :  { %v843_v15 = vadd.f32 %v800_v63, %v365_v50  ;;  %v844_v18 = vadd.f32 %v813_v2, %v394_v54 }
 0x1a7   :  { %v3643_v19 = vmul.f32 -1.442695, %v843_v15  ;;  %v3644_v34 = vmul.f32 -1.442695, %v844_v18 }
 0x1a9   :  { %4145 = vpow2.f32 %v3643_v19 }
 0x1aa   :  { %4147 = vpow2.f32 %v3644_v34 }
 0x1ab   :  { %v826_v52 = vpop.f32.mrf.mxu2  ;;  %v839_v33 = vpop.f32.mrf.mxu3 }
 0x1ac   :  { %v845_v26 = vadd.f32 %v826_v52, %v423_v0  ;;  %v802_v57 = vpop.f32.mrf.mxu0  ;;  %v815_v12 = vpop.f32.mrf.mxu1  ;;  %v846_v50 = vadd.f32 %v839_v33, %v452_v46 }
 0x1ae   :  { %v3645_v35 = vmul.f32 -1.442695, %v845_v26 }
 0x1af   :  { %v4146_v5 = vpop.eup %4145 }
 0x1b0   :  { %v4148_v28 = vpop.eup %4147  ;;  %v856_v39 = vadd.f32 1.0, %v4146_v5  ;;  %4149 = vpow2.f32 %v3645_v35 }
 0x1b1   :  { %v857_v10 = vadd.f32 1.0, %v4148_v28 }
 0x1b2   :  { %4151 = vrcp.f32 %v856_v39  ;;  %v870_v19 = vand.u32 2147483648, %v856_v39  ;;  %v868_v52 = vand.u32 2147483647, %v856_v39  ;;  %vm864_vm14 = vweird.f32 %v856_v39 }
 0x1b3   :  { %4153 = vrcp.f32 %v857_v10  ;;  %v828_v25 = vpop.f32.mrf.mxu2  ;;  %v841_v17 = vpop.f32.mrf.mxu3  ;;  %v885_v34 = vand.u32 2147483648, %v857_v10  ;;  %v883_v57 = vand.u32 2147483647, %v857_v10  ;;  %vm879_vm15 = vweird.f32 %v857_v10 }
 0x1b4   :  { %v871_v5 = vor.u32 1.1754944e-38, %v870_v19  ;;  %vm869_vm2 = vcmp.eq.f32.partialorder %v868_v52, 8.507059e+37 }
 0x1b5   :  { %v886_v25 = vor.u32 1.1754944e-38, %v885_v34  ;;  %vm884_vm3 = vcmp.eq.f32.partialorder %v883_v57, 8.507059e+37 }
 0x1b6   :  { %v4150_v6 = vpop.eup %4149 }
 0x1b7   :  { %v858_v22 = vadd.f32 1.0, %v4150_v6 }
 0x1b8   :  { %v4152_v58 = vpop.eup %4151 }
 0x1b9   :  { %v4154_v54 = vpop.eup %4153  ;;  %v860_v63 = vmul.f32 %v4152_v58, %v856_v39  ;;  %4155 = vrcp.f32 %v858_v22  ;;  %vm865_vm12 = vweird.f32 %v4152_v58  ;;  %v900_v19 = vand.u32 2147483648, %v858_v22 }
 0x1ba   :  { %v875_v2 = vmul.f32 %v4154_v54, %v857_v10  ;;  %4157 = vtanh.f32 %v846_v50  ;;  %vm880_vm13 = vweird.f32 %v4154_v54  ;;  %vm866_vm0 = vmor %vm864_vm14, %vm865_vm12  ;;  %vm894_vm5 = vweird.f32 %v858_v22 }
 0x1bb   :  { %v861_v15 = vsub.f32 1.0, %v860_v63  ;;  %vm881_vm1 = vmor %vm879_vm15, %vm880_vm13 }
 0x1bc   :  { %v876_v18 = vsub.f32 1.0, %v875_v2 }
 0x1bd   :  { %v862_v0 = vmul.f32 %v4152_v58, %v861_v15 }
 0x1be   :  { %v877_v26 = vmul.f32 %v4154_v54, %v876_v18 }
 0x1bf   :  { %v4156_v12 = vpop.eup %4155  ;;  %v863_v35 = vadd.f32 %v4152_v58, %v862_v0  ;;  %v901_v0 = vor.u32 1.1754944e-38, %v900_v19 }
 0x1c0   :  { %v890_v33 = vmul.f32 %v4156_v12, %v858_v22  ;;  %v878_v28 = vadd.f32 %v4154_v54, %v877_v26  ;;  %v4158_v6 = vpop.eup %4157  ;;  %vm895_vm4 = vweird.f32 %v4156_v12 }
 0x1c1   :  { %v867_v17 = vsel %vm866_vm0, %v4152_v58, %v863_v35  ;;  %v898_v58 = vand.u32 2147483647, %v858_v22  ;;  %vm896_vm6 = vmor %vm894_vm5, %vm895_vm4 }
 0x1c2   :  { %v891_v31 = vsub.f32 1.0, %v890_v33  ;;  %v872_v46 = vsel %vm869_vm2, %v871_v5, %v867_v17  ;;  %v882_v50 = vsel %vm881_vm1, %v4154_v54, %v878_v28  ;;  %v5812_v33 = vld [vmem:[#allocation24_spill] sm:$0xff] }
 0x1c3   :  { %v887_v63 = vsel %vm884_vm3, %v886_v25, %v882_v50  ;;  %v906_v2 = vmul.f32 %v4158_v6, %v872_v46  ;;  %vm899_vm7 = vcmp.eq.f32.partialorder %v898_v58, 8.507059e+37 }
 0x1c4   :  { %v892_v15 = vmul.f32 %v4156_v12, %v891_v31  ;;  %v905_v18 = vmul.f32 %v887_v63, %v4916_v40  ;;  %v5813_v31 = vld [vmem:[#allocation26_spill] sm:$0xff] }
 0x1c6   :  { %v4964_v39 = vadd.f32 %v906_v2, %v905_v18  ;;  %v893_v10 = vadd.f32 %v4156_v12, %v892_v15 }
 0x1c8   :  { %4159 = vtanh.f32 %v4964_v39  ;;  %v897_v34 = vsel %vm896_vm6, %v4156_v12, %v893_v10  ;;  %v5811_v12 = vld [vmem:[#allocation23_spill] sm:$0xff] }
 0x1c9   :  { %v902_v52 = vsel %vm899_vm7, %v901_v0, %v897_v34 }
 0x1ce   :  { %v4160_v54 = vpop.eup %4159 }
 0x1cf   :  { %v4967_v26 = vmul.f32 %v4160_v54, %v902_v52 }
 0x1d1   :  { %v917_v40 = vpack.c.bf16 %v4967_v26, %v4967_v26 }
 0x1d3   :  { %926 = vmatmul.bf16.vlgmr.msrb.gmra.mxu0 %v917_v40  ;;  %939 = vmatmul.bf16.vlgmr.msrb.gmra.mxu1 %v917_v40 }
 0x1d4   :  { %952 = vmatmul.bf16.vlgmr.msrb.gmra.mxu2 %v917_v40  ;;  %965 = vmatmul.bf16.vlgmr.msrb.gmra.mxu3 %v917_v40  ;;  %v5814_v40 = vld [vmem:[#allocation28_spill] sm:$0xff] }
 0x1d5   :  { %1172 = vmatpush.bf16.msrb.mxu0 %v4669_v38  ;;  %1185 = vmatpush.bf16.msrb.mxu1 %v4671_v43 }
 0x1d6   :  { %1198 = vmatpush.bf16.msrb.mxu2 %v4673_v49  ;;  %1211 = vmatpush.bf16.msrb.mxu3 %v4678_v53 }
 0x1d9   :  { %1173 = vmatpush.bf16.msrb.mxu0 %v4676_v51  ;;  %1186 = vmatpush.bf16.msrb.mxu1 %v4681_v55 }
 0x1da   :  { %1199 = vmatpush.bf16.msrb.mxu2 %v4684_v61  ;;  %1212 = vmatpush.bf16.msrb.mxu3 %v4690_v1 }
 0x1dd   :  { %1174 = vmatpush.bf16.msrb.mxu0 %v4688_v62  ;;  %1187 = vmatpush.bf16.msrb.mxu1 %v4693_v3 }
 0x1de   :  { %1200 = vmatpush.bf16.msrb.mxu2 %v4696_v9  ;;  %1213 = vmatpush.bf16.msrb.mxu3 %v4702_v14 }
 0x1e1   :  { %1175 = vmatpush.bf16.msrb.mxu0 %v4700_v11  ;;  %1188 = vmatpush.bf16.msrb.mxu1 %v4705_v16 }
 0x1e2   :  { %1201 = vmatpush.bf16.msrb.mxu2 %v4708_v23  ;;  %1214 = vmatpush.bf16.msrb.mxu3 %v4714_v27 }
 0x1e5   :  { %1176 = vmatpush.bf16.msrb.mxu0 %v4712_v24  ;;  %1189 = vmatpush.bf16.msrb.mxu1 %v4717_v30 }
 0x1e6   :  { %1202 = vmatpush.bf16.msrb.mxu2 %v4720_v36  ;;  %1215 = vmatpush.bf16.msrb.mxu3 %v4726_v41 }
 0x1e9   :  { %1177 = vmatpush.bf16.msrb.mxu0 %v4724_v37  ;;  %1190 = vmatpush.bf16.msrb.mxu1 %v4729_v42 }
 0x1ea   :  { %1203 = vmatpush.bf16.msrb.mxu2 %v4732_v44  ;;  %1216 = vmatpush.bf16.msrb.mxu3 %v4741_v60 }
 0x1ed   :  { %1178 = vmatpush.bf16.msrb.mxu0 %v4736_v48  ;;  %1191 = vmatpush.bf16.msrb.mxu1 %v4739_v56 }
 0x1ee   :  { %1204 = vmatpush.bf16.msrb.mxu2 %v4744_v4  ;;  %1217 = vmatpush.bf16.msrb.mxu3 %v4750_v8 }
 0x1f1   :  { %1179 = vmatpush.bf16.msrb.mxu0 %v4748_v7  ;;  %1192 = vmatpush.bf16.msrb.mxu1 %v4753_v13 }
 0x1f2   :  { %1205 = vmatpush.bf16.msrb.mxu2 %v4756_v20  ;;  %1218 = vmatpush.bf16.msrb.mxu3 %v4760_v21 }
 0x250   :  { %v927_v22 = vpop.f32.mrf.mxu0  ;;  %v940_v57 = vpop.f32.mrf.mxu1 }
 0x251   :  { %v970_v35 = vadd.f32 %v927_v22, %v5811_v12  ;;  %v971_v5 = vadd.f32 %v940_v57, %v5812_v33 }
 0x253   :  { %v3646_v28 = vmul.f32 -1.442695, %v970_v35  ;;  %v3647_v25 = vmul.f32 -1.442695, %v971_v5 }
 0x255   :  { %4161 = vpow2.f32 %v3646_v28 }
 0x256   :  { %4163 = vpow2.f32 %v3647_v25 }
 0x257   :  { %v953_v17 = vpop.f32.mrf.mxu2  ;;  %v966_v6 = vpop.f32.mrf.mxu3 }
 0x258   :  { %v972_v46 = vadd.f32 %v953_v17, %v5813_v31  ;;  %v929_v50 = vpop.f32.mrf.mxu0  ;;  %v942_v63 = vpop.f32.mrf.mxu1  ;;  %v973_v22 = vadd.f32 %v966_v6, %v5814_v40 }
 0x25a   :  { %v3648_v2 = vmul.f32 -1.442695, %v972_v46 }
 0x25b   :  { %v4162_v15 = vpop.eup %4161 }
 0x25c   :  { %v4164_v18 = vpop.eup %4163  ;;  %v983_v10 = vadd.f32 1.0, %v4162_v15  ;;  %4165 = vpow2.f32 %v3648_v2 }
 0x25d   :  { %v984_v19 = vadd.f32 1.0, %v4164_v18 }
 0x25e   :  { %4167 = vrcp.f32 %v983_v10  ;;  %v997_v28 = vand.u32 2147483648, %v983_v10  ;;  %v995_v31 = vand.u32 2147483647, %v983_v10  ;;  %vm991_vm10 = vweird.f32 %v983_v10 }
 0x25f   :  { %4169 = vrcp.f32 %v984_v19  ;;  %v955_v58 = vpop.f32.mrf.mxu2  ;;  %v968_v34 = vpop.f32.mrf.mxu3  ;;  %v1012_v25 = vand.u32 2147483648, %v984_v19  ;;  %v1010_v50 = vand.u32 2147483647, %v984_v19  ;;  %vm1006_vm11 = vweird.f32 %v984_v19 }
 0x260   :  { %v998_v15 = vor.u32 1.1754944e-38, %v997_v28  ;;  %vm996_vm14 = vcmp.eq.f32.partialorder %v995_v31, 8.507059e+37 }
 0x261   :  { %v1013_v58 = vor.u32 1.1754944e-38, %v1012_v25  ;;  %vm1011_vm15 = vcmp.eq.f32.partialorder %v1010_v50, 8.507059e+37 }
 0x262   :  { %v4166_v0 = vpop.eup %4165 }
 0x263   :  { %v985_v54 = vadd.f32 1.0, %v4166_v0 }
 0x264   :  { %v4168_v52 = vpop.eup %4167 }
 0x265   :  { %v4170_v57 = vpop.eup %4169  ;;  %v987_v12 = vmul.f32 %v4168_v52, %v983_v10  ;;  %4171 = vrcp.f32 %v985_v54  ;;  %vm992_vm8 = vweird.f32 %v4168_v52  ;;  %v1027_v28 = vand.u32 2147483648, %v985_v54 }
 0x266   :  { %v1002_v35 = vmul.f32 %v4170_v57, %v984_v19  ;;  %4173 = vtanh.f32 %v973_v22  ;;  %vm1007_vm9 = vweird.f32 %v4170_v57  ;;  %vm993_vm12 = vmor %vm991_vm10, %vm992_vm8  ;;  %vm1021_vm1 = vweird.f32 %v985_v54 }
 0x267   :  { %v988_v33 = vsub.f32 1.0, %v987_v12  ;;  %vm1008_vm13 = vmor %vm1006_vm11, %vm1007_vm9  ;;  %v1028_v31 = vor.u32 1.1754944e-38, %v1027_v28 }
 0x268   :  { %v1003_v5 = vsub.f32 1.0, %v1002_v35 }
 0x269   :  { %v989_v17 = vmul.f32 %v4168_v52, %v988_v33 }
 0x26a   :  { %v1004_v46 = vmul.f32 %v4170_v57, %v1003_v5 }
 0x26b   :  { %v4172_v63 = vpop.eup %4171  ;;  %v990_v2 = vadd.f32 %v4168_v52, %v989_v17 }
 0x26c   :  { %v1017_v6 = vmul.f32 %v4172_v63, %v985_v54  ;;  %v1005_v18 = vadd.f32 %v4170_v57, %v1004_v46  ;;  %v4174_v0 = vpop.eup %4173  ;;  %vm1022_vm0 = vweird.f32 %v4172_v63 }
 0x26d   :  { %v994_v34 = vsel %vm993_vm12, %v4168_v52, %v990_v2  ;;  %v1025_v52 = vand.u32 2147483647, %v985_v54  ;;  %vm1023_vm2 = vmor %vm1021_vm1, %vm1022_vm0  ;;  %v5816_v54 = vld [vmem:[#allocation27_spill] sm:$0xff]  ;;  %v5817_v2 = vld [vmem:[#allocation29_spill] sm:$0xff] }
 0x26e   :  { %v1018_v40 = vsub.f32 1.0, %v1017_v6  ;;  %v999_v22 = vsel %vm996_vm14, %v998_v15, %v994_v34  ;;  %v1009_v12 = vsel %vm1008_vm13, %v4170_v57, %v1005_v18  ;;  %v399_v6 = vadd.f32 %v5817_v2, %v4843_v47 }
 0x26f   :  { %v1014_v35 = vsel %vm1011_vm15, %v1013_v58, %v1009_v12  ;;  %v1033_v33 = vmul.f32 %v4174_v0, %v999_v22  ;;  %vm1026_vm3 = vcmp.eq.f32.partialorder %v1025_v52, 8.507059e+37  ;;  %v5818_v22 = vld [vmem:[#allocation30_spill] sm:$0xff] }
 0x270   :  { %v1019_v5 = vmul.f32 %v4172_v63, %v1018_v40  ;;  %v1032_v17 = vmul.f32 %v1014_v35, %v4964_v39  ;;  %v428_v12 = vadd.f32 %v5818_v22, %v4853_v59 }
 0x272   :  { %v5008_v10 = vadd.f32 %v1033_v33, %v1032_v17  ;;  %v1020_v19 = vadd.f32 %v4172_v63, %v1019_v5 }
 0x274   :  { %4175 = vtanh.f32 %v5008_v10  ;;  %v1024_v25 = vsel %vm1023_vm2, %v4172_v63, %v1020_v19  ;;  %v370_v63 = vadd.f32 %v5816_v54, %v4839_v45 }
 0x275   :  { %v1029_v46 = vsel %vm1026_vm3, %v1028_v31, %v1024_v25 }
 0x27a   :  { %v4176_v57 = vpop.eup %4175 }
 0x27b   :  { %v5011_v50 = vmul.f32 %v4176_v57, %v1029_v46 }
 0x27d   :  { %5815 = vst [vmem:[#allocation25_spill] sm:$0xff] %v5011_v50  ;;  %v1044_v39 = vpack.c.bf16 %v5011_v50, %v5011_v50 }
 0x27f   :  { %1053 = vmatmul.bf16.vlgmr.msra.gmra.mxu0 %v1044_v39  ;;  %1066 = vmatmul.bf16.vlgmr.msra.gmra.mxu1 %v1044_v39 }
 0x280   :  { %1079 = vmatmul.bf16.vlgmr.msra.gmra.mxu2 %v1044_v39  ;;  %1092 = vmatmul.bf16.vlgmr.msra.gmra.mxu3 %v1044_v39 }
 0x281   :  { %1299 = vmatpush.bf16.msra.mxu0 %v4669_v38  ;;  %1312 = vmatpush.bf16.msra.mxu1 %v4671_v43 }
 0x282   :  { %1325 = vmatpush.bf16.msra.mxu2 %v4673_v49  ;;  %1338 = vmatpush.bf16.msra.mxu3 %v4678_v53 }
 0x285   :  { %1300 = vmatpush.bf16.msra.mxu0 %v4676_v51  ;;  %1313 = vmatpush.bf16.msra.mxu1 %v4681_v55 }
 0x286   :  { %1326 = vmatpush.bf16.msra.mxu2 %v4684_v61  ;;  %1339 = vmatpush.bf16.msra.mxu3 %v4690_v1 }
 0x289   :  { %1301 = vmatpush.bf16.msra.mxu0 %v4688_v62  ;;  %1314 = vmatpush.bf16.msra.mxu1 %v4693_v3 }
 0x28a   :  { %1327 = vmatpush.bf16.msra.mxu2 %v4696_v9  ;;  %1340 = vmatpush.bf16.msra.mxu3 %v4702_v14 }
 0x28d   :  { %1302 = vmatpush.bf16.msra.mxu0 %v4700_v11  ;;  %1315 = vmatpush.bf16.msra.mxu1 %v4705_v16 }
 0x28e   :  { %1328 = vmatpush.bf16.msra.mxu2 %v4708_v23  ;;  %1341 = vmatpush.bf16.msra.mxu3 %v4714_v27 }
 0x291   :  { %1303 = vmatpush.bf16.msra.mxu0 %v4712_v24  ;;  %1316 = vmatpush.bf16.msra.mxu1 %v4717_v30 }
 0x292   :  { %1329 = vmatpush.bf16.msra.mxu2 %v4720_v36  ;;  %1342 = vmatpush.bf16.msra.mxu3 %v4726_v41 }
 0x295   :  { %1304 = vmatpush.bf16.msra.mxu0 %v4724_v37  ;;  %1317 = vmatpush.bf16.msra.mxu1 %v4729_v42 }
 0x296   :  { %1330 = vmatpush.bf16.msra.mxu2 %v4732_v44  ;;  %1343 = vmatpush.bf16.msra.mxu3 %v4741_v60 }
 0x299   :  { %1305 = vmatpush.bf16.msra.mxu0 %v4736_v48  ;;  %1318 = vmatpush.bf16.msra.mxu1 %v4739_v56 }
 0x29a   :  { %1331 = vmatpush.bf16.msra.mxu2 %v4744_v4  ;;  %1344 = vmatpush.bf16.msra.mxu3 %v4750_v8 }
 0x29d   :  { %1306 = vmatpush.bf16.msra.mxu0 %v4748_v7  ;;  %1319 = vmatpush.bf16.msra.mxu1 %v4753_v13 }
 0x29e   :  { %1332 = vmatpush.bf16.msra.mxu2 %v4756_v20  ;;  %1345 = vmatpush.bf16.msra.mxu3 %v4760_v21 }
 0x2fc   :  { %v1054_v15 = vpop.f32.mrf.mxu0  ;;  %v1067_v18 = vpop.f32.mrf.mxu1 }
 0x2fd   :  { %v1097_v58 = vadd.f32 %v1054_v15, %v370_v63  ;;  %v1098_v34 = vadd.f32 %v1067_v18, %v399_v6  ;;  %v5819_v63 = vld [vmem:[#allocation31_spill] sm:$0xff] }
 0x2fe   :  { %v457_v2 = vadd.f32 %v5819_v63, %v5809_v29 }
 0x2ff   :  { %v3649_v0 = vmul.f32 -1.442695, %v1097_v58  ;;  %v3650_v40 = vmul.f32 -1.442695, %v1098_v34 }
 0x301   :  { %4177 = vpow2.f32 %v3649_v0 }
 0x302   :  { %4179 = vpow2.f32 %v3650_v40 }
 0x303   :  { %v1080_v35 = vpop.f32.mrf.mxu2  ;;  %v1093_v33 = vpop.f32.mrf.mxu3 }
 0x304   :  { %v1099_v5 = vadd.f32 %v1080_v35, %v428_v12  ;;  %v1056_v17 = vpop.f32.mrf.mxu0  ;;  %v1069_v19 = vpop.f32.mrf.mxu1  ;;  %v1100_v18 = vadd.f32 %v1093_v33, %v457_v2 }
 0x306   :  { %v3651_v28 = vmul.f32 -1.442695, %v1099_v5 }
 0x307   :  { %v4178_v52 = vpop.eup %4177 }
 0x308   :  { %v4180_v25 = vpop.eup %4179  ;;  %v1110_v31 = vadd.f32 1.0, %v4178_v52  ;;  %4181 = vpow2.f32 %v3651_v28 }
 0x309   :  { %v1111_v57 = vadd.f32 1.0, %v4180_v25 }
 0x30a   :  { %4183 = vrcp.f32 %v1110_v31  ;;  %v1124_v12 = vand.u32 2147483648, %v1110_v31  ;;  %v1122_v17 = vand.u32 2147483647, %v1110_v31  ;;  %vm1118_vm6 = vweird.f32 %v1110_v31 }
 0x30b   :  { %4185 = vrcp.f32 %v1111_v57  ;;  %v1082_v46 = vpop.f32.mrf.mxu2  ;;  %v1095_v39 = vpop.f32.mrf.mxu3  ;;  %v1139_v35 = vand.u32 2147483648, %v1111_v57  ;;  %v1137_v28 = vand.u32 2147483647, %v1111_v57  ;;  %vm1133_vm7 = vweird.f32 %v1111_v57 }
 0x30c   :  { %v1125_v46 = vor.u32 1.1754944e-38, %v1124_v12  ;;  %vm1123_vm10 = vcmp.eq.f32.partialorder %v1122_v17, 8.507059e+37 }
 0x30d   :  { %vm1138_vm11 = vcmp.eq.f32.partialorder %v1137_v28, 8.507059e+37 }
 0x30e   :  { %v4182_v54 = vpop.eup %4181 }
 0x30f   :  { %v1112_v6 = vadd.f32 1.0, %v4182_v54  ;;  %v1140_v54 = vor.u32 1.1754944e-38, %v1139_v35 }
 0x310   :  { %v4184_v15 = vpop.eup %4183 }
 0x311   :  { %v4186_v58 = vpop.eup %4185  ;;  %v1114_v34 = vmul.f32 %v4184_v15, %v1110_v31  ;;  %4187 = vrcp.f32 %v1112_v6  ;;  %vm1119_vm4 = vweird.f32 %v4184_v15  ;;  %v1154_v12 = vand.u32 2147483648, %v1112_v6 }
 0x312   :  { %v1129_v0 = vmul.f32 %v4186_v58, %v1111_v57  ;;  %4189 = vtanh.f32 %v1100_v18  ;;  %vm1134_vm5 = vweird.f32 %v4186_v58  ;;  %vm1120_vm8 = vmor %vm1118_vm6, %vm1119_vm4  ;;  %vm1148_vm13 = vweird.f32 %v1112_v6 }
 0x313   :  { %v1115_v40 = vsub.f32 1.0, %v1114_v34  ;;  %vm1135_vm9 = vmor %vm1133_vm7, %vm1134_vm5  ;;  %v1155_v17 = vor.u32 1.1754944e-38, %v1154_v12 }
 0x314   :  { %v1130_v22 = vsub.f32 1.0, %v1129_v0 }
 0x315   :  { %v1116_v5 = vmul.f32 %v4184_v15, %v1115_v40 }
 0x316   :  { %v1131_v19 = vmul.f32 %v4186_v58, %v1130_v22 }
 0x317   :  { %v4188_v52 = vpop.eup %4187  ;;  %v1117_v25 = vadd.f32 %v4184_v15, %v1116_v5 }
 0x318   :  { %v1144_v33 = vmul.f32 %v4188_v52, %v1112_v6  ;;  %v1132_v39 = vadd.f32 %v4186_v58, %v1131_v19  ;;  %v4190_v2 = vpop.eup %4189  ;;  %vm1149_vm12 = vweird.f32 %v4188_v52 }
 0x319   :  { %v1121_v63 = vsel %vm1120_vm8, %v4184_v15, %v1117_v25  ;;  %v1152_v15 = vand.u32 2147483647, %v1112_v6  ;;  %vm1150_vm14 = vmor %vm1148_vm13, %vm1149_vm12 }
 0x31a   :  { %v1145_v18 = vsub.f32 1.0, %v1144_v33  ;;  %v1126_v34 = vsel %vm1123_vm10, %v1125_v46, %v1121_v63  ;;  %v1136_v0 = vsel %vm1135_vm9, %v4186_v58, %v1132_v39  ;;  %v5822_v33 = vld [vmem:[#allocation33_spill] sm:$0xff] }
 0x31b   :  { %v1141_v40 = vsel %vm1138_vm11, %v1140_v54, %v1136_v0  ;;  %v1160_v22 = vmul.f32 %v4190_v2, %v1126_v34  ;;  %vm1153_vm15 = vcmp.eq.f32.partialorder %v1152_v15, 8.507059e+37 }
 0x31c   :  { %v1146_v50 = vmul.f32 %v4188_v52, %v1145_v18  ;;  %v1159_v5 = vmul.f32 %v1141_v40, %v5008_v10  ;;  %v5823_v18 = vld [vmem:[#allocation34_spill] sm:$0xff] }
 0x31e   :  { %v5056_v31 = vadd.f32 %v1160_v22, %v1159_v5  ;;  %v1147_v57 = vadd.f32 %v4188_v52, %v1146_v50 }
 0x320   :  { %4191 = vtanh.f32 %v5056_v31  ;;  %v1151_v35 = vsel %vm1150_vm14, %v4188_v52, %v1147_v57  ;;  %v5821_v52 = vld [vmem:[#allocation32_spill] sm:$0xff] }
 0x321   :  { %v1156_v19 = vsel %vm1153_vm15, %v1155_v17, %v1151_v35 }
 0x326   :  { %v4192_v58 = vpop.eup %4191 }
 0x327   :  { %v5059_v28 = vmul.f32 %v4192_v58, %v1156_v19 }
 0x329   :  { %5820 = vst [vmem:[#allocation22_spill] sm:$0xff] %v5059_v28  ;;  %v1171_v10 = vpack.c.bf16 %v5059_v28, %v5059_v28 }
 0x32b   :  { %1180 = vmatmul.bf16.vlgmr.msrb.gmra.mxu0 %v1171_v10  ;;  %1193 = vmatmul.bf16.vlgmr.msrb.gmra.mxu1 %v1171_v10 }
 0x32c   :  { %1206 = vmatmul.bf16.vlgmr.msrb.gmra.mxu2 %v1171_v10  ;;  %1219 = vmatmul.bf16.vlgmr.msrb.gmra.mxu3 %v1171_v10 }
 0x32d   :  { %1426 = vmatpush.bf16.msrb.mxu0 %v4669_v38  ;;  %1439 = vmatpush.bf16.msrb.mxu1 %v4671_v43 }
 0x32e   :  { %1452 = vmatpush.bf16.msrb.mxu2 %v4673_v49  ;;  %1465 = vmatpush.bf16.msrb.mxu3 %v4678_v53 }
 0x331   :  { %1427 = vmatpush.bf16.msrb.mxu0 %v4676_v51  ;;  %1440 = vmatpush.bf16.msrb.mxu1 %v4681_v55 }
 0x332   :  { %1453 = vmatpush.bf16.msrb.mxu2 %v4684_v61  ;;  %1466 = vmatpush.bf16.msrb.mxu3 %v4690_v1 }
 0x335   :  { %1428 = vmatpush.bf16.msrb.mxu0 %v4688_v62  ;;  %1441 = vmatpush.bf16.msrb.mxu1 %v4693_v3 }
 0x336   :  { %1454 = vmatpush.bf16.msrb.mxu2 %v4696_v9  ;;  %1467 = vmatpush.bf16.msrb.mxu3 %v4702_v14 }
 0x339   :  { %1429 = vmatpush.bf16.msrb.mxu0 %v4700_v11  ;;  %1442 = vmatpush.bf16.msrb.mxu1 %v4705_v16 }
 0x33a   :  { %1455 = vmatpush.bf16.msrb.mxu2 %v4708_v23  ;;  %1468 = vmatpush.bf16.msrb.mxu3 %v4714_v27 }
 0x33d   :  { %1430 = vmatpush.bf16.msrb.mxu0 %v4712_v24  ;;  %1443 = vmatpush.bf16.msrb.mxu1 %v4717_v30 }
 0x33e   :  { %1456 = vmatpush.bf16.msrb.mxu2 %v4720_v36  ;;  %1469 = vmatpush.bf16.msrb.mxu3 %v4726_v41 }
 0x341   :  { %1431 = vmatpush.bf16.msrb.mxu0 %v4724_v37  ;;  %1444 = vmatpush.bf16.msrb.mxu1 %v4729_v42 }
 0x342   :  { %1457 = vmatpush.bf16.msrb.mxu2 %v4732_v44  ;;  %1470 = vmatpush.bf16.msrb.mxu3 %v4741_v60 }
 0x345   :  { %1432 = vmatpush.bf16.msrb.mxu0 %v4736_v48  ;;  %1445 = vmatpush.bf16.msrb.mxu1 %v4739_v56 }
 0x346   :  { %1458 = vmatpush.bf16.msrb.mxu2 %v4744_v4  ;;  %1471 = vmatpush.bf16.msrb.mxu3 %v4750_v8 }
 0x349   :  { %1433 = vmatpush.bf16.msrb.mxu0 %v4748_v7  ;;  %1446 = vmatpush.bf16.msrb.mxu1 %v4753_v13 }
 0x34a   :  { %1459 = vmatpush.bf16.msrb.mxu2 %v4756_v20  ;;  %1472 = vmatpush.bf16.msrb.mxu3 %v4760_v21 }
 0x3a8   :  { %v1181_v50 = vpop.f32.mrf.mxu0  ;;  %v1194_v6 = vpop.f32.mrf.mxu1 }
 0x3a9   :  { %v1224_v25 = vadd.f32 %v1181_v50, %v5821_v52  ;;  %v1225_v46 = vadd.f32 %v1194_v6, %v5822_v33  ;;  %v5824_v50 = vld [vmem:[#allocation36_spill] sm:$0xff] }
 0x3ab   :  { %v3652_v39 = vmul.f32 -1.442695, %v1224_v25  ;;  %v3653_v54 = vmul.f32 -1.442695, %v1225_v46 }
 0x3ad   :  { %4193 = vpow2.f32 %v3652_v39 }
 0x3ae   :  { %4195 = vpow2.f32 %v3653_v54 }
 0x3af   :  { %v1207_v63 = vpop.f32.mrf.mxu2  ;;  %v1220_v2 = vpop.f32.mrf.mxu3 }
 0x3b0   :  { %v1226_v34 = vadd.f32 %v1207_v63, %v5823_v18  ;;  %v1183_v0 = vpop.f32.mrf.mxu0  ;;  %v1196_v40 = vpop.f32.mrf.mxu1  ;;  %v1227_v6 = vadd.f32 %v1220_v2, %v5824_v50 }
 0x3b2   :  { %v3654_v22 = vmul.f32 -1.442695, %v1226_v34 }
 0x3b3   :  { %v4194_v5 = vpop.eup %4193 }
 0x3b4   :  { %v4196_v57 = vpop.eup %4195  ;;  %v1237_v12 = vadd.f32 1.0, %v4194_v5  ;;  %4197 = vpow2.f32 %v3654_v22 }
 0x3b5   :  { %v1238_v15 = vadd.f32 1.0, %v4196_v57 }
 0x3b6   :  { %4199 = vrcp.f32 %v1237_v12  ;;  %v1251_v54 = vand.u32 2147483648, %v1237_v12  ;;  %v1249_v34 = vand.u32 2147483647, %v1237_v12  ;;  %vm1245_vm2 = vweird.f32 %v1237_v12 }
 0x3b7   :  { %4201 = vrcp.f32 %v1238_v15  ;;  %v1209_v35 = vpop.f32.mrf.mxu2  ;;  %v1222_v17 = vpop.f32.mrf.mxu3  ;;  %v1266_v63 = vand.u32 2147483648, %v1238_v15  ;;  %v1264_v40 = vand.u32 2147483647, %v1238_v15  ;;  %vm1260_vm3 = vweird.f32 %v1238_v15 }
 0x3b8   :  { %v1252_v57 = vor.u32 1.1754944e-38, %v1251_v54  ;;  %vm1250_vm6 = vcmp.eq.f32.partialorder %v1249_v34, 8.507059e+37 }
 0x3b9   :  { %v1267_v17 = vor.u32 1.1754944e-38, %v1266_v63  ;;  %vm1265_vm7 = vcmp.eq.f32.partialorder %v1264_v40, 8.507059e+37 }
 0x3ba   :  { %v4198_v58 = vpop.eup %4197 }
 0x3bb   :  { %v1239_v19 = vadd.f32 1.0, %v4198_v58 }
 0x3bc   :  { %v4200_v10 = vpop.eup %4199 }
 0x3bd   :  { %v4202_v52 = vpop.eup %4201  ;;  %v1241_v25 = vmul.f32 %v4200_v10, %v1237_v12  ;;  %4203 = vrcp.f32 %v1239_v19  ;;  %vm1246_vm0 = vweird.f32 %v4200_v10  ;;  %v1281_v54 = vand.u32 2147483648, %v1239_v19 }
 0x3be   :  { %v1256_v33 = vmul.f32 %v4202_v52, %v1238_v15  ;;  %4205 = vtanh.f32 %v1227_v6  ;;  %vm1261_vm1 = vweird.f32 %v4202_v52  ;;  %vm1247_vm4 = vmor %vm1245_vm2, %vm1246_vm0  ;;  %vm1275_vm9 = vweird.f32 %v1239_v19 }
 0x3bf   :  { %v1242_v46 = vsub.f32 1.0, %v1241_v25  ;;  %vm1262_vm5 = vmor %vm1260_vm3, %vm1261_vm1  ;;  %v1282_v34 = vor.u32 1.1754944e-38, %v1281_v54 }
 0x3c0   :  { %v1257_v39 = vsub.f32 1.0, %v1256_v33 }
 0x3c1   :  { %v1243_v18 = vmul.f32 %v4200_v10, %v1242_v46 }
 0x3c2   :  { %v1258_v0 = vmul.f32 %v4202_v52, %v1257_v39 }
 0x3c3   :  { %v4204_v22 = vpop.eup %4203  ;;  %v1244_v5 = vadd.f32 %v4200_v10, %v1243_v18 }
 0x3c4   :  { %v1271_v2 = vmul.f32 %v4204_v22, %v1239_v19  ;;  %v1259_v35 = vadd.f32 %v4202_v52, %v1258_v0  ;;  %v4206_v50 = vpop.eup %4205  ;;  %vm1276_vm8 = vweird.f32 %v4204_v22 }
 0x3c5   :  { %v1248_v58 = vsel %vm1247_vm4, %v4200_v10, %v1244_v5  ;;  %v1279_v10 = vand.u32 2147483647, %v1239_v19  ;;  %vm1277_vm10 = vmor %vm1275_vm9, %vm1276_vm8 }
 0x3c6   :  { %v1272_v6 = vsub.f32 1.0, %v1271_v2  ;;  %v1253_v25 = vsel %vm1250_vm6, %v1252_v57, %v1248_v58  ;;  %v1263_v33 = vsel %vm1262_vm5, %v4202_v52, %v1259_v35 }
 0x3c7   :  { %v1268_v46 = vsel %vm1265_vm7, %v1267_v17, %v1263_v33  ;;  %v1287_v39 = vmul.f32 %v4206_v50, %v1253_v25  ;;  %vm1280_vm11 = vcmp.eq.f32.partialorder %v1279_v10, 8.507059e+37 }
 0x3c8   :  { %v1273_v28 = vmul.f32 %v4204_v22, %v1272_v6  ;;  %v1286_v18 = vmul.f32 %v1268_v46, %v5056_v31 }
 0x3ca   :  { %v5100_v12 = vadd.f32 %v1287_v39, %v1286_v18  ;;  %v1274_v15 = vadd.f32 %v4204_v22, %v1273_v28 }
 0x3cc   :  { %4207 = vtanh.f32 %v5100_v12  ;;  %v1278_v63 = vsel %vm1277_vm10, %v4204_v22, %v1274_v15 }
 0x3cd   :  { %v1283_v0 = vsel %vm1280_vm11, %v1282_v34, %v1278_v63 }
 0x3d2   :  { %v4208_v52 = vpop.eup %4207 }
 0x3d3   :  { %v5103_v40 = vmul.f32 %v4208_v52, %v1283_v0 }
 0x3d5   :  { %v1298_v31 = vpack.c.bf16 %v5103_v40, %v5103_v40 }
 0x3d7   :  { %1307 = vmatmul.bf16.vlgmr.msra.gmra.mxu0 %v1298_v31  ;;  %1320 = vmatmul.bf16.vlgmr.msra.gmra.mxu1 %v1298_v31 }
 0x3d8   :  { %1333 = vmatmul.bf16.vlgmr.msra.gmra.mxu2 %v1298_v31  ;;  %1346 = vmatmul.bf16.vlgmr.msra.gmra.mxu3 %v1298_v31 }
 0x3d9   :  { %1553 = vmatpush.bf16.msra.mxu0 %v4669_v38  ;;  %1566 = vmatpush.bf16.msra.mxu1 %v4671_v43  ;;  %v5825_v38 = vld [vmem:[#allocation35_spill] sm:$0xff] }
 0x3da   :  { %1579 = vmatpush.bf16.msra.mxu2 %v4673_v49  ;;  %1592 = vmatpush.bf16.msra.mxu3 %v4678_v53  ;;  %v375_v43 = vadd.f32 %v5825_v38, %v4839_v45  ;;  %v5826_v49 = vld [vmem:[#allocation37_spill] sm:$0xff] }
 0x3dd   :  { %1554 = vmatpush.bf16.msra.mxu0 %v4676_v51  ;;  %1567 = vmatpush.bf16.msra.mxu1 %v4681_v55  ;;  %v404_v51 = vadd.f32 %v5826_v49, %v4843_v47 }
 0x3de   :  { %1580 = vmatpush.bf16.msra.mxu2 %v4684_v61  ;;  %1593 = vmatpush.bf16.msra.mxu3 %v4690_v1 }
 0x3e1   :  { %1555 = vmatpush.bf16.msra.mxu0 %v4688_v62  ;;  %1568 = vmatpush.bf16.msra.mxu1 %v4693_v3 }
 0x3e2   :  { %1581 = vmatpush.bf16.msra.mxu2 %v4696_v9  ;;  %1594 = vmatpush.bf16.msra.mxu3 %v4702_v14  ;;  %v5827_v9 = vld [vmem:[#allocation38_spill] sm:$0xff] }
 0x3e5   :  { %1556 = vmatpush.bf16.msra.mxu0 %v4700_v11  ;;  %1569 = vmatpush.bf16.msra.mxu1 %v4705_v16  ;;  %v433_v11 = vadd.f32 %v5827_v9, %v4853_v59  ;;  %v4071_v9 = vld [vmem:[#allocation7 + $0x1ec] sm:$0xf0] }
 0x3e6   :  { %1582 = vmatpush.bf16.msra.mxu2 %v4708_v23  ;;  %1595 = vmatpush.bf16.msra.mxu3 %v4714_v27 }
 0x3e9   :  { %1557 = vmatpush.bf16.msra.mxu0 %v4712_v24  ;;  %1570 = vmatpush.bf16.msra.mxu1 %v4717_v30 }
 0x3ea   :  { %1583 = vmatpush.bf16.msra.mxu2 %v4720_v36  ;;  %1596 = vmatpush.bf16.msra.mxu3 %v4726_v41 }
 0x3ed   :  { %1558 = vmatpush.bf16.msra.mxu0 %v4724_v37  ;;  %1571 = vmatpush.bf16.msra.mxu1 %v4729_v42 }
 0x3ee   :  { %1584 = vmatpush.bf16.msra.mxu2 %v4732_v44  ;;  %1597 = vmatpush.bf16.msra.mxu3 %v4741_v60  ;;  %v5828_v60 = vld [vmem:[#allocation39_spill] sm:$0xff] }
 0x3f1   :  { %1559 = vmatpush.bf16.msra.mxu0 %v4736_v48  ;;  %1572 = vmatpush.bf16.msra.mxu1 %v4739_v56 }
 0x3f2   :  { %1585 = vmatpush.bf16.msra.mxu2 %v4744_v4  ;;  %1598 = vmatpush.bf16.msra.mxu3 %v4750_v8  ;;  %v462_v4 = vadd.f32 %v5828_v60, %v5809_v29  ;;  %v5830_v60 = vld [vmem:[#allocation41_spill] sm:$0xff] }
 0x3f5   :  { %1560 = vmatpush.bf16.msra.mxu0 %v4748_v7  ;;  %1573 = vmatpush.bf16.msra.mxu1 %v4753_v13 }
 0x3f6   :  { %1586 = vmatpush.bf16.msra.mxu2 %v4756_v20  ;;  %1599 = vmatpush.bf16.msra.mxu3 %v4760_v21 }
 0x454   :  { %v1308_v53 = vpop.f32.mrf.mxu0  ;;  %v1321_v55 = vpop.f32.mrf.mxu1 }
 0x455   :  { %v1351_v61 = vadd.f32 %v1308_v53, %v375_v43  ;;  %v1352_v62 = vadd.f32 %v1321_v55, %v404_v51 }
 0x457   :  { %v3655_v1 = vmul.f32 -1.442695, %v1351_v61  ;;  %v3656_v3 = vmul.f32 -1.442695, %v1352_v62 }
 0x459   :  { %4209 = vpow2.f32 %v3655_v1 }
 0x45a   :  { %4211 = vpow2.f32 %v3656_v3  ;;  %v3778_v3 = vld [vmem:[#allocation7 + $0x1e0] sm:$0xf] }
 0x45b   :  { %v1334_v14 = vpop.f32.mrf.mxu2  ;;  %v1347_v16 = vpop.f32.mrf.mxu3 }
 0x45c   :  { %v1353_v23 = vadd.f32 %v1334_v14, %v433_v11  ;;  %v1310_v24 = vpop.f32.mrf.mxu0  ;;  %v1323_v27 = vpop.f32.mrf.mxu1  ;;  %v1354_v13 = vadd.f32 %v1347_v16, %v462_v4  ;;  %v4069_v11 = vld [vmem:[#allocation7 + $0x1e4] sm:$0xf]  ;;  %v3779_v14 = vor.u32 %v4071_v9, %v3778_v3  ;;  %v3780_v16 = vld [vmem:[#allocation7 + $0x1f0] sm:$0xf0]  ;;  %v3738_v3 = vld [vmem:[#allocation7 + $0x188] sm:$0xf] }
 0x45d   :  { %v4072_v24 = vld [vmem:[#allocation7 + $0x1f4] sm:$0xf0]  ;;  %v3783_v27 = vor.u32 %v4069_v11, %v3780_v16  ;;  %v4058_v16 = vld [vmem:[#allocation7 + $0x18c] sm:$0xf] }
 0x45e   :  { %v3657_v30 = vmul.f32 -1.442695, %v1353_v23  ;;  %v3786_v23 = vld [vmem:[#allocation7 + $0x1e8] sm:$0xf]  ;;  %v4060_v9 = vld [vmem:[#allocation7 + $0x194] sm:$0xf0] }
 0x45f   :  { %v4210_v36 = vpop.eup %4209 }
 0x460   :  { %v4212_v37 = vpop.eup %4211  ;;  %v1364_v41 = vadd.f32 1.0, %v4210_v36  ;;  %4213 = vpow2.f32 %v3657_v30  ;;  %v3787_v30 = vor.u32 %v4072_v24, %v3786_v23  ;;  %v4070_v36 = vld [vmem:[#allocation7 + $0x1ec] sm:$0xf]  ;;  %v3740_v23 = vld [vmem:[#allocation7 + $0x198] sm:$0xf0] }
 0x461   :  { %v1365_v42 = vadd.f32 1.0, %v4212_v37  ;;  %v3788_v37 = vld [vmem:[#allocation7 + $0x1f8] sm:$0xf0] }
 0x462   :  { %4215 = vrcp.f32 %v1364_v41  ;;  %v1378_v5 = vand.u32 2147483648, %v1364_v41  ;;  %v1376_v35 = vand.u32 2147483647, %v1364_v41  ;;  %vm1372_vm14 = vweird.f32 %v1364_v41 }
 0x463   :  { %4217 = vrcp.f32 %v1365_v42  ;;  %v1336_v44 = vpop.f32.mrf.mxu2  ;;  %v1349_v48 = vpop.f32.mrf.mxu3  ;;  %v1393_v2 = vand.u32 2147483648, %v1365_v42  ;;  %v1391_v58 = vand.u32 2147483647, %v1365_v42  ;;  %vm1387_vm15 = vweird.f32 %v1365_v42 }
 0x464   :  { %v1379_v33 = vor.u32 1.1754944e-38, %v1378_v5  ;;  %vm1377_vm2 = vcmp.eq.f32.partialorder %v1376_v35, 8.507059e+37  ;;  %v3791_v44 = vor.u32 %v4070_v36, %v3788_v37  ;;  %v5829_v48 = vld [vmem:[#allocation40_spill] sm:$0xff]  ;;  %v4066_v35 = vld [vmem:[#allocation7 + $0x1cc] sm:$0xf] }
 0x465   :  { %v1394_v39 = vor.u32 1.1754944e-38, %v1393_v2  ;;  %vm1392_vm3 = vcmp.eq.f32.partialorder %v1391_v58, 8.507059e+37  ;;  %v3746_v58 = vld [vmem:[#allocation7 + $0x1a0] sm:$0xf] }
 0x466   :  { %v4214_v56 = vpop.eup %4213 }
 0x467   :  { %v1366_v7 = vadd.f32 1.0, %v4214_v56 }
 0x468   :  { %v4216_v8 = vpop.eup %4215 }
 0x469   :  { %v4218_v20 = vpop.eup %4217  ;;  %v1368_v21 = vmul.f32 %v4216_v8, %v1364_v41  ;;  %4219 = vrcp.f32 %v1366_v7  ;;  %vm1373_vm12 = vweird.f32 %v4216_v8  ;;  %v1408_v49 = vand.u32 2147483648, %v1366_v7 }
 0x46a   :  { %v1383_v28 = vmul.f32 %v4218_v20, %v1365_v42  ;;  %4221 = vtanh.f32 %v1354_v13  ;;  %vm1388_vm13 = vweird.f32 %v4218_v20  ;;  %vm1374_vm0 = vmor %vm1372_vm14, %vm1373_vm12  ;;  %vm1402_vm5 = vweird.f32 %v1366_v7  ;;  %v4065_v13 = vld [vmem:[#allocation7 + $0x1c4] sm:$0xf] }
 0x46b   :  { %v1369_v19 = vsub.f32 1.0, %v1368_v21  ;;  %vm1389_vm1 = vmor %vm1387_vm15, %vm1388_vm13  ;;  %v1406_v51 = vand.u32 2147483647, %v1366_v7  ;;  %v1409_v55 = vor.u32 1.1754944e-38, %v1408_v49  ;;  %v3764_v21 = vld [vmem:[#allocation7 + $0x1d0] sm:$0xf0] }
 0x46c   :  { %v1384_v22 = vsub.f32 1.0, %v1383_v28  ;;  %v3770_v28 = vld [vmem:[#allocation7 + $0x1c8] sm:$0xf]  ;;  %v3767_v2 = vor.u32 %v4065_v13, %v3764_v21  ;;  %v4057_v49 = vld [vmem:[#allocation7 + $0x184] sm:$0xf] }
 0x46d   :  { %v1370_v57 = vmul.f32 %v4216_v8, %v1369_v19  ;;  %vm1407_vm7 = vcmp.eq.f32.partialorder %v1406_v51, 8.507059e+37  ;;  %v4068_v19 = vld [vmem:[#allocation7 + $0x1d4] sm:$0xf0]  ;;  %v5831_v51 = vld [vmem:[#allocation42_spill] sm:$0xff] }
 0x46e   :  { %v1385_v17 = vmul.f32 %v4218_v20, %v1384_v22  ;;  %v4056_v21 = vld [vmem:[#allocation7 + $0x174] sm:$0xf0] }
 0x46f   :  { %v4220_v50 = vpop.eup %4219  ;;  %v1371_v6 = vadd.f32 %v4216_v8, %v1370_v57  ;;  %v3771_v57 = vor.u32 %v4068_v19, %v3770_v28  ;;  %v5832_v19 = vld [vmem:[#allocation44_spill] sm:$0xff] }
 0x470   :  { %v1398_v25 = vmul.f32 %v4220_v50, %v1366_v7  ;;  %v1386_v46 = vadd.f32 %v4218_v20, %v1385_v17  ;;  %v4222_v15 = vpop.eup %4221  ;;  %vm1403_vm4 = vweird.f32 %v4220_v50  ;;  %v3762_v7 = vld [vmem:[#allocation7 + $0x1c0] sm:$0xf]  ;;  %v3772_v17 = vld [vmem:[#allocation7 + $0x1d8] sm:$0xf0] }
 0x471   :  { %v1375_v18 = vsel %vm1374_vm0, %v4216_v8, %v1371_v6  ;;  %vm1404_vm6 = vmor %vm1402_vm5, %vm1403_vm4  ;;  %v4067_v8 = vld [vmem:[#allocation7 + $0x1cc] sm:$0xf0]  ;;  %v3775_v6 = vor.u32 %v4066_v35, %v3772_v17  ;;  %v3698_v35 = vld [vmem:[#allocation7 + $0x140] sm:$0xf] }
 0x472   :  { %v1399_v54 = vsub.f32 1.0, %v1398_v25  ;;  %v1380_v10 = vsel %vm1377_vm2, %v1379_v33, %v1375_v18  ;;  %v1390_v63 = vsel %vm1389_vm1, %v4218_v20, %v1386_v46  ;;  %v3763_v20 = vor.u32 %v4067_v8, %v3762_v7  ;;  %v4061_v33 = vld [vmem:[#allocation7 + $0x1a4] sm:$0xf]  ;;  %v3748_v46 = vld [vmem:[#allocation7 + $0x1b0] sm:$0xf0] }
 0x473   :  { %v1395_v34 = vsel %vm1392_vm3, %v1394_v39, %v1390_v63  ;;  %v1414_v52 = vmul.f32 %v4222_v15, %v1380_v10  ;;  %v3754_v39 = vld [vmem:[#allocation7 + $0x1a8] sm:$0xf]  ;;  %v3751_v18 = vor.u32 %v4061_v33, %v3748_v46  ;;  %v4064_v15 = vld [vmem:[#allocation7 + $0x1b4] sm:$0xf0]  ;;  %v3756_v10 = vld [vmem:[#allocation7 + $0x1b8] sm:$0xf0] }
 0x474   :  { %v1400_v0 = vmul.f32 %v4220_v50, %v1399_v54  ;;  %v1413_v31 = vmul.f32 %v1395_v34, %v5100_v12  ;;  %v4062_v54 = vld [vmem:[#allocation7 + $0x1ac] sm:$0xf]  ;;  %v3716_v7 = vld [vmem:[#allocation7 + $0x170] sm:$0xf0] }
 0x475   :  { %v3700_v46 = vld [vmem:[#allocation7 + $0x150] sm:$0xf0] }
 0x476   :  { %v5148_v38 = vadd.f32 %v1414_v52, %v1413_v31  ;;  %v1401_v43 = vadd.f32 %v4220_v50, %v1400_v0  ;;  %v3755_v52 = vor.u32 %v4064_v15, %v3754_v39  ;;  %v3759_v0 = vor.u32 %v4062_v54, %v3756_v10  ;;  %v3730_v31 = vld [vmem:[#allocation7 + $0x180] sm:$0xf]  ;;  %v3706_v39 = vld [vmem:[#allocation7 + $0x148] sm:$0xf]  ;;  %v4050_v10 = vld [vmem:[#allocation7 + $0x14c] sm:$0xf] }
 0x478   :  { %4223 = vtanh.f32 %v5148_v38  ;;  %v1405_v53 = vsel %vm1404_vm6, %v4220_v50, %v1401_v43  ;;  %v4063_v50 = vld [vmem:[#allocation7 + $0x1ac] sm:$0xf0] }
 0x479   :  { %v1410_v62 = vsel %vm1407_vm7, %v1409_v55, %v1405_v53  ;;  %v3747_v25 = vor.u32 %v4063_v50, %v3746_v58  ;;  %v4059_v43 = vld [vmem:[#allocation7 + $0x18c] sm:$0xf0] }
 0x47a   :  { %v4051_v50 = vld [vmem:[#allocation7 + $0x14c] sm:$0xf0] }
 0x47b   :  { %v3699_v33 = vor.u32 %v4051_v50, %v3698_v35  ;;  %v3676_v35 = vld [vmem:[#allocation7 + $0x118] sm:$0xf0] }
 0x47e   :  { %v4224_v61 = vpop.eup %4223 }
 0x47f   :  { %v5151_v1 = vmul.f32 %v4224_v61, %v1410_v62  ;;  %v3731_v62 = vor.u32 %v4059_v43, %v3730_v31  ;;  %v4047_v43 = vld [vmem:[#allocation7 + $0x12c] sm:$0xf0] }
 0x481   :  { %v1425_v12 = vpack.c.bf16 %v5151_v1, %v5151_v1 }
 0x483   :  { %1434 = vmatmul.bf16.vlgmr.msrb.gmra.mxu0 %v1425_v12  ;;  %1447 = vmatmul.bf16.vlgmr.msrb.gmra.mxu1 %v1425_v12 }
 0x484   :  { %1460 = vmatmul.bf16.vlgmr.msrb.gmra.mxu2 %v1425_v12  ;;  %1473 = vmatmul.bf16.vlgmr.msrb.gmra.mxu3 %v1425_v12  ;;  %v3732_v12 = vld [vmem:[#allocation7 + $0x190] sm:$0xf0] }
 0x485   :  { %1925 = vmatpush.bf16.msrb.mxu0 %v3779_v14  ;;  %1954 = vmatpush.bf16.msrb.mxu1 %v3783_v27  ;;  %v3735_v11 = vor.u32 %v4057_v49, %v3732_v12  ;;  %v3739_v14 = vor.u32 %v4060_v9, %v3738_v3  ;;  %v5835_v3 = vld [vmem:[#allocation25_spill] sm:$0xff] }
 0x486   :  { %1983 = vmatpush.bf16.msrb.mxu2 %v3787_v30  ;;  %2012 = vmatpush.bf16.msrb.mxu3 %v3791_v44  ;;  %v3743_v30 = vor.u32 %v4058_v16, %v3740_v23 }
 0x489   :  { %1926 = vmatpush.bf16.msrb.mxu0 %v3763_v20  ;;  %1955 = vmatpush.bf16.msrb.mxu1 %v3767_v2  ;;  %v3722_v20 = vld [vmem:[#allocation7 + $0x168] sm:$0xf]  ;;  %v4054_v2 = vld [vmem:[#allocation7 + $0x16c] sm:$0xf] }
 0x48a   :  { %1984 = vmatpush.bf16.msrb.mxu2 %v3771_v57  ;;  %2013 = vmatpush.bf16.msrb.mxu3 %v3775_v6  ;;  %v3724_v57 = vld [vmem:[#allocation7 + $0x178] sm:$0xf0]  ;;  %v4049_v6 = vld [vmem:[#allocation7 + $0x144] sm:$0xf] }
 0x48b   :  { %v3727_v58 = vor.u32 %v4054_v2, %v3724_v57  ;;  %v4042_v57 = vld [vmem:[#allocation7 + $0x10c] sm:$0xf] }
 0x48d   :  { %1927 = vmatpush.bf16.msrb.mxu0 %v3747_v25  ;;  %1956 = vmatpush.bf16.msrb.mxu1 %v3751_v18  ;;  %v4052_v18 = vld [vmem:[#allocation7 + $0x154] sm:$0xf0] }
 0x48e   :  { %1985 = vmatpush.bf16.msrb.mxu2 %v3755_v52  ;;  %2014 = vmatpush.bf16.msrb.mxu3 %v3759_v0 }
 0x491   :  { %1928 = vmatpush.bf16.msrb.mxu0 %v3731_v62  ;;  %1957 = vmatpush.bf16.msrb.mxu1 %v3735_v11  ;;  %v3684_v62 = vld [vmem:[#allocation7 + $0x130] sm:$0xf0] }
 0x492   :  { %1986 = vmatpush.bf16.msrb.mxu2 %v3739_v14  ;;  %2015 = vmatpush.bf16.msrb.mxu3 %v3743_v30  ;;  %v3690_v14 = vld [vmem:[#allocation7 + $0x128] sm:$0xf]  ;;  %v3692_v30 = vld [vmem:[#allocation7 + $0x138] sm:$0xf0] }
 0x496   :  { %2016 = vmatpush.bf16.msrb.mxu3 %v3727_v58 }
 0x500   :  { %v1435_v41 = vpop.f32.mrf.mxu0  ;;  %v1448_v42 = vpop.f32.mrf.mxu1 }
 0x501   :  { %v1478_v56 = vadd.f32 %v1435_v41, %v5829_v48  ;;  %v1479_v4 = vadd.f32 %v1448_v42, %v5830_v60  ;;  %v3714_v42 = vld [vmem:[#allocation7 + $0x160] sm:$0xf] }
 0x503   :  { %v3658_v22 = vmul.f32 -1.442695, %v1478_v56  ;;  %v3659_v5 = vmul.f32 -1.442695, %v1479_v4  ;;  %v4055_v56 = vld [vmem:[#allocation7 + $0x16c] sm:$0xf0] }
 0x504   :  { %v3715_v60 = vor.u32 %v4055_v56, %v3714_v42  ;;  %v4053_v4 = vld [vmem:[#allocation7 + $0x164] sm:$0xf]  ;;  %v4043_v56 = vld [vmem:[#allocation7 + $0x10c] sm:$0xf0] }
 0x505   :  { %4225 = vpow2.f32 %v3658_v22  ;;  %v3719_v13 = vor.u32 %v4053_v4, %v3716_v7 }
 0x506   :  { %4227 = vpow2.f32 %v3659_v5  ;;  %1929 = vmatpush.bf16.msrb.mxu0 %v3715_v60  ;;  %v3723_v5 = vor.u32 %v4056_v21, %v3722_v20  ;;  %v4041_v60 = vld [vmem:[#allocation7 + $0x104] sm:$0xf]  ;;  %v3674_v20 = vld [vmem:[#allocation7 + $0x108] sm:$0xf]  ;;  %v4044_v21 = vld [vmem:[#allocation7 + $0x114] sm:$0xf0] }
 0x507   :  { %v1461_v63 = vpop.f32.mrf.mxu2  ;;  %v1474_v34 = vpop.f32.mrf.mxu3  ;;  %1958 = vmatpush.bf16.msrb.mxu1 %v3719_v13  ;;  %v3668_v13 = vld [vmem:[#allocation7 + $0x110] sm:$0xf0]  ;;  %v3675_v50 = vor.u32 %v4044_v21, %v3674_v20  ;;  %v3898_v20 = vld [vmem:[#allocation9 + $0x1c8] sm:$0xf]  ;;  %v4100_v21 = vld [vmem:[#allocation9 + $0x1d4] sm:$0xf0] }
 0x508   :  { %v1480_v53 = vadd.f32 %v1461_v63, %v5831_v51  ;;  %v1437_v55 = vpop.f32.mrf.mxu0  ;;  %v1450_v61 = vpop.f32.mrf.mxu1  ;;  %v1481_v22 = vadd.f32 %v1474_v34, %v5832_v19  ;;  %1987 = vmatpush.bf16.msrb.mxu2 %v3723_v5  ;;  %v3708_v63 = vld [vmem:[#allocation7 + $0x158] sm:$0xf0]  ;;  %v3682_v34 = vld [vmem:[#allocation7 + $0x120] sm:$0xf]  ;;  %v3703_v51 = vor.u32 %v4049_v6, %v3700_v46  ;;  %v3671_v58 = vor.u32 %v4041_v60, %v3668_v13  ;;  %v3892_v13 = vld [vmem:[#allocation9 + $0x1d0] sm:$0xf0] }
 0x509   :  { %v3711_v55 = vor.u32 %v4050_v10, %v3708_v63  ;;  %v4045_v61 = vld [vmem:[#allocation7 + $0x124] sm:$0xf]  ;;  %v3683_v11 = vor.u32 %v4047_v43, %v3682_v34  ;;  %v3890_v60 = vld [vmem:[#allocation9 + $0x1c0] sm:$0xf] }
 0x50a   :  { %v3660_v24 = vmul.f32 -1.442695, %v1480_v53  ;;  %1930 = vmatpush.bf16.msrb.mxu0 %v3699_v33  ;;  %v3707_v53 = vor.u32 %v4052_v18, %v3706_v39  ;;  %v3687_v23 = vor.u32 %v4045_v61, %v3684_v62  ;;  %v3679_v39 = vor.u32 %v4042_v57, %v3676_v35  ;;  %v3908_v62 = vld [vmem:[#allocation9 + $0x1f0] sm:$0xf0]  ;;  %v4093_v57 = vld [vmem:[#allocation9 + $0x1a4] sm:$0xf] }
 0x50b   :  { %v4226_v27 = vpop.eup %4225  ;;  %1959 = vmatpush.bf16.msrb.mxu1 %v3703_v51  ;;  %2017 = vmatpush.bf16.msrb.mxu3 %v3711_v55  ;;  %v1752_v51 = vpack.c.bf16 %v4967_v26, %v4919_v32  ;;  %v4101_v55 = vld [vmem:[#allocation9 + $0x1e4] sm:$0xf]  ;;  %v1754_v32 = vpack.c.bf16 %v5151_v1, %v5103_v40  ;;  %v3914_v26 = vld [vmem:[#allocation9 + $0x1e8] sm:$0xf] }
 0x50c   :  { %v4228_v36 = vpop.eup %4227  ;;  %v5158_v37 = vadd.f32 1.0, %v4226_v27  ;;  %4229 = vpow2.f32 %v3660_v24  ;;  %1988 = vmatpush.bf16.msrb.mxu2 %v3707_v53  ;;  %v4048_v24 = vld [vmem:[#allocation7 + $0x134] sm:$0xf0]  ;;  %v4046_v27 = vld [vmem:[#allocation7 + $0x12c] sm:$0xf] }
 0x50d   :  { %v5160_v41 = vadd.f32 1.0, %v4228_v36  ;;  %v3691_v42 = vor.u32 %v4048_v24, %v3690_v14  ;;  %v4103_v53 = vld [vmem:[#allocation9 + $0x1ec] sm:$0xf0]  ;;  %v4104_v14 = vld [vmem:[#allocation9 + $0x1f4] sm:$0xf0] }
 0x50e   :  { %4231 = vrcp.f32 %v5158_v37  ;;  %v1503_v8 = vand.u32 2147483647, %v5158_v37  ;;  %v1505_v31 = vand.u32 2147483648, %v5158_v37  ;;  %1931 = vmatpush.bf16.msrb.mxu0 %v3683_v11  ;;  %vm1499_vm12 = vweird.f32 %v5158_v37  ;;  %v3916_v24 = vld [vmem:[#allocation9 + $0x1f8] sm:$0xf0] }
 0x50f   :  { %4233 = vrcp.f32 %v5160_v41  ;;  %v1463_v44 = vpop.f32.mrf.mxu2  ;;  %v1476_v48 = vpop.f32.mrf.mxu3  ;;  %v1520_v0 = vand.u32 2147483648, %v5160_v41  ;;  %v1518_v9 = vand.u32 2147483647, %v5160_v41  ;;  %vm1514_vm11 = vweird.f32 %v5160_v41  ;;  %1960 = vmatpush.bf16.msrb.mxu1 %v3687_v23  ;;  %v4102_v23 = vld [vmem:[#allocation9 + $0x1ec] sm:$0xf] }
 0x510   :  { %vm5179_vm8 = vcmp.eq.f32.partialorder %v1503_v8, 8.507059e+37  ;;  %v3695_v44 = vor.u32 %v4046_v27, %v3692_v30  ;;  %v3666_v48 = vld [vmem:[#allocation7 + $0x100] sm:$0xf]  ;;  %v1506_v5 = vor.u32 1.1754944e-38, %v1505_v31  ;;  %1989 = vmatpush.bf16.msrb.mxu2 %v3691_v42  ;;  %v5229_v27 = vor.u32 %v4102_v23, %v3916_v24  ;;  %v5837_v30 = vld [vmem:[#allocation43_spill] sm:$0xff]  ;;  %v5838_v42 = vld [vmem:[#allocation45_spill] sm:$0xff] }
 0x511   :  { %v3667_v8 = vor.u32 %v4043_v56, %v3666_v48  ;;  %v1521_v19 = vor.u32 1.1754944e-38, %v1520_v0  ;;  %vm1519_vm15 = vcmp.eq.f32.partialorder %v1518_v9, 8.507059e+37  ;;  %v5836_v9 = vld [vmem:[#allocation22_spill] sm:$0xff]  ;;  %v409_v40 = vadd.f32 %v5838_v42, %v4843_v47  ;;  %v4098_v47 = vld [vmem:[#allocation9 + $0x1cc] sm:$0xf] }
 0x512   :  { %v4230_v28 = vpop.eup %4229  ;;  %2018 = vmatpush.bf16.msrb.mxu3 %v3695_v44  ;;  %v1753_v11 = vpack.c.bf16 %v5836_v9, %v5835_v3  ;;  %v3842_v3 = vld [vmem:[#allocation9 + $0x160] sm:$0xf]  ;;  %v4087_v9 = vld [vmem:[#allocation9 + $0x16c] sm:$0xf0]  ;;  %v3850_v23 = vld [vmem:[#allocation9 + $0x168] sm:$0xf] }
 0x513   :  { %v5166_v17 = vadd.f32 1.0, %v4230_v28  ;;  %1932 = vmatpush.bf16.msrb.mxu0 %v3667_v8  ;;  %1961 = vmatpush.bf16.msrb.mxu1 %v3671_v58  ;;  %v3882_v58 = vld [vmem:[#allocation9 + $0x1a8] sm:$0xf]  ;;  %v3868_v42 = vld [vmem:[#allocation9 + $0x198] sm:$0xf0] }
 0x514   :  { %v5168_v25 = vpop.eup %4231  ;;  %1990 = vmatpush.bf16.msrb.mxu2 %v3675_v50  ;;  %v4096_v50 = vld [vmem:[#allocation9 + $0x1b4] sm:$0xf0] }
 0x515   :  { %v5170_v15 = vpop.eup %4233  ;;  %v1495_v54 = vmul.f32 %v5168_v25, %v5158_v37  ;;  %4235 = vrcp.f32 %v5166_v17  ;;  %vm1500_vm9 = vweird.f32 %v5168_v25  ;;  %v1535_v34 = vand.u32 2147483648, %v5166_v17 }
 0x516   :  { %v1510_v52 = vmul.f32 %v5170_v15, %v5160_v41  ;;  %4237 = vtanh.f32 %v1481_v22  ;;  %vm1515_vm10 = vweird.f32 %v5170_v15  ;;  %vm1501_vm13 = vmor %vm1499_vm12, %vm1500_vm9  ;;  %2019 = vmatpush.bf16.msrb.mxu3 %v3679_v39  ;;  %vm1529_vm1 = vweird.f32 %v5166_v17 }
 0x517   :  { %v1496_v49 = vsub.f32 1.0, %v1495_v54  ;;  %vm1516_vm14 = vmor %vm1514_vm11, %vm1515_vm10  ;;  %v1536_v0 = vor.u32 1.1754944e-38, %v1535_v34  ;;  %v5251_v39 = vor.u32 %v4096_v50, %v3882_v58 }
 0x518   :  { %v1511_v12 = vsub.f32 1.0, %v1510_v52 }
 0x519   :  { %v1497_v16 = vmul.f32 %v5168_v25, %v1496_v49 }
 0x51a   :  { %v1512_v36 = vmul.f32 %v5170_v15, %v1511_v12  ;;  %v5218_v12 = vor.u32 %v4101_v55, %v3908_v62 }
 0x51b   :  { %v4236_v4 = vpop.eup %4235  ;;  %v1498_v7 = vadd.f32 %v5168_v25, %v1497_v16  ;;  %v5226_v16 = vor.u32 %v4104_v14, %v3914_v26  ;;  %v3844_v14 = vld [vmem:[#allocation9 + $0x170] sm:$0xf0] }
 0x51c   :  { %v4238_v28 = vpop.eup %4237  ;;  %v1525_v22 = vmul.f32 %v4236_v4, %v5166_v17  ;;  %v1513_v2 = vadd.f32 %v5170_v15, %v1512_v36  ;;  %vm1530_vm0 = vweird.f32 %v4236_v4  ;;  %v380_v36 = vadd.f32 %v5837_v30, %v4839_v45  ;;  %v4088_v30 = vld [vmem:[#allocation9 + $0x174] sm:$0xf0] }
 0x51d   :  { %v1502_v37 = vsel %vm1501_vm13, %v5168_v25, %v1498_v7  ;;  %vm1531_vm2 = vmor %vm1529_vm1, %vm1530_vm0  ;;  %v4097_v7 = vld [vmem:[#allocation9 + $0x1c4] sm:$0xf] }
 0x51e   :  { %v1526_v6 = vsub.f32 1.0, %v1525_v22  ;;  %v1507_v33 = vsel %vm5179_vm8, %v1506_v5, %v1502_v37  ;;  %v1517_v46 = vsel %vm1516_vm14, %v5170_v15, %v1513_v2  ;;  %v1533_v15 = vand.u32 2147483647, %v5166_v17  ;;  %v3906_v17 = vld [vmem:[#allocation9 + $0x1e0] sm:$0xf] }
 0x51f   :  { %v1522_v18 = vsel %vm1519_vm15, %v1521_v19, %v1517_v46  ;;  %v1541_v54 = vmul.f32 %v4238_v28, %v1507_v33  ;;  %v5216_v61 = vor.u32 %v4103_v53, %v3906_v17  ;;  %v5238_v45 = vor.u32 %v4097_v7, %v3892_v13  ;;  %v3874_v5 = vld [vmem:[#allocation9 + $0x1a0] sm:$0xf]  ;;  %v4095_v2 = vld [vmem:[#allocation9 + $0x1ac] sm:$0xf0]  ;;  %v3876_v37 = vld [vmem:[#allocation9 + $0x1b0] sm:$0xf0] }
 0x520   :  { %v1527_v41 = vmul.f32 %v4236_v4, %v1526_v6  ;;  %v1540_v10 = vmul.f32 %v1522_v18, %v5148_v38  ;;  %vm1534_vm3 = vcmp.eq.f32.partialorder %v1533_v15, 8.507059e+37  ;;  %v5240_v22 = vor.u32 %v4100_v21, %v3898_v20  ;;  %v5839_v6 = vld [vmem:[#allocation46_spill] sm:$0xff]  ;;  %v3900_v18 = vld [vmem:[#allocation9 + $0x1d8] sm:$0xf0]  ;;  %v4089_v15 = vld [vmem:[#allocation9 + $0x184] sm:$0xf] }
 0x521   :  { %v5245_v35 = vor.u32 %v4095_v2, %v3874_v5  ;;  %v438_v33 = vadd.f32 %v5839_v6, %v4853_v59  ;;  %v5249_v46 = vor.u32 %v4093_v57, %v3876_v37  ;;  %v5255_v34 = vor.u32 %v4098_v47, %v3900_v18  ;;  %v4094_v17 = vld [vmem:[#allocation9 + $0x1ac] sm:$0xf]  ;;  %v3884_v53 = vld [vmem:[#allocation9 + $0x1b8] sm:$0xf0]  ;;  %v4083_v7 = vld [vmem:[#allocation9 + $0x14c] sm:$0xf0] }
 0x522   :  { %v5204_v25 = vadd.f32 %v1541_v54, %v1540_v10  ;;  %v1528_v63 = vadd.f32 %v4236_v4, %v1527_v41  ;;  %v3858_v54 = vld [vmem:[#allocation9 + $0x180] sm:$0xf]  ;;  %v4091_v41 = vld [vmem:[#allocation9 + $0x18c] sm:$0xf0]  ;;  %v5267_v26 = vor.u32 %v4094_v17, %v3884_v53  ;;  %v4081_v20 = vld [vmem:[#allocation9 + $0x144] sm:$0xf] }
 0x523   :  { %v5258_v59 = vor.u32 %v4091_v41, %v3858_v54  ;;  %v3828_v21 = vld [vmem:[#allocation9 + $0x150] sm:$0xf0]  ;;  %v4084_v5 = vld [vmem:[#allocation9 + $0x154] sm:$0xf0]  ;;  %v4086_v57 = vld [vmem:[#allocation9 + $0x16c] sm:$0xf] }
 0x524   :  { %4239 = vtanh.f32 %v5204_v25  ;;  %v1532_v52 = vsel %vm1531_vm2, %v4236_v4, %v1528_v63  ;;  %v4099_v4 = vld [vmem:[#allocation9 + $0x1cc] sm:$0xf0]  ;;  %v3852_v37 = vld [vmem:[#allocation9 + $0x178] sm:$0xf0]  ;;  %v5292_v58 = vor.u32 %v4081_v20, %v3828_v21  ;;  %v3810_v6 = vld [vmem:[#allocation9 + $0x120] sm:$0xf] }
 0x525   :  { %v1537_v31 = vsel %vm1534_vm3, %v1536_v0, %v1532_v52  ;;  %v5236_v8 = vor.u32 %v4099_v4, %v3890_v60  ;;  %v3860_v52 = vld [vmem:[#allocation9 + $0x190] sm:$0xf0]  ;;  %v3866_v0 = vld [vmem:[#allocation9 + $0x188] sm:$0xf]  ;;  %v5280_v60 = vor.u32 %v4088_v30, %v3850_v23  ;;  %v3826_v4 = vld [vmem:[#allocation9 + $0x140] sm:$0xf] }
 0x526   :  { %v5262_v55 = vor.u32 %v4089_v15, %v3860_v52  ;;  %v5288_v2 = vor.u32 %v4083_v7, %v3826_v4  ;;  %v5840_v54 = vld [vmem:[#allocation47_spill] sm:$0xff]  ;;  %v4077_v15 = vld [vmem:[#allocation9 + $0x124] sm:$0xf]  ;;  %v3812_v52 = vld [vmem:[#allocation9 + $0x130] sm:$0xf0] }
 0x527   :  { %v467_v41 = vadd.f32 %v5840_v54, %v5809_v29  ;;  %v4082_v53 = vld [vmem:[#allocation9 + $0x14c] sm:$0xf]  ;;  %v3836_v29 = vld [vmem:[#allocation9 + $0x158] sm:$0xf0]  ;;  %v3794_v7 = vld [vmem:[#allocation9 + $0x100] sm:$0xf] }
 0x528   :  { %v5325_v30 = vor.u32 %v4082_v53, %v3836_v29  ;;  %v4075_v20 = vld [vmem:[#allocation9 + $0x10c] sm:$0xf0] }
 0x52a   :  { %v4240_v38 = vpop.eup %4239 }
 0x52b   :  { %v5210_v43 = vmul.f32 %v4240_v38, %v1537_v31 }
 0x52d   :  { %v1552_v49 = vpack.c.bf16 %v5210_v43, %v5210_v43 }
 0x52f   :  { %1561 = vmatmul.bf16.vlgmr.msra.gmra.mxu0 %v1552_v49  ;;  %1574 = vmatmul.bf16.vlgmr.msra.gmra.mxu1 %v1552_v49 }
 0x530   :  { %1587 = vmatmul.bf16.vlgmr.msra.gmra.mxu2 %v1552_v49  ;;  %1600 = vmatmul.bf16.vlgmr.msra.gmra.mxu3 %v1552_v49 }
 0x531   :  { %2237 = vmatpush.bf16.msra.mxu0 %v5216_v61  ;;  %2250 = vmatpush.bf16.msra.mxu1 %v5218_v12 }
 0x532   :  { %2263 = vmatpush.bf16.msra.mxu2 %v5226_v16  ;;  %2276 = vmatpush.bf16.msra.mxu3 %v5229_v27 }
 0x535   :  { %2238 = vmatpush.bf16.msra.mxu0 %v5236_v8  ;;  %2251 = vmatpush.bf16.msra.mxu1 %v5238_v45 }
 0x536   :  { %2264 = vmatpush.bf16.msra.mxu2 %v5240_v22  ;;  %2277 = vmatpush.bf16.msra.mxu3 %v5255_v34 }
 0x539   :  { %2239 = vmatpush.bf16.msra.mxu0 %v5245_v35  ;;  %2252 = vmatpush.bf16.msra.mxu1 %v5249_v46 }
 0x53a   :  { %2265 = vmatpush.bf16.msra.mxu2 %v5251_v39  ;;  %2278 = vmatpush.bf16.msra.mxu3 %v5267_v26 }
 0x53d   :  { %2240 = vmatpush.bf16.msra.mxu0 %v5258_v59  ;;  %2253 = vmatpush.bf16.msra.mxu1 %v5262_v55 }
 0x53f   :  { %1933 = vmatmul.bf16.vlgmr.msrb.gmra.mxu0 %v1752_v51  ;;  %1962 = vmatmul.bf16.vlgmr.msrb.gmra.mxu1 %v1752_v51 }
 0x540   :  { %1991 = vmatmul.bf16.vlgmr.msrb.gmra.mxu2 %v1752_v51  ;;  %2020 = vmatmul.bf16.vlgmr.msrb.gmra.mxu3 %v1752_v51  ;;  %v4092_v51 = vld [vmem:[#allocation9 + $0x194] sm:$0xf0] }
 0x541   :  { %v5264_v62 = vor.u32 %v4092_v51, %v3866_v0  ;;  %v3818_v0 = vld [vmem:[#allocation9 + $0x128] sm:$0xf] }
 0x543   :  { %2266 = vmatpush.bf16.msra.mxu2 %v5264_v62 }
 0x547   :  { %2267 = vmatpush.bf16.msra.mxu2 %v5280_v60 }
 0x54f   :  { %1938 = vmatmul.bf16.gmra.mxu0 %v1753_v11  ;;  %1967 = vmatmul.bf16.gmra.mxu1 %v1753_v11 }
 0x550   :  { %1996 = vmatmul.bf16.gmra.mxu2 %v1753_v11  ;;  %2025 = vmatmul.bf16.gmra.mxu3 %v1753_v11  ;;  %v4085_v11 = vld [vmem:[#allocation9 + $0x164] sm:$0xf] }
 0x55f   :  { %1943 = vmatmul.bf16.gmra.mxu0 %v1754_v32  ;;  %1972 = vmatmul.bf16.gmra.mxu1 %v1754_v32 }
 0x560   :  { %2001 = vmatmul.bf16.gmra.mxu2 %v1754_v32  ;;  %2030 = vmatmul.bf16.gmra.mxu3 %v1754_v32 }
 0x5ac   :  { %v1562_v1 = vpop.f32.mrf.mxu0  ;;  %v1575_v44 = vpop.f32.mrf.mxu1 }
 0x5ad   :  { %v1605_v48 = vadd.f32 %v1562_v1, %v380_v36  ;;  %v1606_v56 = vadd.f32 %v1575_v44, %v409_v40  ;;  %v4090_v36 = vld [vmem:[#allocation9 + $0x18c] sm:$0xf]  ;;  %v5272_v44 = vor.u32 %v4087_v9, %v3842_v3 }
 0x5ae   :  { %v5284_v13 = vor.u32 %v4090_v36, %v3868_v42  ;;  %v4078_v36 = vld [vmem:[#allocation9 + $0x12c] sm:$0xf]  ;;  %v3820_v42 = vld [vmem:[#allocation9 + $0x138] sm:$0xf0] }
 0x5af   :  { %v3661_v28 = vmul.f32 -1.442695, %v1605_v48  ;;  %v3662_v19 = vmul.f32 -1.442695, %v1606_v56  ;;  %v5278_v56 = vor.u32 %v4085_v11, %v3844_v14  ;;  %2241 = vmatpush.bf16.msra.mxu0 %v5272_v44  ;;  %v5316_v11 = vor.u32 %v4077_v15, %v3812_v52  ;;  %v4074_v52 = vld [vmem:[#allocation9 + $0x10c] sm:$0xf] }
 0x5b0   :  { %2279 = vmatpush.bf16.msra.mxu3 %v5284_v13 }
 0x5b1   :  { %4241 = vpow2.f32 %v3661_v28  ;;  %v3834_v28 = vld [vmem:[#allocation9 + $0x148] sm:$0xf]  ;;  %2254 = vmatpush.bf16.msra.mxu1 %v5278_v56 }
 0x5b2   :  { %4243 = vpow2.f32 %v3662_v19  ;;  %v5294_v50 = vor.u32 %v4084_v5, %v3834_v28 }
 0x5b3   :  { %v1588_v10 = vpop.f32.mrf.mxu2  ;;  %v5253_v63 = vpop.f32.mrf.mxu3  ;;  %2242 = vmatpush.bf16.msra.mxu0 %v5288_v2 }
 0x5b4   :  { %v1607_v38 = vadd.f32 %v1588_v10, %v438_v33  ;;  %v1564_v31 = vpop.f32.mrf.mxu0  ;;  %v1577_v49 = vpop.f32.mrf.mxu1  ;;  %v4079_v33 = vld [vmem:[#allocation9 + $0x12c] sm:$0xf0]  ;;  %v5299_v10 = vor.u32 %v4086_v57, %v3852_v37  ;;  %v1608_v51 = vadd.f32 %v5253_v63, %v467_v41  ;;  %2268 = vmatpush.bf16.msra.mxu2 %v5294_v50  ;;  %v5337_v57 = vor.u32 %v4075_v20, %v3794_v7 }
 0x5b5   :  { %v4080_v31 = vld [vmem:[#allocation9 + $0x134] sm:$0xf0]  ;;  %v5307_v17 = vor.u32 %v4079_v33, %v3810_v6  ;;  %2255 = vmatpush.bf16.msra.mxu1 %v5292_v58  ;;  %v5341_v6 = vor.u32 %v4078_v36, %v3820_v42  ;;  %v3802_v33 = vld [vmem:[#allocation9 + $0x108] sm:$0xf] }
 0x5b6   :  { %v3663_v32 = vmul.f32 -1.442695, %v1607_v38  ;;  %v5318_v63 = vor.u32 %v4080_v31, %v3818_v0  ;;  %2280 = vmatpush.bf16.msra.mxu3 %v5299_v10  ;;  %v3804_v0 = vld [vmem:[#allocation9 + $0x118] sm:$0xf0] }
 0x5b7   :  { %v4242_v24 = vpop.eup %4241  ;;  %2243 = vmatpush.bf16.msra.mxu0 %v5307_v17 }
 0x5b8   :  { %v4244_v40 = vpop.eup %4243  ;;  %v5269_v1 = vadd.f32 1.0, %v4242_v24  ;;  %4245 = vpow2.f32 %v3663_v32  ;;  %2269 = vmatpush.bf16.msra.mxu2 %v5318_v63 }
 0x5b9   :  { %v5274_v48 = vadd.f32 1.0, %v4244_v40  ;;  %2256 = vmatpush.bf16.msra.mxu1 %v5316_v11 }
 0x5ba   :  { %4247 = vrcp.f32 %v5269_v1  ;;  %v1630_v14 = vand.u32 2147483647, %v5269_v1  ;;  %v1632_v24 = vand.u32 2147483648, %v5269_v1  ;;  %2281 = vmatpush.bf16.msra.mxu3 %v5325_v30  ;;  %vm1626_vm6 = vweird.f32 %v5269_v1 }
 0x5bb   :  { %4249 = vrcp.f32 %v5274_v48  ;;  %v1590_v19 = vpop.f32.mrf.mxu2  ;;  %v1603_v47 = vpop.f32.mrf.mxu3  ;;  %v1647_v4 = vand.u32 2147483648, %v5274_v48  ;;  %v1645_v28 = vand.u32 2147483647, %v5274_v48  ;;  %vm1641_vm7 = vweird.f32 %v5274_v48  ;;  %2244 = vmatpush.bf16.msra.mxu0 %v5337_v57 }
 0x5bc   :  { %v4073_v19 = vld [vmem:[#allocation9 + $0x104] sm:$0xf]  ;;  %v3796_v47 = vld [vmem:[#allocation9 + $0x110] sm:$0xf0]  ;;  %vm1631_vm10 = vcmp.eq.f32.partialorder %v1630_v14, 8.507059e+37 }
 0x5bd   :  { %v5339_v37 = vor.u32 %v4073_v19, %v3796_v47  ;;  %vm1646_vm11 = vcmp.eq.f32.partialorder %v1645_v28, 8.507059e+37  ;;  %v1934_v47 = vpop.f32.mrf.mxu0 }
 0x5be   :  { %v4246_v18 = vpop.eup %4245  ;;  %2282 = vmatpush.bf16.msra.mxu3 %v5341_v6 }
 0x5bf   :  { %v5301_v38 = vadd.f32 1.0, %v4246_v18  ;;  %v4076_v18 = vld [vmem:[#allocation9 + $0x114] sm:$0xf0]  ;;  %2257 = vmatpush.bf16.msra.mxu1 %v5339_v37  ;;  %2361 = vmatpush.bf16.msrb.mxu0 %v5216_v61 }
 0x5c0   :  { %v5303_v49 = vpop.eup %4247  ;;  %v5345_v15 = vor.u32 %v4076_v18, %v3802_v33 }
 0x5c1   :  { %v5309_v3 = vpop.eup %4249  ;;  %v1622_v9 = vmul.f32 %v5303_v49, %v5269_v1  ;;  %4251 = vrcp.f32 %v5301_v38  ;;  %vm1627_vm5 = vweird.f32 %v5303_v49  ;;  %v1648_v1 = vor.u32 1.1754944e-38, %v1647_v4 }
 0x5c2   :  { %v1637_v32 = vmul.f32 %v5309_v3, %v5274_v48  ;;  %4253 = vtanh.f32 %v1608_v51  ;;  %vm1642_vm4 = vweird.f32 %v5309_v3  ;;  %vm1628_vm8 = vmor %vm1626_vm6, %vm1627_vm5  ;;  %v1633_v51 = vor.u32 1.1754944e-38, %v1632_v24  ;;  %2270 = vmatpush.bf16.msra.mxu2 %v5345_v15 }
 0x5c3   :  { %v1623_v23 = vsub.f32 1.0, %v1622_v9  ;;  %vm1643_vm9 = vmor %vm1641_vm7, %vm1642_vm4  ;;  %v5360_v24 = vor.u32 %v4074_v52, %v3804_v0  ;;  %2374 = vmatpush.bf16.msrb.mxu1 %v5218_v12  ;;  %2362 = vmatpush.bf16.msrb.mxu0 %v5236_v8  ;;  %v1662_v4 = vand.u32 2147483648, %v5301_v38  ;;  %vm1656_vm13 = vweird.f32 %v5301_v38  ;;  %v1992_v33 = vpop.f32.mrf.mxu2  ;;  %v2021_v18 = vpop.f32.mrf.mxu3 }
 0x5c4   :  { %v1638_v40 = vsub.f32 1.0, %v1637_v32 }
 0x5c5   :  { %v1624_v21 = vmul.f32 %v5303_v49, %v1623_v23  ;;  %2283 = vmatpush.bf16.msra.mxu3 %v5360_v24  ;;  %v1663_v20 = vor.u32 1.1754944e-38, %v1662_v4 }
 0x5c6   :  { %v1639_v5 = vmul.f32 %v5309_v3, %v1638_v40  ;;  %2387 = vmatpush.bf16.msrb.mxu2 %v5226_v16 }
 0x5c7   :  { %v4252_v54 = vpop.eup %4251  ;;  %v1625_v41 = vadd.f32 %v5303_v49, %v1624_v21  ;;  %2375 = vmatpush.bf16.msrb.mxu1 %v5238_v45  ;;  %2363 = vmatpush.bf16.msrb.mxu0 %v5245_v35 }
 0x5c8   :  { %v1652_v31 = vmul.f32 %v4252_v54, %v5301_v38  ;;  %v1640_v53 = vadd.f32 %v5309_v3, %v1639_v5  ;;  %v4254_v48 = vpop.eup %4253  ;;  %vm1657_vm12 = vweird.f32 %v4252_v54  ;;  %v1963_v5 = vpop.f32.mrf.mxu1 }
 0x5c9   :  { %v1629_v29 = vsel %vm1628_vm8, %v5303_v49, %v1625_v41  ;;  %2400 = vmatpush.bf16.msrb.mxu3 %v5229_v27  ;;  %vm1658_vm14 = vmor %vm1656_vm13, %vm1657_vm12 }
 0x5ca   :  { %v1653_v9 = vsub.f32 1.0, %v1652_v31  ;;  %v1634_v32 = vsel %vm1631_vm10, %v1633_v51, %v1629_v29  ;;  %v1644_v23 = vsel %vm1643_vm9, %v5309_v3, %v1640_v53  ;;  %2388 = vmatpush.bf16.msrb.mxu2 %v5240_v22 }
 0x5cb   :  { %v1649_v36 = vsel %vm1646_vm11, %v1648_v1, %v1644_v23  ;;  %v1668_v42 = vmul.f32 %v4254_v48, %v1634_v32  ;;  %2376 = vmatpush.bf16.msrb.mxu1 %v5249_v46  ;;  %2364 = vmatpush.bf16.msrb.mxu0 %v5258_v59  ;;  %v5440_v52 = vpop.f32.mrf.mxu2  ;;  %v5442_v0 = vpop.f32.mrf.mxu3 }
 0x5cc   :  { %v1654_v49 = vmul.f32 %v4252_v54, %v1653_v9  ;;  %v1667_v14 = vmul.f32 %v1649_v36, %v5204_v25  ;;  %v1660_v25 = vand.u32 2147483647, %v5301_v38  ;;  %5842 = vst [vmem:[#allocation23_spill] sm:$0xff] %v5442_v0 }
 0x5cd   :  { %2401 = vmatpush.bf16.msrb.mxu3 %v5255_v34 }
 0x5ce   :  { %v1669_v40 = vadd.f32 %v1668_v42, %v1667_v14  ;;  %v1655_v3 = vadd.f32 %v4252_v54, %v1654_v49  ;;  %2389 = vmatpush.bf16.msrb.mxu2 %v5251_v39  ;;  %vm1661_vm15 = vcmp.eq.f32.partialorder %v1660_v25, 8.507059e+37 }
 0x5cf   :  { %2377 = vmatpush.bf16.msrb.mxu1 %v5262_v55  ;;  %2365 = vmatpush.bf16.msrb.mxu0 %v5272_v44 }
 0x5d0   :  { %4255 = vtanh.f32 %v1669_v40  ;;  %1675 = vst [vmem:[#allocation16] sm:$0xff] %v1669_v40  ;;  %v1659_v7 = vsel %vm1658_vm14, %v4252_v54, %v1655_v3  ;;  %v5436_v54 = vpop.f32.mrf.mxu0  ;;  %v5438_v41 = vpop.f32.mrf.mxu1 }
 0x5d1   :  { %v1664_v28 = vsel %vm1661_vm15, %v1663_v20, %v1659_v7  ;;  %2402 = vmatpush.bf16.msrb.mxu3 %v5267_v26 }
 0x5d2   :  { %2390 = vmatpush.bf16.msrb.mxu2 %v5264_v62 }
 0x5d3   :  { %2378 = vmatpush.bf16.msrb.mxu1 %v5278_v56  ;;  %2366 = vmatpush.bf16.msrb.mxu0 %v5288_v2  ;;  %v5448_v53 = vpop.f32.mrf.mxu2  ;;  %v5450_v1 = vpop.f32.mrf.mxu3 }
 0x5d4   :  { %5845 = vst [vmem:[#allocation28_spill] sm:$0xff] %v5448_v53 }
 0x5d5   :  { %2403 = vmatpush.bf16.msrb.mxu3 %v5284_v13  ;;  %5846 = vst [vmem:[#allocation27_spill] sm:$0xff] %v5450_v1 }
 0x5d6   :  { %v4256_v21 = vpop.eup %4255  ;;  %2391 = vmatpush.bf16.msrb.mxu2 %v5280_v60 }
 0x5d7   :  { %v1671_v19 = vmul.f32 %v4256_v21, %v1664_v28  ;;  %2379 = vmatpush.bf16.msrb.mxu1 %v5292_v58  ;;  %2367 = vmatpush.bf16.msrb.mxu0 %v5307_v17  ;;  %v1743_v28 = vld [vmem:[#allocation10 + $0x4] sm:$0xf] }
 0x5d8   :  { %v5444_v31 = vpop.f32.mrf.mxu0  ;;  %v5446_v51 = vpop.f32.mrf.mxu1 }
 0x5d9   :  { %v1755_v38 = vpack.c.bf16 %v1671_v19, %v5210_v43  ;;  %1674 = vst [vmem:[#allocation14] sm:$0xff] %v1671_v19  ;;  %2404 = vmatpush.bf16.msrb.mxu3 %v5299_v10  ;;  %v5841_v43 = vmov 0  }
 0x5da   :  { %2392 = vmatpush.bf16.msrb.mxu2 %v5294_v50  ;;  %5843 = vst [vmem:[#allocation24_spill] sm:$0xff] %v5444_v31 }
 0x5db   :  { %1948 = vmatmul.bf16.gmra.mxu0 %v1755_v38  ;;  %1977 = vmatmul.bf16.gmra.mxu1 %v1755_v38  ;;  %5844 = vst [vmem:[#allocation26_spill] sm:$0xff] %v5446_v51  ;;  %v5456_v9 = vpop.f32.mrf.mxu2  ;;  %v5458_v32 = vpop.f32.mrf.mxu3 }
 0x5dc   :  { %2006 = vmatmul.bf16.gmra.mxu2 %v1755_v38  ;;  %2035 = vmatmul.bf16.gmra.mxu3 %v1755_v38  ;;  %5849 = vst [vmem:[#allocation31_spill] sm:$0xff] %v5456_v9 }
 0x5dd   :  { %2405 = vmatpush.bf16.msrb.mxu3 %v5325_v30  ;;  %2380 = vmatpush.bf16.msrb.mxu1 %v5316_v11  ;;  %5850 = vst [vmem:[#allocation32_spill] sm:$0xff] %v5458_v32 }
 0x5de   :  { %2393 = vmatpush.bf16.msrb.mxu2 %v5318_v63  ;;  %2368 = vmatpush.bf16.msrb.mxu0 %v5337_v57 }
 0x5e0   :  { %v5452_v29 = vpop.f32.mrf.mxu0  ;;  %v5454_v48 = vpop.f32.mrf.mxu1 }
 0x5e1   :  { %2406 = vmatpush.bf16.msrb.mxu3 %v5341_v6  ;;  %2381 = vmatpush.bf16.msrb.mxu1 %v5339_v37  ;;  %5847 = vst [vmem:[#allocation29_spill] sm:$0xff] %v5452_v29 }
 0x5e2   :  { %2394 = vmatpush.bf16.msrb.mxu2 %v5345_v15  ;;  %5848 = vst [vmem:[#allocation30_spill] sm:$0xff] %v5454_v48 }
 0x5e3   :  { %v5464_v42 = vpop.f32.mrf.mxu2  ;;  %v5466_v49 = vpop.f32.mrf.mxu3 }
 0x5e4   :  { %5853 = vst [vmem:[#allocation36_spill] sm:$0xff] %v5464_v42  ;;  %v5498_v42 = vperm.slane %v1743_v28, 2 }
 0x5e5   :  { %2407 = vmatpush.bf16.msrb.mxu3 %v5360_v24  ;;  %5854 = vst [vmem:[#allocation35_spill] sm:$0xff] %v5466_v49 }
 0x5e8   :  { %v5460_v23 = vpop.f32.mrf.mxu0  ;;  %v5462_v36 = vpop.f32.mrf.mxu1 }
 0x5e9   :  { %5851 = vst [vmem:[#allocation33_spill] sm:$0xff] %v5460_v23 }
 0x5ea   :  { %5852 = vst [vmem:[#allocation34_spill] sm:$0xff] %v5462_v36  ;;  %v1993_v36 = vadd.f32 %v1992_v33, %v5498_v42 }
 0x5eb   :  { %2245 = vmatmul.bf16.vlgmr.msra.gmra.mxu0 %v5841_v43  ;;  %2258 = vmatmul.bf16.vlgmr.msra.gmra.mxu1 %v5841_v43  ;;  %v5472_v3 = vpop.f32.mrf.mxu2  ;;  %v5474_v4 = vpop.f32.mrf.mxu3 }
 0x5ec   :  { %2271 = vmatmul.bf16.vlgmr.msra.gmra.mxu2 %v5841_v43  ;;  %2284 = vmatmul.bf16.vlgmr.msra.gmra.mxu3 %v5841_v43  ;;  %5857 = vst [vmem:[#allocation39_spill] sm:$0xff] %v5472_v3  ;;  %v5488_v43 = vperm.slane %v1743_v28, 0 }
 0x5ed   :  { %2485 = vmatpush.bf16.msra.mxu0 %v5216_v61  ;;  %2498 = vmatpush.bf16.msra.mxu1 %v5218_v12  ;;  %5858 = vst [vmem:[#allocation40_spill] sm:$0xff] %v5474_v4 }
 0x5ee   :  { %2511 = vmatpush.bf16.msra.mxu2 %v5226_v16  ;;  %2524 = vmatpush.bf16.msra.mxu3 %v5229_v27  ;;  %v1935_v3 = vadd.f32 %v1934_v47, %v5488_v43 }
 0x5f0   :  { %v5468_v14 = vpop.f32.mrf.mxu0  ;;  %v5470_v40 = vpop.f32.mrf.mxu1 }
 0x5f1   :  { %2486 = vmatpush.bf16.msra.mxu0 %v5236_v8  ;;  %2499 = vmatpush.bf16.msra.mxu1 %v5238_v45  ;;  %5855 = vst [vmem:[#allocation37_spill] sm:$0xff] %v5468_v14 }
 0x5f2   :  { %2512 = vmatpush.bf16.msra.mxu2 %v5240_v22  ;;  %2525 = vmatpush.bf16.msra.mxu3 %v5255_v34  ;;  %5856 = vst [vmem:[#allocation38_spill] sm:$0xff] %v5470_v40  ;;  %v5490_v40 = vperm.slane %v1743_v28, 1 }
 0x5f4   :  { %v1964_v4 = vadd.f32 %v1963_v5, %v5490_v40 }
 0x5f5   :  { %2487 = vmatpush.bf16.msra.mxu0 %v5245_v35  ;;  %2500 = vmatpush.bf16.msra.mxu1 %v5249_v46 }
 0x5f6   :  { %2513 = vmatpush.bf16.msra.mxu2 %v5251_v39  ;;  %2526 = vmatpush.bf16.msra.mxu3 %v5267_v26 }
 0x5f9   :  { %2488 = vmatpush.bf16.msra.mxu0 %v5258_v59  ;;  %2501 = vmatpush.bf16.msra.mxu1 %v5262_v55 }
 0x5fa   :  { %2514 = vmatpush.bf16.msra.mxu2 %v5264_v62  ;;  %2527 = vmatpush.bf16.msra.mxu3 %v5284_v13 }
 0x5fd   :  { %2489 = vmatpush.bf16.msra.mxu0 %v5272_v44  ;;  %2502 = vmatpush.bf16.msra.mxu1 %v5278_v56 }
 0x5fe   :  { %2515 = vmatpush.bf16.msra.mxu2 %v5280_v60  ;;  %2528 = vmatpush.bf16.msra.mxu3 %v5299_v10 }
 0x601   :  { %2490 = vmatpush.bf16.msra.mxu0 %v5288_v2  ;;  %2503 = vmatpush.bf16.msra.mxu1 %v5292_v58 }
 0x602   :  { %2516 = vmatpush.bf16.msra.mxu2 %v5294_v50  ;;  %2529 = vmatpush.bf16.msra.mxu3 %v5325_v30 }
 0x605   :  { %2491 = vmatpush.bf16.msra.mxu0 %v5307_v17  ;;  %2504 = vmatpush.bf16.msra.mxu1 %v5316_v11 }
 0x606   :  { %2517 = vmatpush.bf16.msra.mxu2 %v5318_v63  ;;  %2530 = vmatpush.bf16.msra.mxu3 %v5341_v6 }
 0x609   :  { %2492 = vmatpush.bf16.msra.mxu0 %v5337_v57  ;;  %2505 = vmatpush.bf16.msra.mxu1 %v5339_v37 }
 0x60a   :  { %2518 = vmatpush.bf16.msra.mxu2 %v5345_v15  ;;  %2531 = vmatpush.bf16.msra.mxu3 %v5360_v24 }
 0x658   :  { %v5476_v25 = vpop.f32.mrf.mxu0  ;;  %v5478_v7 = vpop.f32.mrf.mxu1 }
 0x659   :  { %5859 = vst [vmem:[#allocation41_spill] sm:$0xff] %v5476_v25 }
 0x65a   :  { %5860 = vst [vmem:[#allocation42_spill] sm:$0xff] %v5478_v7 }
 0x65f   :  { %v5480_v20 = vpop.f32.mrf.mxu2  ;;  %v5482_v21 = vpop.f32.mrf.mxu3 }
 0x660   :  { %5861 = vst [vmem:[#allocation44_spill] sm:$0xff] %v5480_v20  ;;  %v5484_v19 = vpop.f32.mrf.mxu0  ;;  %v5486_v38 = vpop.f32.mrf.mxu1 }
 0x661   :  { %5862 = vst [vmem:[#allocation25_spill] sm:$0xff] %v5482_v21 }
 0x662   :  { %5863 = vst [vmem:[#allocation22_spill] sm:$0xff] %v5484_v19 }
 0x663   :  { %5864 = vst [vmem:[#allocation43_spill] sm:$0xff] %v5486_v38 }
 0x667   :  { %v5494_v25 = vpop.f32.mrf.mxu2  ;;  %v5496_v7 = vpop.f32.mrf.mxu3 }
 0x668   :  { %5865 = vst [vmem:[#allocation45_spill] sm:$0xff] %v5494_v25  ;;  %v2246_v20 = vpop.f32.mrf.mxu0  ;;  %v2259_v14 = vpop.f32.mrf.mxu1 }
 0x669   :  { %5866 = vst [vmem:[#allocation46_spill] sm:$0xff] %v5496_v7  ;;  %v2289_v21 = vadd.f32 %v2246_v20, %v1935_v3  ;;  %v2290_v49 = vadd.f32 %v2259_v14, %v1964_v4  ;;  %v5501_v14 = vperm.slane %v1743_v28, 3 }
 0x66b   :  { %v3920_v19 = vmul.f32 -1.442695, %v2289_v21  ;;  %v3921_v38 = vmul.f32 -1.442695, %v2290_v49  ;;  %5867 = vst [vmem:[#allocation47_spill] sm:$0xff] %v5501_v14  ;;  %v2022_v33 = vadd.f32 %v2021_v18, %v5501_v14 }
 0x66d   :  { %4257 = vpow2.f32 %v3920_v19 }
 0x66e   :  { %4259 = vpow2.f32 %v3921_v38 }
 0x66f   :  { %v2272_v23 = vpop.f32.mrf.mxu2  ;;  %v2285_v47 = vpop.f32.mrf.mxu3 }
 0x670   :  { %v2291_v32 = vadd.f32 %v2272_v23, %v1993_v36  ;;  %v2248_v5 = vpop.f32.mrf.mxu0  ;;  %v2261_v9 = vpop.f32.mrf.mxu1  ;;  %v2292_v23 = vadd.f32 %v2285_v47, %v2022_v33 }
 0x672   :  { %v3922_v25 = vmul.f32 -1.442695, %v2291_v32 }
 0x673   :  { %v4258_v48 = vpop.eup %4257 }
 0x674   :  { %v4260_v7 = vpop.eup %4259  ;;  %v2302_v29 = vadd.f32 1.0, %v4258_v48  ;;  %4261 = vpow2.f32 %v3922_v25 }
 0x675   :  { %v2303_v3 = vadd.f32 1.0, %v4260_v7 }
 0x676   :  { %4263 = vrcp.f32 %v2302_v29  ;;  %v2316_v25 = vand.u32 2147483648, %v2302_v29  ;;  %v2314_v5 = vand.u32 2147483647, %v2302_v29  ;;  %vm2310_vm2 = vweird.f32 %v2302_v29 }
 0x677   :  { %4265 = vrcp.f32 %v2303_v3  ;;  %v2274_v49 = vpop.f32.mrf.mxu2  ;;  %v2287_v4 = vpop.f32.mrf.mxu3  ;;  %v2331_v7 = vand.u32 2147483648, %v2303_v3  ;;  %vm2325_vm3 = vweird.f32 %v2303_v3 }
 0x678   :  { %v2329_v4 = vand.u32 2147483647, %v2303_v3  ;;  %vm2315_vm5 = vcmp.eq.f32.partialorder %v2314_v5, 8.507059e+37 }
 0x679   :  { %v2332_v53 = vor.u32 1.1754944e-38, %v2331_v7 }
 0x67a   :  { %v4262_v20 = vpop.eup %4261  ;;  %vm2330_vm7 = vcmp.eq.f32.partialorder %v2329_v4, 8.507059e+37 }
 0x67b   :  { %v2304_v21 = vadd.f32 1.0, %v4262_v20  ;;  %v2317_v20 = vor.u32 1.1754944e-38, %v2316_v25 }
 0x67c   :  { %v4264_v19 = vpop.eup %4263 }
 0x67d   :  { %v4266_v36 = vpop.eup %4265  ;;  %v2306_v9 = vmul.f32 %v4264_v19, %v2302_v29  ;;  %4267 = vrcp.f32 %v2304_v21  ;;  %vm2311_vm0 = vweird.f32 %v4264_v19  ;;  %vm2340_vm9 = vweird.f32 %v2304_v21 }
 0x67e   :  { %v2321_v32 = vmul.f32 %v4266_v36, %v2303_v3  ;;  %4269 = vtanh.f32 %v2292_v23  ;;  %vm2326_vm1 = vweird.f32 %v4266_v36  ;;  %vm2312_vm4 = vmor %vm2310_vm2, %vm2311_vm0  ;;  %v2346_v3 = vand.u32 2147483648, %v2304_v21 }
 0x67f   :  { %v2307_v38 = vsub.f32 1.0, %v2306_v9  ;;  %vm2327_vm6 = vmor %vm2325_vm3, %vm2326_vm1 }
 0x680   :  { %v2322_v48 = vsub.f32 1.0, %v2321_v32  ;;  %v2347_v7 = vor.u32 1.1754944e-38, %v2346_v3 }
 0x681   :  { %v2308_v28 = vmul.f32 %v4264_v19, %v2307_v38 }
 0x682   :  { %v2323_v49 = vmul.f32 %v4266_v36, %v2322_v48 }
 0x683   :  { %v4268_v1 = vpop.eup %4267  ;;  %v2309_v18 = vadd.f32 %v4264_v19, %v2308_v28 }
 0x684   :  { %v2336_v47 = vmul.f32 %v4268_v1, %v2304_v21  ;;  %v2324_v33 = vadd.f32 %v4266_v36, %v2323_v49  ;;  %v4270_v23 = vpop.eup %4269  ;;  %vm2341_vm8 = vweird.f32 %v4268_v1 }
 0x685   :  { %v2313_v9 = vsel %vm2312_vm4, %v4264_v19, %v2309_v18  ;;  %v2344_v19 = vand.u32 2147483647, %v2304_v21  ;;  %vm2342_vm10 = vmor %vm2340_vm9, %vm2341_vm8 }
 0x686   :  { %v2337_v32 = vsub.f32 1.0, %v2336_v47  ;;  %v2318_v38 = vsel %vm2315_vm5, %v2317_v20, %v2313_v9  ;;  %v2328_v51 = vsel %vm2327_vm6, %v4266_v36, %v2324_v33  ;;  %v1995_v47 = vadd.f32 %v5440_v52, %v5498_v42 }
 0x687   :  { %v2333_v48 = vsel %vm2330_vm7, %v2332_v53, %v2328_v51  ;;  %v2352_v31 = vmul.f32 %v4270_v23, %v2318_v38  ;;  %vm2345_vm11 = vcmp.eq.f32.partialorder %v2344_v19, 8.507059e+37 }
 0x688   :  { %v2338_v0 = vmul.f32 %v4268_v1, %v2337_v32  ;;  %v2351_v14 = vmul.f32 0.0, %v2333_v48 }
 0x68a   :  { %v5504_v28 = vadd.f32 %v2352_v31, %v2351_v14  ;;  %v2339_v29 = vadd.f32 %v4268_v1, %v2338_v0  ;;  %v1937_v0 = vadd.f32 %v5436_v54, %v5488_v43  ;;  %v1966_v31 = vadd.f32 %v5438_v41, %v5490_v40 }
 0x68c   :  { %4271 = vtanh.f32 %v5504_v28  ;;  %v2343_v25 = vsel %vm2342_vm10, %v4268_v1, %v2339_v29 }
 0x68d   :  { %v2348_v36 = vsel %vm2345_vm11, %v2347_v7, %v2343_v25  ;;  %v5868_v7 = vld [vmem:[#allocation47_spill] sm:$0xff] }
 0x692   :  { %v4272_v5 = vpop.eup %4271 }
 0x693   :  { %v2355_v49 = vmul.f32 %v4272_v5, %v2348_v36  ;;  %v5869_v5 = vld [vmem:[#allocation23_spill] sm:$0xff] }
 0x694   :  { %v2024_v52 = vadd.f32 %v5869_v5, %v5868_v7 }
 0x695   :  { %v2360_v51 = vpack.c.bf16 %v2355_v49, %v2355_v49 }
 0x697   :  { %2369 = vmatmul.bf16.vlgmr.msrb.gmra.mxu0 %v2360_v51  ;;  %2382 = vmatmul.bf16.vlgmr.msrb.gmra.mxu1 %v2360_v51 }
 0x698   :  { %2395 = vmatmul.bf16.vlgmr.msrb.gmra.mxu2 %v2360_v51  ;;  %2408 = vmatmul.bf16.vlgmr.msrb.gmra.mxu3 %v2360_v51 }
 0x699   :  { %2609 = vmatpush.bf16.msrb.mxu0 %v5216_v61  ;;  %2622 = vmatpush.bf16.msrb.mxu1 %v5218_v12 }
 0x69a   :  { %2635 = vmatpush.bf16.msrb.mxu2 %v5226_v16  ;;  %2648 = vmatpush.bf16.msrb.mxu3 %v5229_v27 }
 0x69d   :  { %2610 = vmatpush.bf16.msrb.mxu0 %v5236_v8  ;;  %2623 = vmatpush.bf16.msrb.mxu1 %v5238_v45 }
 0x69e   :  { %2636 = vmatpush.bf16.msrb.mxu2 %v5240_v22  ;;  %2649 = vmatpush.bf16.msrb.mxu3 %v5255_v34 }
 0x6a1   :  { %2611 = vmatpush.bf16.msrb.mxu0 %v5245_v35  ;;  %2624 = vmatpush.bf16.msrb.mxu1 %v5249_v46 }
 0x6a2   :  { %2637 = vmatpush.bf16.msrb.mxu2 %v5251_v39  ;;  %2650 = vmatpush.bf16.msrb.mxu3 %v5267_v26 }
 0x6a5   :  { %2612 = vmatpush.bf16.msrb.mxu0 %v5258_v59  ;;  %2625 = vmatpush.bf16.msrb.mxu1 %v5262_v55 }
 0x6a6   :  { %2638 = vmatpush.bf16.msrb.mxu2 %v5264_v62  ;;  %2651 = vmatpush.bf16.msrb.mxu3 %v5284_v13 }
 0x6a9   :  { %2613 = vmatpush.bf16.msrb.mxu0 %v5272_v44  ;;  %2626 = vmatpush.bf16.msrb.mxu1 %v5278_v56 }
 0x6aa   :  { %2639 = vmatpush.bf16.msrb.mxu2 %v5280_v60  ;;  %2652 = vmatpush.bf16.msrb.mxu3 %v5299_v10 }
 0x6ad   :  { %2614 = vmatpush.bf16.msrb.mxu0 %v5288_v2  ;;  %2627 = vmatpush.bf16.msrb.mxu1 %v5292_v58 }
 0x6ae   :  { %2640 = vmatpush.bf16.msrb.mxu2 %v5294_v50  ;;  %2653 = vmatpush.bf16.msrb.mxu3 %v5325_v30 }
 0x6b1   :  { %2615 = vmatpush.bf16.msrb.mxu0 %v5307_v17  ;;  %2628 = vmatpush.bf16.msrb.mxu1 %v5316_v11 }
 0x6b2   :  { %2641 = vmatpush.bf16.msrb.mxu2 %v5318_v63  ;;  %2654 = vmatpush.bf16.msrb.mxu3 %v5341_v6 }
 0x6b5   :  { %2616 = vmatpush.bf16.msrb.mxu0 %v5337_v57  ;;  %2629 = vmatpush.bf16.msrb.mxu1 %v5339_v37 }
 0x6b6   :  { %2642 = vmatpush.bf16.msrb.mxu2 %v5345_v15  ;;  %2655 = vmatpush.bf16.msrb.mxu3 %v5360_v24 }
 0x714   :  { %v2370_v53 = vpop.f32.mrf.mxu0  ;;  %v2383_v1 = vpop.f32.mrf.mxu1 }
 0x715   :  { %v2413_v14 = vadd.f32 %v2370_v53, %v1937_v0  ;;  %v2414_v21 = vadd.f32 %v2383_v1, %v1966_v31 }
 0x717   :  { %v3923_v4 = vmul.f32 -1.442695, %v2413_v14  ;;  %v3924_v18 = vmul.f32 -1.442695, %v2414_v21 }
 0x719   :  { %4273 = vpow2.f32 %v3923_v4 }
 0x71a   :  { %4275 = vpow2.f32 %v3924_v18 }
 0x71b   :  { %v2396_v20 = vpop.f32.mrf.mxu2  ;;  %v2409_v33 = vpop.f32.mrf.mxu3 }
 0x71c   :  { %v2415_v9 = vadd.f32 %v2396_v20, %v1995_v47  ;;  %v2372_v23 = vpop.f32.mrf.mxu0  ;;  %v2385_v32 = vpop.f32.mrf.mxu1  ;;  %v2416_v51 = vadd.f32 %v2409_v33, %v2024_v52 }
 0x71e   :  { %v3925_v54 = vmul.f32 -1.442695, %v2415_v9 }
 0x71f   :  { %v4274_v38 = vpop.eup %4273 }
 0x720   :  { %v4276_v48 = vpop.eup %4275  ;;  %v2426_v41 = vadd.f32 1.0, %v4274_v38  ;;  %4277 = vpow2.f32 %v3925_v54 }
 0x721   :  { %v2427_v29 = vadd.f32 1.0, %v4276_v48 }
 0x722   :  { %4279 = vrcp.f32 %v2426_v41  ;;  %v2440_v21 = vand.u32 2147483648, %v2426_v41  ;;  %v2438_v47 = vand.u32 2147483647, %v2426_v41  ;;  %vm2434_vm14 = vweird.f32 %v2426_v41 }
 0x723   :  { %4281 = vrcp.f32 %v2427_v29  ;;  %v2398_v3 = vpop.f32.mrf.mxu2  ;;  %v2411_v19 = vpop.f32.mrf.mxu3  ;;  %v2455_v4 = vand.u32 2147483648, %v2427_v29  ;;  %v2453_v9 = vand.u32 2147483647, %v2427_v29  ;;  %vm2449_vm15 = vweird.f32 %v2427_v29 }
 0x724   :  { %v2441_v54 = vor.u32 1.1754944e-38, %v2440_v21  ;;  %vm2439_vm2 = vcmp.eq.f32.partialorder %v2438_v47, 8.507059e+37 }
 0x725   :  { %v2456_v48 = vor.u32 1.1754944e-38, %v2455_v4  ;;  %vm2454_vm3 = vcmp.eq.f32.partialorder %v2453_v9, 8.507059e+37  ;;  %v5871_v9 = vld [vmem:[#allocation26_spill] sm:$0xff] }
 0x726   :  { %v4278_v25 = vpop.eup %4277 }
 0x727   :  { %v2428_v36 = vadd.f32 1.0, %v4278_v25 }
 0x728   :  { %v4280_v49 = vpop.eup %4279 }
 0x729   :  { %v4282_v0 = vpop.eup %4281  ;;  %v2430_v31 = vmul.f32 %v4280_v49, %v2426_v41  ;;  %4283 = vrcp.f32 %v2428_v36  ;;  %vm2435_vm12 = vweird.f32 %v4280_v49  ;;  %vm2464_vm5 = vweird.f32 %v2428_v36 }
 0x72a   :  { %v2445_v53 = vmul.f32 %v4282_v0, %v2427_v29  ;;  %4285 = vtanh.f32 %v2416_v51  ;;  %vm2450_vm13 = vweird.f32 %v4282_v0  ;;  %vm2436_vm0 = vmor %vm2434_vm14, %vm2435_vm12 }
 0x72b   :  { %v2431_v1 = vsub.f32 1.0, %v2430_v31  ;;  %vm2451_vm1 = vmor %vm2449_vm15, %vm2450_vm13 }
 0x72c   :  { %v2446_v14 = vsub.f32 1.0, %v2445_v53 }
 0x72d   :  { %v2432_v18 = vmul.f32 %v4280_v49, %v2431_v1 }
 0x72e   :  { %v2447_v20 = vmul.f32 %v4282_v0, %v2446_v14  ;;  %v2470_v14 = vand.u32 2147483648, %v2428_v36 }
 0x72f   :  { %v4284_v23 = vpop.eup %4283  ;;  %v2433_v32 = vadd.f32 %v4280_v49, %v2432_v18 }
 0x730   :  { %v2460_v33 = vmul.f32 %v4284_v23, %v2428_v36  ;;  %v2448_v38 = vadd.f32 %v4282_v0, %v2447_v20  ;;  %v4286_v19 = vpop.eup %4285  ;;  %vm2465_vm4 = vweird.f32 %v4284_v23  ;;  %v2471_v4 = vor.u32 1.1754944e-38, %v2470_v14 }
 0x731   :  { %v2437_v3 = vsel %vm2436_vm0, %v4280_v49, %v2433_v32  ;;  %v2468_v49 = vand.u32 2147483647, %v2428_v36  ;;  %vm2466_vm6 = vmor %vm2464_vm5, %vm2465_vm4 }
 0x732   :  { %v2461_v25 = vsub.f32 1.0, %v2460_v33  ;;  %v2442_v5 = vsel %vm2439_vm2, %v2441_v54, %v2437_v3  ;;  %v2452_v52 = vsel %vm2451_vm1, %v4282_v0, %v2448_v38 }
 0x733   :  { %v2457_v51 = vsel %vm2454_vm3, %v2456_v48, %v2452_v52  ;;  %v2476_v31 = vmul.f32 %v4286_v19, %v2442_v5  ;;  %vm2469_vm7 = vcmp.eq.f32.partialorder %v2468_v49, 8.507059e+37  ;;  %v5872_v19 = vld [vmem:[#allocation28_spill] sm:$0xff] }
 0x734   :  { %v2462_v53 = vmul.f32 %v4284_v23, %v2461_v25  ;;  %v2475_v1 = vmul.f32 %v2457_v51, %v5504_v28  ;;  %v5870_v28 = vld [vmem:[#allocation24_spill] sm:$0xff]  ;;  %v1998_v25 = vadd.f32 %v5872_v19, %v5498_v42 }
 0x735   :  { %v1940_v36 = vadd.f32 %v5870_v28, %v5488_v43 }
 0x736   :  { %v5548_v41 = vadd.f32 %v2476_v31, %v2475_v1  ;;  %v2463_v29 = vadd.f32 %v4284_v23, %v2462_v53 }
 0x738   :  { %4287 = vtanh.f32 %v5548_v41  ;;  %v2467_v21 = vsel %vm2466_vm6, %v4284_v23, %v2463_v29  ;;  %v1969_v23 = vadd.f32 %v5871_v9, %v5490_v40 }
 0x739   :  { %v2472_v18 = vsel %vm2469_vm7, %v2471_v4, %v2467_v21 }
 0x73e   :  { %v4288_v0 = vpop.eup %4287 }
 0x73f   :  { %v2479_v47 = vmul.f32 %v4288_v0, %v2472_v18 }
 0x741   :  { %v2484_v20 = vpack.c.bf16 %v2479_v47, %v2479_v47  ;;  %v5873_v47 = vld [vmem:[#allocation27_spill] sm:$0xff] }
 0x743   :  { %2493 = vmatmul.bf16.vlgmr.msra.gmra.mxu0 %v2484_v20  ;;  %2506 = vmatmul.bf16.vlgmr.msra.gmra.mxu1 %v2484_v20 }
 0x744   :  { %2519 = vmatmul.bf16.vlgmr.msra.gmra.mxu2 %v2484_v20  ;;  %2532 = vmatmul.bf16.vlgmr.msra.gmra.mxu3 %v2484_v20  ;;  %v2027_v20 = vadd.f32 %v5873_v47, %v5868_v7 }
 0x745   :  { %2733 = vmatpush.bf16.msra.mxu0 %v5216_v61  ;;  %2746 = vmatpush.bf16.msra.mxu1 %v5218_v12 }
 0x746   :  { %2759 = vmatpush.bf16.msra.mxu2 %v5226_v16  ;;  %2772 = vmatpush.bf16.msra.mxu3 %v5229_v27 }
 0x749   :  { %2734 = vmatpush.bf16.msra.mxu0 %v5236_v8  ;;  %2747 = vmatpush.bf16.msra.mxu1 %v5238_v45 }
 0x74a   :  { %2760 = vmatpush.bf16.msra.mxu2 %v5240_v22  ;;  %2773 = vmatpush.bf16.msra.mxu3 %v5255_v34 }
 0x74d   :  { %2735 = vmatpush.bf16.msra.mxu0 %v5245_v35  ;;  %2748 = vmatpush.bf16.msra.mxu1 %v5249_v46 }
 0x74e   :  { %2761 = vmatpush.bf16.msra.mxu2 %v5251_v39  ;;  %2774 = vmatpush.bf16.msra.mxu3 %v5267_v26 }
 0x751   :  { %2736 = vmatpush.bf16.msra.mxu0 %v5258_v59  ;;  %2749 = vmatpush.bf16.msra.mxu1 %v5262_v55 }
 0x752   :  { %2762 = vmatpush.bf16.msra.mxu2 %v5264_v62  ;;  %2775 = vmatpush.bf16.msra.mxu3 %v5284_v13 }
 0x755   :  { %2737 = vmatpush.bf16.msra.mxu0 %v5272_v44  ;;  %2750 = vmatpush.bf16.msra.mxu1 %v5278_v56 }
 0x756   :  { %2763 = vmatpush.bf16.msra.mxu2 %v5280_v60  ;;  %2776 = vmatpush.bf16.msra.mxu3 %v5299_v10 }
 0x759   :  { %2738 = vmatpush.bf16.msra.mxu0 %v5288_v2  ;;  %2751 = vmatpush.bf16.msra.mxu1 %v5292_v58 }
 0x75a   :  { %2764 = vmatpush.bf16.msra.mxu2 %v5294_v50  ;;  %2777 = vmatpush.bf16.msra.mxu3 %v5325_v30 }
 0x75d   :  { %2739 = vmatpush.bf16.msra.mxu0 %v5307_v17  ;;  %2752 = vmatpush.bf16.msra.mxu1 %v5316_v11 }
 0x75e   :  { %2765 = vmatpush.bf16.msra.mxu2 %v5318_v63  ;;  %2778 = vmatpush.bf16.msra.mxu3 %v5341_v6 }
 0x761   :  { %2740 = vmatpush.bf16.msra.mxu0 %v5337_v57  ;;  %2753 = vmatpush.bf16.msra.mxu1 %v5339_v37 }
 0x762   :  { %2766 = vmatpush.bf16.msra.mxu2 %v5345_v15  ;;  %2779 = vmatpush.bf16.msra.mxu3 %v5360_v24 }
 0x7c0   :  { %v2494_v32 = vpop.f32.mrf.mxu0  ;;  %v2507_v33 = vpop.f32.mrf.mxu1 }
 0x7c1   :  { %v2537_v54 = vadd.f32 %v2494_v32, %v1940_v36  ;;  %v2538_v38 = vadd.f32 %v2507_v33, %v1969_v23 }
 0x7c3   :  { %v3926_v48 = vmul.f32 -1.442695, %v2537_v54  ;;  %v3927_v3 = vmul.f32 -1.442695, %v2538_v38 }
 0x7c5   :  { %4289 = vpow2.f32 %v3926_v48 }
 0x7c6   :  { %4291 = vpow2.f32 %v3927_v3 }
 0x7c7   :  { %v2520_v5 = vpop.f32.mrf.mxu2  ;;  %v2533_v52 = vpop.f32.mrf.mxu3 }
 0x7c8   :  { %v2539_v51 = vadd.f32 %v2520_v5, %v1998_v25  ;;  %v2496_v31 = vpop.f32.mrf.mxu0  ;;  %v2509_v53 = vpop.f32.mrf.mxu1  ;;  %v2540_v9 = vadd.f32 %v2533_v52, %v2027_v20 }
 0x7ca   :  { %v3928_v1 = vmul.f32 -1.442695, %v2539_v51 }
 0x7cb   :  { %v4290_v29 = vpop.eup %4289 }
 0x7cc   :  { %v4292_v14 = vpop.eup %4291  ;;  %v2550_v49 = vadd.f32 1.0, %v4290_v29  ;;  %4293 = vpow2.f32 %v3928_v1 }
 0x7cd   :  { %v2551_v21 = vadd.f32 1.0, %v4292_v14 }
 0x7ce   :  { %4295 = vrcp.f32 %v2550_v49  ;;  %v2564_v48 = vand.u32 2147483648, %v2550_v49  ;;  %v2562_v25 = vand.u32 2147483647, %v2550_v49  ;;  %vm2558_vm10 = vweird.f32 %v2550_v49 }
 0x7cf   :  { %4297 = vrcp.f32 %v2551_v21  ;;  %v2522_v4 = vpop.f32.mrf.mxu2  ;;  %v2535_v0 = vpop.f32.mrf.mxu3  ;;  %v2579_v3 = vand.u32 2147483648, %v2551_v21  ;;  %v2577_v51 = vand.u32 2147483647, %v2551_v21  ;;  %vm2573_vm11 = vweird.f32 %v2551_v21 }
 0x7d0   :  { %v2565_v1 = vor.u32 1.1754944e-38, %v2564_v48  ;;  %vm2563_vm14 = vcmp.eq.f32.partialorder %v2562_v25, 8.507059e+37 }
 0x7d1   :  { %v2580_v14 = vor.u32 1.1754944e-38, %v2579_v3  ;;  %vm2578_vm15 = vcmp.eq.f32.partialorder %v2577_v51, 8.507059e+37  ;;  %v5875_v51 = vld [vmem:[#allocation30_spill] sm:$0xff] }
 0x7d2   :  { %v4294_v18 = vpop.eup %4293 }
 0x7d3   :  { %v2552_v28 = vadd.f32 1.0, %v4294_v18 }
 0x7d4   :  { %v4296_v36 = vpop.eup %4295 }
 0x7d5   :  { %v4298_v23 = vpop.eup %4297  ;;  %v2554_v32 = vmul.f32 %v4296_v36, %v2550_v49  ;;  %4299 = vrcp.f32 %v2552_v28  ;;  %vm2559_vm8 = vweird.f32 %v4296_v36  ;;  %vm2588_vm1 = vweird.f32 %v2552_v28 }
 0x7d6   :  { %v2569_v33 = vmul.f32 %v4298_v23, %v2551_v21  ;;  %4301 = vtanh.f32 %v2540_v9  ;;  %vm2574_vm9 = vweird.f32 %v4298_v23  ;;  %vm2560_vm12 = vmor %vm2558_vm10, %vm2559_vm8 }
 0x7d7   :  { %v2555_v54 = vsub.f32 1.0, %v2554_v32  ;;  %vm2575_vm13 = vmor %vm2573_vm11, %vm2574_vm9 }
 0x7d8   :  { %v2570_v38 = vsub.f32 1.0, %v2569_v33 }
 0x7d9   :  { %v2556_v19 = vmul.f32 %v4296_v36, %v2555_v54 }
 0x7da   :  { %v2571_v5 = vmul.f32 %v4298_v23, %v2570_v38  ;;  %v2594_v38 = vand.u32 2147483648, %v2552_v28 }
 0x7db   :  { %v4300_v31 = vpop.eup %4299  ;;  %v2557_v53 = vadd.f32 %v4296_v36, %v2556_v19 }
 0x7dc   :  { %v2584_v52 = vmul.f32 %v4300_v31, %v2552_v28  ;;  %v2572_v29 = vadd.f32 %v4298_v23, %v2571_v5  ;;  %v4302_v0 = vpop.eup %4301  ;;  %vm2589_vm0 = vweird.f32 %v4300_v31  ;;  %v2595_v3 = vor.u32 1.1754944e-38, %v2594_v38 }
 0x7dd   :  { %v2561_v4 = vsel %vm2560_vm12, %v4296_v36, %v2557_v53  ;;  %v2592_v36 = vand.u32 2147483647, %v2552_v28  ;;  %vm2590_vm2 = vmor %vm2588_vm1, %vm2589_vm0 }
 0x7de   :  { %v2585_v18 = vsub.f32 1.0, %v2584_v52  ;;  %v2566_v47 = vsel %vm2563_vm14, %v2565_v1, %v2561_v4  ;;  %v2576_v20 = vsel %vm2575_vm13, %v4298_v23, %v2572_v29 }
 0x7df   :  { %v2581_v9 = vsel %vm2578_vm15, %v2580_v14, %v2576_v20  ;;  %v2600_v32 = vmul.f32 %v4302_v0, %v2566_v47  ;;  %vm2593_vm3 = vcmp.eq.f32.partialorder %v2592_v36, 8.507059e+37  ;;  %v5876_v0 = vld [vmem:[#allocation31_spill] sm:$0xff] }
 0x7e0   :  { %v2586_v33 = vmul.f32 %v4300_v31, %v2585_v18  ;;  %v2599_v54 = vmul.f32 %v2581_v9, %v5548_v41  ;;  %v5874_v41 = vld [vmem:[#allocation29_spill] sm:$0xff]  ;;  %v2000_v18 = vadd.f32 %v5876_v0, %v5498_v42 }
 0x7e1   :  { %v1942_v28 = vadd.f32 %v5874_v41, %v5488_v43 }
 0x7e2   :  { %v5592_v49 = vadd.f32 %v2600_v32, %v2599_v54  ;;  %v2587_v21 = vadd.f32 %v4300_v31, %v2586_v33 }
 0x7e4   :  { %4303 = vtanh.f32 %v5592_v49  ;;  %v2591_v48 = vsel %vm2590_vm2, %v4300_v31, %v2587_v21  ;;  %v1971_v31 = vadd.f32 %v5875_v51, %v5490_v40 }
 0x7e5   :  { %v2596_v19 = vsel %vm2593_vm3, %v2595_v3, %v2591_v48 }
 0x7ea   :  { %v4304_v23 = vpop.eup %4303 }
 0x7eb   :  { %v2603_v25 = vmul.f32 %v4304_v23, %v2596_v19 }
 0x7ed   :  { %v2608_v5 = vpack.c.bf16 %v2603_v25, %v2603_v25  ;;  %v5877_v25 = vld [vmem:[#allocation32_spill] sm:$0xff] }
 0x7ef   :  { %2617 = vmatmul.bf16.vlgmr.msrb.gmra.mxu0 %v2608_v5  ;;  %2630 = vmatmul.bf16.vlgmr.msrb.gmra.mxu1 %v2608_v5 }
 0x7f0   :  { %2643 = vmatmul.bf16.vlgmr.msrb.gmra.mxu2 %v2608_v5  ;;  %2656 = vmatmul.bf16.vlgmr.msrb.gmra.mxu3 %v2608_v5  ;;  %v2029_v5 = vadd.f32 %v5877_v25, %v5868_v7 }
 0x7f1   :  { %2857 = vmatpush.bf16.msrb.mxu0 %v5216_v61  ;;  %2870 = vmatpush.bf16.msrb.mxu1 %v5218_v12 }
 0x7f2   :  { %2883 = vmatpush.bf16.msrb.mxu2 %v5226_v16  ;;  %2896 = vmatpush.bf16.msrb.mxu3 %v5229_v27 }
 0x7f5   :  { %2858 = vmatpush.bf16.msrb.mxu0 %v5236_v8  ;;  %2871 = vmatpush.bf16.msrb.mxu1 %v5238_v45 }
 0x7f6   :  { %2884 = vmatpush.bf16.msrb.mxu2 %v5240_v22  ;;  %2897 = vmatpush.bf16.msrb.mxu3 %v5255_v34 }
 0x7f9   :  { %2859 = vmatpush.bf16.msrb.mxu0 %v5245_v35  ;;  %2872 = vmatpush.bf16.msrb.mxu1 %v5249_v46 }
 0x7fa   :  { %2885 = vmatpush.bf16.msrb.mxu2 %v5251_v39  ;;  %2898 = vmatpush.bf16.msrb.mxu3 %v5267_v26 }
 0x7fd   :  { %2860 = vmatpush.bf16.msrb.mxu0 %v5258_v59  ;;  %2873 = vmatpush.bf16.msrb.mxu1 %v5262_v55 }
 0x7fe   :  { %2886 = vmatpush.bf16.msrb.mxu2 %v5264_v62  ;;  %2899 = vmatpush.bf16.msrb.mxu3 %v5284_v13 }
 0x801   :  { %2861 = vmatpush.bf16.msrb.mxu0 %v5272_v44  ;;  %2874 = vmatpush.bf16.msrb.mxu1 %v5278_v56 }
 0x802   :  { %2887 = vmatpush.bf16.msrb.mxu2 %v5280_v60  ;;  %2900 = vmatpush.bf16.msrb.mxu3 %v5299_v10 }
 0x805   :  { %2862 = vmatpush.bf16.msrb.mxu0 %v5288_v2  ;;  %2875 = vmatpush.bf16.msrb.mxu1 %v5292_v58 }
 0x806   :  { %2888 = vmatpush.bf16.msrb.mxu2 %v5294_v50  ;;  %2901 = vmatpush.bf16.msrb.mxu3 %v5325_v30 }
 0x809   :  { %2863 = vmatpush.bf16.msrb.mxu0 %v5307_v17  ;;  %2876 = vmatpush.bf16.msrb.mxu1 %v5316_v11 }
 0x80a   :  { %2889 = vmatpush.bf16.msrb.mxu2 %v5318_v63  ;;  %2902 = vmatpush.bf16.msrb.mxu3 %v5341_v6 }
 0x80d   :  { %2864 = vmatpush.bf16.msrb.mxu0 %v5337_v57  ;;  %2877 = vmatpush.bf16.msrb.mxu1 %v5339_v37 }
 0x80e   :  { %2890 = vmatpush.bf16.msrb.mxu2 %v5345_v15  ;;  %2903 = vmatpush.bf16.msrb.mxu3 %v5360_v24 }
 0x86c   :  { %v2618_v53 = vpop.f32.mrf.mxu0  ;;  %v2631_v52 = vpop.f32.mrf.mxu1 }
 0x86d   :  { %v2661_v1 = vadd.f32 %v2618_v53, %v1942_v28  ;;  %v2662_v29 = vadd.f32 %v2631_v52, %v1971_v31 }
 0x86f   :  { %v3929_v14 = vmul.f32 -1.442695, %v2661_v1  ;;  %v3930_v4 = vmul.f32 -1.442695, %v2662_v29 }
 0x871   :  { %4305 = vpow2.f32 %v3929_v14 }
 0x872   :  { %4307 = vpow2.f32 %v3930_v4 }
 0x873   :  { %v2644_v47 = vpop.f32.mrf.mxu2  ;;  %v2657_v20 = vpop.f32.mrf.mxu3 }
 0x874   :  { %v2663_v9 = vadd.f32 %v2644_v47, %v2000_v18  ;;  %v2620_v32 = vpop.f32.mrf.mxu0  ;;  %v2633_v33 = vpop.f32.mrf.mxu1  ;;  %v2664_v51 = vadd.f32 %v2657_v20, %v2029_v5 }
 0x876   :  { %v3931_v54 = vmul.f32 -1.442695, %v2663_v9 }
 0x877   :  { %v4306_v21 = vpop.eup %4305 }
 0x878   :  { %v4308_v38 = vpop.eup %4307  ;;  %v2674_v36 = vadd.f32 1.0, %v4306_v21  ;;  %4309 = vpow2.f32 %v3931_v54 }
 0x879   :  { %v2675_v48 = vadd.f32 1.0, %v4308_v38 }
 0x87a   :  { %4311 = vrcp.f32 %v2674_v36  ;;  %v2688_v14 = vand.u32 2147483648, %v2674_v36  ;;  %v2686_v18 = vand.u32 2147483647, %v2674_v36  ;;  %vm2682_vm6 = vweird.f32 %v2674_v36 }
 0x87b   :  { %4313 = vrcp.f32 %v2675_v48  ;;  %v2646_v3 = vpop.f32.mrf.mxu2  ;;  %v2659_v23 = vpop.f32.mrf.mxu3  ;;  %v2703_v4 = vand.u32 2147483648, %v2675_v48  ;;  %v2701_v9 = vand.u32 2147483647, %v2675_v48  ;;  %vm2697_vm7 = vweird.f32 %v2675_v48 }
 0x87c   :  { %v2689_v54 = vor.u32 1.1754944e-38, %v2688_v14  ;;  %vm2687_vm10 = vcmp.eq.f32.partialorder %v2686_v18, 8.507059e+37 }
 0x87d   :  { %v2704_v38 = vor.u32 1.1754944e-38, %v2703_v4  ;;  %vm2702_vm11 = vcmp.eq.f32.partialorder %v2701_v9, 8.507059e+37  ;;  %v5879_v9 = vld [vmem:[#allocation34_spill] sm:$0xff] }
 0x87e   :  { %v4310_v19 = vpop.eup %4309 }
 0x87f   :  { %v2676_v41 = vadd.f32 1.0, %v4310_v19 }
 0x880   :  { %v4312_v28 = vpop.eup %4311 }
 0x881   :  { %v4314_v31 = vpop.eup %4313  ;;  %v2678_v53 = vmul.f32 %v4312_v28, %v2674_v36  ;;  %4315 = vrcp.f32 %v2676_v41  ;;  %vm2683_vm4 = vweird.f32 %v4312_v28  ;;  %vm2712_vm13 = vweird.f32 %v2676_v41 }
 0x882   :  { %v2693_v52 = vmul.f32 %v4314_v31, %v2675_v48  ;;  %4317 = vtanh.f32 %v2664_v51  ;;  %vm2698_vm5 = vweird.f32 %v4314_v31  ;;  %vm2684_vm8 = vmor %vm2682_vm6, %vm2683_vm4 }
 0x883   :  { %v2679_v1 = vsub.f32 1.0, %v2678_v53  ;;  %vm2699_vm9 = vmor %vm2697_vm7, %vm2698_vm5 }
 0x884   :  { %v2694_v29 = vsub.f32 1.0, %v2693_v52 }
 0x885   :  { %v2680_v0 = vmul.f32 %v4312_v28, %v2679_v1 }
 0x886   :  { %v2695_v47 = vmul.f32 %v4314_v31, %v2694_v29  ;;  %v2718_v29 = vand.u32 2147483648, %v2676_v41 }
 0x887   :  { %v4316_v32 = vpop.eup %4315  ;;  %v2681_v33 = vadd.f32 %v4312_v28, %v2680_v0 }
 0x888   :  { %v2708_v20 = vmul.f32 %v4316_v32, %v2676_v41  ;;  %v2696_v21 = vadd.f32 %v4314_v31, %v2695_v47  ;;  %v4318_v23 = vpop.eup %4317  ;;  %vm2713_vm12 = vweird.f32 %v4316_v32  ;;  %v2719_v4 = vor.u32 1.1754944e-38, %v2718_v29 }
 0x889   :  { %v2685_v3 = vsel %vm2684_vm8, %v4312_v28, %v2681_v33  ;;  %v2716_v28 = vand.u32 2147483647, %v2676_v41  ;;  %vm2714_vm14 = vmor %vm2712_vm13, %vm2713_vm12 }
 0x88a   :  { %v2709_v19 = vsub.f32 1.0, %v2708_v20  ;;  %v2690_v25 = vsel %vm2687_vm10, %v2689_v54, %v2685_v3  ;;  %v2700_v5 = vsel %vm2699_vm9, %v4314_v31, %v2696_v21 }
 0x88b   :  { %v2705_v51 = vsel %vm2702_vm11, %v2704_v38, %v2700_v5  ;;  %v2724_v53 = vmul.f32 %v4318_v23, %v2690_v25  ;;  %vm2717_vm15 = vcmp.eq.f32.partialorder %v2716_v28, 8.507059e+37  ;;  %v5880_v23 = vld [vmem:[#allocation36_spill] sm:$0xff] }
 0x88c   :  { %v2710_v52 = vmul.f32 %v4316_v32, %v2709_v19  ;;  %v2723_v1 = vmul.f32 %v2705_v51, %v5592_v49  ;;  %v5878_v49 = vld [vmem:[#allocation33_spill] sm:$0xff]  ;;  %v2003_v19 = vadd.f32 %v5880_v23, %v5498_v42 }
 0x88d   :  { %v1945_v41 = vadd.f32 %v5878_v49, %v5488_v43 }
 0x88e   :  { %v5636_v36 = vadd.f32 %v2724_v53, %v2723_v1  ;;  %v2711_v48 = vadd.f32 %v4316_v32, %v2710_v52 }
 0x890   :  { %4319 = vtanh.f32 %v5636_v36  ;;  %v2715_v14 = vsel %vm2714_vm14, %v4316_v32, %v2711_v48  ;;  %v1974_v32 = vadd.f32 %v5879_v9, %v5490_v40 }
 0x891   :  { %v2720_v0 = vsel %vm2717_vm15, %v2719_v4, %v2715_v14 }
 0x896   :  { %v4320_v31 = vpop.eup %4319 }
 0x897   :  { %v2727_v18 = vmul.f32 %v4320_v31, %v2720_v0 }
 0x899   :  { %v2732_v47 = vpack.c.bf16 %v2727_v18, %v2727_v18  ;;  %v5881_v18 = vld [vmem:[#allocation35_spill] sm:$0xff] }
 0x89b   :  { %2741 = vmatmul.bf16.vlgmr.msra.gmra.mxu0 %v2732_v47  ;;  %2754 = vmatmul.bf16.vlgmr.msra.gmra.mxu1 %v2732_v47 }
 0x89c   :  { %2767 = vmatmul.bf16.vlgmr.msra.gmra.mxu2 %v2732_v47  ;;  %2780 = vmatmul.bf16.vlgmr.msra.gmra.mxu3 %v2732_v47  ;;  %v2032_v47 = vadd.f32 %v5881_v18, %v5868_v7 }
 0x89d   :  { %2981 = vmatpush.bf16.msra.mxu0 %v5216_v61  ;;  %2994 = vmatpush.bf16.msra.mxu1 %v5218_v12 }
 0x89e   :  { %3007 = vmatpush.bf16.msra.mxu2 %v5226_v16  ;;  %3020 = vmatpush.bf16.msra.mxu3 %v5229_v27 }
 0x8a1   :  { %2982 = vmatpush.bf16.msra.mxu0 %v5236_v8  ;;  %2995 = vmatpush.bf16.msra.mxu1 %v5238_v45 }
 0x8a2   :  { %3008 = vmatpush.bf16.msra.mxu2 %v5240_v22  ;;  %3021 = vmatpush.bf16.msra.mxu3 %v5255_v34 }
 0x8a5   :  { %2983 = vmatpush.bf16.msra.mxu0 %v5245_v35  ;;  %2996 = vmatpush.bf16.msra.mxu1 %v5249_v46 }
 0x8a6   :  { %3009 = vmatpush.bf16.msra.mxu2 %v5251_v39  ;;  %3022 = vmatpush.bf16.msra.mxu3 %v5267_v26 }
 0x8a9   :  { %2984 = vmatpush.bf16.msra.mxu0 %v5258_v59  ;;  %2997 = vmatpush.bf16.msra.mxu1 %v5262_v55 }
 0x8aa   :  { %3010 = vmatpush.bf16.msra.mxu2 %v5264_v62  ;;  %3023 = vmatpush.bf16.msra.mxu3 %v5284_v13 }
 0x8ad   :  { %2985 = vmatpush.bf16.msra.mxu0 %v5272_v44  ;;  %2998 = vmatpush.bf16.msra.mxu1 %v5278_v56 }
 0x8ae   :  { %3011 = vmatpush.bf16.msra.mxu2 %v5280_v60  ;;  %3024 = vmatpush.bf16.msra.mxu3 %v5299_v10 }
 0x8b1   :  { %2986 = vmatpush.bf16.msra.mxu0 %v5288_v2  ;;  %2999 = vmatpush.bf16.msra.mxu1 %v5292_v58 }
 0x8b2   :  { %3012 = vmatpush.bf16.msra.mxu2 %v5294_v50  ;;  %3025 = vmatpush.bf16.msra.mxu3 %v5325_v30 }
 0x8b5   :  { %2987 = vmatpush.bf16.msra.mxu0 %v5307_v17  ;;  %3000 = vmatpush.bf16.msra.mxu1 %v5316_v11 }
 0x8b6   :  { %3013 = vmatpush.bf16.msra.mxu2 %v5318_v63  ;;  %3026 = vmatpush.bf16.msra.mxu3 %v5341_v6 }
 0x8b9   :  { %2988 = vmatpush.bf16.msra.mxu0 %v5337_v57  ;;  %3001 = vmatpush.bf16.msra.mxu1 %v5339_v37 }
 0x8ba   :  { %3014 = vmatpush.bf16.msra.mxu2 %v5345_v15  ;;  %3027 = vmatpush.bf16.msra.mxu3 %v5360_v24 }
 0x918   :  { %v2742_v33 = vpop.f32.mrf.mxu0  ;;  %v2755_v20 = vpop.f32.mrf.mxu1 }
 0x919   :  { %v2785_v54 = vadd.f32 %v2742_v33, %v1945_v41  ;;  %v2786_v21 = vadd.f32 %v2755_v20, %v1974_v32 }
 0x91b   :  { %v3932_v38 = vmul.f32 -1.442695, %v2785_v54  ;;  %v3933_v3 = vmul.f32 -1.442695, %v2786_v21 }
 0x91d   :  { %4321 = vpow2.f32 %v3932_v38 }
 0x91e   :  { %4323 = vpow2.f32 %v3933_v3 }
 0x91f   :  { %v2768_v25 = vpop.f32.mrf.mxu2  ;;  %v2781_v5 = vpop.f32.mrf.mxu3 }
 0x920   :  { %v2787_v51 = vadd.f32 %v2768_v25, %v2003_v19  ;;  %v2744_v53 = vpop.f32.mrf.mxu0  ;;  %v2757_v52 = vpop.f32.mrf.mxu1  ;;  %v2788_v9 = vadd.f32 %v2781_v5, %v2032_v47 }
 0x922   :  { %v3934_v1 = vmul.f32 -1.442695, %v2787_v51 }
 0x923   :  { %v4322_v48 = vpop.eup %4321 }
 0x924   :  { %v4324_v29 = vpop.eup %4323  ;;  %v2798_v28 = vadd.f32 1.0, %v4322_v48  ;;  %4325 = vpow2.f32 %v3934_v1 }
 0x925   :  { %v2799_v14 = vadd.f32 1.0, %v4324_v29 }
 0x926   :  { %4327 = vrcp.f32 %v2798_v28  ;;  %v2812_v38 = vand.u32 2147483648, %v2798_v28  ;;  %v2810_v19 = vand.u32 2147483647, %v2798_v28  ;;  %vm2806_vm2 = vweird.f32 %v2798_v28 }
 0x927   :  { %4329 = vrcp.f32 %v2799_v14  ;;  %v2770_v4 = vpop.f32.mrf.mxu2  ;;  %v2783_v31 = vpop.f32.mrf.mxu3  ;;  %v2827_v3 = vand.u32 2147483648, %v2799_v14  ;;  %v2825_v51 = vand.u32 2147483647, %v2799_v14  ;;  %vm2821_vm3 = vweird.f32 %v2799_v14 }
 0x928   :  { %v2813_v1 = vor.u32 1.1754944e-38, %v2812_v38  ;;  %vm2811_vm6 = vcmp.eq.f32.partialorder %v2810_v19, 8.507059e+37 }
 0x929   :  { %v2828_v29 = vor.u32 1.1754944e-38, %v2827_v3  ;;  %vm2826_vm7 = vcmp.eq.f32.partialorder %v2825_v51, 8.507059e+37 }
 0x92a   :  { %v4326_v0 = vpop.eup %4325 }
 0x92b   :  { %v2800_v49 = vadd.f32 1.0, %v4326_v0 }
 0x92c   :  { %v4328_v41 = vpop.eup %4327 }
 0x92d   :  { %v4330_v32 = vpop.eup %4329  ;;  %v2802_v33 = vmul.f32 %v4328_v41, %v2798_v28  ;;  %4331 = vrcp.f32 %v2800_v49  ;;  %vm2807_vm0 = vweird.f32 %v4328_v41  ;;  %vm2836_vm9 = vweird.f32 %v2800_v49 }
 0x92e   :  { %v2817_v20 = vmul.f32 %v4330_v32, %v2799_v14  ;;  %4333 = vtanh.f32 %v2788_v9  ;;  %vm2822_vm1 = vweird.f32 %v4330_v32  ;;  %vm2808_vm4 = vmor %vm2806_vm2, %vm2807_vm0 }
 0x92f   :  { %v2803_v54 = vsub.f32 1.0, %v2802_v33  ;;  %vm2823_vm5 = vmor %vm2821_vm3, %vm2822_vm1 }
 0x930   :  { %v2818_v21 = vsub.f32 1.0, %v2817_v20 }
 0x931   :  { %v2804_v23 = vmul.f32 %v4328_v41, %v2803_v54 }
 0x932   :  { %v2819_v25 = vmul.f32 %v4330_v32, %v2818_v21  ;;  %v2842_v21 = vand.u32 2147483648, %v2800_v49 }
 0x933   :  { %v4332_v53 = vpop.eup %4331  ;;  %v2805_v52 = vadd.f32 %v4328_v41, %v2804_v23 }
 0x934   :  { %v2832_v5 = vmul.f32 %v4332_v53, %v2800_v49  ;;  %v2820_v48 = vadd.f32 %v4330_v32, %v2819_v25  ;;  %v4334_v31 = vpop.eup %4333  ;;  %vm2837_vm8 = vweird.f32 %v4332_v53  ;;  %v2843_v3 = vor.u32 1.1754944e-38, %v2842_v21 }
 0x935   :  { %v2809_v4 = vsel %vm2808_vm4, %v4328_v41, %v2805_v52  ;;  %v2840_v41 = vand.u32 2147483647, %v2800_v49  ;;  %vm2838_vm10 = vmor %vm2836_vm9, %vm2837_vm8 }
 0x936   :  { %v2833_v0 = vsub.f32 1.0, %v2832_v5  ;;  %v2814_v18 = vsel %vm2811_vm6, %v2813_v1, %v2809_v4  ;;  %v2824_v47 = vsel %vm2823_vm5, %v4330_v32, %v2820_v48 }
 0x937   :  { %v2829_v9 = vsel %vm2826_vm7, %v2828_v29, %v2824_v47  ;;  %v2848_v33 = vmul.f32 %v4334_v31, %v2814_v18  ;;  %vm2841_vm11 = vcmp.eq.f32.partialorder %v2840_v41, 8.507059e+37 }
 0x938   :  { %v2834_v20 = vmul.f32 %v4332_v53, %v2833_v0  ;;  %v2847_v54 = vmul.f32 %v2829_v9, %v5636_v36 }
 0x93a   :  { %v5680_v28 = vadd.f32 %v2848_v33, %v2847_v54  ;;  %v2835_v14 = vadd.f32 %v4332_v53, %v2834_v20 }
 0x93c   :  { %4335 = vtanh.f32 %v5680_v28  ;;  %v2839_v38 = vsel %vm2838_vm10, %v4332_v53, %v2835_v14 }
 0x93d   :  { %v2844_v23 = vsel %vm2841_vm11, %v2843_v3, %v2839_v38 }
 0x942   :  { %v4336_v32 = vpop.eup %4335 }
 0x943   :  { %v2851_v19 = vmul.f32 %v4336_v32, %v2844_v23 }
 0x945   :  { %v2856_v25 = vpack.c.bf16 %v2851_v19, %v2851_v19 }
 0x947   :  { %2865 = vmatmul.bf16.vlgmr.msrb.gmra.mxu0 %v2856_v25  ;;  %2878 = vmatmul.bf16.vlgmr.msrb.gmra.mxu1 %v2856_v25 }
 0x948   :  { %2891 = vmatmul.bf16.vlgmr.msrb.gmra.mxu2 %v2856_v25  ;;  %2904 = vmatmul.bf16.vlgmr.msrb.gmra.mxu3 %v2856_v25 }
 0x949   :  { %3105 = vmatpush.bf16.msrb.mxu0 %v5216_v61  ;;  %3118 = vmatpush.bf16.msrb.mxu1 %v5218_v12  ;;  %v5882_v61 = vld [vmem:[#allocation37_spill] sm:$0xff] }
 0x94a   :  { %3131 = vmatpush.bf16.msrb.mxu2 %v5226_v16  ;;  %3144 = vmatpush.bf16.msrb.mxu3 %v5229_v27  ;;  %v1947_v12 = vadd.f32 %v5882_v61, %v5488_v43  ;;  %v5883_v16 = vld [vmem:[#allocation38_spill] sm:$0xff] }
 0x94b   :  { %v1976_v27 = vadd.f32 %v5883_v16, %v5490_v40 }
 0x94d   :  { %3106 = vmatpush.bf16.msrb.mxu0 %v5236_v8  ;;  %3119 = vmatpush.bf16.msrb.mxu1 %v5238_v45 }
 0x94e   :  { %3132 = vmatpush.bf16.msrb.mxu2 %v5240_v22  ;;  %3145 = vmatpush.bf16.msrb.mxu3 %v5255_v34  ;;  %v5884_v34 = vld [vmem:[#allocation39_spill] sm:$0xff] }
 0x951   :  { %3107 = vmatpush.bf16.msrb.mxu0 %v5245_v35  ;;  %3120 = vmatpush.bf16.msrb.mxu1 %v5249_v46 }
 0x952   :  { %3133 = vmatpush.bf16.msrb.mxu2 %v5251_v39  ;;  %3146 = vmatpush.bf16.msrb.mxu3 %v5267_v26 }
 0x955   :  { %3108 = vmatpush.bf16.msrb.mxu0 %v5258_v59  ;;  %3121 = vmatpush.bf16.msrb.mxu1 %v5262_v55  ;;  %v2005_v59 = vadd.f32 %v5884_v34, %v5498_v42 }
 0x956   :  { %3134 = vmatpush.bf16.msrb.mxu2 %v5264_v62  ;;  %3147 = vmatpush.bf16.msrb.mxu3 %v5284_v13 }
 0x959   :  { %3109 = vmatpush.bf16.msrb.mxu0 %v5272_v44  ;;  %3122 = vmatpush.bf16.msrb.mxu1 %v5278_v56 }
 0x95a   :  { %3135 = vmatpush.bf16.msrb.mxu2 %v5280_v60  ;;  %3148 = vmatpush.bf16.msrb.mxu3 %v5299_v10 }
 0x95d   :  { %3110 = vmatpush.bf16.msrb.mxu0 %v5288_v2  ;;  %3123 = vmatpush.bf16.msrb.mxu1 %v5292_v58 }
 0x95e   :  { %3136 = vmatpush.bf16.msrb.mxu2 %v5294_v50  ;;  %3149 = vmatpush.bf16.msrb.mxu3 %v5325_v30 }
 0x961   :  { %3111 = vmatpush.bf16.msrb.mxu0 %v5307_v17  ;;  %3124 = vmatpush.bf16.msrb.mxu1 %v5316_v11 }
 0x962   :  { %3137 = vmatpush.bf16.msrb.mxu2 %v5318_v63  ;;  %3150 = vmatpush.bf16.msrb.mxu3 %v5341_v6  ;;  %v5885_v63 = vld [vmem:[#allocation40_spill] sm:$0xff] }
 0x963   :  { %v2034_v30 = vadd.f32 %v5885_v63, %v5868_v7 }
 0x965   :  { %3112 = vmatpush.bf16.msrb.mxu0 %v5337_v57  ;;  %3125 = vmatpush.bf16.msrb.mxu1 %v5339_v37 }
 0x966   :  { %3138 = vmatpush.bf16.msrb.mxu2 %v5345_v15  ;;  %3151 = vmatpush.bf16.msrb.mxu3 %v5360_v24 }
 0x9c4   :  { %v2866_v8 = vpop.f32.mrf.mxu0  ;;  %v2879_v45 = vpop.f32.mrf.mxu1 }
 0x9c5   :  { %v2909_v22 = vadd.f32 %v2866_v8, %v1947_v12  ;;  %v2910_v35 = vadd.f32 %v2879_v45, %v1976_v27 }
 0x9c7   :  { %v3935_v46 = vmul.f32 -1.442695, %v2909_v22  ;;  %v3936_v39 = vmul.f32 -1.442695, %v2910_v35 }
 0x9c9   :  { %4337 = vpow2.f32 %v3935_v46  ;;  %v5887_v46 = vld [vmem:[#allocation42_spill] sm:$0xff] }
 0x9ca   :  { %4339 = vpow2.f32 %v3936_v39  ;;  %v1979_v39 = vadd.f32 %v5887_v46, %v5490_v40 }
 0x9cb   :  { %v2892_v55 = vpop.f32.mrf.mxu2  ;;  %v2905_v62 = vpop.f32.mrf.mxu3 }
 0x9cc   :  { %v2911_v26 = vadd.f32 %v2892_v55, %v2005_v59  ;;  %v2868_v44 = vpop.f32.mrf.mxu0  ;;  %v2881_v56 = vpop.f32.mrf.mxu1  ;;  %v2912_v6 = vadd.f32 %v2905_v62, %v2034_v30 }
 0x9cd   :  { %v5888_v56 = vld [vmem:[#allocation44_spill] sm:$0xff] }
 0x9ce   :  { %v3937_v60 = vmul.f32 -1.442695, %v2911_v26 }
 0x9cf   :  { %v4338_v13 = vpop.eup %4337 }
 0x9d0   :  { %v4340_v2 = vpop.eup %4339  ;;  %v2922_v58 = vadd.f32 1.0, %v4338_v13  ;;  %4341 = vpow2.f32 %v3937_v60  ;;  %v2008_v60 = vadd.f32 %v5888_v56, %v5498_v42  ;;  %v5890_v56 = vld [vmem:[#allocation22_spill] sm:$0xff] }
 0x9d1   :  { %v2923_v50 = vadd.f32 1.0, %v4340_v2 }
 0x9d2   :  { %4343 = vrcp.f32 %v2922_v58  ;;  %v2936_v53 = vand.u32 2147483648, %v2922_v58  ;;  %v2934_v1 = vand.u32 2147483647, %v2922_v58  ;;  %vm2930_vm14 = vweird.f32 %v2922_v58 }
 0x9d3   :  { %4345 = vrcp.f32 %v2923_v50  ;;  %v2894_v10 = vpop.f32.mrf.mxu2  ;;  %v2907_v17 = vpop.f32.mrf.mxu3  ;;  %v2951_v52 = vand.u32 2147483648, %v2923_v50  ;;  %v2949_v29 = vand.u32 2147483647, %v2923_v50  ;;  %vm2945_vm15 = vweird.f32 %v2923_v50 }
 0x9d4   :  { %v2937_v18 = vor.u32 1.1754944e-38, %v2936_v53  ;;  %vm2935_vm2 = vcmp.eq.f32.partialorder %v2934_v1, 8.507059e+37 }
 0x9d5   :  { %v2952_v9 = vor.u32 1.1754944e-38, %v2951_v52  ;;  %vm2950_vm3 = vcmp.eq.f32.partialorder %v2949_v29, 8.507059e+37 }
 0x9d6   :  { %v4342_v11 = vpop.eup %4341 }
 0x9d7   :  { %v2924_v57 = vadd.f32 1.0, %v4342_v11 }
 0x9d8   :  { %v4344_v37 = vpop.eup %4343 }
 0x9d9   :  { %v4346_v15 = vpop.eup %4345  ;;  %v2926_v24 = vmul.f32 %v4344_v37, %v2922_v58  ;;  %4347 = vrcp.f32 %v2924_v57  ;;  %vm2931_vm12 = vweird.f32 %v4344_v37  ;;  %v2966_v25 = vand.u32 2147483648, %v2924_v57 }
 0x9da   :  { %v2941_v36 = vmul.f32 %v4346_v15, %v2923_v50  ;;  %4349 = vtanh.f32 %v2912_v6  ;;  %vm2946_vm13 = vweird.f32 %v4346_v15  ;;  %vm2932_vm0 = vmor %vm2930_vm14, %vm2931_vm12  ;;  %vm2960_vm5 = vweird.f32 %v2924_v57 }
 0x9db   :  { %v2927_v49 = vsub.f32 1.0, %v2926_v24  ;;  %vm2947_vm1 = vmor %vm2945_vm15, %vm2946_vm13  ;;  %v2964_v61 = vand.u32 2147483647, %v2924_v57  ;;  %v2967_v16 = vor.u32 1.1754944e-38, %v2966_v25  ;;  %v5889_v24 = vld [vmem:[#allocation25_spill] sm:$0xff] }
 0x9dc   :  { %v2942_v51 = vsub.f32 1.0, %v2941_v36  ;;  %v2037_v36 = vadd.f32 %v5889_v24, %v5868_v7 }
 0x9dd   :  { %v2928_v5 = vmul.f32 %v4344_v37, %v2927_v49  ;;  %vm2965_vm7 = vcmp.eq.f32.partialorder %v2964_v61, 8.507059e+37 }
 0x9de   :  { %v2943_v48 = vmul.f32 %v4346_v15, %v2942_v51 }
 0x9df   :  { %v4348_v4 = vpop.eup %4347  ;;  %v2929_v31 = vadd.f32 %v4344_v37, %v2928_v5 }
 0x9e0   :  { %v2956_v0 = vmul.f32 %v4348_v4, %v2924_v57  ;;  %v2944_v47 = vadd.f32 %v4346_v15, %v2943_v48  ;;  %v4350_v20 = vpop.eup %4349  ;;  %vm2961_vm4 = vweird.f32 %v4348_v4 }
 0x9e1   :  { %v2933_v33 = vsel %vm2932_vm0, %v4344_v37, %v2929_v31  ;;  %vm2962_vm6 = vmor %vm2960_vm5, %vm2961_vm4 }
 0x9e2   :  { %v2957_v54 = vsub.f32 1.0, %v2956_v0  ;;  %v2938_v14 = vsel %vm2935_vm2, %v2937_v18, %v2933_v33  ;;  %v2948_v21 = vsel %vm2947_vm1, %v4346_v15, %v2944_v47 }
 0x9e3   :  { %v2953_v41 = vsel %vm2950_vm3, %v2952_v9, %v2948_v21  ;;  %v2972_v38 = vmul.f32 %v4350_v20, %v2938_v14 }
 0x9e4   :  { %v2958_v3 = vmul.f32 %v4348_v4, %v2957_v54  ;;  %v2971_v32 = vmul.f32 %v2953_v41, %v5680_v28  ;;  %v5886_v28 = vld [vmem:[#allocation41_spill] sm:$0xff] }
 0x9e5   :  { %v1950_v35 = vadd.f32 %v5886_v28, %v5488_v43 }
 0x9e6   :  { %v5724_v23 = vadd.f32 %v2972_v38, %v2971_v32  ;;  %v2959_v19 = vadd.f32 %v4348_v4, %v2958_v3 }
 0x9e8   :  { %4351 = vtanh.f32 %v5724_v23  ;;  %v2963_v12 = vsel %vm2962_vm6, %v4348_v4, %v2959_v19 }
 0x9e9   :  { %v2968_v8 = vsel %vm2965_vm7, %v2967_v16, %v2963_v12 }
 0x9ee   :  { %v4352_v27 = vpop.eup %4351 }
 0x9ef   :  { %v2975_v45 = vmul.f32 %v4352_v27, %v2968_v8 }
 0x9f1   :  { %v2980_v22 = vpack.c.bf16 %v2975_v45, %v2975_v45 }
 0x9f3   :  { %2989 = vmatmul.bf16.vlgmr.msra.gmra.mxu0 %v2980_v22  ;;  %3002 = vmatmul.bf16.vlgmr.msra.gmra.mxu1 %v2980_v22 }
 0x9f4   :  { %3015 = vmatmul.bf16.vlgmr.msra.gmra.mxu2 %v2980_v22  ;;  %3028 = vmatmul.bf16.vlgmr.msra.gmra.mxu3 %v2980_v22 }
 0xa70   :  { %v2990_v34 = vpop.f32.mrf.mxu0  ;;  %v3003_v59 = vpop.f32.mrf.mxu1 }
 0xa71   :  { %v3033_v55 = vadd.f32 %v2990_v34, %v1950_v35  ;;  %v3034_v62 = vadd.f32 %v3003_v59, %v1979_v39 }
 0xa73   :  { %v3938_v26 = vmul.f32 -1.442695, %v3033_v55  ;;  %v3939_v44 = vmul.f32 -1.442695, %v3034_v62  ;;  %v4111_v62 = vld [vmem:[#allocation12 + $0x30] sm:$0xff] }
 0xa75   :  { %4353 = vpow2.f32 %v3938_v26  ;;  %v4110_v26 = vld [vmem:[#allocation12 + $0x28] sm:$0xff] }
 0xa76   :  { %4355 = vpow2.f32 %v3939_v44  ;;  %v4109_v44 = vld [vmem:[#allocation12 + $0x20] sm:$0xff] }
 0xa77   :  { %v3016_v13 = vpop.f32.mrf.mxu2  ;;  %v3029_v2 = vpop.f32.mrf.mxu3 }
 0xa78   :  { %v3035_v58 = vadd.f32 %v3016_v13, %v2008_v60  ;;  %v2992_v50 = vpop.f32.mrf.mxu0  ;;  %v3005_v10 = vpop.f32.mrf.mxu1  ;;  %v3036_v53 = vadd.f32 %v3029_v2, %v2037_v36  ;;  %v1952_v60 = vadd.f32 %v5890_v56, %v5488_v43  ;;  %v5891_v13 = vld [vmem:[#allocation43_spill] sm:$0xff] }
 0xa79   :  { %v1981_v2 = vadd.f32 %v5891_v13, %v5490_v40 }
 0xa7a   :  { %v3940_v17 = vmul.f32 -1.442695, %v3035_v58  ;;  %v4108_v58 = vld [vmem:[#allocation12 + $0x18] sm:$0xff] }
 0xa7b   :  { %v4354_v11 = vpop.eup %4353 }
 0xa7c   :  { %v4356_v63 = vpop.eup %4355  ;;  %v3046_v30 = vadd.f32 1.0, %v4354_v11  ;;  %4357 = vpow2.f32 %v3940_v17 }
 0xa7d   :  { %v3047_v57 = vadd.f32 1.0, %v4356_v63 }
 0xa7e   :  { %4359 = vrcp.f32 %v3046_v30  ;;  %v3060_v4 = vand.u32 2147483648, %v3046_v30  ;;  %v3058_v18 = vand.u32 2147483647, %v3046_v30  ;;  %vm3054_vm10 = vweird.f32 %v3046_v30 }
 0xa7f   :  { %4361 = vrcp.f32 %v3047_v57  ;;  %v3018_v37 = vpop.f32.mrf.mxu2  ;;  %v3031_v6 = vpop.f32.mrf.mxu3  ;;  %v3075_v31 = vand.u32 2147483648, %v3047_v57  ;;  %v3073_v9 = vand.u32 2147483647, %v3047_v57  ;;  %vm3069_vm11 = vweird.f32 %v3047_v57 }
 0xa80   :  { %v3061_v14 = vor.u32 1.1754944e-38, %v3060_v4  ;;  %vm3059_vm14 = vcmp.eq.f32.partialorder %v3058_v18, 8.507059e+37  ;;  %v4106_v37 = vld [vmem:[#allocation12 + $0x8] sm:$0xff]  ;;  %v5892_v6 = vld [vmem:[#allocation45_spill] sm:$0xff] }
 0xa81   :  { %v3076_v41 = vor.u32 1.1754944e-38, %v3075_v31  ;;  %vm3074_vm15 = vcmp.eq.f32.partialorder %v3073_v9, 8.507059e+37  ;;  %v5893_v31 = vld [vmem:[#allocation46_spill] sm:$0xff] }
 0xa82   :  { %v4358_v15 = vpop.eup %4357 }
 0xa83   :  { %v3048_v49 = vadd.f32 1.0, %v4358_v15  ;;  %v2010_v15 = vadd.f32 %v5892_v6, %v5498_v42 }
 0xa84   :  { %v4360_v51 = vpop.eup %4359 }
 0xa85   :  { %v4362_v52 = vpop.eup %4361  ;;  %v3050_v5 = vmul.f32 %v4360_v51, %v3046_v30  ;;  %4363 = vrcp.f32 %v3048_v49  ;;  %vm3055_vm8 = vweird.f32 %v4360_v51  ;;  %v3090_v22 = vand.u32 2147483648, %v3048_v49 }
 0xa86   :  { %v3065_v1 = vmul.f32 %v4362_v52, %v3047_v57  ;;  %4365 = vtanh.f32 %v3036_v53  ;;  %vm3070_vm9 = vweird.f32 %v4362_v52  ;;  %vm3056_vm12 = vmor %vm3054_vm10, %vm3055_vm8  ;;  %vm3084_vm1 = vweird.f32 %v3048_v49  ;;  %v4107_v57 = vld [vmem:[#allocation12 + $0x10] sm:$0xff] }
 0xa87   :  { %v3051_v48 = vsub.f32 1.0, %v3050_v5  ;;  %vm3071_vm13 = vmor %vm3069_vm11, %vm3070_vm9  ;;  %v3088_v28 = vand.u32 2147483647, %v3048_v49  ;;  %v3091_v46 = vor.u32 1.1754944e-38, %v3090_v22 }
 0xa88   :  { %v3066_v29 = vsub.f32 1.0, %v3065_v1 }
 0xa89   :  { %v3052_v0 = vmul.f32 %v4360_v51, %v3051_v48  ;;  %vm3089_vm3 = vcmp.eq.f32.partialorder %v3088_v28, 8.507059e+37 }
 0xa8a   :  { %v3067_v47 = vmul.f32 %v4362_v52, %v3066_v29 }
 0xa8b   :  { %v4364_v33 = vpop.eup %4363  ;;  %v3053_v20 = vadd.f32 %v4360_v51, %v3052_v0  ;;  %v2039_v0 = vadd.f32 %v5893_v31, %v5868_v7 }
 0xa8c   :  { %v3080_v54 = vmul.f32 %v4364_v33, %v3048_v49  ;;  %v3068_v21 = vadd.f32 %v4362_v52, %v3067_v47  ;;  %v4366_v3 = vpop.eup %4365  ;;  %vm3085_vm0 = vweird.f32 %v4364_v33 }
 0xa8d   :  { %v3057_v38 = vsel %vm3056_vm12, %v4360_v51, %v3053_v20  ;;  %vm3086_vm2 = vmor %vm3084_vm1, %vm3085_vm0  ;;  %v4105_v51 = vld [vmem:[#allocation12] sm:$0xff] }
 0xa8e   :  { %v3081_v32 = vsub.f32 1.0, %v3080_v54  ;;  %v3062_v19 = vsel %vm3059_vm14, %v3061_v14, %v3057_v38  ;;  %v3072_v25 = vsel %vm3071_vm13, %v4362_v52, %v3068_v21 }
 0xa8f   :  { %v3077_v61 = vsel %vm3074_vm15, %v3076_v41, %v3072_v25  ;;  %v3096_v12 = vmul.f32 %v4366_v3, %v3062_v19 }
 0xa90   :  { %v3082_v16 = vmul.f32 %v4364_v33, %v3081_v32  ;;  %v3095_v27 = vmul.f32 %v3077_v61, %v5724_v23  ;;  %v4112_v23 = vld [vmem:[#allocation12 + $0x38] sm:$0xff] }
 0xa91   :  { %3297 = vmatpush.bf16.msra.mxu0 %v4112_v23 }
 0xa92   :  { %v5736_v8 = vadd.f32 %v3096_v12, %v3095_v27  ;;  %v3083_v45 = vadd.f32 %v4364_v33, %v3082_v16 }
 0xa94   :  { %4367 = vtanh.f32 %v5736_v8  ;;  %v3087_v35 = vsel %vm3086_vm2, %v4364_v33, %v3083_v45 }
 0xa95   :  { %v3092_v34 = vsel %vm3089_vm3, %v3091_v46, %v3087_v35  ;;  %3298 = vmatpush.bf16.msra.mxu0 %v4111_v62 }
 0xa99   :  { %3299 = vmatpush.bf16.msra.mxu0 %v4110_v26 }
 0xa9a   :  { %v4368_v39 = vpop.eup %4367 }
 0xa9b   :  { %v3099_v59 = vmul.f32 %v4368_v39, %v3092_v34 }
 0xa9d   :  { %v3104_v55 = vpack.c.bf16 %v3099_v59, %v3099_v59  ;;  %3300 = vmatpush.bf16.msra.mxu0 %v4109_v44 }
 0xa9f   :  { %3113 = vmatmul.bf16.vlgmr.msrb.gmra.mxu0 %v3104_v55  ;;  %3126 = vmatmul.bf16.vlgmr.msrb.gmra.mxu1 %v3104_v55 }
 0xaa0   :  { %3139 = vmatmul.bf16.vlgmr.msrb.gmra.mxu2 %v3104_v55  ;;  %3152 = vmatmul.bf16.vlgmr.msrb.gmra.mxu3 %v3104_v55 }
 0xaa1   :  { %3301 = vmatpush.bf16.msra.mxu0 %v4108_v58 }
 0xaa5   :  { %3302 = vmatpush.bf16.msra.mxu0 %v4107_v57 }
 0xaa9   :  { %3303 = vmatpush.bf16.msra.mxu0 %v4106_v37 }
 0xaad   :  { %3304 = vmatpush.bf16.msra.mxu0 %v4105_v51 }
 0xb1c   :  { %v3114_v50 = vpop.f32.mrf.mxu0  ;;  %v3127_v10 = vpop.f32.mrf.mxu1 }
 0xb1d   :  { %v3157_v17 = vadd.f32 %v3114_v50, %v1952_v60  ;;  %v3158_v11 = vadd.f32 %v3127_v10, %v1981_v2 }
 0xb1f   :  { %v3941_v63 = vmul.f32 -1.442695, %v3157_v17  ;;  %v3942_v30 = vmul.f32 -1.442695, %v3158_v11 }
 0xb21   :  { %4369 = vpow2.f32 %v3941_v63 }
 0xb22   :  { %4371 = vpow2.f32 %v3942_v30 }
 0xb23   :  { %v3140_v43 = vpop.f32.mrf.mxu2  ;;  %v3153_v24 = vpop.f32.mrf.mxu3 }
 0xb24   :  { %v3159_v36 = vadd.f32 %v3140_v43, %v2010_v15  ;;  %v3116_v40 = vpop.f32.mrf.mxu0  ;;  %v3129_v49 = vpop.f32.mrf.mxu1  ;;  %v3160_v9 = vadd.f32 %v3153_v24, %v2039_v0 }
 0xb26   :  { %v3943_v53 = vmul.f32 -1.442695, %v3159_v36 }
 0xb27   :  { %v4370_v52 = vpop.eup %4369 }
 0xb28   :  { %v4372_v5 = vpop.eup %4371  ;;  %v3170_v1 = vadd.f32 1.0, %v4370_v52  ;;  %4373 = vpow2.f32 %v3943_v53 }
 0xb29   :  { %v3171_v48 = vadd.f32 1.0, %v4372_v5 }
 0xb2a   :  { %4375 = vrcp.f32 %v3170_v1  ;;  %v3184_v41 = vand.u32 2147483648, %v3170_v1  ;;  %v3182_v32 = vand.u32 2147483647, %v3170_v1  ;;  %vm3178_vm6 = vweird.f32 %v3170_v1 }
 0xb2b   :  { %4377 = vrcp.f32 %v3171_v48  ;;  %v3142_v29 = vpop.f32.mrf.mxu2  ;;  %v3155_v4 = vpop.f32.mrf.mxu3  ;;  %v3199_v38 = vand.u32 2147483648, %v3171_v48  ;;  %v3197_v25 = vand.u32 2147483647, %v3171_v48  ;;  %vm3193_vm7 = vweird.f32 %v3171_v48 }
 0xb2c   :  { %v3185_v16 = vor.u32 1.1754944e-38, %v3184_v41  ;;  %vm3183_vm10 = vcmp.eq.f32.partialorder %v3182_v32, 8.507059e+37 }
 0xb2d   :  { %v3200_v45 = vor.u32 1.1754944e-38, %v3199_v38  ;;  %vm3198_vm11 = vcmp.eq.f32.partialorder %v3197_v25, 8.507059e+37 }
 0xb2e   :  { %v4374_v42 = vpop.eup %4373 }
 0xb2f   :  { %v3172_v18 = vadd.f32 1.0, %v4374_v42 }
 0xb30   :  { %v4376_v47 = vpop.eup %4375 }
 0xb31   :  { %v4378_v33 = vpop.eup %4377  ;;  %v3174_v20 = vmul.f32 %v4376_v47, %v3170_v1  ;;  %4379 = vrcp.f32 %v3172_v18  ;;  %vm3179_vm4 = vweird.f32 %v4376_v47  ;;  %v3214_v44 = vand.u32 2147483648, %v3172_v18 }
 0xb32   :  { %v3189_v54 = vmul.f32 %v4378_v33, %v3171_v48  ;;  %4381 = vtanh.f32 %v3160_v9  ;;  %vm3194_vm5 = vweird.f32 %v4378_v33  ;;  %vm3180_vm8 = vmor %vm3178_vm6, %vm3179_vm4  ;;  %vm3208_vm13 = vweird.f32 %v3172_v18 }
 0xb33   :  { %v3175_v14 = vsub.f32 1.0, %v3174_v20  ;;  %vm3195_vm9 = vmor %vm3193_vm7, %vm3194_vm5  ;;  %v3212_v56 = vand.u32 2147483647, %v3172_v18  ;;  %v3215_v13 = vor.u32 1.1754944e-38, %v3214_v44 }
 0xb34   :  { %v3190_v21 = vsub.f32 1.0, %v3189_v54 }
 0xb35   :  { %v3176_v3 = vmul.f32 %v4376_v47, %v3175_v14  ;;  %vm3213_vm15 = vcmp.eq.f32.partialorder %v3212_v56, 8.507059e+37 }
 0xb36   :  { %v3191_v19 = vmul.f32 %v4378_v33, %v3190_v21 }
 0xb37   :  { %v4380_v61 = vpop.eup %4379  ;;  %v3177_v7 = vadd.f32 %v4376_v47, %v3176_v3 }
 0xb38   :  { %v3204_v12 = vmul.f32 %v4380_v61, %v3172_v18  ;;  %v3192_v27 = vadd.f32 %v4378_v33, %v3191_v19  ;;  %v4382_v28 = vpop.eup %4381  ;;  %vm3209_vm12 = vweird.f32 %v4380_v61 }
 0xb39   :  { %v3181_v22 = vsel %vm3180_vm8, %v4376_v47, %v3177_v7  ;;  %vm3210_vm14 = vmor %vm3208_vm13, %vm3209_vm12 }
 0xb3a   :  { %v3205_v35 = vsub.f32 1.0, %v3204_v12  ;;  %v3186_v46 = vsel %vm3183_vm10, %v3185_v16, %v3181_v22  ;;  %v3196_v39 = vsel %vm3195_vm9, %v4378_v33, %v3192_v27 }
 0xb3b   :  { %v3201_v34 = vsel %vm3198_vm11, %v3200_v45, %v3196_v39  ;;  %v3220_v59 = vmul.f32 %v4382_v28, %v3186_v46 }
 0xb3c   :  { %v3206_v55 = vmul.f32 %v4380_v61, %v3205_v35  ;;  %v3219_v23 = vmul.f32 %v3201_v34, %v5736_v8  ;;  %v4128_v8 = vld [vmem:[%s5771_s5] ss:$0 sm:$0xff]  ;;  %s3337_s5 = sshll.u32 %s5772_s6, 4  ;;  %s3338_s5 = int_to_ptr.hbm [resolvable:$true] %s3337_s5 }
 0xb3e   :  { %v3221_v62 = vadd.f32 %v3220_v59, %v3219_v23  ;;  %v3207_v26 = vadd.f32 %v4380_v61, %v3206_v55 }
 0xb40   :  { %4383 = vtanh.f32 %v3221_v62  ;;  %3227 = vst [vmem:[#allocation16 + $0x8] sm:$0xff] %v3221_v62  ;;  %v3211_v60 = vsel %vm3210_vm14, %v4380_v61, %v3207_v26 }
 0xb41   :  { %v3216_v58 = vsel %vm3213_vm15, %v3215_v13, %v3211_v60 }
 0xb46   :  { %v4384_v2 = vpop.eup %4383 }
 0xb47   :  { %v3223_v50 = vmul.f32 %v4384_v2, %v3216_v58 }
 0xb49   :  { %v3228_v10 = vpack.c.bf16 %v3223_v50, %v3223_v50  ;;  %3225 = vst [vmem:[#allocation14 + $0x8] sm:$0xff] %v3223_v50 }
 0xb4a   :  { %3353 = dma.vmem_to_hbm [thread:$0]  %s3346_s13, 256, %s3348_s11, [#allocation15], %s4598_s25, %s4598_s25, %s4599_s26  }
 0xb4b   :  { %3305 = vmatmul.bf16.vlgmr.msra.gmra.mxu0 %v3228_v10  ;;  %3366 = dma.vmem_to_hbm [thread:$0]  %s3359_s15, 256, %s3361_s18, [#allocation15], %s4598_s25, %s4598_s25, %s4599_s26  }
 0xbc8   :  { %v3306_v17 = vpop.f32.mrf.mxu0 }
 0xbc9   :  { %v3307_v11 = vadd.f32 %v4128_v8, %v3306_v17 }
 0xbcb   :  { %v3976_v63 = vmul.f32 -1.442695, %v3307_v11 }
 0xbcd   :  { %4385 = vpow2.f32 %v3976_v63 }
 0xbd0   :  { %v3308_v30 = vpop.f32.mrf.mxu0 }
 0xbd3   :  { %v4386_v57 = vpop.eup %4385 }
 0xbd4   :  { %v3313_v37 = vadd.f32 1.0, %v4386_v57 }
 0xbd6   :  { %4387 = vrcp.f32 %v3313_v37  ;;  %v3325_v24 = vand.u32 2147483648, %v3313_v37  ;;  %v3323_v40 = vand.u32 2147483647, %v3313_v37  ;;  %vm3319_vm1 = vweird.f32 %v3313_v37 }
 0xbd8   :  { %v3326_v51 = vor.u32 1.1754944e-38, %v3325_v24  ;;  %vm3324_vm3 = vcmp.eq.f32.partialorder %v3323_v40, 8.507059e+37 }
 0xbdc   :  { %v4388_v6 = vpop.eup %4387 }
 0xbdd   :  { %v3315_v15 = vmul.f32 %v4388_v6, %v3313_v37  ;;  %vm3320_vm0 = vweird.f32 %v4388_v6 }
 0xbde   :  { %vm3321_vm2 = vmor %vm3319_vm1, %vm3320_vm0 }
 0xbdf   :  { %v3316_v43 = vsub.f32 1.0, %v3315_v15 }
 0xbe1   :  { %v3317_v36 = vmul.f32 %v4388_v6, %v3316_v43 }
 0xbe3   :  { %v3318_v49 = vadd.f32 %v4388_v6, %v3317_v36 }
 0xbe5   :  { %v3322_v53 = vsel %vm3321_vm2, %v4388_v6, %v3318_v49 }
 0xbe6   :  { %v3327_v52 = vsel %vm3324_vm3, %v3326_v51, %v3322_v53 }
 0xbe7   :  { %3329 = vst [vmem:[#allocation13] sm:$0xff] %v3327_v52 }
 0xbe8   :  { %3340 = dma.vmem_to_hbm [thread:$0]  %s3336_s19, 128, %s3338_s5, [#allocation6]  }
 0xbe9   :  { %4587 = dma.done.wait [#allocation6], 128  }
 0xbea   :  { %4588 = vsyncadd [#allocation6], 4294967168 }
 0xbeb   :  { %4589 = dma.done.wait [#allocation15], 512  }
 0xbec   :  { %4590 = vsyncadd [#allocation15], 4294966784 }
 0xbed   :  { %3379 = vsyncpa [#allocation5], 1 }
 0xbee   :  { %3380 = vsyncpa [#allocation8], 1 }
 0xbef   :  { %3381 = vsyncpa [#allocation11], 1 }
 0xbf0   :  { %3382 = vsyncpa [#allocation6], 1 }
 0xbf1   :  { %3383 = vsyncpa [#allocation15], 1 }

</bundles_post_ra>
